<compile_context>
chip_gen: v6e
topology: v6e:2x2x1
jax: 0.10.0
libtpu: 0.0.40
codegen_flags: <defaults>
</compile_context>

<pallas_src>
import jax
import jax.numpy as jnp
import numpy as np
from jax.experimental import pallas as pl
from jax.experimental.pallas import tpu as pltpu

BN_EPS = 1e-5
COUT = 64
K1 = 16          # layer-1 im2col contraction width (9 taps zero-padded to 16)


def _make_kernel(Bblk, H, W):
    H1, W1 = H, W
    H2, W2 = H // 2, W // 2
    H3, W3 = H // 4, W // 4
    H4, W4 = H // 8, W // 8

    def fill_im2col(pad_ref, col_ref, Hl, Wl):
        # Build the (Bblk*Hl*Wl, 9*COUT) im2col LHS: per output row, 9 shifted
        # tap loads from the zero-padded activation, concatenated along lanes,
        # written with one full-width store.
        for b in range(Bblk):
            for h in range(Hl):
                taps = [pad_ref[b, h + kh, pl.ds(kw, Wl), :]
                        for kh in range(3) for kw in range(3)]
                col_ref[pl.ds((b * Hl + h) * Wl, Wl), :] = jnp.concatenate(taps, axis=1)

    def pool_bias_relu(conv_ref, pad_next_ref, bias, Hl, Wl):
        # 2x2 max-pool fused with the folded-BN bias + ReLU epilogue.  conv_ref
        # is the flat (Bblk*Hl*Wl, COUT) conv output (rows ordered b, h, w).
        # Each pooled row is stored into the next layer's padded buffer with
        # its left/right halo zeros in the same store.
        Hh, Wh = Hl // 2, Wl // 2
        bias_b = jnp.broadcast_to(bias, (Wh, COUT))          # hoisted once
        zrow = jnp.zeros((1, COUT), jnp.float32)
        zfull = jnp.zeros((Wh + 2, COUT), jnp.float32)
        for b in range(Bblk):
            pad_next_ref[b, 0, :, :] = zfull                 # top halo row
            pad_next_ref[b, Hh + 1, :, :] = zfull            # bottom halo row
            for r in range(Hh):
                top = (b * Hl + 2 * r) * Wl
                bot = top + Wl
                v00 = conv_ref[pl.ds(top,     Wh, 2), :]
                v01 = conv_ref[pl.ds(top + 1, Wh, 2), :]
                v10 = conv_ref[pl.ds(bot,     Wh, 2), :]
                v11 = conv_ref[pl.ds(bot + 1, Wh, 2), :]
                m = jnp.maximum(jnp.maximum(v00, v01), jnp.maximum(v10, v11))
                act = jnp.maximum(m + bias_b, 0.0)
                pad_next_ref[b, r + 1, :, :] = jnp.concatenate([zrow, act, zrow], axis=0)

    def kernel(xcol_ref, w1_ref, b1_ref, w2_ref, b2_ref, w3_ref, b3_ref,
               w4_ref, b4_ref, o_ref,
               conv1, pad2, col2, conv2, pad3, col3, conv3, pad4, col4, conv4):
        # ---- layer 1: one (Bblk*H*W, 16) x (16, 64) MXU dot ----
        conv1[...] = jnp.dot(xcol_ref[...], w1_ref[...],
                             preferred_element_type=jnp.float32)
        pool_bias_relu(conv1, pad2, b1_ref[...], H1, W1)

        # ---- layers 2..4: im2col fill + ONE MXU dot per layer ----
        fill_im2col(pad2, col2, H2, W2)
        conv2[...] = jnp.dot(col2[...], w2_ref[...],
                             preferred_element_type=jnp.float32)
        pool_bias_relu(conv2, pad3, b2_ref[...], H2, W2)

        fill_im2col(pad3, col3, H3, W3)
        conv3[...] = jnp.dot(col3[...], w3_ref[...],
                             preferred_element_type=jnp.float32)
        pool_bias_relu(conv3, pad4, b3_ref[...], H3, W3)

        fill_im2col(pad4, col4, H4, W4)
        conv4[...] = jnp.dot(col4[...], w4_ref[...],
                             preferred_element_type=jnp.float32)

        # ---- bias + ReLU + global average pool (AdaptiveAvgPool2d((1,1))) ----
        npix = H4 * W4
        bias4 = jnp.broadcast_to(b4_ref[...], (npix, COUT))
        inv = 1.0 / float(npix)
        for b in range(Bblk):
            rows = conv4[pl.ds(b * npix, npix), :]
            act = jnp.maximum(rows + bias4, 0.0)
            o_ref[pl.ds(b, 1), :] = jnp.sum(act, axis=0, keepdims=True) * inv

    return kernel


def _fold_layer(p):
    """Fold inference BatchNorm into the conv weight/bias.

    Returns wmat (9*Cin, COUT) stacked tap-major / channel-minor with the BN
    scale folded in, and bias (1, COUT) = (conv_bias - mean) * scale + beta.
    """
    scale = p["gamma"] / jnp.sqrt(p["var"] + BN_EPS)
    w = jnp.transpose(p["w"], (2, 3, 1, 0))                  # (3, 3, Cin, COUT)
    cin = w.shape[2]
    wmat = (w * scale[None, None, None, :]).reshape(9 * cin, COUT).astype(jnp.float32)
    bias = ((p["b"] - p["mean"]) * scale + p["beta"]).reshape(1, COUT).astype(jnp.float32)
    return wmat, bias


def _layer1_im2col(x_nchw):
    """Tiny wrapper-side im2col of the 1-channel input: (B,1,H,W) -> (B*H*W, 16).

    Layout plumbing only (taps ordered kh-major/kw-minor, zero-padded to K=16)
    so the kernel's layer-1 conv is a single lane-friendly MXU dot.
    """
    B, _, H, W = x_nchw.shape
    x = x_nchw[:, 0].astype(jnp.float32)                     # (B, H, W)
    xp = jnp.pad(x, ((0, 0), (1, 1), (1, 1)))
    taps = [xp[:, kh:kh + H, kw:kw + W] for kh in range(3) for kw in range(3)]
    col = jnp.stack(taps, axis=-1).reshape(B * H * W, 9)
    return jnp.pad(col, ((0, 0), (0, K1 - 9)))


def _pick_block(B):
    """Images per grid step: whole batch if small, else an 8-aligned divisor."""
    if B <= 8:
        return B
    for c in (32, 24, 16, 8):
        if B % c == 0:
            return c
    return B


def embedding_network(x_nchw, params):
    """Forward pass: x_nchw (B, 1, H, W) -> (B, 64)."""
    B, cin, H, W = x_nchw.shape
    assert cin == 1 and H % 8 == 0 and W % 8 == 0
    Bblk = _pick_block(B)
    n_blocks = B // Bblk

    x_col = _layer1_im2col(x_nchw)                           # (B*H*W, 16)

    w1, b1 = _fold_layer(params[0])
    w1 = jnp.pad(w1, ((0, K1 - 9), (0, 0)))                  # (16, 64)
    w2, b2 = _fold_layer(params[1])                          # (576, 64)
    w3, b3 = _fold_layer(params[2])
    w4, b4 = _fold_layer(params[3])

    def const2d(a):
        return pl.BlockSpec(a.shape, lambda i: (0, 0))

    H2, W2, H3, W3, H4, W4 = H // 2, W // 2, H // 4, W // 4, H // 8, W // 8
    R1, R2, R3, R4 = Bblk * H * W, Bblk * H2 * W2, Bblk * H3 * W3, Bblk * H4 * W4
    KC = 9 * COUT

    in_specs = [
        pl.BlockSpec((R1, K1), lambda i: (i, 0)),            # layer-1 im2col block
        const2d(w1), const2d(b1),
        const2d(w2), const2d(b2),
        const2d(w3), const2d(b3),
        const2d(w4), const2d(b4),
    ]
    out_spec = pl.BlockSpec((Bblk, COUT), lambda i: (i, 0))

    scratch = [
        pltpu.VMEM((R1, COUT), jnp.float32),                          # conv1
        pltpu.VMEM((Bblk, H2 + 2, W2 + 2, COUT), jnp.float32),        # pad2
        pltpu.VMEM((R2, KC), jnp.float32),                            # col2
        pltpu.VMEM((R2, COUT), jnp.float32),                          # conv2
        pltpu.VMEM((Bblk, H3 + 2, W3 + 2, COUT), jnp.float32),        # pad3
        pltpu.VMEM((R3, KC), jnp.float32),                            # col3
        pltpu.VMEM((R3, COUT), jnp.float32),                          # conv3
        pltpu.VMEM((Bblk, H4 + 2, W4 + 2, COUT), jnp.float32),        # pad4
        pltpu.VMEM((R4, KC), jnp.float32),                            # col4
        pltpu.VMEM((R4, COUT), jnp.float32),                          # conv4
    ]
    # Total scratch is well under the 32 MiB scoped-VMEM default at these sizes
    # (~0.7 MB for Bblk=2, H=W=16), so no vmem_limit_bytes override is needed.

    out = pl.pallas_call(
        _make_kernel(Bblk, H, W),
        out_shape=jax.ShapeDtypeStruct((B, COUT), jnp.float32),
        grid=(n_blocks,),
        in_specs=in_specs,
        out_specs=out_spec,
        scratch_shapes=scratch,
        compiler_params=pltpu.CompilerParams(dimension_semantics=("parallel",)),
    )(x_col, w1, b1, w2, b2, w3, b3, w4, b4)
    return out


def init_params(key):
    """Deterministic synthetic parameters matching the PyTorch module's shapes."""
    params = []
    cins = [1, 64, 64, 64]
    for cin in cins:
        key, k1, k2, k3, k4, k5, k6 = jax.random.split(key, 7)
        fan_in = cin * 9
        params.append(dict(
            w=jax.random.normal(k1, (COUT, cin, 3, 3), jnp.float32) * np.sqrt(2.0 / fan_in),
            b=0.05 * jax.random.normal(k2, (COUT,), jnp.float32),
            gamma=1.0 + 0.1 * jax.random.normal(k3, (COUT,), jnp.float32),
            beta=0.1 * jax.random.normal(k4, (COUT,), jnp.float32),
            mean=0.05 * jax.random.normal(k5, (COUT,), jnp.float32),
            var=1.0 + 0.1 * jax.random.uniform(k6, (COUT,), jnp.float32),
        ))
    return params


def reference_forward(x_nchw, params):
    """Pure-JAX reference (lax.conv) for correctness checking."""
    x = x_nchw.astype(jnp.float32)
    for i, p in enumerate(params):
        x = jax.lax.conv_general_dilated(
            x, p["w"], window_strides=(1, 1), padding=((1, 1), (1, 1)),
            dimension_numbers=("NCHW", "OIHW", "NCHW"),
            precision=jax.lax.Precision.HIGHEST)
        x = x + p["b"][None, :, None, None]
        scale = (p["gamma"] / jnp.sqrt(p["var"] + BN_EPS))[None, :, None, None]
        x = (x - p["mean"][None, :, None, None]) * scale + p["beta"][None, :, None, None]
        x = jnp.maximum(x, 0.0)
        if i < 3:
            B, C, Hc, Wc = x.shape
            x = x.reshape(B, C, Hc // 2, 2, Wc // 2, 2).max(axis=(3, 5))
    return jnp.mean(x, axis=(2, 3))


if __name__ == "__main__":
    key = jax.random.PRNGKey(0)
    kx, kp = jax.random.split(key)
    x = jax.random.normal(kx, (2, 1, 16, 16), jnp.float32)   # NCHW, 1 input channel
    params = init_params(kp)

    out = jax.block_until_ready(embedding_network(x, params))
    assert out.shape == (2, 64), out.shape

    ref = jax.block_until_ready(reference_forward(x, params))
    np.testing.assert_allclose(np.asarray(out), np.asarray(ref), rtol=1e-2, atol=1e-2)

    print("KERNEL_OK")
</pallas_src>

<mosaic_0001>
module attributes {stable_mosaic.version = 11 : i64} {
  func.func @kernel(%arg0: i32, %arg1: memref<512x16xf32, #tpu.memory_space<vmem>>, %arg2: memref<16x64xf32, #tpu.memory_space<vmem>>, %arg3: memref<1x64xf32, #tpu.memory_space<vmem>>, %arg4: memref<576x64xf32, #tpu.memory_space<vmem>>, %arg5: memref<1x64xf32, #tpu.memory_space<vmem>>, %arg6: memref<576x64xf32, #tpu.memory_space<vmem>>, %arg7: memref<1x64xf32, #tpu.memory_space<vmem>>, %arg8: memref<576x64xf32, #tpu.memory_space<vmem>>, %arg9: memref<1x64xf32, #tpu.memory_space<vmem>>, %arg10: memref<2x64xf32, #tpu.memory_space<vmem>>, %arg11: memref<512x64xf32, #tpu.memory_space<vmem>>, %arg12: memref<2x10x10x64xf32, #tpu.memory_space<vmem>>, %arg13: memref<128x576xf32, #tpu.memory_space<vmem>>, %arg14: memref<128x64xf32, #tpu.memory_space<vmem>>, %arg15: memref<2x6x6x64xf32, #tpu.memory_space<vmem>>, %arg16: memref<32x576xf32, #tpu.memory_space<vmem>>, %arg17: memref<32x64xf32, #tpu.memory_space<vmem>>, %arg18: memref<2x4x4x64xf32, #tpu.memory_space<vmem>>, %arg19: memref<8x576xf32, #tpu.memory_space<vmem>>, %arg20: memref<8x64xf32, #tpu.memory_space<vmem>>) attributes {dimension_semantics = [#tpu.dimension_semantics<parallel>], iteration_bounds = array<i64: 1>, scalar_prefetch = 0 : i64, scratch_operands = 10 : i64, tpu.core_type = #tpu.core_type<tc>, window_params = [{transform_indices = @transform_0, window_bounds = array<i64: 512, 16>}, {pipeline_mode = #tpu.pipeline_mode<synchronous>, transform_indices = @transform_1, window_bounds = array<i64: 16, 64>}, {pipeline_mode = #tpu.pipeline_mode<synchronous>, transform_indices = @transform_2, window_bounds = array<i64: 1, 64>}, {pipeline_mode = #tpu.pipeline_mode<synchronous>, transform_indices = @transform_3, window_bounds = array<i64: 576, 64>}, {pipeline_mode = #tpu.pipeline_mode<synchronous>, transform_indices = @transform_4, window_bounds = array<i64: 1, 64>}, {pipeline_mode = #tpu.pipeline_mode<synchronous>, transform_indices = @transform_5, window_bounds = array<i64: 576, 64>}, {pipeline_mode = #tpu.pipeline_mode<synchronous>, transform_indices = @transform_6, window_bounds = array<i64: 1, 64>}, {pipeline_mode = #tpu.pipeline_mode<synchronous>, transform_indices = @transform_7, window_bounds = array<i64: 576, 64>}, {pipeline_mode = #tpu.pipeline_mode<synchronous>, transform_indices = @transform_8, window_bounds = array<i64: 1, 64>}, {transform_indices = @transform_9, window_bounds = array<i64: 2, 64>}]} {
    %c0 = arith.constant 0 : index
    %c0_0 = arith.constant 0 : index
    %0 = vector.load %arg1[%c0, %c0_0] : memref<512x16xf32, #tpu.memory_space<vmem>>, vector<512x16xf32>
    %c0_1 = arith.constant 0 : index
    %c0_2 = arith.constant 0 : index
    %1 = vector.load %arg2[%c0_1, %c0_2] : memref<16x64xf32, #tpu.memory_space<vmem>>, vector<16x64xf32>
    %cst = arith.constant dense<0.000000e+00> : vector<512x64xf32>
    %2 = tpu.matmul %0, %1, %cst {dimension_numbers = #tpu.dot_dimension_numbers<[1], [0], [0], [1], [0, 0, 1, 1], [], []>} : vector<512x16xf32>, vector<16x64xf32>, vector<512x64xf32> -> vector<512x64xf32>
    %c0_3 = arith.constant 0 : index
    %c0_4 = arith.constant 0 : index
    %3 = vector.load %arg11[%c0_3, %c0_4] : memref<512x64xf32, #tpu.memory_space<vmem>>, vector<512x64xf32>
    tpu.vector_store %arg11[%c0_3, %c0_4], %2 {strides = array<i32>} : memref<512x64xf32, #tpu.memory_space<vmem>>, vector<512x64xf32>,
    %c0_5 = arith.constant 0 : index
    %c0_6 = arith.constant 0 : index
    %4 = vector.load %arg3[%c0_5, %c0_6] : memref<1x64xf32, #tpu.memory_space<vmem>>, vector<1x64xf32>
    %5 = vector.shape_cast %4 : vector<1x64xf32> to vector<1x64xf32>
    %6 = vector.broadcast %5 : vector<1x64xf32> to vector<8x64xf32>
    %cst_7 = arith.constant 0.000000e+00 : f32
    %7 = vector.broadcast %cst_7 : f32 to vector<1x64xf32>
    %cst_8 = arith.constant 0.000000e+00 : f32
    %8 = vector.broadcast %cst_8 : f32 to vector<10x64xf32>
    %c0_9 = arith.constant 0 : index
    %c0_10 = arith.constant 0 : index
    %c0_11 = arith.constant 0 : index
    %c0_12 = arith.constant 0 : index
    %9 = vector.load %arg12[%c0_9, %c0_10, %c0_11, %c0_12] : memref<2x10x10x64xf32, #tpu.memory_space<vmem>>, vector<1x1x10x64xf32>
    %10 = vector.shape_cast %9 : vector<1x1x10x64xf32> to vector<10x64xf32>
    %11 = vector.shape_cast %8 : vector<10x64xf32> to vector<1x1x10x64xf32>
    tpu.vector_store %arg12[%c0_9, %c0_10, %c0_11, %c0_12], %11 {strides = array<i32>} : memref<2x10x10x64xf32, #tpu.memory_space<vmem>>, vector<1x1x10x64xf32>,
    %c0_13 = arith.constant 0 : index
    %c9 = arith.constant 9 : index
    %c0_14 = arith.constant 0 : index
    %c0_15 = arith.constant 0 : index
    %12 = vector.load %arg12[%c0_13, %c9, %c0_14, %c0_15] : memref<2x10x10x64xf32, #tpu.memory_space<vmem>>, vector<1x1x10x64xf32>
    %13 = vector.shape_cast %12 : vector<1x1x10x64xf32> to vector<10x64xf32>
    %14 = vector.shape_cast %8 : vector<10x64xf32> to vector<1x1x10x64xf32>
    tpu.vector_store %arg12[%c0_13, %c9, %c0_14, %c0_15], %14 {strides = array<i32>} : memref<2x10x10x64xf32, #tpu.memory_space<vmem>>, vector<1x1x10x64xf32>,
    %c0_16 = arith.constant 0 : index
    %c0_17 = arith.constant 0 : index
    %15 = tpu.strided_load %arg11[%c0_16, %c0_17] {strides = array<i32: 2, 1>} : memref<512x64xf32, #tpu.memory_space<vmem>>, vector<8x64xf32>
    %c1 = arith.constant 1 : index
    %c0_18 = arith.constant 0 : index
    %16 = tpu.strided_load %arg11[%c1, %c0_18] {strides = array<i32: 2, 1>} : memref<512x64xf32, #tpu.memory_space<vmem>>, vector<8x64xf32>
    %c16 = arith.constant 16 : index
    %c0_19 = arith.constant 0 : index
    %17 = tpu.strided_load %arg11[%c16, %c0_19] {strides = array<i32: 2, 1>} : memref<512x64xf32, #tpu.memory_space<vmem>>, vector<8x64xf32>
    %c17 = arith.constant 17 : index
    %c0_20 = arith.constant 0 : index
    %18 = tpu.strided_load %arg11[%c17, %c0_20] {strides = array<i32: 2, 1>} : memref<512x64xf32, #tpu.memory_space<vmem>>, vector<8x64xf32>
    %19 = arith.maximumf %15, %16 : vector<8x64xf32>
    %20 = arith.maximumf %17, %18 : vector<8x64xf32>
    %21 = arith.maximumf %19, %20 : vector<8x64xf32>
    %22 = arith.addf %21, %6 : vector<8x64xf32>
    %cst_21 = arith.constant 0.000000e+00 : f32
    %23 = vector.broadcast %cst_21 : f32 to vector<8x64xf32>
    %24 = arith.maximumf %22, %23 : vector<8x64xf32>
    %25 = tpu.concatenate %7, %24, %7 in 0 : vector<1x64xf32>, vector<8x64xf32>, vector<1x64xf32> -> vector<10x64xf32>
    %c0_22 = arith.constant 0 : index
    %c1_23 = arith.constant 1 : index
    %c0_24 = arith.constant 0 : index
    %c0_25 = arith.constant 0 : index
    %26 = vector.load %arg12[%c0_22, %c1_23, %c0_24, %c0_25] : memref<2x10x10x64xf32, #tpu.memory_space<vmem>>, vector<1x1x10x64xf32>
    %27 = vector.shape_cast %26 : vector<1x1x10x64xf32> to vector<10x64xf32>
    %28 = vector.shape_cast %25 : vector<10x64xf32> to vector<1x1x10x64xf32>
    tpu.vector_store %arg12[%c0_22, %c1_23, %c0_24, %c0_25], %28 {strides = array<i32>} : memref<2x10x10x64xf32, #tpu.memory_space<vmem>>, vector<1x1x10x64xf32>,
    %c32 = arith.constant 32 : index
    %c0_26 = arith.constant 0 : index
    %29 = tpu.strided_load %arg11[%c32, %c0_26] {strides = array<i32: 2, 1>} : memref<512x64xf32, #tpu.memory_space<vmem>>, vector<8x64xf32>
    %c33 = arith.constant 33 : index
    %c0_27 = arith.constant 0 : index
    %30 = tpu.strided_load %arg11[%c33, %c0_27] {strides = array<i32: 2, 1>} : memref<512x64xf32, #tpu.memory_space<vmem>>, vector<8x64xf32>
    %c48 = arith.constant 48 : index
    %c0_28 = arith.constant 0 : index
    %31 = tpu.strided_load %arg11[%c48, %c0_28] {strides = array<i32: 2, 1>} : memref<512x64xf32, #tpu.memory_space<vmem>>, vector<8x64xf32>
    %c49 = arith.constant 49 : index
    %c0_29 = arith.constant 0 : index
    %32 = tpu.strided_load %arg11[%c49, %c0_29] {strides = array<i32: 2, 1>} : memref<512x64xf32, #tpu.memory_space<vmem>>, vector<8x64xf32>
    %33 = arith.maximumf %29, %30 : vector<8x64xf32>
    %34 = arith.maximumf %31, %32 : vector<8x64xf32>
    %35 = arith.maximumf %33, %34 : vector<8x64xf32>
    %36 = arith.addf %35, %6 : vector<8x64xf32>
    %cst_30 = arith.constant 0.000000e+00 : f32
    %37 = vector.broadcast %cst_30 : f32 to vector<8x64xf32>
    %38 = arith.maximumf %36, %37 : vector<8x64xf32>
    %39 = tpu.concatenate %7, %38, %7 in 0 : vector<1x64xf32>, vector<8x64xf32>, vector<1x64xf32> -> vector<10x64xf32>
    %c0_31 = arith.constant 0 : index
    %c2 = arith.constant 2 : index
    %c0_32 = arith.constant 0 : index
    %c0_33 = arith.constant 0 : index
    %40 = vector.load %arg12[%c0_31, %c2, %c0_32, %c0_33] : memref<2x10x10x64xf32, #tpu.memory_space<vmem>>, vector<1x1x10x64xf32>
    %41 = vector.shape_cast %40 : vector<1x1x10x64xf32> to vector<10x64xf32>
    %42 = vector.shape_cast %39 : vector<10x64xf32> to vector<1x1x10x64xf32>
    tpu.vector_store %arg12[%c0_31, %c2, %c0_32, %c0_33], %42 {strides = array<i32>} : memref<2x10x10x64xf32, #tpu.memory_space<vmem>>, vector<1x1x10x64xf32>,
    %c64 = arith.constant 64 : index
    %c0_34 = arith.constant 0 : index
    %43 = tpu.strided_load %arg11[%c64, %c0_34] {strides = array<i32: 2, 1>} : memref<512x64xf32, #tpu.memory_space<vmem>>, vector<8x64xf32>
    %c65 = arith.constant 65 : index
    %c0_35 = arith.constant 0 : index
    %44 = tpu.strided_load %arg11[%c65, %c0_35] {strides = array<i32: 2, 1>} : memref<512x64xf32, #tpu.memory_space<vmem>>, vector<8x64xf32>
    %c80 = arith.constant 80 : index
    %c0_36 = arith.constant 0 : index
    %45 = tpu.strided_load %arg11[%c80, %c0_36] {strides = array<i32: 2, 1>} : memref<512x64xf32, #tpu.memory_space<vmem>>, vector<8x64xf32>
    %c81 = arith.constant 81 : index
    %c0_37 = arith.constant 0 : index
    %46 = tpu.strided_load %arg11[%c81, %c0_37] {strides = array<i32: 2, 1>} : memref<512x64xf32, #tpu.memory_space<vmem>>, vector<8x64xf32>
    %47 = arith.maximumf %43, %44 : vector<8x64xf32>
    %48 = arith.maximumf %45, %46 : vector<8x64xf32>
    %49 = arith.maximumf %47, %48 : vector<8x64xf32>
    %50 = arith.addf %49, %6 : vector<8x64xf32>
    %cst_38 = arith.constant 0.000000e+00 : f32
    %51 = vector.broadcast %cst_38 : f32 to vector<8x64xf32>
    %52 = arith.maximumf %50, %51 : vector<8x64xf32>
    %53 = tpu.concatenate %7, %52, %7 in 0 : vector<1x64xf32>, vector<8x64xf32>, vector<1x64xf32> -> vector<10x64xf32>
    %c0_39 = arith.constant 0 : index
    %c3 = arith.constant 3 : index
    %c0_40 = arith.constant 0 : index
    %c0_41 = arith.constant 0 : index
    %54 = vector.load %arg12[%c0_39, %c3, %c0_40, %c0_41] : memref<2x10x10x64xf32, #tpu.memory_space<vmem>>, vector<1x1x10x64xf32>
    %55 = vector.shape_cast %54 : vector<1x1x10x64xf32> to vector<10x64xf32>
    %56 = vector.shape_cast %53 : vector<10x64xf32> to vector<1x1x10x64xf32>
    tpu.vector_store %arg12[%c0_39, %c3, %c0_40, %c0_41], %56 {strides = array<i32>} : memref<2x10x10x64xf32, #tpu.memory_space<vmem>>, vector<1x1x10x64xf32>,
    %c96 = arith.constant 96 : index
    %c0_42 = arith.constant 0 : index
    %57 = tpu.strided_load %arg11[%c96, %c0_42] {strides = array<i32: 2, 1>} : memref<512x64xf32, #tpu.memory_space<vmem>>, vector<8x64xf32>
    %c97 = arith.constant 97 : index
    %c0_43 = arith.constant 0 : index
    %58 = tpu.strided_load %arg11[%c97, %c0_43] {strides = array<i32: 2, 1>} : memref<512x64xf32, #tpu.memory_space<vmem>>, vector<8x64xf32>
    %c112 = arith.constant 112 : index
    %c0_44 = arith.constant 0 : index
    %59 = tpu.strided_load %arg11[%c112, %c0_44] {strides = array<i32: 2, 1>} : memref<512x64xf32, #tpu.memory_space<vmem>>, vector<8x64xf32>
    %c113 = arith.constant 113 : index
    %c0_45 = arith.constant 0 : index
    %60 = tpu.strided_load %arg11[%c113, %c0_45] {strides = array<i32: 2, 1>} : memref<512x64xf32, #tpu.memory_space<vmem>>, vector<8x64xf32>
    %61 = arith.maximumf %57, %58 : vector<8x64xf32>
    %62 = arith.maximumf %59, %60 : vector<8x64xf32>
    %63 = arith.maximumf %61, %62 : vector<8x64xf32>
    %64 = arith.addf %63, %6 : vector<8x64xf32>
    %cst_46 = arith.constant 0.000000e+00 : f32
    %65 = vector.broadcast %cst_46 : f32 to vector<8x64xf32>
    %66 = arith.maximumf %64, %65 : vector<8x64xf32>
    %67 = tpu.concatenate %7, %66, %7 in 0 : vector<1x64xf32>, vector<8x64xf32>, vector<1x64xf32> -> vector<10x64xf32>
    %c0_47 = arith.constant 0 : index
    %c4 = arith.constant 4 : index
    %c0_48 = arith.constant 0 : index
    %c0_49 = arith.constant 0 : index
    %68 = vector.load %arg12[%c0_47, %c4, %c0_48, %c0_49] : memref<2x10x10x64xf32, #tpu.memory_space<vmem>>, vector<1x1x10x64xf32>
    %69 = vector.shape_cast %68 : vector<1x1x10x64xf32> to vector<10x64xf32>
    %70 = vector.shape_cast %67 : vector<10x64xf32> to vector<1x1x10x64xf32>
    tpu.vector_store %arg12[%c0_47, %c4, %c0_48, %c0_49], %70 {strides = array<i32>} : memref<2x10x10x64xf32, #tpu.memory_space<vmem>>, vector<1x1x10x64xf32>,
    %c128 = arith.constant 128 : index
    %c0_50 = arith.constant 0 : index
    %71 = tpu.strided_load %arg11[%c128, %c0_50] {strides = array<i32: 2, 1>} : memref<512x64xf32, #tpu.memory_space<vmem>>, vector<8x64xf32>
    %c129 = arith.constant 129 : index
    %c0_51 = arith.constant 0 : index
    %72 = tpu.strided_load %arg11[%c129, %c0_51] {strides = array<i32: 2, 1>} : memref<512x64xf32, #tpu.memory_space<vmem>>, vector<8x64xf32>
    %c144 = arith.constant 144 : index
    %c0_52 = arith.constant 0 : index
    %73 = tpu.strided_load %arg11[%c144, %c0_52] {strides = array<i32: 2, 1>} : memref<512x64xf32, #tpu.memory_space<vmem>>, vector<8x64xf32>
    %c145 = arith.constant 145 : index
    %c0_53 = arith.constant 0 : index
    %74 = tpu.strided_load %arg11[%c145, %c0_53] {strides = array<i32: 2, 1>} : memref<512x64xf32, #tpu.memory_space<vmem>>, vector<8x64xf32>
    %75 = arith.maximumf %71, %72 : vector<8x64xf32>
    %76 = arith.maximumf %73, %74 : vector<8x64xf32>
    %77 = arith.maximumf %75, %76 : vector<8x64xf32>
    %78 = arith.addf %77, %6 : vector<8x64xf32>
    %cst_54 = arith.constant 0.000000e+00 : f32
    %79 = vector.broadcast %cst_54 : f32 to vector<8x64xf32>
    %80 = arith.maximumf %78, %79 : vector<8x64xf32>
    %81 = tpu.concatenate %7, %80, %7 in 0 : vector<1x64xf32>, vector<8x64xf32>, vector<1x64xf32> -> vector<10x64xf32>
    %c0_55 = arith.constant 0 : index
    %c5 = arith.constant 5 : index
    %c0_56 = arith.constant 0 : index
    %c0_57 = arith.constant 0 : index
    %82 = vector.load %arg12[%c0_55, %c5, %c0_56, %c0_57] : memref<2x10x10x64xf32, #tpu.memory_space<vmem>>, vector<1x1x10x64xf32>
    %83 = vector.shape_cast %82 : vector<1x1x10x64xf32> to vector<10x64xf32>
    %84 = vector.shape_cast %81 : vector<10x64xf32> to vector<1x1x10x64xf32>
    tpu.vector_store %arg12[%c0_55, %c5, %c0_56, %c0_57], %84 {strides = array<i32>} : memref<2x10x10x64xf32, #tpu.memory_space<vmem>>, vector<1x1x10x64xf32>,
    %c160 = arith.constant 160 : index
    %c0_58 = arith.constant 0 : index
    %85 = tpu.strided_load %arg11[%c160, %c0_58] {strides = array<i32: 2, 1>} : memref<512x64xf32, #tpu.memory_space<vmem>>, vector<8x64xf32>
    %c161 = arith.constant 161 : index
    %c0_59 = arith.constant 0 : index
    %86 = tpu.strided_load %arg11[%c161, %c0_59] {strides = array<i32: 2, 1>} : memref<512x64xf32, #tpu.memory_space<vmem>>, vector<8x64xf32>
    %c176 = arith.constant 176 : index
    %c0_60 = arith.constant 0 : index
    %87 = tpu.strided_load %arg11[%c176, %c0_60] {strides = array<i32: 2, 1>} : memref<512x64xf32, #tpu.memory_space<vmem>>, vector<8x64xf32>
    %c177 = arith.constant 177 : index
    %c0_61 = arith.constant 0 : index
    %88 = tpu.strided_load %arg11[%c177, %c0_61] {strides = array<i32: 2, 1>} : memref<512x64xf32, #tpu.memory_space<vmem>>, vector<8x64xf32>
    %89 = arith.maximumf %85, %86 : vector<8x64xf32>
    %90 = arith.maximumf %87, %88 : vector<8x64xf32>
    %91 = arith.maximumf %89, %90 : vector<8x64xf32>
    %92 = arith.addf %91, %6 : vector<8x64xf32>
    %cst_62 = arith.constant 0.000000e+00 : f32
    %93 = vector.broadcast %cst_62 : f32 to vector<8x64xf32>
    %94 = arith.maximumf %92, %93 : vector<8x64xf32>
    %95 = tpu.concatenate %7, %94, %7 in 0 : vector<1x64xf32>, vector<8x64xf32>, vector<1x64xf32> -> vector<10x64xf32>
    %c0_63 = arith.constant 0 : index
    %c6 = arith.constant 6 : index
    %c0_64 = arith.constant 0 : index
    %c0_65 = arith.constant 0 : index
    %96 = vector.load %arg12[%c0_63, %c6, %c0_64, %c0_65] : memref<2x10x10x64xf32, #tpu.memory_space<vmem>>, vector<1x1x10x64xf32>
    %97 = vector.shape_cast %96 : vector<1x1x10x64xf32> to vector<10x64xf32>
    %98 = vector.shape_cast %95 : vector<10x64xf32> to vector<1x1x10x64xf32>
    tpu.vector_store %arg12[%c0_63, %c6, %c0_64, %c0_65], %98 {strides = array<i32>} : memref<2x10x10x64xf32, #tpu.memory_space<vmem>>, vector<1x1x10x64xf32>,
    %c192 = arith.constant 192 : index
    %c0_66 = arith.constant 0 : index
    %99 = tpu.strided_load %arg11[%c192, %c0_66] {strides = array<i32: 2, 1>} : memref<512x64xf32, #tpu.memory_space<vmem>>, vector<8x64xf32>
    %c193 = arith.constant 193 : index
    %c0_67 = arith.constant 0 : index
    %100 = tpu.strided_load %arg11[%c193, %c0_67] {strides = array<i32: 2, 1>} : memref<512x64xf32, #tpu.memory_space<vmem>>, vector<8x64xf32>
    %c208 = arith.constant 208 : index
    %c0_68 = arith.constant 0 : index
    %101 = tpu.strided_load %arg11[%c208, %c0_68] {strides = array<i32: 2, 1>} : memref<512x64xf32, #tpu.memory_space<vmem>>, vector<8x64xf32>
    %c209 = arith.constant 209 : index
    %c0_69 = arith.constant 0 : index
    %102 = tpu.strided_load %arg11[%c209, %c0_69] {strides = array<i32: 2, 1>} : memref<512x64xf32, #tpu.memory_space<vmem>>, vector<8x64xf32>
    %103 = arith.maximumf %99, %100 : vector<8x64xf32>
    %104 = arith.maximumf %101, %102 : vector<8x64xf32>
    %105 = arith.maximumf %103, %104 : vector<8x64xf32>
    %106 = arith.addf %105, %6 : vector<8x64xf32>
    %cst_70 = arith.constant 0.000000e+00 : f32
    %107 = vector.broadcast %cst_70 : f32 to vector<8x64xf32>
    %108 = arith.maximumf %106, %107 : vector<8x64xf32>
    %109 = tpu.concatenate %7, %108, %7 in 0 : vector<1x64xf32>, vector<8x64xf32>, vector<1x64xf32> -> vector<10x64xf32>
    %c0_71 = arith.constant 0 : index
    %c7 = arith.constant 7 : index
    %c0_72 = arith.constant 0 : index
    %c0_73 = arith.constant 0 : index
    %110 = vector.load %arg12[%c0_71, %c7, %c0_72, %c0_73] : memref<2x10x10x64xf32, #tpu.memory_space<vmem>>, vector<1x1x10x64xf32>
    %111 = vector.shape_cast %110 : vector<1x1x10x64xf32> to vector<10x64xf32>
    %112 = vector.shape_cast %109 : vector<10x64xf32> to vector<1x1x10x64xf32>
    tpu.vector_store %arg12[%c0_71, %c7, %c0_72, %c0_73], %112 {strides = array<i32>} : memref<2x10x10x64xf32, #tpu.memory_space<vmem>>, vector<1x1x10x64xf32>,
    %c224 = arith.constant 224 : index
    %c0_74 = arith.constant 0 : index
    %113 = tpu.strided_load %arg11[%c224, %c0_74] {strides = array<i32: 2, 1>} : memref<512x64xf32, #tpu.memory_space<vmem>>, vector<8x64xf32>
    %c225 = arith.constant 225 : index
    %c0_75 = arith.constant 0 : index
    %114 = tpu.strided_load %arg11[%c225, %c0_75] {strides = array<i32: 2, 1>} : memref<512x64xf32, #tpu.memory_space<vmem>>, vector<8x64xf32>
    %c240 = arith.constant 240 : index
    %c0_76 = arith.constant 0 : index
    %115 = tpu.strided_load %arg11[%c240, %c0_76] {strides = array<i32: 2, 1>} : memref<512x64xf32, #tpu.memory_space<vmem>>, vector<8x64xf32>
    %c241 = arith.constant 241 : index
    %c0_77 = arith.constant 0 : index
    %116 = tpu.strided_load %arg11[%c241, %c0_77] {strides = array<i32: 2, 1>} : memref<512x64xf32, #tpu.memory_space<vmem>>, vector<8x64xf32>
    %117 = arith.maximumf %113, %114 : vector<8x64xf32>
    %118 = arith.maximumf %115, %116 : vector<8x64xf32>
    %119 = arith.maximumf %117, %118 : vector<8x64xf32>
    %120 = arith.addf %119, %6 : vector<8x64xf32>
    %cst_78 = arith.constant 0.000000e+00 : f32
    %121 = vector.broadcast %cst_78 : f32 to vector<8x64xf32>
    %122 = arith.maximumf %120, %121 : vector<8x64xf32>
    %123 = tpu.concatenate %7, %122, %7 in 0 : vector<1x64xf32>, vector<8x64xf32>, vector<1x64xf32> -> vector<10x64xf32>
    %c0_79 = arith.constant 0 : index
    %c8 = arith.constant 8 : index
    %c0_80 = arith.constant 0 : index
    %c0_81 = arith.constant 0 : index
    %124 = vector.load %arg12[%c0_79, %c8, %c0_80, %c0_81] : memref<2x10x10x64xf32, #tpu.memory_space<vmem>>, vector<1x1x10x64xf32>
    %125 = vector.shape_cast %124 : vector<1x1x10x64xf32> to vector<10x64xf32>
    %126 = vector.shape_cast %123 : vector<10x64xf32> to vector<1x1x10x64xf32>
    tpu.vector_store %arg12[%c0_79, %c8, %c0_80, %c0_81], %126 {strides = array<i32>} : memref<2x10x10x64xf32, #tpu.memory_space<vmem>>, vector<1x1x10x64xf32>,
    %c1_82 = arith.constant 1 : index
    %c0_83 = arith.constant 0 : index
    %c0_84 = arith.constant 0 : index
    %c0_85 = arith.constant 0 : index
    %127 = vector.load %arg12[%c1_82, %c0_83, %c0_84, %c0_85] : memref<2x10x10x64xf32, #tpu.memory_space<vmem>>, vector<1x1x10x64xf32>
    %128 = vector.shape_cast %127 : vector<1x1x10x64xf32> to vector<10x64xf32>
    %129 = vector.shape_cast %8 : vector<10x64xf32> to vector<1x1x10x64xf32>
    tpu.vector_store %arg12[%c1_82, %c0_83, %c0_84, %c0_85], %129 {strides = array<i32>} : memref<2x10x10x64xf32, #tpu.memory_space<vmem>>, vector<1x1x10x64xf32>,
    %c1_86 = arith.constant 1 : index
    %c9_87 = arith.constant 9 : index
    %c0_88 = arith.constant 0 : index
    %c0_89 = arith.constant 0 : index
    %130 = vector.load %arg12[%c1_86, %c9_87, %c0_88, %c0_89] : memref<2x10x10x64xf32, #tpu.memory_space<vmem>>, vector<1x1x10x64xf32>
    %131 = vector.shape_cast %130 : vector<1x1x10x64xf32> to vector<10x64xf32>
    %132 = vector.shape_cast %8 : vector<10x64xf32> to vector<1x1x10x64xf32>
    tpu.vector_store %arg12[%c1_86, %c9_87, %c0_88, %c0_89], %132 {strides = array<i32>} : memref<2x10x10x64xf32, #tpu.memory_space<vmem>>, vector<1x1x10x64xf32>,
    %c256 = arith.constant 256 : index
    %c0_90 = arith.constant 0 : index
    %133 = tpu.strided_load %arg11[%c256, %c0_90] {strides = array<i32: 2, 1>} : memref<512x64xf32, #tpu.memory_space<vmem>>, vector<8x64xf32>
    %c257 = arith.constant 257 : index
    %c0_91 = arith.constant 0 : index
    %134 = tpu.strided_load %arg11[%c257, %c0_91] {strides = array<i32: 2, 1>} : memref<512x64xf32, #tpu.memory_space<vmem>>, vector<8x64xf32>
    %c272 = arith.constant 272 : index
    %c0_92 = arith.constant 0 : index
    %135 = tpu.strided_load %arg11[%c272, %c0_92] {strides = array<i32: 2, 1>} : memref<512x64xf32, #tpu.memory_space<vmem>>, vector<8x64xf32>
    %c273 = arith.constant 273 : index
    %c0_93 = arith.constant 0 : index
    %136 = tpu.strided_load %arg11[%c273, %c0_93] {strides = array<i32: 2, 1>} : memref<512x64xf32, #tpu.memory_space<vmem>>, vector<8x64xf32>
    %137 = arith.maximumf %133, %134 : vector<8x64xf32>
    %138 = arith.maximumf %135, %136 : vector<8x64xf32>
    %139 = arith.maximumf %137, %138 : vector<8x64xf32>
    %140 = arith.addf %139, %6 : vector<8x64xf32>
    %cst_94 = arith.constant 0.000000e+00 : f32
    %141 = vector.broadcast %cst_94 : f32 to vector<8x64xf32>
    %142 = arith.maximumf %140, %141 : vector<8x64xf32>
    %143 = tpu.concatenate %7, %142, %7 in 0 : vector<1x64xf32>, vector<8x64xf32>, vector<1x64xf32> -> vector<10x64xf32>
    %c1_95 = arith.constant 1 : index
    %c1_96 = arith.constant 1 : index
    %c0_97 = arith.constant 0 : index
    %c0_98 = arith.constant 0 : index
    %144 = vector.load %arg12[%c1_95, %c1_96, %c0_97, %c0_98] : memref<2x10x10x64xf32, #tpu.memory_space<vmem>>, vector<1x1x10x64xf32>
    %145 = vector.shape_cast %144 : vector<1x1x10x64xf32> to vector<10x64xf32>
    %146 = vector.shape_cast %143 : vector<10x64xf32> to vector<1x1x10x64xf32>
    tpu.vector_store %arg12[%c1_95, %c1_96, %c0_97, %c0_98], %146 {strides = array<i32>} : memref<2x10x10x64xf32, #tpu.memory_space<vmem>>, vector<1x1x10x64xf32>,
    %c288 = arith.constant 288 : index
    %c0_99 = arith.constant 0 : index
    %147 = tpu.strided_load %arg11[%c288, %c0_99] {strides = array<i32: 2, 1>} : memref<512x64xf32, #tpu.memory_space<vmem>>, vector<8x64xf32>
    %c289 = arith.constant 289 : index
    %c0_100 = arith.constant 0 : index
    %148 = tpu.strided_load %arg11[%c289, %c0_100] {strides = array<i32: 2, 1>} : memref<512x64xf32, #tpu.memory_space<vmem>>, vector<8x64xf32>
    %c304 = arith.constant 304 : index
    %c0_101 = arith.constant 0 : index
    %149 = tpu.strided_load %arg11[%c304, %c0_101] {strides = array<i32: 2, 1>} : memref<512x64xf32, #tpu.memory_space<vmem>>, vector<8x64xf32>
    %c305 = arith.constant 305 : index
    %c0_102 = arith.constant 0 : index
    %150 = tpu.strided_load %arg11[%c305, %c0_102] {strides = array<i32: 2, 1>} : memref<512x64xf32, #tpu.memory_space<vmem>>, vector<8x64xf32>
    %151 = arith.maximumf %147, %148 : vector<8x64xf32>
    %152 = arith.maximumf %149, %150 : vector<8x64xf32>
    %153 = arith.maximumf %151, %152 : vector<8x64xf32>
    %154 = arith.addf %153, %6 : vector<8x64xf32>
    %cst_103 = arith.constant 0.000000e+00 : f32
    %155 = vector.broadcast %cst_103 : f32 to vector<8x64xf32>
    %156 = arith.maximumf %154, %155 : vector<8x64xf32>
    %157 = tpu.concatenate %7, %156, %7 in 0 : vector<1x64xf32>, vector<8x64xf32>, vector<1x64xf32> -> vector<10x64xf32>
    %c1_104 = arith.constant 1 : index
    %c2_105 = arith.constant 2 : index
    %c0_106 = arith.constant 0 : index
    %c0_107 = arith.constant 0 : index
    %158 = vector.load %arg12[%c1_104, %c2_105, %c0_106, %c0_107] : memref<2x10x10x64xf32, #tpu.memory_space<vmem>>, vector<1x1x10x64xf32>
    %159 = vector.shape_cast %158 : vector<1x1x10x64xf32> to vector<10x64xf32>
    %160 = vector.shape_cast %157 : vector<10x64xf32> to vector<1x1x10x64xf32>
    tpu.vector_store %arg12[%c1_104, %c2_105, %c0_106, %c0_107], %160 {strides = array<i32>} : memref<2x10x10x64xf32, #tpu.memory_space<vmem>>, vector<1x1x10x64xf32>,
    %c320 = arith.constant 320 : index
    %c0_108 = arith.constant 0 : index
    %161 = tpu.strided_load %arg11[%c320, %c0_108] {strides = array<i32: 2, 1>} : memref<512x64xf32, #tpu.memory_space<vmem>>, vector<8x64xf32>
    %c321 = arith.constant 321 : index
    %c0_109 = arith.constant 0 : index
    %162 = tpu.strided_load %arg11[%c321, %c0_109] {strides = array<i32: 2, 1>} : memref<512x64xf32, #tpu.memory_space<vmem>>, vector<8x64xf32>
    %c336 = arith.constant 336 : index
    %c0_110 = arith.constant 0 : index
    %163 = tpu.strided_load %arg11[%c336, %c0_110] {strides = array<i32: 2, 1>} : memref<512x64xf32, #tpu.memory_space<vmem>>, vector<8x64xf32>
    %c337 = arith.constant 337 : index
    %c0_111 = arith.constant 0 : index
    %164 = tpu.strided_load %arg11[%c337, %c0_111] {strides = array<i32: 2, 1>} : memref<512x64xf32, #tpu.memory_space<vmem>>, vector<8x64xf32>
    %165 = arith.maximumf %161, %162 : vector<8x64xf32>
    %166 = arith.maximumf %163, %164 : vector<8x64xf32>
    %167 = arith.maximumf %165, %166 : vector<8x64xf32>
    %168 = arith.addf %167, %6 : vector<8x64xf32>
    %cst_112 = arith.constant 0.000000e+00 : f32
    %169 = vector.broadcast %cst_112 : f32 to vector<8x64xf32>
    %170 = arith.maximumf %168, %169 : vector<8x64xf32>
    %171 = tpu.concatenate %7, %170, %7 in 0 : vector<1x64xf32>, vector<8x64xf32>, vector<1x64xf32> -> vector<10x64xf32>
    %c1_113 = arith.constant 1 : index
    %c3_114 = arith.constant 3 : index
    %c0_115 = arith.constant 0 : index
    %c0_116 = arith.constant 0 : index
    %172 = vector.load %arg12[%c1_113, %c3_114, %c0_115, %c0_116] : memref<2x10x10x64xf32, #tpu.memory_space<vmem>>, vector<1x1x10x64xf32>
    %173 = vector.shape_cast %172 : vector<1x1x10x64xf32> to vector<10x64xf32>
    %174 = vector.shape_cast %171 : vector<10x64xf32> to vector<1x1x10x64xf32>
    tpu.vector_store %arg12[%c1_113, %c3_114, %c0_115, %c0_116], %174 {strides = array<i32>} : memref<2x10x10x64xf32, #tpu.memory_space<vmem>>, vector<1x1x10x64xf32>,
    %c352 = arith.constant 352 : index
    %c0_117 = arith.constant 0 : index
    %175 = tpu.strided_load %arg11[%c352, %c0_117] {strides = array<i32: 2, 1>} : memref<512x64xf32, #tpu.memory_space<vmem>>, vector<8x64xf32>
    %c353 = arith.constant 353 : index
    %c0_118 = arith.constant 0 : index
    %176 = tpu.strided_load %arg11[%c353, %c0_118] {strides = array<i32: 2, 1>} : memref<512x64xf32, #tpu.memory_space<vmem>>, vector<8x64xf32>
    %c368 = arith.constant 368 : index
    %c0_119 = arith.constant 0 : index
    %177 = tpu.strided_load %arg11[%c368, %c0_119] {strides = array<i32: 2, 1>} : memref<512x64xf32, #tpu.memory_space<vmem>>, vector<8x64xf32>
    %c369 = arith.constant 369 : index
    %c0_120 = arith.constant 0 : index
    %178 = tpu.strided_load %arg11[%c369, %c0_120] {strides = array<i32: 2, 1>} : memref<512x64xf32, #tpu.memory_space<vmem>>, vector<8x64xf32>
    %179 = arith.maximumf %175, %176 : vector<8x64xf32>
    %180 = arith.maximumf %177, %178 : vector<8x64xf32>
    %181 = arith.maximumf %179, %180 : vector<8x64xf32>
    %182 = arith.addf %181, %6 : vector<8x64xf32>
    %cst_121 = arith.constant 0.000000e+00 : f32
    %183 = vector.broadcast %cst_121 : f32 to vector<8x64xf32>
    %184 = arith.maximumf %182, %183 : vector<8x64xf32>
    %185 = tpu.concatenate %7, %184, %7 in 0 : vector<1x64xf32>, vector<8x64xf32>, vector<1x64xf32> -> vector<10x64xf32>
    %c1_122 = arith.constant 1 : index
    %c4_123 = arith.constant 4 : index
    %c0_124 = arith.constant 0 : index
    %c0_125 = arith.constant 0 : index
    %186 = vector.load %arg12[%c1_122, %c4_123, %c0_124, %c0_125] : memref<2x10x10x64xf32, #tpu.memory_space<vmem>>, vector<1x1x10x64xf32>
    %187 = vector.shape_cast %186 : vector<1x1x10x64xf32> to vector<10x64xf32>
    %188 = vector.shape_cast %185 : vector<10x64xf32> to vector<1x1x10x64xf32>
    tpu.vector_store %arg12[%c1_122, %c4_123, %c0_124, %c0_125], %188 {strides = array<i32>} : memref<2x10x10x64xf32, #tpu.memory_space<vmem>>, vector<1x1x10x64xf32>,
    %c384 = arith.constant 384 : index
    %c0_126 = arith.constant 0 : index
    %189 = tpu.strided_load %arg11[%c384, %c0_126] {strides = array<i32: 2, 1>} : memref<512x64xf32, #tpu.memory_space<vmem>>, vector<8x64xf32>
    %c385 = arith.constant 385 : index
    %c0_127 = arith.constant 0 : index
    %190 = tpu.strided_load %arg11[%c385, %c0_127] {strides = array<i32: 2, 1>} : memref<512x64xf32, #tpu.memory_space<vmem>>, vector<8x64xf32>
    %c400 = arith.constant 400 : index
    %c0_128 = arith.constant 0 : index
    %191 = tpu.strided_load %arg11[%c400, %c0_128] {strides = array<i32: 2, 1>} : memref<512x64xf32, #tpu.memory_space<vmem>>, vector<8x64xf32>
    %c401 = arith.constant 401 : index
    %c0_129 = arith.constant 0 : index
    %192 = tpu.strided_load %arg11[%c401, %c0_129] {strides = array<i32: 2, 1>} : memref<512x64xf32, #tpu.memory_space<vmem>>, vector<8x64xf32>
    %193 = arith.maximumf %189, %190 : vector<8x64xf32>
    %194 = arith.maximumf %191, %192 : vector<8x64xf32>
    %195 = arith.maximumf %193, %194 : vector<8x64xf32>
    %196 = arith.addf %195, %6 : vector<8x64xf32>
    %cst_130 = arith.constant 0.000000e+00 : f32
    %197 = vector.broadcast %cst_130 : f32 to vector<8x64xf32>
    %198 = arith.maximumf %196, %197 : vector<8x64xf32>
    %199 = tpu.concatenate %7, %198, %7 in 0 : vector<1x64xf32>, vector<8x64xf32>, vector<1x64xf32> -> vector<10x64xf32>
    %c1_131 = arith.constant 1 : index
    %c5_132 = arith.constant 5 : index
    %c0_133 = arith.constant 0 : index
    %c0_134 = arith.constant 0 : index
    %200 = vector.load %arg12[%c1_131, %c5_132, %c0_133, %c0_134] : memref<2x10x10x64xf32, #tpu.memory_space<vmem>>, vector<1x1x10x64xf32>
    %201 = vector.shape_cast %200 : vector<1x1x10x64xf32> to vector<10x64xf32>
    %202 = vector.shape_cast %199 : vector<10x64xf32> to vector<1x1x10x64xf32>
    tpu.vector_store %arg12[%c1_131, %c5_132, %c0_133, %c0_134], %202 {strides = array<i32>} : memref<2x10x10x64xf32, #tpu.memory_space<vmem>>, vector<1x1x10x64xf32>,
    %c416 = arith.constant 416 : index
    %c0_135 = arith.constant 0 : index
    %203 = tpu.strided_load %arg11[%c416, %c0_135] {strides = array<i32: 2, 1>} : memref<512x64xf32, #tpu.memory_space<vmem>>, vector<8x64xf32>
    %c417 = arith.constant 417 : index
    %c0_136 = arith.constant 0 : index
    %204 = tpu.strided_load %arg11[%c417, %c0_136] {strides = array<i32: 2, 1>} : memref<512x64xf32, #tpu.memory_space<vmem>>, vector<8x64xf32>
    %c432 = arith.constant 432 : index
    %c0_137 = arith.constant 0 : index
    %205 = tpu.strided_load %arg11[%c432, %c0_137] {strides = array<i32: 2, 1>} : memref<512x64xf32, #tpu.memory_space<vmem>>, vector<8x64xf32>
    %c433 = arith.constant 433 : index
    %c0_138 = arith.constant 0 : index
    %206 = tpu.strided_load %arg11[%c433, %c0_138] {strides = array<i32: 2, 1>} : memref<512x64xf32, #tpu.memory_space<vmem>>, vector<8x64xf32>
    %207 = arith.maximumf %203, %204 : vector<8x64xf32>
    %208 = arith.maximumf %205, %206 : vector<8x64xf32>
    %209 = arith.maximumf %207, %208 : vector<8x64xf32>
    %210 = arith.addf %209, %6 : vector<8x64xf32>
    %cst_139 = arith.constant 0.000000e+00 : f32
    %211 = vector.broadcast %cst_139 : f32 to vector<8x64xf32>
    %212 = arith.maximumf %210, %211 : vector<8x64xf32>
    %213 = tpu.concatenate %7, %212, %7 in 0 : vector<1x64xf32>, vector<8x64xf32>, vector<1x64xf32> -> vector<10x64xf32>
    %c1_140 = arith.constant 1 : index
    %c6_141 = arith.constant 6 : index
    %c0_142 = arith.constant 0 : index
    %c0_143 = arith.constant 0 : index
    %214 = vector.load %arg12[%c1_140, %c6_141, %c0_142, %c0_143] : memref<2x10x10x64xf32, #tpu.memory_space<vmem>>, vector<1x1x10x64xf32>
    %215 = vector.shape_cast %214 : vector<1x1x10x64xf32> to vector<10x64xf32>
    %216 = vector.shape_cast %213 : vector<10x64xf32> to vector<1x1x10x64xf32>
    tpu.vector_store %arg12[%c1_140, %c6_141, %c0_142, %c0_143], %216 {strides = array<i32>} : memref<2x10x10x64xf32, #tpu.memory_space<vmem>>, vector<1x1x10x64xf32>,
    %c448 = arith.constant 448 : index
    %c0_144 = arith.constant 0 : index
    %217 = tpu.strided_load %arg11[%c448, %c0_144] {strides = array<i32: 2, 1>} : memref<512x64xf32, #tpu.memory_space<vmem>>, vector<8x64xf32>
    %c449 = arith.constant 449 : index
    %c0_145 = arith.constant 0 : index
    %218 = tpu.strided_load %arg11[%c449, %c0_145] {strides = array<i32: 2, 1>} : memref<512x64xf32, #tpu.memory_space<vmem>>, vector<8x64xf32>
    %c464 = arith.constant 464 : index
    %c0_146 = arith.constant 0 : index
    %219 = tpu.strided_load %arg11[%c464, %c0_146] {strides = array<i32: 2, 1>} : memref<512x64xf32, #tpu.memory_space<vmem>>, vector<8x64xf32>
    %c465 = arith.constant 465 : index
    %c0_147 = arith.constant 0 : index
    %220 = tpu.strided_load %arg11[%c465, %c0_147] {strides = array<i32: 2, 1>} : memref<512x64xf32, #tpu.memory_space<vmem>>, vector<8x64xf32>
    %221 = arith.maximumf %217, %218 : vector<8x64xf32>
    %222 = arith.maximumf %219, %220 : vector<8x64xf32>
    %223 = arith.maximumf %221, %222 : vector<8x64xf32>
    %224 = arith.addf %223, %6 : vector<8x64xf32>
    %cst_148 = arith.constant 0.000000e+00 : f32
    %225 = vector.broadcast %cst_148 : f32 to vector<8x64xf32>
    %226 = arith.maximumf %224, %225 : vector<8x64xf32>
    %227 = tpu.concatenate %7, %226, %7 in 0 : vector<1x64xf32>, vector<8x64xf32>, vector<1x64xf32> -> vector<10x64xf32>
    %c1_149 = arith.constant 1 : index
    %c7_150 = arith.constant 7 : index
    %c0_151 = arith.constant 0 : index
    %c0_152 = arith.constant 0 : index
    %228 = vector.load %arg12[%c1_149, %c7_150, %c0_151, %c0_152] : memref<2x10x10x64xf32, #tpu.memory_space<vmem>>, vector<1x1x10x64xf32>
    %229 = vector.shape_cast %228 : vector<1x1x10x64xf32> to vector<10x64xf32>
    %230 = vector.shape_cast %227 : vector<10x64xf32> to vector<1x1x10x64xf32>
    tpu.vector_store %arg12[%c1_149, %c7_150, %c0_151, %c0_152], %230 {strides = array<i32>} : memref<2x10x10x64xf32, #tpu.memory_space<vmem>>, vector<1x1x10x64xf32>,
    %c480 = arith.constant 480 : index
    %c0_153 = arith.constant 0 : index
    %231 = tpu.strided_load %arg11[%c480, %c0_153] {strides = array<i32: 2, 1>} : memref<512x64xf32, #tpu.memory_space<vmem>>, vector<8x64xf32>
    %c481 = arith.constant 481 : index
    %c0_154 = arith.constant 0 : index
    %232 = tpu.strided_load %arg11[%c481, %c0_154] {strides = array<i32: 2, 1>} : memref<512x64xf32, #tpu.memory_space<vmem>>, vector<8x64xf32>
    %c496 = arith.constant 496 : index
    %c0_155 = arith.constant 0 : index
    %233 = tpu.strided_load %arg11[%c496, %c0_155] {strides = array<i32: 2, 1>} : memref<512x64xf32, #tpu.memory_space<vmem>>, vector<8x64xf32>
    %c497 = arith.constant 497 : index
    %c0_156 = arith.constant 0 : index
    %234 = tpu.strided_load %arg11[%c497, %c0_156] {strides = array<i32: 2, 1>} : memref<512x64xf32, #tpu.memory_space<vmem>>, vector<8x64xf32>
    %235 = arith.maximumf %231, %232 : vector<8x64xf32>
    %236 = arith.maximumf %233, %234 : vector<8x64xf32>
    %237 = arith.maximumf %235, %236 : vector<8x64xf32>
    %238 = arith.addf %237, %6 : vector<8x64xf32>
    %cst_157 = arith.constant 0.000000e+00 : f32
    %239 = vector.broadcast %cst_157 : f32 to vector<8x64xf32>
    %240 = arith.maximumf %238, %239 : vector<8x64xf32>
    %241 = tpu.concatenate %7, %240, %7 in 0 : vector<1x64xf32>, vector<8x64xf32>, vector<1x64xf32> -> vector<10x64xf32>
    %c1_158 = arith.constant 1 : index
    %c8_159 = arith.constant 8 : index
    %c0_160 = arith.constant 0 : index
    %c0_161 = arith.constant 0 : index
    %242 = vector.load %arg12[%c1_158, %c8_159, %c0_160, %c0_161] : memref<2x10x10x64xf32, #tpu.memory_space<vmem>>, vector<1x1x10x64xf32>
    %243 = vector.shape_cast %242 : vector<1x1x10x64xf32> to vector<10x64xf32>
    %244 = vector.shape_cast %241 : vector<10x64xf32> to vector<1x1x10x64xf32>
    tpu.vector_store %arg12[%c1_158, %c8_159, %c0_160, %c0_161], %244 {strides = array<i32>} : memref<2x10x10x64xf32, #tpu.memory_space<vmem>>, vector<1x1x10x64xf32>,
    %c0_162 = arith.constant 0 : index
    %c0_163 = arith.constant 0 : index
    %c0_164 = arith.constant 0 : index
    %c0_165 = arith.constant 0 : index
    %245 = vector.load %arg12[%c0_162, %c0_163, %c0_164, %c0_165] : memref<2x10x10x64xf32, #tpu.memory_space<vmem>>, vector<1x1x8x64xf32>
    %246 = vector.shape_cast %245 : vector<1x1x8x64xf32> to vector<8x64xf32>
    %c0_166 = arith.constant 0 : index
    %c0_167 = arith.constant 0 : index
    %c1_168 = arith.constant 1 : index
    %c0_169 = arith.constant 0 : index
    %247 = vector.load %arg12[%c0_166, %c0_167, %c1_168, %c0_169] : memref<2x10x10x64xf32, #tpu.memory_space<vmem>>, vector<1x1x8x64xf32>
    %248 = vector.shape_cast %247 : vector<1x1x8x64xf32> to vector<8x64xf32>
    %c0_170 = arith.constant 0 : index
    %c0_171 = arith.constant 0 : index
    %c2_172 = arith.constant 2 : index
    %c0_173 = arith.constant 0 : index
    %249 = vector.load %arg12[%c0_170, %c0_171, %c2_172, %c0_173] : memref<2x10x10x64xf32, #tpu.memory_space<vmem>>, vector<1x1x8x64xf32>
    %250 = vector.shape_cast %249 : vector<1x1x8x64xf32> to vector<8x64xf32>
    %c0_174 = arith.constant 0 : index
    %c1_175 = arith.constant 1 : index
    %c0_176 = arith.constant 0 : index
    %c0_177 = arith.constant 0 : index
    %251 = vector.load %arg12[%c0_174, %c1_175, %c0_176, %c0_177] : memref<2x10x10x64xf32, #tpu.memory_space<vmem>>, vector<1x1x8x64xf32>
    %252 = vector.shape_cast %251 : vector<1x1x8x64xf32> to vector<8x64xf32>
    %c0_178 = arith.constant 0 : index
    %c1_179 = arith.constant 1 : index
    %c1_180 = arith.constant 1 : index
    %c0_181 = arith.constant 0 : index
    %253 = vector.load %arg12[%c0_178, %c1_179, %c1_180, %c0_181] : memref<2x10x10x64xf32, #tpu.memory_space<vmem>>, vector<1x1x8x64xf32>
    %254 = vector.shape_cast %253 : vector<1x1x8x64xf32> to vector<8x64xf32>
    %c0_182 = arith.constant 0 : index
    %c1_183 = arith.constant 1 : index
    %c2_184 = arith.constant 2 : index
    %c0_185 = arith.constant 0 : index
    %255 = vector.load %arg12[%c0_182, %c1_183, %c2_184, %c0_185] : memref<2x10x10x64xf32, #tpu.memory_space<vmem>>, vector<1x1x8x64xf32>
    %256 = vector.shape_cast %255 : vector<1x1x8x64xf32> to vector<8x64xf32>
    %c0_186 = arith.constant 0 : index
    %c2_187 = arith.constant 2 : index
    %c0_188 = arith.constant 0 : index
    %c0_189 = arith.constant 0 : index
    %257 = vector.load %arg12[%c0_186, %c2_187, %c0_188, %c0_189] : memref<2x10x10x64xf32, #tpu.memory_space<vmem>>, vector<1x1x8x64xf32>
    %258 = vector.shape_cast %257 : vector<1x1x8x64xf32> to vector<8x64xf32>
    %c0_190 = arith.constant 0 : index
    %c2_191 = arith.constant 2 : index
    %c1_192 = arith.constant 1 : index
    %c0_193 = arith.constant 0 : index
    %259 = vector.load %arg12[%c0_190, %c2_191, %c1_192, %c0_193] : memref<2x10x10x64xf32, #tpu.memory_space<vmem>>, vector<1x1x8x64xf32>
    %260 = vector.shape_cast %259 : vector<1x1x8x64xf32> to vector<8x64xf32>
    %c0_194 = arith.constant 0 : index
    %c2_195 = arith.constant 2 : index
    %c2_196 = arith.constant 2 : index
    %c0_197 = arith.constant 0 : index
    %261 = vector.load %arg12[%c0_194, %c2_195, %c2_196, %c0_197] : memref<2x10x10x64xf32, #tpu.memory_space<vmem>>, vector<1x1x8x64xf32>
    %262 = vector.shape_cast %261 : vector<1x1x8x64xf32> to vector<8x64xf32>
    %263 = tpu.concatenate %246, %248, %250, %252, %254, %256, %258, %260, %262 in 1 : vector<8x64xf32>, vector<8x64xf32>, vector<8x64xf32>, vector<8x64xf32>, vector<8x64xf32>, vector<8x64xf32>, vector<8x64xf32>, vector<8x64xf32>, vector<8x64xf32> -> vector<8x576xf32>
    %c0_198 = arith.constant 0 : index
    %c0_199 = arith.constant 0 : index
    %264 = vector.load %arg13[%c0_198, %c0_199] : memref<128x576xf32, #tpu.memory_space<vmem>>, vector<8x576xf32>
    tpu.vector_store %arg13[%c0_198, %c0_199], %263 {strides = array<i32>} : memref<128x576xf32, #tpu.memory_space<vmem>>, vector<8x576xf32>,
    %c0_200 = arith.constant 0 : index
    %c1_201 = arith.constant 1 : index
    %c0_202 = arith.constant 0 : index
    %c0_203 = arith.constant 0 : index
    %265 = vector.load %arg12[%c0_200, %c1_201, %c0_202, %c0_203] : memref<2x10x10x64xf32, #tpu.memory_space<vmem>>, vector<1x1x8x64xf32>
    %266 = vector.shape_cast %265 : vector<1x1x8x64xf32> to vector<8x64xf32>
    %c0_204 = arith.constant 0 : index
    %c1_205 = arith.constant 1 : index
    %c1_206 = arith.constant 1 : index
    %c0_207 = arith.constant 0 : index
    %267 = vector.load %arg12[%c0_204, %c1_205, %c1_206, %c0_207] : memref<2x10x10x64xf32, #tpu.memory_space<vmem>>, vector<1x1x8x64xf32>
    %268 = vector.shape_cast %267 : vector<1x1x8x64xf32> to vector<8x64xf32>
    %c0_208 = arith.constant 0 : index
    %c1_209 = arith.constant 1 : index
    %c2_210 = arith.constant 2 : index
    %c0_211 = arith.constant 0 : index
    %269 = vector.load %arg12[%c0_208, %c1_209, %c2_210, %c0_211] : memref<2x10x10x64xf32, #tpu.memory_space<vmem>>, vector<1x1x8x64xf32>
    %270 = vector.shape_cast %269 : vector<1x1x8x64xf32> to vector<8x64xf32>
    %c0_212 = arith.constant 0 : index
    %c2_213 = arith.constant 2 : index
    %c0_214 = arith.constant 0 : index
    %c0_215 = arith.constant 0 : index
    %271 = vector.load %arg12[%c0_212, %c2_213, %c0_214, %c0_215] : memref<2x10x10x64xf32, #tpu.memory_space<vmem>>, vector<1x1x8x64xf32>
    %272 = vector.shape_cast %271 : vector<1x1x8x64xf32> to vector<8x64xf32>
    %c0_216 = arith.constant 0 : index
    %c2_217 = arith.constant 2 : index
    %c1_218 = arith.constant 1 : index
    %c0_219 = arith.constant 0 : index
    %273 = vector.load %arg12[%c0_216, %c2_217, %c1_218, %c0_219] : memref<2x10x10x64xf32, #tpu.memory_space<vmem>>, vector<1x1x8x64xf32>
    %274 = vector.shape_cast %273 : vector<1x1x8x64xf32> to vector<8x64xf32>
    %c0_220 = arith.constant 0 : index
    %c2_221 = arith.constant 2 : index
    %c2_222 = arith.constant 2 : index
    %c0_223 = arith.constant 0 : index
    %275 = vector.load %arg12[%c0_220, %c2_221, %c2_222, %c0_223] : memref<2x10x10x64xf32, #tpu.memory_space<vmem>>, vector<1x1x8x64xf32>
    %276 = vector.shape_cast %275 : vector<1x1x8x64xf32> to vector<8x64xf32>
    %c0_224 = arith.constant 0 : index
    %c3_225 = arith.constant 3 : index
    %c0_226 = arith.constant 0 : index
    %c0_227 = arith.constant 0 : index
    %277 = vector.load %arg12[%c0_224, %c3_225, %c0_226, %c0_227] : memref<2x10x10x64xf32, #tpu.memory_space<vmem>>, vector<1x1x8x64xf32>
    %278 = vector.shape_cast %277 : vector<1x1x8x64xf32> to vector<8x64xf32>
    %c0_228 = arith.constant 0 : index
    %c3_229 = arith.constant 3 : index
    %c1_230 = arith.constant 1 : index
    %c0_231 = arith.constant 0 : index
    %279 = vector.load %arg12[%c0_228, %c3_229, %c1_230, %c0_231] : memref<2x10x10x64xf32, #tpu.memory_space<vmem>>, vector<1x1x8x64xf32>
    %280 = vector.shape_cast %279 : vector<1x1x8x64xf32> to vector<8x64xf32>
    %c0_232 = arith.constant 0 : index
    %c3_233 = arith.constant 3 : index
    %c2_234 = arith.constant 2 : index
    %c0_235 = arith.constant 0 : index
    %281 = vector.load %arg12[%c0_232, %c3_233, %c2_234, %c0_235] : memref<2x10x10x64xf32, #tpu.memory_space<vmem>>, vector<1x1x8x64xf32>
    %282 = vector.shape_cast %281 : vector<1x1x8x64xf32> to vector<8x64xf32>
    %283 = tpu.concatenate %266, %268, %270, %272, %274, %276, %278, %280, %282 in 1 : vector<8x64xf32>, vector<8x64xf32>, vector<8x64xf32>, vector<8x64xf32>, vector<8x64xf32>, vector<8x64xf32>, vector<8x64xf32>, vector<8x64xf32>, vector<8x64xf32> -> vector<8x576xf32>
    %c8_236 = arith.constant 8 : index
    %c0_237 = arith.constant 0 : index
    %284 = vector.load %arg13[%c8_236, %c0_237] : memref<128x576xf32, #tpu.memory_space<vmem>>, vector<8x576xf32>
    tpu.vector_store %arg13[%c8_236, %c0_237], %283 {strides = array<i32>} : memref<128x576xf32, #tpu.memory_space<vmem>>, vector<8x576xf32>,
    %c0_238 = arith.constant 0 : index
    %c2_239 = arith.constant 2 : index
    %c0_240 = arith.constant 0 : index
    %c0_241 = arith.constant 0 : index
    %285 = vector.load %arg12[%c0_238, %c2_239, %c0_240, %c0_241] : memref<2x10x10x64xf32, #tpu.memory_space<vmem>>, vector<1x1x8x64xf32>
    %286 = vector.shape_cast %285 : vector<1x1x8x64xf32> to vector<8x64xf32>
    %c0_242 = arith.constant 0 : index
    %c2_243 = arith.constant 2 : index
    %c1_244 = arith.constant 1 : index
    %c0_245 = arith.constant 0 : index
    %287 = vector.load %arg12[%c0_242, %c2_243, %c1_244, %c0_245] : memref<2x10x10x64xf32, #tpu.memory_space<vmem>>, vector<1x1x8x64xf32>
    %288 = vector.shape_cast %287 : vector<1x1x8x64xf32> to vector<8x64xf32>
    %c0_246 = arith.constant 0 : index
    %c2_247 = arith.constant 2 : index
    %c2_248 = arith.constant 2 : index
    %c0_249 = arith.constant 0 : index
    %289 = vector.load %arg12[%c0_246, %c2_247, %c2_248, %c0_249] : memref<2x10x10x64xf32, #tpu.memory_space<vmem>>, vector<1x1x8x64xf32>
    %290 = vector.shape_cast %289 : vector<1x1x8x64xf32> to vector<8x64xf32>
    %c0_250 = arith.constant 0 : index
    %c3_251 = arith.constant 3 : index
    %c0_252 = arith.constant 0 : index
    %c0_253 = arith.constant 0 : index
    %291 = vector.load %arg12[%c0_250, %c3_251, %c0_252, %c0_253] : memref<2x10x10x64xf32, #tpu.memory_space<vmem>>, vector<1x1x8x64xf32>
    %292 = vector.shape_cast %291 : vector<1x1x8x64xf32> to vector<8x64xf32>
    %c0_254 = arith.constant 0 : index
    %c3_255 = arith.constant 3 : index
    %c1_256 = arith.constant 1 : index
    %c0_257 = arith.constant 0 : index
    %293 = vector.load %arg12[%c0_254, %c3_255, %c1_256, %c0_257] : memref<2x10x10x64xf32, #tpu.memory_space<vmem>>, vector<1x1x8x64xf32>
    %294 = vector.shape_cast %293 : vector<1x1x8x64xf32> to vector<8x64xf32>
    %c0_258 = arith.constant 0 : index
    %c3_259 = arith.constant 3 : index
    %c2_260 = arith.constant 2 : index
    %c0_261 = arith.constant 0 : index
    %295 = vector.load %arg12[%c0_258, %c3_259, %c2_260, %c0_261] : memref<2x10x10x64xf32, #tpu.memory_space<vmem>>, vector<1x1x8x64xf32>
    %296 = vector.shape_cast %295 : vector<1x1x8x64xf32> to vector<8x64xf32>
    %c0_262 = arith.constant 0 : index
    %c4_263 = arith.constant 4 : index
    %c0_264 = arith.constant 0 : index
    %c0_265 = arith.constant 0 : index
    %297 = vector.load %arg12[%c0_262, %c4_263, %c0_264, %c0_265] : memref<2x10x10x64xf32, #tpu.memory_space<vmem>>, vector<1x1x8x64xf32>
    %298 = vector.shape_cast %297 : vector<1x1x8x64xf32> to vector<8x64xf32>
    %c0_266 = arith.constant 0 : index
    %c4_267 = arith.constant 4 : index
    %c1_268 = arith.constant 1 : index
    %c0_269 = arith.constant 0 : index
    %299 = vector.load %arg12[%c0_266, %c4_267, %c1_268, %c0_269] : memref<2x10x10x64xf32, #tpu.memory_space<vmem>>, vector<1x1x8x64xf32>
    %300 = vector.shape_cast %299 : vector<1x1x8x64xf32> to vector<8x64xf32>
    %c0_270 = arith.constant 0 : index
    %c4_271 = arith.constant 4 : index
    %c2_272 = arith.constant 2 : index
    %c0_273 = arith.constant 0 : index
    %301 = vector.load %arg12[%c0_270, %c4_271, %c2_272, %c0_273] : memref<2x10x10x64xf32, #tpu.memory_space<vmem>>, vector<1x1x8x64xf32>
    %302 = vector.shape_cast %301 : vector<1x1x8x64xf32> to vector<8x64xf32>
    %303 = tpu.concatenate %286, %288, %290, %292, %294, %296, %298, %300, %302 in 1 : vector<8x64xf32>, vector<8x64xf32>, vector<8x64xf32>, vector<8x64xf32>, vector<8x64xf32>, vector<8x64xf32>, vector<8x64xf32>, vector<8x64xf32>, vector<8x64xf32> -> vector<8x576xf32>
    %c16_274 = arith.constant 16 : index
    %c0_275 = arith.constant 0 : index
    %304 = vector.load %arg13[%c16_274, %c0_275] : memref<128x576xf32, #tpu.memory_space<vmem>>, vector<8x576xf32>
    tpu.vector_store %arg13[%c16_274, %c0_275], %303 {strides = array<i32>} : memref<128x576xf32, #tpu.memory_space<vmem>>, vector<8x576xf32>,
    %c0_276 = arith.constant 0 : index
    %c3_277 = arith.constant 3 : index
    %c0_278 = arith.constant 0 : index
    %c0_279 = arith.constant 0 : index
    %305 = vector.load %arg12[%c0_276, %c3_277, %c0_278, %c0_279] : memref<2x10x10x64xf32, #tpu.memory_space<vmem>>, vector<1x1x8x64xf32>
    %306 = vector.shape_cast %305 : vector<1x1x8x64xf32> to vector<8x64xf32>
    %c0_280 = arith.constant 0 : index
    %c3_281 = arith.constant 3 : index
    %c1_282 = arith.constant 1 : index
    %c0_283 = arith.constant 0 : index
    %307 = vector.load %arg12[%c0_280, %c3_281, %c1_282, %c0_283] : memref<2x10x10x64xf32, #tpu.memory_space<vmem>>, vector<1x1x8x64xf32>
    %308 = vector.shape_cast %307 : vector<1x1x8x64xf32> to vector<8x64xf32>
    %c0_284 = arith.constant 0 : index
    %c3_285 = arith.constant 3 : index
    %c2_286 = arith.constant 2 : index
    %c0_287 = arith.constant 0 : index
    %309 = vector.load %arg12[%c0_284, %c3_285, %c2_286, %c0_287] : memref<2x10x10x64xf32, #tpu.memory_space<vmem>>, vector<1x1x8x64xf32>
    %310 = vector.shape_cast %309 : vector<1x1x8x64xf32> to vector<8x64xf32>
    %c0_288 = arith.constant 0 : index
    %c4_289 = arith.constant 4 : index
    %c0_290 = arith.constant 0 : index
    %c0_291 = arith.constant 0 : index
    %311 = vector.load %arg12[%c0_288, %c4_289, %c0_290, %c0_291] : memref<2x10x10x64xf32, #tpu.memory_space<vmem>>, vector<1x1x8x64xf32>
    %312 = vector.shape_cast %311 : vector<1x1x8x64xf32> to vector<8x64xf32>
    %c0_292 = arith.constant 0 : index
    %c4_293 = arith.constant 4 : index
    %c1_294 = arith.constant 1 : index
    %c0_295 = arith.constant 0 : index
    %313 = vector.load %arg12[%c0_292, %c4_293, %c1_294, %c0_295] : memref<2x10x10x64xf32, #tpu.memory_space<vmem>>, vector<1x1x8x64xf32>
    %314 = vector.shape_cast %313 : vector<1x1x8x64xf32> to vector<8x64xf32>
    %c0_296 = arith.constant 0 : index
    %c4_297 = arith.constant 4 : index
    %c2_298 = arith.constant 2 : index
    %c0_299 = arith.constant 0 : index
    %315 = vector.load %arg12[%c0_296, %c4_297, %c2_298, %c0_299] : memref<2x10x10x64xf32, #tpu.memory_space<vmem>>, vector<1x1x8x64xf32>
    %316 = vector.shape_cast %315 : vector<1x1x8x64xf32> to vector<8x64xf32>
    %c0_300 = arith.constant 0 : index
    %c5_301 = arith.constant 5 : index
    %c0_302 = arith.constant 0 : index
    %c0_303 = arith.constant 0 : index
    %317 = vector.load %arg12[%c0_300, %c5_301, %c0_302, %c0_303] : memref<2x10x10x64xf32, #tpu.memory_space<vmem>>, vector<1x1x8x64xf32>
    %318 = vector.shape_cast %317 : vector<1x1x8x64xf32> to vector<8x64xf32>
    %c0_304 = arith.constant 0 : index
    %c5_305 = arith.constant 5 : index
    %c1_306 = arith.constant 1 : index
    %c0_307 = arith.constant 0 : index
    %319 = vector.load %arg12[%c0_304, %c5_305, %c1_306, %c0_307] : memref<2x10x10x64xf32, #tpu.memory_space<vmem>>, vector<1x1x8x64xf32>
    %320 = vector.shape_cast %319 : vector<1x1x8x64xf32> to vector<8x64xf32>
    %c0_308 = arith.constant 0 : index
    %c5_309 = arith.constant 5 : index
    %c2_310 = arith.constant 2 : index
    %c0_311 = arith.constant 0 : index
    %321 = vector.load %arg12[%c0_308, %c5_309, %c2_310, %c0_311] : memref<2x10x10x64xf32, #tpu.memory_space<vmem>>, vector<1x1x8x64xf32>
    %322 = vector.shape_cast %321 : vector<1x1x8x64xf32> to vector<8x64xf32>
    %323 = tpu.concatenate %306, %308, %310, %312, %314, %316, %318, %320, %322 in 1 : vector<8x64xf32>, vector<8x64xf32>, vector<8x64xf32>, vector<8x64xf32>, vector<8x64xf32>, vector<8x64xf32>, vector<8x64xf32>, vector<8x64xf32>, vector<8x64xf32> -> vector<8x576xf32>
    %c24 = arith.constant 24 : index
    %c0_312 = arith.constant 0 : index
    %324 = vector.load %arg13[%c24, %c0_312] : memref<128x576xf32, #tpu.memory_space<vmem>>, vector<8x576xf32>
    tpu.vector_store %arg13[%c24, %c0_312], %323 {strides = array<i32>} : memref<128x576xf32, #tpu.memory_space<vmem>>, vector<8x576xf32>,
    %c0_313 = arith.constant 0 : index
    %c4_314 = arith.constant 4 : index
    %c0_315 = arith.constant 0 : index
    %c0_316 = arith.constant 0 : index
    %325 = vector.load %arg12[%c0_313, %c4_314, %c0_315, %c0_316] : memref<2x10x10x64xf32, #tpu.memory_space<vmem>>, vector<1x1x8x64xf32>
    %326 = vector.shape_cast %325 : vector<1x1x8x64xf32> to vector<8x64xf32>
    %c0_317 = arith.constant 0 : index
    %c4_318 = arith.constant 4 : index
    %c1_319 = arith.constant 1 : index
    %c0_320 = arith.constant 0 : index
    %327 = vector.load %arg12[%c0_317, %c4_318, %c1_319, %c0_320] : memref<2x10x10x64xf32, #tpu.memory_space<vmem>>, vector<1x1x8x64xf32>
    %328 = vector.shape_cast %327 : vector<1x1x8x64xf32> to vector<8x64xf32>
    %c0_321 = arith.constant 0 : index
    %c4_322 = arith.constant 4 : index
    %c2_323 = arith.constant 2 : index
    %c0_324 = arith.constant 0 : index
    %329 = vector.load %arg12[%c0_321, %c4_322, %c2_323, %c0_324] : memref<2x10x10x64xf32, #tpu.memory_space<vmem>>, vector<1x1x8x64xf32>
    %330 = vector.shape_cast %329 : vector<1x1x8x64xf32> to vector<8x64xf32>
    %c0_325 = arith.constant 0 : index
    %c5_326 = arith.constant 5 : index
    %c0_327 = arith.constant 0 : index
    %c0_328 = arith.constant 0 : index
    %331 = vector.load %arg12[%c0_325, %c5_326, %c0_327, %c0_328] : memref<2x10x10x64xf32, #tpu.memory_space<vmem>>, vector<1x1x8x64xf32>
    %332 = vector.shape_cast %331 : vector<1x1x8x64xf32> to vector<8x64xf32>
    %c0_329 = arith.constant 0 : index
    %c5_330 = arith.constant 5 : index
    %c1_331 = arith.constant 1 : index
    %c0_332 = arith.constant 0 : index
    %333 = vector.load %arg12[%c0_329, %c5_330, %c1_331, %c0_332] : memref<2x10x10x64xf32, #tpu.memory_space<vmem>>, vector<1x1x8x64xf32>
    %334 = vector.shape_cast %333 : vector<1x1x8x64xf32> to vector<8x64xf32>
    %c0_333 = arith.constant 0 : index
    %c5_334 = arith.constant 5 : index
    %c2_335 = arith.constant 2 : index
    %c0_336 = arith.constant 0 : index
    %335 = vector.load %arg12[%c0_333, %c5_334, %c2_335, %c0_336] : memref<2x10x10x64xf32, #tpu.memory_space<vmem>>, vector<1x1x8x64xf32>
    %336 = vector.shape_cast %335 : vector<1x1x8x64xf32> to vector<8x64xf32>
    %c0_337 = arith.constant 0 : index
    %c6_338 = arith.constant 6 : index
    %c0_339 = arith.constant 0 : index
    %c0_340 = arith.constant 0 : index
    %337 = vector.load %arg12[%c0_337, %c6_338, %c0_339, %c0_340] : memref<2x10x10x64xf32, #tpu.memory_space<vmem>>, vector<1x1x8x64xf32>
    %338 = vector.shape_cast %337 : vector<1x1x8x64xf32> to vector<8x64xf32>
    %c0_341 = arith.constant 0 : index
    %c6_342 = arith.constant 6 : index
    %c1_343 = arith.constant 1 : index
    %c0_344 = arith.constant 0 : index
    %339 = vector.load %arg12[%c0_341, %c6_342, %c1_343, %c0_344] : memref<2x10x10x64xf32, #tpu.memory_space<vmem>>, vector<1x1x8x64xf32>
    %340 = vector.shape_cast %339 : vector<1x1x8x64xf32> to vector<8x64xf32>
    %c0_345 = arith.constant 0 : index
    %c6_346 = arith.constant 6 : index
    %c2_347 = arith.constant 2 : index
    %c0_348 = arith.constant 0 : index
    %341 = vector.load %arg12[%c0_345, %c6_346, %c2_347, %c0_348] : memref<2x10x10x64xf32, #tpu.memory_space<vmem>>, vector<1x1x8x64xf32>
    %342 = vector.shape_cast %341 : vector<1x1x8x64xf32> to vector<8x64xf32>
    %343 = tpu.concatenate %326, %328, %330, %332, %334, %336, %338, %340, %342 in 1 : vector<8x64xf32>, vector<8x64xf32>, vector<8x64xf32>, vector<8x64xf32>, vector<8x64xf32>, vector<8x64xf32>, vector<8x64xf32>, vector<8x64xf32>, vector<8x64xf32> -> vector<8x576xf32>
    %c32_349 = arith.constant 32 : index
    %c0_350 = arith.constant 0 : index
    %344 = vector.load %arg13[%c32_349, %c0_350] : memref<128x576xf32, #tpu.memory_space<vmem>>, vector<8x576xf32>
    tpu.vector_store %arg13[%c32_349, %c0_350], %343 {strides = array<i32>} : memref<128x576xf32, #tpu.memory_space<vmem>>, vector<8x576xf32>,
    %c0_351 = arith.constant 0 : index
    %c5_352 = arith.constant 5 : index
    %c0_353 = arith.constant 0 : index
    %c0_354 = arith.constant 0 : index
    %345 = vector.load %arg12[%c0_351, %c5_352, %c0_353, %c0_354] : memref<2x10x10x64xf32, #tpu.memory_space<vmem>>, vector<1x1x8x64xf32>
    %346 = vector.shape_cast %345 : vector<1x1x8x64xf32> to vector<8x64xf32>
    %c0_355 = arith.constant 0 : index
    %c5_356 = arith.constant 5 : index
    %c1_357 = arith.constant 1 : index
    %c0_358 = arith.constant 0 : index
    %347 = vector.load %arg12[%c0_355, %c5_356, %c1_357, %c0_358] : memref<2x10x10x64xf32, #tpu.memory_space<vmem>>, vector<1x1x8x64xf32>
    %348 = vector.shape_cast %347 : vector<1x1x8x64xf32> to vector<8x64xf32>
    %c0_359 = arith.constant 0 : index
    %c5_360 = arith.constant 5 : index
    %c2_361 = arith.constant 2 : index
    %c0_362 = arith.constant 0 : index
    %349 = vector.load %arg12[%c0_359, %c5_360, %c2_361, %c0_362] : memref<2x10x10x64xf32, #tpu.memory_space<vmem>>, vector<1x1x8x64xf32>
    %350 = vector.shape_cast %349 : vector<1x1x8x64xf32> to vector<8x64xf32>
    %c0_363 = arith.constant 0 : index
    %c6_364 = arith.constant 6 : index
    %c0_365 = arith.constant 0 : index
    %c0_366 = arith.constant 0 : index
    %351 = vector.load %arg12[%c0_363, %c6_364, %c0_365, %c0_366] : memref<2x10x10x64xf32, #tpu.memory_space<vmem>>, vector<1x1x8x64xf32>
    %352 = vector.shape_cast %351 : vector<1x1x8x64xf32> to vector<8x64xf32>
    %c0_367 = arith.constant 0 : index
    %c6_368 = arith.constant 6 : index
    %c1_369 = arith.constant 1 : index
    %c0_370 = arith.constant 0 : index
    %353 = vector.load %arg12[%c0_367, %c6_368, %c1_369, %c0_370] : memref<2x10x10x64xf32, #tpu.memory_space<vmem>>, vector<1x1x8x64xf32>
    %354 = vector.shape_cast %353 : vector<1x1x8x64xf32> to vector<8x64xf32>
    %c0_371 = arith.constant 0 : index
    %c6_372 = arith.constant 6 : index
    %c2_373 = arith.constant 2 : index
    %c0_374 = arith.constant 0 : index
    %355 = vector.load %arg12[%c0_371, %c6_372, %c2_373, %c0_374] : memref<2x10x10x64xf32, #tpu.memory_space<vmem>>, vector<1x1x8x64xf32>
    %356 = vector.shape_cast %355 : vector<1x1x8x64xf32> to vector<8x64xf32>
    %c0_375 = arith.constant 0 : index
    %c7_376 = arith.constant 7 : index
    %c0_377 = arith.constant 0 : index
    %c0_378 = arith.constant 0 : index
    %357 = vector.load %arg12[%c0_375, %c7_376, %c0_377, %c0_378] : memref<2x10x10x64xf32, #tpu.memory_space<vmem>>, vector<1x1x8x64xf32>
    %358 = vector.shape_cast %357 : vector<1x1x8x64xf32> to vector<8x64xf32>
    %c0_379 = arith.constant 0 : index
    %c7_380 = arith.constant 7 : index
    %c1_381 = arith.constant 1 : index
    %c0_382 = arith.constant 0 : index
    %359 = vector.load %arg12[%c0_379, %c7_380, %c1_381, %c0_382] : memref<2x10x10x64xf32, #tpu.memory_space<vmem>>, vector<1x1x8x64xf32>
    %360 = vector.shape_cast %359 : vector<1x1x8x64xf32> to vector<8x64xf32>
    %c0_383 = arith.constant 0 : index
    %c7_384 = arith.constant 7 : index
    %c2_385 = arith.constant 2 : index
    %c0_386 = arith.constant 0 : index
    %361 = vector.load %arg12[%c0_383, %c7_384, %c2_385, %c0_386] : memref<2x10x10x64xf32, #tpu.memory_space<vmem>>, vector<1x1x8x64xf32>
    %362 = vector.shape_cast %361 : vector<1x1x8x64xf32> to vector<8x64xf32>
    %363 = tpu.concatenate %346, %348, %350, %352, %354, %356, %358, %360, %362 in 1 : vector<8x64xf32>, vector<8x64xf32>, vector<8x64xf32>, vector<8x64xf32>, vector<8x64xf32>, vector<8x64xf32>, vector<8x64xf32>, vector<8x64xf32>, vector<8x64xf32> -> vector<8x576xf32>
    %c40 = arith.constant 40 : index
    %c0_387 = arith.constant 0 : index
    %364 = vector.load %arg13[%c40, %c0_387] : memref<128x576xf32, #tpu.memory_space<vmem>>, vector<8x576xf32>
    tpu.vector_store %arg13[%c40, %c0_387], %363 {strides = array<i32>} : memref<128x576xf32, #tpu.memory_space<vmem>>, vector<8x576xf32>,
    %c0_388 = arith.constant 0 : index
    %c6_389 = arith.constant 6 : index
    %c0_390 = arith.constant 0 : index
    %c0_391 = arith.constant 0 : index
    %365 = vector.load %arg12[%c0_388, %c6_389, %c0_390, %c0_391] : memref<2x10x10x64xf32, #tpu.memory_space<vmem>>, vector<1x1x8x64xf32>
    %366 = vector.shape_cast %365 : vector<1x1x8x64xf32> to vector<8x64xf32>
    %c0_392 = arith.constant 0 : index
    %c6_393 = arith.constant 6 : index
    %c1_394 = arith.constant 1 : index
    %c0_395 = arith.constant 0 : index
    %367 = vector.load %arg12[%c0_392, %c6_393, %c1_394, %c0_395] : memref<2x10x10x64xf32, #tpu.memory_space<vmem>>, vector<1x1x8x64xf32>
    %368 = vector.shape_cast %367 : vector<1x1x8x64xf32> to vector<8x64xf32>
    %c0_396 = arith.constant 0 : index
    %c6_397 = arith.constant 6 : index
    %c2_398 = arith.constant 2 : index
    %c0_399 = arith.constant 0 : index
    %369 = vector.load %arg12[%c0_396, %c6_397, %c2_398, %c0_399] : memref<2x10x10x64xf32, #tpu.memory_space<vmem>>, vector<1x1x8x64xf32>
    %370 = vector.shape_cast %369 : vector<1x1x8x64xf32> to vector<8x64xf32>
    %c0_400 = arith.constant 0 : index
    %c7_401 = arith.constant 7 : index
    %c0_402 = arith.constant 0 : index
    %c0_403 = arith.constant 0 : index
    %371 = vector.load %arg12[%c0_400, %c7_401, %c0_402, %c0_403] : memref<2x10x10x64xf32, #tpu.memory_space<vmem>>, vector<1x1x8x64xf32>
    %372 = vector.shape_cast %371 : vector<1x1x8x64xf32> to vector<8x64xf32>
    %c0_404 = arith.constant 0 : index
    %c7_405 = arith.constant 7 : index
    %c1_406 = arith.constant 1 : index
    %c0_407 = arith.constant 0 : index
    %373 = vector.load %arg12[%c0_404, %c7_405, %c1_406, %c0_407] : memref<2x10x10x64xf32, #tpu.memory_space<vmem>>, vector<1x1x8x64xf32>
    %374 = vector.shape_cast %373 : vector<1x1x8x64xf32> to vector<8x64xf32>
    %c0_408 = arith.constant 0 : index
    %c7_409 = arith.constant 7 : index
    %c2_410 = arith.constant 2 : index
    %c0_411 = arith.constant 0 : index
    %375 = vector.load %arg12[%c0_408, %c7_409, %c2_410, %c0_411] : memref<2x10x10x64xf32, #tpu.memory_space<vmem>>, vector<1x1x8x64xf32>
    %376 = vector.shape_cast %375 : vector<1x1x8x64xf32> to vector<8x64xf32>
    %c0_412 = arith.constant 0 : index
    %c8_413 = arith.constant 8 : index
    %c0_414 = arith.constant 0 : index
    %c0_415 = arith.constant 0 : index
    %377 = vector.load %arg12[%c0_412, %c8_413, %c0_414, %c0_415] : memref<2x10x10x64xf32, #tpu.memory_space<vmem>>, vector<1x1x8x64xf32>
    %378 = vector.shape_cast %377 : vector<1x1x8x64xf32> to vector<8x64xf32>
    %c0_416 = arith.constant 0 : index
    %c8_417 = arith.constant 8 : index
    %c1_418 = arith.constant 1 : index
    %c0_419 = arith.constant 0 : index
    %379 = vector.load %arg12[%c0_416, %c8_417, %c1_418, %c0_419] : memref<2x10x10x64xf32, #tpu.memory_space<vmem>>, vector<1x1x8x64xf32>
    %380 = vector.shape_cast %379 : vector<1x1x8x64xf32> to vector<8x64xf32>
    %c0_420 = arith.constant 0 : index
    %c8_421 = arith.constant 8 : index
    %c2_422 = arith.constant 2 : index
    %c0_423 = arith.constant 0 : index
    %381 = vector.load %arg12[%c0_420, %c8_421, %c2_422, %c0_423] : memref<2x10x10x64xf32, #tpu.memory_space<vmem>>, vector<1x1x8x64xf32>
    %382 = vector.shape_cast %381 : vector<1x1x8x64xf32> to vector<8x64xf32>
    %383 = tpu.concatenate %366, %368, %370, %372, %374, %376, %378, %380, %382 in 1 : vector<8x64xf32>, vector<8x64xf32>, vector<8x64xf32>, vector<8x64xf32>, vector<8x64xf32>, vector<8x64xf32>, vector<8x64xf32>, vector<8x64xf32>, vector<8x64xf32> -> vector<8x576xf32>
    %c48_424 = arith.constant 48 : index
    %c0_425 = arith.constant 0 : index
    %384 = vector.load %arg13[%c48_424, %c0_425] : memref<128x576xf32, #tpu.memory_space<vmem>>, vector<8x576xf32>
    tpu.vector_store %arg13[%c48_424, %c0_425], %383 {strides = array<i32>} : memref<128x576xf32, #tpu.memory_space<vmem>>, vector<8x576xf32>,
    %c0_426 = arith.constant 0 : index
    %c7_427 = arith.constant 7 : index
    %c0_428 = arith.constant 0 : index
    %c0_429 = arith.constant 0 : index
    %385 = vector.load %arg12[%c0_426, %c7_427, %c0_428, %c0_429] : memref<2x10x10x64xf32, #tpu.memory_space<vmem>>, vector<1x1x8x64xf32>
    %386 = vector.shape_cast %385 : vector<1x1x8x64xf32> to vector<8x64xf32>
    %c0_430 = arith.constant 0 : index
    %c7_431 = arith.constant 7 : index
    %c1_432 = arith.constant 1 : index
    %c0_433 = arith.constant 0 : index
    %387 = vector.load %arg12[%c0_430, %c7_431, %c1_432, %c0_433] : memref<2x10x10x64xf32, #tpu.memory_space<vmem>>, vector<1x1x8x64xf32>
    %388 = vector.shape_cast %387 : vector<1x1x8x64xf32> to vector<8x64xf32>
    %c0_434 = arith.constant 0 : index
    %c7_435 = arith.constant 7 : index
    %c2_436 = arith.constant 2 : index
    %c0_437 = arith.constant 0 : index
    %389 = vector.load %arg12[%c0_434, %c7_435, %c2_436, %c0_437] : memref<2x10x10x64xf32, #tpu.memory_space<vmem>>, vector<1x1x8x64xf32>
    %390 = vector.shape_cast %389 : vector<1x1x8x64xf32> to vector<8x64xf32>
    %c0_438 = arith.constant 0 : index
    %c8_439 = arith.constant 8 : index
    %c0_440 = arith.constant 0 : index
    %c0_441 = arith.constant 0 : index
    %391 = vector.load %arg12[%c0_438, %c8_439, %c0_440, %c0_441] : memref<2x10x10x64xf32, #tpu.memory_space<vmem>>, vector<1x1x8x64xf32>
    %392 = vector.shape_cast %391 : vector<1x1x8x64xf32> to vector<8x64xf32>
    %c0_442 = arith.constant 0 : index
    %c8_443 = arith.constant 8 : index
    %c1_444 = arith.constant 1 : index
    %c0_445 = arith.constant 0 : index
    %393 = vector.load %arg12[%c0_442, %c8_443, %c1_444, %c0_445] : memref<2x10x10x64xf32, #tpu.memory_space<vmem>>, vector<1x1x8x64xf32>
    %394 = vector.shape_cast %393 : vector<1x1x8x64xf32> to vector<8x64xf32>
    %c0_446 = arith.constant 0 : index
    %c8_447 = arith.constant 8 : index
    %c2_448 = arith.constant 2 : index
    %c0_449 = arith.constant 0 : index
    %395 = vector.load %arg12[%c0_446, %c8_447, %c2_448, %c0_449] : memref<2x10x10x64xf32, #tpu.memory_space<vmem>>, vector<1x1x8x64xf32>
    %396 = vector.shape_cast %395 : vector<1x1x8x64xf32> to vector<8x64xf32>
    %c0_450 = arith.constant 0 : index
    %c9_451 = arith.constant 9 : index
    %c0_452 = arith.constant 0 : index
    %c0_453 = arith.constant 0 : index
    %397 = vector.load %arg12[%c0_450, %c9_451, %c0_452, %c0_453] : memref<2x10x10x64xf32, #tpu.memory_space<vmem>>, vector<1x1x8x64xf32>
    %398 = vector.shape_cast %397 : vector<1x1x8x64xf32> to vector<8x64xf32>
    %c0_454 = arith.constant 0 : index
    %c9_455 = arith.constant 9 : index
    %c1_456 = arith.constant 1 : index
    %c0_457 = arith.constant 0 : index
    %399 = vector.load %arg12[%c0_454, %c9_455, %c1_456, %c0_457] : memref<2x10x10x64xf32, #tpu.memory_space<vmem>>, vector<1x1x8x64xf32>
    %400 = vector.shape_cast %399 : vector<1x1x8x64xf32> to vector<8x64xf32>
    %c0_458 = arith.constant 0 : index
    %c9_459 = arith.constant 9 : index
    %c2_460 = arith.constant 2 : index
    %c0_461 = arith.constant 0 : index
    %401 = vector.load %arg12[%c0_458, %c9_459, %c2_460, %c0_461] : memref<2x10x10x64xf32, #tpu.memory_space<vmem>>, vector<1x1x8x64xf32>
    %402 = vector.shape_cast %401 : vector<1x1x8x64xf32> to vector<8x64xf32>
    %403 = tpu.concatenate %386, %388, %390, %392, %394, %396, %398, %400, %402 in 1 : vector<8x64xf32>, vector<8x64xf32>, vector<8x64xf32>, vector<8x64xf32>, vector<8x64xf32>, vector<8x64xf32>, vector<8x64xf32>, vector<8x64xf32>, vector<8x64xf32> -> vector<8x576xf32>
    %c56 = arith.constant 56 : index
    %c0_462 = arith.constant 0 : index
    %404 = vector.load %arg13[%c56, %c0_462] : memref<128x576xf32, #tpu.memory_space<vmem>>, vector<8x576xf32>
    tpu.vector_store %arg13[%c56, %c0_462], %403 {strides = array<i32>} : memref<128x576xf32, #tpu.memory_space<vmem>>, vector<8x576xf32>,
    %c1_463 = arith.constant 1 : index
    %c0_464 = arith.constant 0 : index
    %c0_465 = arith.constant 0 : index
    %c0_466 = arith.constant 0 : index
    %405 = vector.load %arg12[%c1_463, %c0_464, %c0_465, %c0_466] : memref<2x10x10x64xf32, #tpu.memory_space<vmem>>, vector<1x1x8x64xf32>
    %406 = vector.shape_cast %405 : vector<1x1x8x64xf32> to vector<8x64xf32>
    %c1_467 = arith.constant 1 : index
    %c0_468 = arith.constant 0 : index
    %c1_469 = arith.constant 1 : index
    %c0_470 = arith.constant 0 : index
    %407 = vector.load %arg12[%c1_467, %c0_468, %c1_469, %c0_470] : memref<2x10x10x64xf32, #tpu.memory_space<vmem>>, vector<1x1x8x64xf32>
    %408 = vector.shape_cast %407 : vector<1x1x8x64xf32> to vector<8x64xf32>
    %c1_471 = arith.constant 1 : index
    %c0_472 = arith.constant 0 : index
    %c2_473 = arith.constant 2 : index
    %c0_474 = arith.constant 0 : index
    %409 = vector.load %arg12[%c1_471, %c0_472, %c2_473, %c0_474] : memref<2x10x10x64xf32, #tpu.memory_space<vmem>>, vector<1x1x8x64xf32>
    %410 = vector.shape_cast %409 : vector<1x1x8x64xf32> to vector<8x64xf32>
    %c1_475 = arith.constant 1 : index
    %c1_476 = arith.constant 1 : index
    %c0_477 = arith.constant 0 : index
    %c0_478 = arith.constant 0 : index
    %411 = vector.load %arg12[%c1_475, %c1_476, %c0_477, %c0_478] : memref<2x10x10x64xf32, #tpu.memory_space<vmem>>, vector<1x1x8x64xf32>
    %412 = vector.shape_cast %411 : vector<1x1x8x64xf32> to vector<8x64xf32>
    %c1_479 = arith.constant 1 : index
    %c1_480 = arith.constant 1 : index
    %c1_481 = arith.constant 1 : index
    %c0_482 = arith.constant 0 : index
    %413 = vector.load %arg12[%c1_479, %c1_480, %c1_481, %c0_482] : memref<2x10x10x64xf32, #tpu.memory_space<vmem>>, vector<1x1x8x64xf32>
    %414 = vector.shape_cast %413 : vector<1x1x8x64xf32> to vector<8x64xf32>
    %c1_483 = arith.constant 1 : index
    %c1_484 = arith.constant 1 : index
    %c2_485 = arith.constant 2 : index
    %c0_486 = arith.constant 0 : index
    %415 = vector.load %arg12[%c1_483, %c1_484, %c2_485, %c0_486] : memref<2x10x10x64xf32, #tpu.memory_space<vmem>>, vector<1x1x8x64xf32>
    %416 = vector.shape_cast %415 : vector<1x1x8x64xf32> to vector<8x64xf32>
    %c1_487 = arith.constant 1 : index
    %c2_488 = arith.constant 2 : index
    %c0_489 = arith.constant 0 : index
    %c0_490 = arith.constant 0 : index
    %417 = vector.load %arg12[%c1_487, %c2_488, %c0_489, %c0_490] : memref<2x10x10x64xf32, #tpu.memory_space<vmem>>, vector<1x1x8x64xf32>
    %418 = vector.shape_cast %417 : vector<1x1x8x64xf32> to vector<8x64xf32>
    %c1_491 = arith.constant 1 : index
    %c2_492 = arith.constant 2 : index
    %c1_493 = arith.constant 1 : index
    %c0_494 = arith.constant 0 : index
    %419 = vector.load %arg12[%c1_491, %c2_492, %c1_493, %c0_494] : memref<2x10x10x64xf32, #tpu.memory_space<vmem>>, vector<1x1x8x64xf32>
    %420 = vector.shape_cast %419 : vector<1x1x8x64xf32> to vector<8x64xf32>
    %c1_495 = arith.constant 1 : index
    %c2_496 = arith.constant 2 : index
    %c2_497 = arith.constant 2 : index
    %c0_498 = arith.constant 0 : index
    %421 = vector.load %arg12[%c1_495, %c2_496, %c2_497, %c0_498] : memref<2x10x10x64xf32, #tpu.memory_space<vmem>>, vector<1x1x8x64xf32>
    %422 = vector.shape_cast %421 : vector<1x1x8x64xf32> to vector<8x64xf32>
    %423 = tpu.concatenate %406, %408, %410, %412, %414, %416, %418, %420, %422 in 1 : vector<8x64xf32>, vector<8x64xf32>, vector<8x64xf32>, vector<8x64xf32>, vector<8x64xf32>, vector<8x64xf32>, vector<8x64xf32>, vector<8x64xf32>, vector<8x64xf32> -> vector<8x576xf32>
    %c64_499 = arith.constant 64 : index
    %c0_500 = arith.constant 0 : index
    %424 = vector.load %arg13[%c64_499, %c0_500] : memref<128x576xf32, #tpu.memory_space<vmem>>, vector<8x576xf32>
    tpu.vector_store %arg13[%c64_499, %c0_500], %423 {strides = array<i32>} : memref<128x576xf32, #tpu.memory_space<vmem>>, vector<8x576xf32>,
    %c1_501 = arith.constant 1 : index
    %c1_502 = arith.constant 1 : index
    %c0_503 = arith.constant 0 : index
    %c0_504 = arith.constant 0 : index
    %425 = vector.load %arg12[%c1_501, %c1_502, %c0_503, %c0_504] : memref<2x10x10x64xf32, #tpu.memory_space<vmem>>, vector<1x1x8x64xf32>
    %426 = vector.shape_cast %425 : vector<1x1x8x64xf32> to vector<8x64xf32>
    %c1_505 = arith.constant 1 : index
    %c1_506 = arith.constant 1 : index
    %c1_507 = arith.constant 1 : index
    %c0_508 = arith.constant 0 : index
    %427 = vector.load %arg12[%c1_505, %c1_506, %c1_507, %c0_508] : memref<2x10x10x64xf32, #tpu.memory_space<vmem>>, vector<1x1x8x64xf32>
    %428 = vector.shape_cast %427 : vector<1x1x8x64xf32> to vector<8x64xf32>
    %c1_509 = arith.constant 1 : index
    %c1_510 = arith.constant 1 : index
    %c2_511 = arith.constant 2 : index
    %c0_512 = arith.constant 0 : index
    %429 = vector.load %arg12[%c1_509, %c1_510, %c2_511, %c0_512] : memref<2x10x10x64xf32, #tpu.memory_space<vmem>>, vector<1x1x8x64xf32>
    %430 = vector.shape_cast %429 : vector<1x1x8x64xf32> to vector<8x64xf32>
    %c1_513 = arith.constant 1 : index
    %c2_514 = arith.constant 2 : index
    %c0_515 = arith.constant 0 : index
    %c0_516 = arith.constant 0 : index
    %431 = vector.load %arg12[%c1_513, %c2_514, %c0_515, %c0_516] : memref<2x10x10x64xf32, #tpu.memory_space<vmem>>, vector<1x1x8x64xf32>
    %432 = vector.shape_cast %431 : vector<1x1x8x64xf32> to vector<8x64xf32>
    %c1_517 = arith.constant 1 : index
    %c2_518 = arith.constant 2 : index
    %c1_519 = arith.constant 1 : index
    %c0_520 = arith.constant 0 : index
    %433 = vector.load %arg12[%c1_517, %c2_518, %c1_519, %c0_520] : memref<2x10x10x64xf32, #tpu.memory_space<vmem>>, vector<1x1x8x64xf32>
    %434 = vector.shape_cast %433 : vector<1x1x8x64xf32> to vector<8x64xf32>
    %c1_521 = arith.constant 1 : index
    %c2_522 = arith.constant 2 : index
    %c2_523 = arith.constant 2 : index
    %c0_524 = arith.constant 0 : index
    %435 = vector.load %arg12[%c1_521, %c2_522, %c2_523, %c0_524] : memref<2x10x10x64xf32, #tpu.memory_space<vmem>>, vector<1x1x8x64xf32>
    %436 = vector.shape_cast %435 : vector<1x1x8x64xf32> to vector<8x64xf32>
    %c1_525 = arith.constant 1 : index
    %c3_526 = arith.constant 3 : index
    %c0_527 = arith.constant 0 : index
    %c0_528 = arith.constant 0 : index
    %437 = vector.load %arg12[%c1_525, %c3_526, %c0_527, %c0_528] : memref<2x10x10x64xf32, #tpu.memory_space<vmem>>, vector<1x1x8x64xf32>
    %438 = vector.shape_cast %437 : vector<1x1x8x64xf32> to vector<8x64xf32>
    %c1_529 = arith.constant 1 : index
    %c3_530 = arith.constant 3 : index
    %c1_531 = arith.constant 1 : index
    %c0_532 = arith.constant 0 : index
    %439 = vector.load %arg12[%c1_529, %c3_530, %c1_531, %c0_532] : memref<2x10x10x64xf32, #tpu.memory_space<vmem>>, vector<1x1x8x64xf32>
    %440 = vector.shape_cast %439 : vector<1x1x8x64xf32> to vector<8x64xf32>
    %c1_533 = arith.constant 1 : index
    %c3_534 = arith.constant 3 : index
    %c2_535 = arith.constant 2 : index
    %c0_536 = arith.constant 0 : index
    %441 = vector.load %arg12[%c1_533, %c3_534, %c2_535, %c0_536] : memref<2x10x10x64xf32, #tpu.memory_space<vmem>>, vector<1x1x8x64xf32>
    %442 = vector.shape_cast %441 : vector<1x1x8x64xf32> to vector<8x64xf32>
    %443 = tpu.concatenate %426, %428, %430, %432, %434, %436, %438, %440, %442 in 1 : vector<8x64xf32>, vector<8x64xf32>, vector<8x64xf32>, vector<8x64xf32>, vector<8x64xf32>, vector<8x64xf32>, vector<8x64xf32>, vector<8x64xf32>, vector<8x64xf32> -> vector<8x576xf32>
    %c72 = arith.constant 72 : index
    %c0_537 = arith.constant 0 : index
    %444 = vector.load %arg13[%c72, %c0_537] : memref<128x576xf32, #tpu.memory_space<vmem>>, vector<8x576xf32>
    tpu.vector_store %arg13[%c72, %c0_537], %443 {strides = array<i32>} : memref<128x576xf32, #tpu.memory_space<vmem>>, vector<8x576xf32>,
    %c1_538 = arith.constant 1 : index
    %c2_539 = arith.constant 2 : index
    %c0_540 = arith.constant 0 : index
    %c0_541 = arith.constant 0 : index
    %445 = vector.load %arg12[%c1_538, %c2_539, %c0_540, %c0_541] : memref<2x10x10x64xf32, #tpu.memory_space<vmem>>, vector<1x1x8x64xf32>
    %446 = vector.shape_cast %445 : vector<1x1x8x64xf32> to vector<8x64xf32>
    %c1_542 = arith.constant 1 : index
    %c2_543 = arith.constant 2 : index
    %c1_544 = arith.constant 1 : index
    %c0_545 = arith.constant 0 : index
    %447 = vector.load %arg12[%c1_542, %c2_543, %c1_544, %c0_545] : memref<2x10x10x64xf32, #tpu.memory_space<vmem>>, vector<1x1x8x64xf32>
    %448 = vector.shape_cast %447 : vector<1x1x8x64xf32> to vector<8x64xf32>
    %c1_546 = arith.constant 1 : index
    %c2_547 = arith.constant 2 : index
    %c2_548 = arith.constant 2 : index
    %c0_549 = arith.constant 0 : index
    %449 = vector.load %arg12[%c1_546, %c2_547, %c2_548, %c0_549] : memref<2x10x10x64xf32, #tpu.memory_space<vmem>>, vector<1x1x8x64xf32>
    %450 = vector.shape_cast %449 : vector<1x1x8x64xf32> to vector<8x64xf32>
    %c1_550 = arith.constant 1 : index
    %c3_551 = arith.constant 3 : index
    %c0_552 = arith.constant 0 : index
    %c0_553 = arith.constant 0 : index
    %451 = vector.load %arg12[%c1_550, %c3_551, %c0_552, %c0_553] : memref<2x10x10x64xf32, #tpu.memory_space<vmem>>, vector<1x1x8x64xf32>
    %452 = vector.shape_cast %451 : vector<1x1x8x64xf32> to vector<8x64xf32>
    %c1_554 = arith.constant 1 : index
    %c3_555 = arith.constant 3 : index
    %c1_556 = arith.constant 1 : index
    %c0_557 = arith.constant 0 : index
    %453 = vector.load %arg12[%c1_554, %c3_555, %c1_556, %c0_557] : memref<2x10x10x64xf32, #tpu.memory_space<vmem>>, vector<1x1x8x64xf32>
    %454 = vector.shape_cast %453 : vector<1x1x8x64xf32> to vector<8x64xf32>
    %c1_558 = arith.constant 1 : index
    %c3_559 = arith.constant 3 : index
    %c2_560 = arith.constant 2 : index
    %c0_561 = arith.constant 0 : index
    %455 = vector.load %arg12[%c1_558, %c3_559, %c2_560, %c0_561] : memref<2x10x10x64xf32, #tpu.memory_space<vmem>>, vector<1x1x8x64xf32>
    %456 = vector.shape_cast %455 : vector<1x1x8x64xf32> to vector<8x64xf32>
    %c1_562 = arith.constant 1 : index
    %c4_563 = arith.constant 4 : index
    %c0_564 = arith.constant 0 : index
    %c0_565 = arith.constant 0 : index
    %457 = vector.load %arg12[%c1_562, %c4_563, %c0_564, %c0_565] : memref<2x10x10x64xf32, #tpu.memory_space<vmem>>, vector<1x1x8x64xf32>
    %458 = vector.shape_cast %457 : vector<1x1x8x64xf32> to vector<8x64xf32>
    %c1_566 = arith.constant 1 : index
    %c4_567 = arith.constant 4 : index
    %c1_568 = arith.constant 1 : index
    %c0_569 = arith.constant 0 : index
    %459 = vector.load %arg12[%c1_566, %c4_567, %c1_568, %c0_569] : memref<2x10x10x64xf32, #tpu.memory_space<vmem>>, vector<1x1x8x64xf32>
    %460 = vector.shape_cast %459 : vector<1x1x8x64xf32> to vector<8x64xf32>
    %c1_570 = arith.constant 1 : index
    %c4_571 = arith.constant 4 : index
    %c2_572 = arith.constant 2 : index
    %c0_573 = arith.constant 0 : index
    %461 = vector.load %arg12[%c1_570, %c4_571, %c2_572, %c0_573] : memref<2x10x10x64xf32, #tpu.memory_space<vmem>>, vector<1x1x8x64xf32>
    %462 = vector.shape_cast %461 : vector<1x1x8x64xf32> to vector<8x64xf32>
    %463 = tpu.concatenate %446, %448, %450, %452, %454, %456, %458, %460, %462 in 1 : vector<8x64xf32>, vector<8x64xf32>, vector<8x64xf32>, vector<8x64xf32>, vector<8x64xf32>, vector<8x64xf32>, vector<8x64xf32>, vector<8x64xf32>, vector<8x64xf32> -> vector<8x576xf32>
    %c80_574 = arith.constant 80 : index
    %c0_575 = arith.constant 0 : index
    %464 = vector.load %arg13[%c80_574, %c0_575] : memref<128x576xf32, #tpu.memory_space<vmem>>, vector<8x576xf32>
    tpu.vector_store %arg13[%c80_574, %c0_575], %463 {strides = array<i32>} : memref<128x576xf32, #tpu.memory_space<vmem>>, vector<8x576xf32>,
    %c1_576 = arith.constant 1 : index
    %c3_577 = arith.constant 3 : index
    %c0_578 = arith.constant 0 : index
    %c0_579 = arith.constant 0 : index
    %465 = vector.load %arg12[%c1_576, %c3_577, %c0_578, %c0_579] : memref<2x10x10x64xf32, #tpu.memory_space<vmem>>, vector<1x1x8x64xf32>
    %466 = vector.shape_cast %465 : vector<1x1x8x64xf32> to vector<8x64xf32>
    %c1_580 = arith.constant 1 : index
    %c3_581 = arith.constant 3 : index
    %c1_582 = arith.constant 1 : index
    %c0_583 = arith.constant 0 : index
    %467 = vector.load %arg12[%c1_580, %c3_581, %c1_582, %c0_583] : memref<2x10x10x64xf32, #tpu.memory_space<vmem>>, vector<1x1x8x64xf32>
    %468 = vector.shape_cast %467 : vector<1x1x8x64xf32> to vector<8x64xf32>
    %c1_584 = arith.constant 1 : index
    %c3_585 = arith.constant 3 : index
    %c2_586 = arith.constant 2 : index
    %c0_587 = arith.constant 0 : index
    %469 = vector.load %arg12[%c1_584, %c3_585, %c2_586, %c0_587] : memref<2x10x10x64xf32, #tpu.memory_space<vmem>>, vector<1x1x8x64xf32>
    %470 = vector.shape_cast %469 : vector<1x1x8x64xf32> to vector<8x64xf32>
    %c1_588 = arith.constant 1 : index
    %c4_589 = arith.constant 4 : index
    %c0_590 = arith.constant 0 : index
    %c0_591 = arith.constant 0 : index
    %471 = vector.load %arg12[%c1_588, %c4_589, %c0_590, %c0_591] : memref<2x10x10x64xf32, #tpu.memory_space<vmem>>, vector<1x1x8x64xf32>
    %472 = vector.shape_cast %471 : vector<1x1x8x64xf32> to vector<8x64xf32>
    %c1_592 = arith.constant 1 : index
    %c4_593 = arith.constant 4 : index
    %c1_594 = arith.constant 1 : index
    %c0_595 = arith.constant 0 : index
    %473 = vector.load %arg12[%c1_592, %c4_593, %c1_594, %c0_595] : memref<2x10x10x64xf32, #tpu.memory_space<vmem>>, vector<1x1x8x64xf32>
    %474 = vector.shape_cast %473 : vector<1x1x8x64xf32> to vector<8x64xf32>
    %c1_596 = arith.constant 1 : index
    %c4_597 = arith.constant 4 : index
    %c2_598 = arith.constant 2 : index
    %c0_599 = arith.constant 0 : index
    %475 = vector.load %arg12[%c1_596, %c4_597, %c2_598, %c0_599] : memref<2x10x10x64xf32, #tpu.memory_space<vmem>>, vector<1x1x8x64xf32>
    %476 = vector.shape_cast %475 : vector<1x1x8x64xf32> to vector<8x64xf32>
    %c1_600 = arith.constant 1 : index
    %c5_601 = arith.constant 5 : index
    %c0_602 = arith.constant 0 : index
    %c0_603 = arith.constant 0 : index
    %477 = vector.load %arg12[%c1_600, %c5_601, %c0_602, %c0_603] : memref<2x10x10x64xf32, #tpu.memory_space<vmem>>, vector<1x1x8x64xf32>
    %478 = vector.shape_cast %477 : vector<1x1x8x64xf32> to vector<8x64xf32>
    %c1_604 = arith.constant 1 : index
    %c5_605 = arith.constant 5 : index
    %c1_606 = arith.constant 1 : index
    %c0_607 = arith.constant 0 : index
    %479 = vector.load %arg12[%c1_604, %c5_605, %c1_606, %c0_607] : memref<2x10x10x64xf32, #tpu.memory_space<vmem>>, vector<1x1x8x64xf32>
    %480 = vector.shape_cast %479 : vector<1x1x8x64xf32> to vector<8x64xf32>
    %c1_608 = arith.constant 1 : index
    %c5_609 = arith.constant 5 : index
    %c2_610 = arith.constant 2 : index
    %c0_611 = arith.constant 0 : index
    %481 = vector.load %arg12[%c1_608, %c5_609, %c2_610, %c0_611] : memref<2x10x10x64xf32, #tpu.memory_space<vmem>>, vector<1x1x8x64xf32>
    %482 = vector.shape_cast %481 : vector<1x1x8x64xf32> to vector<8x64xf32>
    %483 = tpu.concatenate %466, %468, %470, %472, %474, %476, %478, %480, %482 in 1 : vector<8x64xf32>, vector<8x64xf32>, vector<8x64xf32>, vector<8x64xf32>, vector<8x64xf32>, vector<8x64xf32>, vector<8x64xf32>, vector<8x64xf32>, vector<8x64xf32> -> vector<8x576xf32>
    %c88 = arith.constant 88 : index
    %c0_612 = arith.constant 0 : index
    %484 = vector.load %arg13[%c88, %c0_612] : memref<128x576xf32, #tpu.memory_space<vmem>>, vector<8x576xf32>
    tpu.vector_store %arg13[%c88, %c0_612], %483 {strides = array<i32>} : memref<128x576xf32, #tpu.memory_space<vmem>>, vector<8x576xf32>,
    %c1_613 = arith.constant 1 : index
    %c4_614 = arith.constant 4 : index
    %c0_615 = arith.constant 0 : index
    %c0_616 = arith.constant 0 : index
    %485 = vector.load %arg12[%c1_613, %c4_614, %c0_615, %c0_616] : memref<2x10x10x64xf32, #tpu.memory_space<vmem>>, vector<1x1x8x64xf32>
    %486 = vector.shape_cast %485 : vector<1x1x8x64xf32> to vector<8x64xf32>
    %c1_617 = arith.constant 1 : index
    %c4_618 = arith.constant 4 : index
    %c1_619 = arith.constant 1 : index
    %c0_620 = arith.constant 0 : index
    %487 = vector.load %arg12[%c1_617, %c4_618, %c1_619, %c0_620] : memref<2x10x10x64xf32, #tpu.memory_space<vmem>>, vector<1x1x8x64xf32>
    %488 = vector.shape_cast %487 : vector<1x1x8x64xf32> to vector<8x64xf32>
    %c1_621 = arith.constant 1 : index
    %c4_622 = arith.constant 4 : index
    %c2_623 = arith.constant 2 : index
    %c0_624 = arith.constant 0 : index
    %489 = vector.load %arg12[%c1_621, %c4_622, %c2_623, %c0_624] : memref<2x10x10x64xf32, #tpu.memory_space<vmem>>, vector<1x1x8x64xf32>
    %490 = vector.shape_cast %489 : vector<1x1x8x64xf32> to vector<8x64xf32>
    %c1_625 = arith.constant 1 : index
    %c5_626 = arith.constant 5 : index
    %c0_627 = arith.constant 0 : index
    %c0_628 = arith.constant 0 : index
    %491 = vector.load %arg12[%c1_625, %c5_626, %c0_627, %c0_628] : memref<2x10x10x64xf32, #tpu.memory_space<vmem>>, vector<1x1x8x64xf32>
    %492 = vector.shape_cast %491 : vector<1x1x8x64xf32> to vector<8x64xf32>
    %c1_629 = arith.constant 1 : index
    %c5_630 = arith.constant 5 : index
    %c1_631 = arith.constant 1 : index
    %c0_632 = arith.constant 0 : index
    %493 = vector.load %arg12[%c1_629, %c5_630, %c1_631, %c0_632] : memref<2x10x10x64xf32, #tpu.memory_space<vmem>>, vector<1x1x8x64xf32>
    %494 = vector.shape_cast %493 : vector<1x1x8x64xf32> to vector<8x64xf32>
    %c1_633 = arith.constant 1 : index
    %c5_634 = arith.constant 5 : index
    %c2_635 = arith.constant 2 : index
    %c0_636 = arith.constant 0 : index
    %495 = vector.load %arg12[%c1_633, %c5_634, %c2_635, %c0_636] : memref<2x10x10x64xf32, #tpu.memory_space<vmem>>, vector<1x1x8x64xf32>
    %496 = vector.shape_cast %495 : vector<1x1x8x64xf32> to vector<8x64xf32>
    %c1_637 = arith.constant 1 : index
    %c6_638 = arith.constant 6 : index
    %c0_639 = arith.constant 0 : index
    %c0_640 = arith.constant 0 : index
    %497 = vector.load %arg12[%c1_637, %c6_638, %c0_639, %c0_640] : memref<2x10x10x64xf32, #tpu.memory_space<vmem>>, vector<1x1x8x64xf32>
    %498 = vector.shape_cast %497 : vector<1x1x8x64xf32> to vector<8x64xf32>
    %c1_641 = arith.constant 1 : index
    %c6_642 = arith.constant 6 : index
    %c1_643 = arith.constant 1 : index
    %c0_644 = arith.constant 0 : index
    %499 = vector.load %arg12[%c1_641, %c6_642, %c1_643, %c0_644] : memref<2x10x10x64xf32, #tpu.memory_space<vmem>>, vector<1x1x8x64xf32>
    %500 = vector.shape_cast %499 : vector<1x1x8x64xf32> to vector<8x64xf32>
    %c1_645 = arith.constant 1 : index
    %c6_646 = arith.constant 6 : index
    %c2_647 = arith.constant 2 : index
    %c0_648 = arith.constant 0 : index
    %501 = vector.load %arg12[%c1_645, %c6_646, %c2_647, %c0_648] : memref<2x10x10x64xf32, #tpu.memory_space<vmem>>, vector<1x1x8x64xf32>
    %502 = vector.shape_cast %501 : vector<1x1x8x64xf32> to vector<8x64xf32>
    %503 = tpu.concatenate %486, %488, %490, %492, %494, %496, %498, %500, %502 in 1 : vector<8x64xf32>, vector<8x64xf32>, vector<8x64xf32>, vector<8x64xf32>, vector<8x64xf32>, vector<8x64xf32>, vector<8x64xf32>, vector<8x64xf32>, vector<8x64xf32> -> vector<8x576xf32>
    %c96_649 = arith.constant 96 : index
    %c0_650 = arith.constant 0 : index
    %504 = vector.load %arg13[%c96_649, %c0_650] : memref<128x576xf32, #tpu.memory_space<vmem>>, vector<8x576xf32>
    tpu.vector_store %arg13[%c96_649, %c0_650], %503 {strides = array<i32>} : memref<128x576xf32, #tpu.memory_space<vmem>>, vector<8x576xf32>,
    %c1_651 = arith.constant 1 : index
    %c5_652 = arith.constant 5 : index
    %c0_653 = arith.constant 0 : index
    %c0_654 = arith.constant 0 : index
    %505 = vector.load %arg12[%c1_651, %c5_652, %c0_653, %c0_654] : memref<2x10x10x64xf32, #tpu.memory_space<vmem>>, vector<1x1x8x64xf32>
    %506 = vector.shape_cast %505 : vector<1x1x8x64xf32> to vector<8x64xf32>
    %c1_655 = arith.constant 1 : index
    %c5_656 = arith.constant 5 : index
    %c1_657 = arith.constant 1 : index
    %c0_658 = arith.constant 0 : index
    %507 = vector.load %arg12[%c1_655, %c5_656, %c1_657, %c0_658] : memref<2x10x10x64xf32, #tpu.memory_space<vmem>>, vector<1x1x8x64xf32>
    %508 = vector.shape_cast %507 : vector<1x1x8x64xf32> to vector<8x64xf32>
    %c1_659 = arith.constant 1 : index
    %c5_660 = arith.constant 5 : index
    %c2_661 = arith.constant 2 : index
    %c0_662 = arith.constant 0 : index
    %509 = vector.load %arg12[%c1_659, %c5_660, %c2_661, %c0_662] : memref<2x10x10x64xf32, #tpu.memory_space<vmem>>, vector<1x1x8x64xf32>
    %510 = vector.shape_cast %509 : vector<1x1x8x64xf32> to vector<8x64xf32>
    %c1_663 = arith.constant 1 : index
    %c6_664 = arith.constant 6 : index
    %c0_665 = arith.constant 0 : index
    %c0_666 = arith.constant 0 : index
    %511 = vector.load %arg12[%c1_663, %c6_664, %c0_665, %c0_666] : memref<2x10x10x64xf32, #tpu.memory_space<vmem>>, vector<1x1x8x64xf32>
    %512 = vector.shape_cast %511 : vector<1x1x8x64xf32> to vector<8x64xf32>
    %c1_667 = arith.constant 1 : index
    %c6_668 = arith.constant 6 : index
    %c1_669 = arith.constant 1 : index
    %c0_670 = arith.constant 0 : index
    %513 = vector.load %arg12[%c1_667, %c6_668, %c1_669, %c0_670] : memref<2x10x10x64xf32, #tpu.memory_space<vmem>>, vector<1x1x8x64xf32>
    %514 = vector.shape_cast %513 : vector<1x1x8x64xf32> to vector<8x64xf32>
    %c1_671 = arith.constant 1 : index
    %c6_672 = arith.constant 6 : index
    %c2_673 = arith.constant 2 : index
    %c0_674 = arith.constant 0 : index
    %515 = vector.load %arg12[%c1_671, %c6_672, %c2_673, %c0_674] : memref<2x10x10x64xf32, #tpu.memory_space<vmem>>, vector<1x1x8x64xf32>
    %516 = vector.shape_cast %515 : vector<1x1x8x64xf32> to vector<8x64xf32>
    %c1_675 = arith.constant 1 : index
    %c7_676 = arith.constant 7 : index
    %c0_677 = arith.constant 0 : index
    %c0_678 = arith.constant 0 : index
    %517 = vector.load %arg12[%c1_675, %c7_676, %c0_677, %c0_678] : memref<2x10x10x64xf32, #tpu.memory_space<vmem>>, vector<1x1x8x64xf32>
    %518 = vector.shape_cast %517 : vector<1x1x8x64xf32> to vector<8x64xf32>
    %c1_679 = arith.constant 1 : index
    %c7_680 = arith.constant 7 : index
    %c1_681 = arith.constant 1 : index
    %c0_682 = arith.constant 0 : index
    %519 = vector.load %arg12[%c1_679, %c7_680, %c1_681, %c0_682] : memref<2x10x10x64xf32, #tpu.memory_space<vmem>>, vector<1x1x8x64xf32>
    %520 = vector.shape_cast %519 : vector<1x1x8x64xf32> to vector<8x64xf32>
    %c1_683 = arith.constant 1 : index
    %c7_684 = arith.constant 7 : index
    %c2_685 = arith.constant 2 : index
    %c0_686 = arith.constant 0 : index
    %521 = vector.load %arg12[%c1_683, %c7_684, %c2_685, %c0_686] : memref<2x10x10x64xf32, #tpu.memory_space<vmem>>, vector<1x1x8x64xf32>
    %522 = vector.shape_cast %521 : vector<1x1x8x64xf32> to vector<8x64xf32>
    %523 = tpu.concatenate %506, %508, %510, %512, %514, %516, %518, %520, %522 in 1 : vector<8x64xf32>, vector<8x64xf32>, vector<8x64xf32>, vector<8x64xf32>, vector<8x64xf32>, vector<8x64xf32>, vector<8x64xf32>, vector<8x64xf32>, vector<8x64xf32> -> vector<8x576xf32>
    %c104 = arith.constant 104 : index
    %c0_687 = arith.constant 0 : index
    %524 = vector.load %arg13[%c104, %c0_687] : memref<128x576xf32, #tpu.memory_space<vmem>>, vector<8x576xf32>
    tpu.vector_store %arg13[%c104, %c0_687], %523 {strides = array<i32>} : memref<128x576xf32, #tpu.memory_space<vmem>>, vector<8x576xf32>,
    %c1_688 = arith.constant 1 : index
    %c6_689 = arith.constant 6 : index
    %c0_690 = arith.constant 0 : index
    %c0_691 = arith.constant 0 : index
    %525 = vector.load %arg12[%c1_688, %c6_689, %c0_690, %c0_691] : memref<2x10x10x64xf32, #tpu.memory_space<vmem>>, vector<1x1x8x64xf32>
    %526 = vector.shape_cast %525 : vector<1x1x8x64xf32> to vector<8x64xf32>
    %c1_692 = arith.constant 1 : index
    %c6_693 = arith.constant 6 : index
    %c1_694 = arith.constant 1 : index
    %c0_695 = arith.constant 0 : index
    %527 = vector.load %arg12[%c1_692, %c6_693, %c1_694, %c0_695] : memref<2x10x10x64xf32, #tpu.memory_space<vmem>>, vector<1x1x8x64xf32>
    %528 = vector.shape_cast %527 : vector<1x1x8x64xf32> to vector<8x64xf32>
    %c1_696 = arith.constant 1 : index
    %c6_697 = arith.constant 6 : index
    %c2_698 = arith.constant 2 : index
    %c0_699 = arith.constant 0 : index
    %529 = vector.load %arg12[%c1_696, %c6_697, %c2_698, %c0_699] : memref<2x10x10x64xf32, #tpu.memory_space<vmem>>, vector<1x1x8x64xf32>
    %530 = vector.shape_cast %529 : vector<1x1x8x64xf32> to vector<8x64xf32>
    %c1_700 = arith.constant 1 : index
    %c7_701 = arith.constant 7 : index
    %c0_702 = arith.constant 0 : index
    %c0_703 = arith.constant 0 : index
    %531 = vector.load %arg12[%c1_700, %c7_701, %c0_702, %c0_703] : memref<2x10x10x64xf32, #tpu.memory_space<vmem>>, vector<1x1x8x64xf32>
    %532 = vector.shape_cast %531 : vector<1x1x8x64xf32> to vector<8x64xf32>
    %c1_704 = arith.constant 1 : index
    %c7_705 = arith.constant 7 : index
    %c1_706 = arith.constant 1 : index
    %c0_707 = arith.constant 0 : index
    %533 = vector.load %arg12[%c1_704, %c7_705, %c1_706, %c0_707] : memref<2x10x10x64xf32, #tpu.memory_space<vmem>>, vector<1x1x8x64xf32>
    %534 = vector.shape_cast %533 : vector<1x1x8x64xf32> to vector<8x64xf32>
    %c1_708 = arith.constant 1 : index
    %c7_709 = arith.constant 7 : index
    %c2_710 = arith.constant 2 : index
    %c0_711 = arith.constant 0 : index
    %535 = vector.load %arg12[%c1_708, %c7_709, %c2_710, %c0_711] : memref<2x10x10x64xf32, #tpu.memory_space<vmem>>, vector<1x1x8x64xf32>
    %536 = vector.shape_cast %535 : vector<1x1x8x64xf32> to vector<8x64xf32>
    %c1_712 = arith.constant 1 : index
    %c8_713 = arith.constant 8 : index
    %c0_714 = arith.constant 0 : index
    %c0_715 = arith.constant 0 : index
    %537 = vector.load %arg12[%c1_712, %c8_713, %c0_714, %c0_715] : memref<2x10x10x64xf32, #tpu.memory_space<vmem>>, vector<1x1x8x64xf32>
    %538 = vector.shape_cast %537 : vector<1x1x8x64xf32> to vector<8x64xf32>
    %c1_716 = arith.constant 1 : index
    %c8_717 = arith.constant 8 : index
    %c1_718 = arith.constant 1 : index
    %c0_719 = arith.constant 0 : index
    %539 = vector.load %arg12[%c1_716, %c8_717, %c1_718, %c0_719] : memref<2x10x10x64xf32, #tpu.memory_space<vmem>>, vector<1x1x8x64xf32>
    %540 = vector.shape_cast %539 : vector<1x1x8x64xf32> to vector<8x64xf32>
    %c1_720 = arith.constant 1 : index
    %c8_721 = arith.constant 8 : index
    %c2_722 = arith.constant 2 : index
    %c0_723 = arith.constant 0 : index
    %541 = vector.load %arg12[%c1_720, %c8_721, %c2_722, %c0_723] : memref<2x10x10x64xf32, #tpu.memory_space<vmem>>, vector<1x1x8x64xf32>
    %542 = vector.shape_cast %541 : vector<1x1x8x64xf32> to vector<8x64xf32>
    %543 = tpu.concatenate %526, %528, %530, %532, %534, %536, %538, %540, %542 in 1 : vector<8x64xf32>, vector<8x64xf32>, vector<8x64xf32>, vector<8x64xf32>, vector<8x64xf32>, vector<8x64xf32>, vector<8x64xf32>, vector<8x64xf32>, vector<8x64xf32> -> vector<8x576xf32>
    %c112_724 = arith.constant 112 : index
    %c0_725 = arith.constant 0 : index
    %544 = vector.load %arg13[%c112_724, %c0_725] : memref<128x576xf32, #tpu.memory_space<vmem>>, vector<8x576xf32>
    tpu.vector_store %arg13[%c112_724, %c0_725], %543 {strides = array<i32>} : memref<128x576xf32, #tpu.memory_space<vmem>>, vector<8x576xf32>,
    %c1_726 = arith.constant 1 : index
    %c7_727 = arith.constant 7 : index
    %c0_728 = arith.constant 0 : index
    %c0_729 = arith.constant 0 : index
    %545 = vector.load %arg12[%c1_726, %c7_727, %c0_728, %c0_729] : memref<2x10x10x64xf32, #tpu.memory_space<vmem>>, vector<1x1x8x64xf32>
    %546 = vector.shape_cast %545 : vector<1x1x8x64xf32> to vector<8x64xf32>
    %c1_730 = arith.constant 1 : index
    %c7_731 = arith.constant 7 : index
    %c1_732 = arith.constant 1 : index
    %c0_733 = arith.constant 0 : index
    %547 = vector.load %arg12[%c1_730, %c7_731, %c1_732, %c0_733] : memref<2x10x10x64xf32, #tpu.memory_space<vmem>>, vector<1x1x8x64xf32>
    %548 = vector.shape_cast %547 : vector<1x1x8x64xf32> to vector<8x64xf32>
    %c1_734 = arith.constant 1 : index
    %c7_735 = arith.constant 7 : index
    %c2_736 = arith.constant 2 : index
    %c0_737 = arith.constant 0 : index
    %549 = vector.load %arg12[%c1_734, %c7_735, %c2_736, %c0_737] : memref<2x10x10x64xf32, #tpu.memory_space<vmem>>, vector<1x1x8x64xf32>
    %550 = vector.shape_cast %549 : vector<1x1x8x64xf32> to vector<8x64xf32>
    %c1_738 = arith.constant 1 : index
    %c8_739 = arith.constant 8 : index
    %c0_740 = arith.constant 0 : index
    %c0_741 = arith.constant 0 : index
    %551 = vector.load %arg12[%c1_738, %c8_739, %c0_740, %c0_741] : memref<2x10x10x64xf32, #tpu.memory_space<vmem>>, vector<1x1x8x64xf32>
    %552 = vector.shape_cast %551 : vector<1x1x8x64xf32> to vector<8x64xf32>
    %c1_742 = arith.constant 1 : index
    %c8_743 = arith.constant 8 : index
    %c1_744 = arith.constant 1 : index
    %c0_745 = arith.constant 0 : index
    %553 = vector.load %arg12[%c1_742, %c8_743, %c1_744, %c0_745] : memref<2x10x10x64xf32, #tpu.memory_space<vmem>>, vector<1x1x8x64xf32>
    %554 = vector.shape_cast %553 : vector<1x1x8x64xf32> to vector<8x64xf32>
    %c1_746 = arith.constant 1 : index
    %c8_747 = arith.constant 8 : index
    %c2_748 = arith.constant 2 : index
    %c0_749 = arith.constant 0 : index
    %555 = vector.load %arg12[%c1_746, %c8_747, %c2_748, %c0_749] : memref<2x10x10x64xf32, #tpu.memory_space<vmem>>, vector<1x1x8x64xf32>
    %556 = vector.shape_cast %555 : vector<1x1x8x64xf32> to vector<8x64xf32>
    %c1_750 = arith.constant 1 : index
    %c9_751 = arith.constant 9 : index
    %c0_752 = arith.constant 0 : index
    %c0_753 = arith.constant 0 : index
    %557 = vector.load %arg12[%c1_750, %c9_751, %c0_752, %c0_753] : memref<2x10x10x64xf32, #tpu.memory_space<vmem>>, vector<1x1x8x64xf32>
    %558 = vector.shape_cast %557 : vector<1x1x8x64xf32> to vector<8x64xf32>
    %c1_754 = arith.constant 1 : index
    %c9_755 = arith.constant 9 : index
    %c1_756 = arith.constant 1 : index
    %c0_757 = arith.constant 0 : index
    %559 = vector.load %arg12[%c1_754, %c9_755, %c1_756, %c0_757] : memref<2x10x10x64xf32, #tpu.memory_space<vmem>>, vector<1x1x8x64xf32>
    %560 = vector.shape_cast %559 : vector<1x1x8x64xf32> to vector<8x64xf32>
    %c1_758 = arith.constant 1 : index
    %c9_759 = arith.constant 9 : index
    %c2_760 = arith.constant 2 : index
    %c0_761 = arith.constant 0 : index
    %561 = vector.load %arg12[%c1_758, %c9_759, %c2_760, %c0_761] : memref<2x10x10x64xf32, #tpu.memory_space<vmem>>, vector<1x1x8x64xf32>
    %562 = vector.shape_cast %561 : vector<1x1x8x64xf32> to vector<8x64xf32>
    %563 = tpu.concatenate %546, %548, %550, %552, %554, %556, %558, %560, %562 in 1 : vector<8x64xf32>, vector<8x64xf32>, vector<8x64xf32>, vector<8x64xf32>, vector<8x64xf32>, vector<8x64xf32>, vector<8x64xf32>, vector<8x64xf32>, vector<8x64xf32> -> vector<8x576xf32>
    %c120 = arith.constant 120 : index
    %c0_762 = arith.constant 0 : index
    %564 = vector.load %arg13[%c120, %c0_762] : memref<128x576xf32, #tpu.memory_space<vmem>>, vector<8x576xf32>
    tpu.vector_store %arg13[%c120, %c0_762], %563 {strides = array<i32>} : memref<128x576xf32, #tpu.memory_space<vmem>>, vector<8x576xf32>,
    %c0_763 = arith.constant 0 : index
    %c0_764 = arith.constant 0 : index
    %565 = vector.load %arg13[%c0_763, %c0_764] : memref<128x576xf32, #tpu.memory_space<vmem>>, vector<128x576xf32>
    %c0_765 = arith.constant 0 : index
    %c0_766 = arith.constant 0 : index
    %566 = vector.load %arg4[%c0_765, %c0_766] : memref<576x64xf32, #tpu.memory_space<vmem>>, vector<576x64xf32>
    %cst_767 = arith.constant dense<0.000000e+00> : vector<128x64xf32>
    %567 = tpu.matmul %565, %566, %cst_767 {dimension_numbers = #tpu.dot_dimension_numbers<[1], [0], [0], [1], [0, 0, 1, 1], [], []>} : vector<128x576xf32>, vector<576x64xf32>, vector<128x64xf32> -> vector<128x64xf32>
    %c0_768 = arith.constant 0 : index
    %c0_769 = arith.constant 0 : index
    %568 = vector.load %arg14[%c0_768, %c0_769] : memref<128x64xf32, #tpu.memory_space<vmem>>, vector<128x64xf32>
    tpu.vector_store %arg14[%c0_768, %c0_769], %567 {strides = array<i32>} : memref<128x64xf32, #tpu.memory_space<vmem>>, vector<128x64xf32>,
    %c0_770 = arith.constant 0 : index
    %c0_771 = arith.constant 0 : index
    %569 = vector.load %arg5[%c0_770, %c0_771] : memref<1x64xf32, #tpu.memory_space<vmem>>, vector<1x64xf32>
    %570 = vector.shape_cast %569 : vector<1x64xf32> to vector<1x64xf32>
    %571 = vector.broadcast %570 : vector<1x64xf32> to vector<4x64xf32>
    %cst_772 = arith.constant 0.000000e+00 : f32
    %572 = vector.broadcast %cst_772 : f32 to vector<1x64xf32>
    %cst_773 = arith.constant 0.000000e+00 : f32
    %573 = vector.broadcast %cst_773 : f32 to vector<6x64xf32>
    %c0_774 = arith.constant 0 : index
    %c0_775 = arith.constant 0 : index
    %c0_776 = arith.constant 0 : index
    %c0_777 = arith.constant 0 : index
    %574 = vector.load %arg15[%c0_774, %c0_775, %c0_776, %c0_777] : memref<2x6x6x64xf32, #tpu.memory_space<vmem>>, vector<1x1x6x64xf32>
    %575 = vector.shape_cast %574 : vector<1x1x6x64xf32> to vector<6x64xf32>
    %576 = vector.shape_cast %573 : vector<6x64xf32> to vector<1x1x6x64xf32>
    tpu.vector_store %arg15[%c0_774, %c0_775, %c0_776, %c0_777], %576 {strides = array<i32>} : memref<2x6x6x64xf32, #tpu.memory_space<vmem>>, vector<1x1x6x64xf32>,
    %c0_778 = arith.constant 0 : index
    %c5_779 = arith.constant 5 : index
    %c0_780 = arith.constant 0 : index
    %c0_781 = arith.constant 0 : index
    %577 = vector.load %arg15[%c0_778, %c5_779, %c0_780, %c0_781] : memref<2x6x6x64xf32, #tpu.memory_space<vmem>>, vector<1x1x6x64xf32>
    %578 = vector.shape_cast %577 : vector<1x1x6x64xf32> to vector<6x64xf32>
    %579 = vector.shape_cast %573 : vector<6x64xf32> to vector<1x1x6x64xf32>
    tpu.vector_store %arg15[%c0_778, %c5_779, %c0_780, %c0_781], %579 {strides = array<i32>} : memref<2x6x6x64xf32, #tpu.memory_space<vmem>>, vector<1x1x6x64xf32>,
    %c0_782 = arith.constant 0 : index
    %c0_783 = arith.constant 0 : index
    %580 = tpu.strided_load %arg14[%c0_782, %c0_783] {strides = array<i32: 2, 1>} : memref<128x64xf32, #tpu.memory_space<vmem>>, vector<4x64xf32>
    %c1_784 = arith.constant 1 : index
    %c0_785 = arith.constant 0 : index
    %581 = tpu.strided_load %arg14[%c1_784, %c0_785] {strides = array<i32: 2, 1>} : memref<128x64xf32, #tpu.memory_space<vmem>>, vector<4x64xf32>
    %c8_786 = arith.constant 8 : index
    %c0_787 = arith.constant 0 : index
    %582 = tpu.strided_load %arg14[%c8_786, %c0_787] {strides = array<i32: 2, 1>} : memref<128x64xf32, #tpu.memory_space<vmem>>, vector<4x64xf32>
    %c9_788 = arith.constant 9 : index
    %c0_789 = arith.constant 0 : index
    %583 = tpu.strided_load %arg14[%c9_788, %c0_789] {strides = array<i32: 2, 1>} : memref<128x64xf32, #tpu.memory_space<vmem>>, vector<4x64xf32>
    %584 = arith.maximumf %580, %581 : vector<4x64xf32>
    %585 = arith.maximumf %582, %583 : vector<4x64xf32>
    %586 = arith.maximumf %584, %585 : vector<4x64xf32>
    %587 = arith.addf %586, %571 : vector<4x64xf32>
    %cst_790 = arith.constant 0.000000e+00 : f32
    %588 = vector.broadcast %cst_790 : f32 to vector<4x64xf32>
    %589 = arith.maximumf %587, %588 : vector<4x64xf32>
    %590 = tpu.concatenate %572, %589, %572 in 0 : vector<1x64xf32>, vector<4x64xf32>, vector<1x64xf32> -> vector<6x64xf32>
    %c0_791 = arith.constant 0 : index
    %c1_792 = arith.constant 1 : index
    %c0_793 = arith.constant 0 : index
    %c0_794 = arith.constant 0 : index
    %591 = vector.load %arg15[%c0_791, %c1_792, %c0_793, %c0_794] : memref<2x6x6x64xf32, #tpu.memory_space<vmem>>, vector<1x1x6x64xf32>
    %592 = vector.shape_cast %591 : vector<1x1x6x64xf32> to vector<6x64xf32>
    %593 = vector.shape_cast %590 : vector<6x64xf32> to vector<1x1x6x64xf32>
    tpu.vector_store %arg15[%c0_791, %c1_792, %c0_793, %c0_794], %593 {strides = array<i32>} : memref<2x6x6x64xf32, #tpu.memory_space<vmem>>, vector<1x1x6x64xf32>,
    %c16_795 = arith.constant 16 : index
    %c0_796 = arith.constant 0 : index
    %594 = tpu.strided_load %arg14[%c16_795, %c0_796] {strides = array<i32: 2, 1>} : memref<128x64xf32, #tpu.memory_space<vmem>>, vector<4x64xf32>
    %c17_797 = arith.constant 17 : index
    %c0_798 = arith.constant 0 : index
    %595 = tpu.strided_load %arg14[%c17_797, %c0_798] {strides = array<i32: 2, 1>} : memref<128x64xf32, #tpu.memory_space<vmem>>, vector<4x64xf32>
    %c24_799 = arith.constant 24 : index
    %c0_800 = arith.constant 0 : index
    %596 = tpu.strided_load %arg14[%c24_799, %c0_800] {strides = array<i32: 2, 1>} : memref<128x64xf32, #tpu.memory_space<vmem>>, vector<4x64xf32>
    %c25 = arith.constant 25 : index
    %c0_801 = arith.constant 0 : index
    %597 = tpu.strided_load %arg14[%c25, %c0_801] {strides = array<i32: 2, 1>} : memref<128x64xf32, #tpu.memory_space<vmem>>, vector<4x64xf32>
    %598 = arith.maximumf %594, %595 : vector<4x64xf32>
    %599 = arith.maximumf %596, %597 : vector<4x64xf32>
    %600 = arith.maximumf %598, %599 : vector<4x64xf32>
    %601 = arith.addf %600, %571 : vector<4x64xf32>
    %cst_802 = arith.constant 0.000000e+00 : f32
    %602 = vector.broadcast %cst_802 : f32 to vector<4x64xf32>
    %603 = arith.maximumf %601, %602 : vector<4x64xf32>
    %604 = tpu.concatenate %572, %603, %572 in 0 : vector<1x64xf32>, vector<4x64xf32>, vector<1x64xf32> -> vector<6x64xf32>
    %c0_803 = arith.constant 0 : index
    %c2_804 = arith.constant 2 : index
    %c0_805 = arith.constant 0 : index
    %c0_806 = arith.constant 0 : index
    %605 = vector.load %arg15[%c0_803, %c2_804, %c0_805, %c0_806] : memref<2x6x6x64xf32, #tpu.memory_space<vmem>>, vector<1x1x6x64xf32>
    %606 = vector.shape_cast %605 : vector<1x1x6x64xf32> to vector<6x64xf32>
    %607 = vector.shape_cast %604 : vector<6x64xf32> to vector<1x1x6x64xf32>
    tpu.vector_store %arg15[%c0_803, %c2_804, %c0_805, %c0_806], %607 {strides = array<i32>} : memref<2x6x6x64xf32, #tpu.memory_space<vmem>>, vector<1x1x6x64xf32>,
    %c32_807 = arith.constant 32 : index
    %c0_808 = arith.constant 0 : index
    %608 = tpu.strided_load %arg14[%c32_807, %c0_808] {strides = array<i32: 2, 1>} : memref<128x64xf32, #tpu.memory_space<vmem>>, vector<4x64xf32>
    %c33_809 = arith.constant 33 : index
    %c0_810 = arith.constant 0 : index
    %609 = tpu.strided_load %arg14[%c33_809, %c0_810] {strides = array<i32: 2, 1>} : memref<128x64xf32, #tpu.memory_space<vmem>>, vector<4x64xf32>
    %c40_811 = arith.constant 40 : index
    %c0_812 = arith.constant 0 : index
    %610 = tpu.strided_load %arg14[%c40_811, %c0_812] {strides = array<i32: 2, 1>} : memref<128x64xf32, #tpu.memory_space<vmem>>, vector<4x64xf32>
    %c41 = arith.constant 41 : index
    %c0_813 = arith.constant 0 : index
    %611 = tpu.strided_load %arg14[%c41, %c0_813] {strides = array<i32: 2, 1>} : memref<128x64xf32, #tpu.memory_space<vmem>>, vector<4x64xf32>
    %612 = arith.maximumf %608, %609 : vector<4x64xf32>
    %613 = arith.maximumf %610, %611 : vector<4x64xf32>
    %614 = arith.maximumf %612, %613 : vector<4x64xf32>
    %615 = arith.addf %614, %571 : vector<4x64xf32>
    %cst_814 = arith.constant 0.000000e+00 : f32
    %616 = vector.broadcast %cst_814 : f32 to vector<4x64xf32>
    %617 = arith.maximumf %615, %616 : vector<4x64xf32>
    %618 = tpu.concatenate %572, %617, %572 in 0 : vector<1x64xf32>, vector<4x64xf32>, vector<1x64xf32> -> vector<6x64xf32>
    %c0_815 = arith.constant 0 : index
    %c3_816 = arith.constant 3 : index
    %c0_817 = arith.constant 0 : index
    %c0_818 = arith.constant 0 : index
    %619 = vector.load %arg15[%c0_815, %c3_816, %c0_817, %c0_818] : memref<2x6x6x64xf32, #tpu.memory_space<vmem>>, vector<1x1x6x64xf32>
    %620 = vector.shape_cast %619 : vector<1x1x6x64xf32> to vector<6x64xf32>
    %621 = vector.shape_cast %618 : vector<6x64xf32> to vector<1x1x6x64xf32>
    tpu.vector_store %arg15[%c0_815, %c3_816, %c0_817, %c0_818], %621 {strides = array<i32>} : memref<2x6x6x64xf32, #tpu.memory_space<vmem>>, vector<1x1x6x64xf32>,
    %c48_819 = arith.constant 48 : index
    %c0_820 = arith.constant 0 : index
    %622 = tpu.strided_load %arg14[%c48_819, %c0_820] {strides = array<i32: 2, 1>} : memref<128x64xf32, #tpu.memory_space<vmem>>, vector<4x64xf32>
    %c49_821 = arith.constant 49 : index
    %c0_822 = arith.constant 0 : index
    %623 = tpu.strided_load %arg14[%c49_821, %c0_822] {strides = array<i32: 2, 1>} : memref<128x64xf32, #tpu.memory_space<vmem>>, vector<4x64xf32>
    %c56_823 = arith.constant 56 : index
    %c0_824 = arith.constant 0 : index
    %624 = tpu.strided_load %arg14[%c56_823, %c0_824] {strides = array<i32: 2, 1>} : memref<128x64xf32, #tpu.memory_space<vmem>>, vector<4x64xf32>
    %c57 = arith.constant 57 : index
    %c0_825 = arith.constant 0 : index
    %625 = tpu.strided_load %arg14[%c57, %c0_825] {strides = array<i32: 2, 1>} : memref<128x64xf32, #tpu.memory_space<vmem>>, vector<4x64xf32>
    %626 = arith.maximumf %622, %623 : vector<4x64xf32>
    %627 = arith.maximumf %624, %625 : vector<4x64xf32>
    %628 = arith.maximumf %626, %627 : vector<4x64xf32>
    %629 = arith.addf %628, %571 : vector<4x64xf32>
    %cst_826 = arith.constant 0.000000e+00 : f32
    %630 = vector.broadcast %cst_826 : f32 to vector<4x64xf32>
    %631 = arith.maximumf %629, %630 : vector<4x64xf32>
    %632 = tpu.concatenate %572, %631, %572 in 0 : vector<1x64xf32>, vector<4x64xf32>, vector<1x64xf32> -> vector<6x64xf32>
    %c0_827 = arith.constant 0 : index
    %c4_828 = arith.constant 4 : index
    %c0_829 = arith.constant 0 : index
    %c0_830 = arith.constant 0 : index
    %633 = vector.load %arg15[%c0_827, %c4_828, %c0_829, %c0_830] : memref<2x6x6x64xf32, #tpu.memory_space<vmem>>, vector<1x1x6x64xf32>
    %634 = vector.shape_cast %633 : vector<1x1x6x64xf32> to vector<6x64xf32>
    %635 = vector.shape_cast %632 : vector<6x64xf32> to vector<1x1x6x64xf32>
    tpu.vector_store %arg15[%c0_827, %c4_828, %c0_829, %c0_830], %635 {strides = array<i32>} : memref<2x6x6x64xf32, #tpu.memory_space<vmem>>, vector<1x1x6x64xf32>,
    %c1_831 = arith.constant 1 : index
    %c0_832 = arith.constant 0 : index
    %c0_833 = arith.constant 0 : index
    %c0_834 = arith.constant 0 : index
    %636 = vector.load %arg15[%c1_831, %c0_832, %c0_833, %c0_834] : memref<2x6x6x64xf32, #tpu.memory_space<vmem>>, vector<1x1x6x64xf32>
    %637 = vector.shape_cast %636 : vector<1x1x6x64xf32> to vector<6x64xf32>
    %638 = vector.shape_cast %573 : vector<6x64xf32> to vector<1x1x6x64xf32>
    tpu.vector_store %arg15[%c1_831, %c0_832, %c0_833, %c0_834], %638 {strides = array<i32>} : memref<2x6x6x64xf32, #tpu.memory_space<vmem>>, vector<1x1x6x64xf32>,
    %c1_835 = arith.constant 1 : index
    %c5_836 = arith.constant 5 : index
    %c0_837 = arith.constant 0 : index
    %c0_838 = arith.constant 0 : index
    %639 = vector.load %arg15[%c1_835, %c5_836, %c0_837, %c0_838] : memref<2x6x6x64xf32, #tpu.memory_space<vmem>>, vector<1x1x6x64xf32>
    %640 = vector.shape_cast %639 : vector<1x1x6x64xf32> to vector<6x64xf32>
    %641 = vector.shape_cast %573 : vector<6x64xf32> to vector<1x1x6x64xf32>
    tpu.vector_store %arg15[%c1_835, %c5_836, %c0_837, %c0_838], %641 {strides = array<i32>} : memref<2x6x6x64xf32, #tpu.memory_space<vmem>>, vector<1x1x6x64xf32>,
    %c64_839 = arith.constant 64 : index
    %c0_840 = arith.constant 0 : index
    %642 = tpu.strided_load %arg14[%c64_839, %c0_840] {strides = array<i32: 2, 1>} : memref<128x64xf32, #tpu.memory_space<vmem>>, vector<4x64xf32>
    %c65_841 = arith.constant 65 : index
    %c0_842 = arith.constant 0 : index
    %643 = tpu.strided_load %arg14[%c65_841, %c0_842] {strides = array<i32: 2, 1>} : memref<128x64xf32, #tpu.memory_space<vmem>>, vector<4x64xf32>
    %c72_843 = arith.constant 72 : index
    %c0_844 = arith.constant 0 : index
    %644 = tpu.strided_load %arg14[%c72_843, %c0_844] {strides = array<i32: 2, 1>} : memref<128x64xf32, #tpu.memory_space<vmem>>, vector<4x64xf32>
    %c73 = arith.constant 73 : index
    %c0_845 = arith.constant 0 : index
    %645 = tpu.strided_load %arg14[%c73, %c0_845] {strides = array<i32: 2, 1>} : memref<128x64xf32, #tpu.memory_space<vmem>>, vector<4x64xf32>
    %646 = arith.maximumf %642, %643 : vector<4x64xf32>
    %647 = arith.maximumf %644, %645 : vector<4x64xf32>
    %648 = arith.maximumf %646, %647 : vector<4x64xf32>
    %649 = arith.addf %648, %571 : vector<4x64xf32>
    %cst_846 = arith.constant 0.000000e+00 : f32
    %650 = vector.broadcast %cst_846 : f32 to vector<4x64xf32>
    %651 = arith.maximumf %649, %650 : vector<4x64xf32>
    %652 = tpu.concatenate %572, %651, %572 in 0 : vector<1x64xf32>, vector<4x64xf32>, vector<1x64xf32> -> vector<6x64xf32>
    %c1_847 = arith.constant 1 : index
    %c1_848 = arith.constant 1 : index
    %c0_849 = arith.constant 0 : index
    %c0_850 = arith.constant 0 : index
    %653 = vector.load %arg15[%c1_847, %c1_848, %c0_849, %c0_850] : memref<2x6x6x64xf32, #tpu.memory_space<vmem>>, vector<1x1x6x64xf32>
    %654 = vector.shape_cast %653 : vector<1x1x6x64xf32> to vector<6x64xf32>
    %655 = vector.shape_cast %652 : vector<6x64xf32> to vector<1x1x6x64xf32>
    tpu.vector_store %arg15[%c1_847, %c1_848, %c0_849, %c0_850], %655 {strides = array<i32>} : memref<2x6x6x64xf32, #tpu.memory_space<vmem>>, vector<1x1x6x64xf32>,
    %c80_851 = arith.constant 80 : index
    %c0_852 = arith.constant 0 : index
    %656 = tpu.strided_load %arg14[%c80_851, %c0_852] {strides = array<i32: 2, 1>} : memref<128x64xf32, #tpu.memory_space<vmem>>, vector<4x64xf32>
    %c81_853 = arith.constant 81 : index
    %c0_854 = arith.constant 0 : index
    %657 = tpu.strided_load %arg14[%c81_853, %c0_854] {strides = array<i32: 2, 1>} : memref<128x64xf32, #tpu.memory_space<vmem>>, vector<4x64xf32>
    %c88_855 = arith.constant 88 : index
    %c0_856 = arith.constant 0 : index
    %658 = tpu.strided_load %arg14[%c88_855, %c0_856] {strides = array<i32: 2, 1>} : memref<128x64xf32, #tpu.memory_space<vmem>>, vector<4x64xf32>
    %c89 = arith.constant 89 : index
    %c0_857 = arith.constant 0 : index
    %659 = tpu.strided_load %arg14[%c89, %c0_857] {strides = array<i32: 2, 1>} : memref<128x64xf32, #tpu.memory_space<vmem>>, vector<4x64xf32>
    %660 = arith.maximumf %656, %657 : vector<4x64xf32>
    %661 = arith.maximumf %658, %659 : vector<4x64xf32>
    %662 = arith.maximumf %660, %661 : vector<4x64xf32>
    %663 = arith.addf %662, %571 : vector<4x64xf32>
    %cst_858 = arith.constant 0.000000e+00 : f32
    %664 = vector.broadcast %cst_858 : f32 to vector<4x64xf32>
    %665 = arith.maximumf %663, %664 : vector<4x64xf32>
    %666 = tpu.concatenate %572, %665, %572 in 0 : vector<1x64xf32>, vector<4x64xf32>, vector<1x64xf32> -> vector<6x64xf32>
    %c1_859 = arith.constant 1 : index
    %c2_860 = arith.constant 2 : index
    %c0_861 = arith.constant 0 : index
    %c0_862 = arith.constant 0 : index
    %667 = vector.load %arg15[%c1_859, %c2_860, %c0_861, %c0_862] : memref<2x6x6x64xf32, #tpu.memory_space<vmem>>, vector<1x1x6x64xf32>
    %668 = vector.shape_cast %667 : vector<1x1x6x64xf32> to vector<6x64xf32>
    %669 = vector.shape_cast %666 : vector<6x64xf32> to vector<1x1x6x64xf32>
    tpu.vector_store %arg15[%c1_859, %c2_860, %c0_861, %c0_862], %669 {strides = array<i32>} : memref<2x6x6x64xf32, #tpu.memory_space<vmem>>, vector<1x1x6x64xf32>,
    %c96_863 = arith.constant 96 : index
    %c0_864 = arith.constant 0 : index
    %670 = tpu.strided_load %arg14[%c96_863, %c0_864] {strides = array<i32: 2, 1>} : memref<128x64xf32, #tpu.memory_space<vmem>>, vector<4x64xf32>
    %c97_865 = arith.constant 97 : index
    %c0_866 = arith.constant 0 : index
    %671 = tpu.strided_load %arg14[%c97_865, %c0_866] {strides = array<i32: 2, 1>} : memref<128x64xf32, #tpu.memory_space<vmem>>, vector<4x64xf32>
    %c104_867 = arith.constant 104 : index
    %c0_868 = arith.constant 0 : index
    %672 = tpu.strided_load %arg14[%c104_867, %c0_868] {strides = array<i32: 2, 1>} : memref<128x64xf32, #tpu.memory_space<vmem>>, vector<4x64xf32>
    %c105 = arith.constant 105 : index
    %c0_869 = arith.constant 0 : index
    %673 = tpu.strided_load %arg14[%c105, %c0_869] {strides = array<i32: 2, 1>} : memref<128x64xf32, #tpu.memory_space<vmem>>, vector<4x64xf32>
    %674 = arith.maximumf %670, %671 : vector<4x64xf32>
    %675 = arith.maximumf %672, %673 : vector<4x64xf32>
    %676 = arith.maximumf %674, %675 : vector<4x64xf32>
    %677 = arith.addf %676, %571 : vector<4x64xf32>
    %cst_870 = arith.constant 0.000000e+00 : f32
    %678 = vector.broadcast %cst_870 : f32 to vector<4x64xf32>
    %679 = arith.maximumf %677, %678 : vector<4x64xf32>
    %680 = tpu.concatenate %572, %679, %572 in 0 : vector<1x64xf32>, vector<4x64xf32>, vector<1x64xf32> -> vector<6x64xf32>
    %c1_871 = arith.constant 1 : index
    %c3_872 = arith.constant 3 : index
    %c0_873 = arith.constant 0 : index
    %c0_874 = arith.constant 0 : index
    %681 = vector.load %arg15[%c1_871, %c3_872, %c0_873, %c0_874] : memref<2x6x6x64xf32, #tpu.memory_space<vmem>>, vector<1x1x6x64xf32>
    %682 = vector.shape_cast %681 : vector<1x1x6x64xf32> to vector<6x64xf32>
    %683 = vector.shape_cast %680 : vector<6x64xf32> to vector<1x1x6x64xf32>
    tpu.vector_store %arg15[%c1_871, %c3_872, %c0_873, %c0_874], %683 {strides = array<i32>} : memref<2x6x6x64xf32, #tpu.memory_space<vmem>>, vector<1x1x6x64xf32>,
    %c112_875 = arith.constant 112 : index
    %c0_876 = arith.constant 0 : index
    %684 = tpu.strided_load %arg14[%c112_875, %c0_876] {strides = array<i32: 2, 1>} : memref<128x64xf32, #tpu.memory_space<vmem>>, vector<4x64xf32>
    %c113_877 = arith.constant 113 : index
    %c0_878 = arith.constant 0 : index
    %685 = tpu.strided_load %arg14[%c113_877, %c0_878] {strides = array<i32: 2, 1>} : memref<128x64xf32, #tpu.memory_space<vmem>>, vector<4x64xf32>
    %c120_879 = arith.constant 120 : index
    %c0_880 = arith.constant 0 : index
    %686 = tpu.strided_load %arg14[%c120_879, %c0_880] {strides = array<i32: 2, 1>} : memref<128x64xf32, #tpu.memory_space<vmem>>, vector<4x64xf32>
    %c121 = arith.constant 121 : index
    %c0_881 = arith.constant 0 : index
    %687 = tpu.strided_load %arg14[%c121, %c0_881] {strides = array<i32: 2, 1>} : memref<128x64xf32, #tpu.memory_space<vmem>>, vector<4x64xf32>
    %688 = arith.maximumf %684, %685 : vector<4x64xf32>
    %689 = arith.maximumf %686, %687 : vector<4x64xf32>
    %690 = arith.maximumf %688, %689 : vector<4x64xf32>
    %691 = arith.addf %690, %571 : vector<4x64xf32>
    %cst_882 = arith.constant 0.000000e+00 : f32
    %692 = vector.broadcast %cst_882 : f32 to vector<4x64xf32>
    %693 = arith.maximumf %691, %692 : vector<4x64xf32>
    %694 = tpu.concatenate %572, %693, %572 in 0 : vector<1x64xf32>, vector<4x64xf32>, vector<1x64xf32> -> vector<6x64xf32>
    %c1_883 = arith.constant 1 : index
    %c4_884 = arith.constant 4 : index
    %c0_885 = arith.constant 0 : index
    %c0_886 = arith.constant 0 : index
    %695 = vector.load %arg15[%c1_883, %c4_884, %c0_885, %c0_886] : memref<2x6x6x64xf32, #tpu.memory_space<vmem>>, vector<1x1x6x64xf32>
    %696 = vector.shape_cast %695 : vector<1x1x6x64xf32> to vector<6x64xf32>
    %697 = vector.shape_cast %694 : vector<6x64xf32> to vector<1x1x6x64xf32>
    tpu.vector_store %arg15[%c1_883, %c4_884, %c0_885, %c0_886], %697 {strides = array<i32>} : memref<2x6x6x64xf32, #tpu.memory_space<vmem>>, vector<1x1x6x64xf32>,
    %c0_887 = arith.constant 0 : index
    %c0_888 = arith.constant 0 : index
    %c0_889 = arith.constant 0 : index
    %c0_890 = arith.constant 0 : index
    %698 = vector.load %arg15[%c0_887, %c0_888, %c0_889, %c0_890] : memref<2x6x6x64xf32, #tpu.memory_space<vmem>>, vector<1x1x4x64xf32>
    %699 = vector.shape_cast %698 : vector<1x1x4x64xf32> to vector<4x64xf32>
    %c0_891 = arith.constant 0 : index
    %c0_892 = arith.constant 0 : index
    %c1_893 = arith.constant 1 : index
    %c0_894 = arith.constant 0 : index
    %700 = vector.load %arg15[%c0_891, %c0_892, %c1_893, %c0_894] : memref<2x6x6x64xf32, #tpu.memory_space<vmem>>, vector<1x1x4x64xf32>
    %701 = vector.shape_cast %700 : vector<1x1x4x64xf32> to vector<4x64xf32>
    %c0_895 = arith.constant 0 : index
    %c0_896 = arith.constant 0 : index
    %c2_897 = arith.constant 2 : index
    %c0_898 = arith.constant 0 : index
    %702 = vector.load %arg15[%c0_895, %c0_896, %c2_897, %c0_898] : memref<2x6x6x64xf32, #tpu.memory_space<vmem>>, vector<1x1x4x64xf32>
    %703 = vector.shape_cast %702 : vector<1x1x4x64xf32> to vector<4x64xf32>
    %c0_899 = arith.constant 0 : index
    %c1_900 = arith.constant 1 : index
    %c0_901 = arith.constant 0 : index
    %c0_902 = arith.constant 0 : index
    %704 = vector.load %arg15[%c0_899, %c1_900, %c0_901, %c0_902] : memref<2x6x6x64xf32, #tpu.memory_space<vmem>>, vector<1x1x4x64xf32>
    %705 = vector.shape_cast %704 : vector<1x1x4x64xf32> to vector<4x64xf32>
    %c0_903 = arith.constant 0 : index
    %c1_904 = arith.constant 1 : index
    %c1_905 = arith.constant 1 : index
    %c0_906 = arith.constant 0 : index
    %706 = vector.load %arg15[%c0_903, %c1_904, %c1_905, %c0_906] : memref<2x6x6x64xf32, #tpu.memory_space<vmem>>, vector<1x1x4x64xf32>
    %707 = vector.shape_cast %706 : vector<1x1x4x64xf32> to vector<4x64xf32>
    %c0_907 = arith.constant 0 : index
    %c1_908 = arith.constant 1 : index
    %c2_909 = arith.constant 2 : index
    %c0_910 = arith.constant 0 : index
    %708 = vector.load %arg15[%c0_907, %c1_908, %c2_909, %c0_910] : memref<2x6x6x64xf32, #tpu.memory_space<vmem>>, vector<1x1x4x64xf32>
    %709 = vector.shape_cast %708 : vector<1x1x4x64xf32> to vector<4x64xf32>
    %c0_911 = arith.constant 0 : index
    %c2_912 = arith.constant 2 : index
    %c0_913 = arith.constant 0 : index
    %c0_914 = arith.constant 0 : index
    %710 = vector.load %arg15[%c0_911, %c2_912, %c0_913, %c0_914] : memref<2x6x6x64xf32, #tpu.memory_space<vmem>>, vector<1x1x4x64xf32>
    %711 = vector.shape_cast %710 : vector<1x1x4x64xf32> to vector<4x64xf32>
    %c0_915 = arith.constant 0 : index
    %c2_916 = arith.constant 2 : index
    %c1_917 = arith.constant 1 : index
    %c0_918 = arith.constant 0 : index
    %712 = vector.load %arg15[%c0_915, %c2_916, %c1_917, %c0_918] : memref<2x6x6x64xf32, #tpu.memory_space<vmem>>, vector<1x1x4x64xf32>
    %713 = vector.shape_cast %712 : vector<1x1x4x64xf32> to vector<4x64xf32>
    %c0_919 = arith.constant 0 : index
    %c2_920 = arith.constant 2 : index
    %c2_921 = arith.constant 2 : index
    %c0_922 = arith.constant 0 : index
    %714 = vector.load %arg15[%c0_919, %c2_920, %c2_921, %c0_922] : memref<2x6x6x64xf32, #tpu.memory_space<vmem>>, vector<1x1x4x64xf32>
    %715 = vector.shape_cast %714 : vector<1x1x4x64xf32> to vector<4x64xf32>
    %716 = tpu.concatenate %699, %701, %703, %705, %707, %709, %711, %713, %715 in 1 : vector<4x64xf32>, vector<4x64xf32>, vector<4x64xf32>, vector<4x64xf32>, vector<4x64xf32>, vector<4x64xf32>, vector<4x64xf32>, vector<4x64xf32>, vector<4x64xf32> -> vector<4x576xf32>
    %c0_923 = arith.constant 0 : index
    %c0_924 = arith.constant 0 : index
    %717 = vector.load %arg16[%c0_923, %c0_924] : memref<32x576xf32, #tpu.memory_space<vmem>>, vector<4x576xf32>
    tpu.vector_store %arg16[%c0_923, %c0_924], %716 {strides = array<i32>} : memref<32x576xf32, #tpu.memory_space<vmem>>, vector<4x576xf32>,
    %c0_925 = arith.constant 0 : index
    %c1_926 = arith.constant 1 : index
    %c0_927 = arith.constant 0 : index
    %c0_928 = arith.constant 0 : index
    %718 = vector.load %arg15[%c0_925, %c1_926, %c0_927, %c0_928] : memref<2x6x6x64xf32, #tpu.memory_space<vmem>>, vector<1x1x4x64xf32>
    %719 = vector.shape_cast %718 : vector<1x1x4x64xf32> to vector<4x64xf32>
    %c0_929 = arith.constant 0 : index
    %c1_930 = arith.constant 1 : index
    %c1_931 = arith.constant 1 : index
    %c0_932 = arith.constant 0 : index
    %720 = vector.load %arg15[%c0_929, %c1_930, %c1_931, %c0_932] : memref<2x6x6x64xf32, #tpu.memory_space<vmem>>, vector<1x1x4x64xf32>
    %721 = vector.shape_cast %720 : vector<1x1x4x64xf32> to vector<4x64xf32>
    %c0_933 = arith.constant 0 : index
    %c1_934 = arith.constant 1 : index
    %c2_935 = arith.constant 2 : index
    %c0_936 = arith.constant 0 : index
    %722 = vector.load %arg15[%c0_933, %c1_934, %c2_935, %c0_936] : memref<2x6x6x64xf32, #tpu.memory_space<vmem>>, vector<1x1x4x64xf32>
    %723 = vector.shape_cast %722 : vector<1x1x4x64xf32> to vector<4x64xf32>
    %c0_937 = arith.constant 0 : index
    %c2_938 = arith.constant 2 : index
    %c0_939 = arith.constant 0 : index
    %c0_940 = arith.constant 0 : index
    %724 = vector.load %arg15[%c0_937, %c2_938, %c0_939, %c0_940] : memref<2x6x6x64xf32, #tpu.memory_space<vmem>>, vector<1x1x4x64xf32>
    %725 = vector.shape_cast %724 : vector<1x1x4x64xf32> to vector<4x64xf32>
    %c0_941 = arith.constant 0 : index
    %c2_942 = arith.constant 2 : index
    %c1_943 = arith.constant 1 : index
    %c0_944 = arith.constant 0 : index
    %726 = vector.load %arg15[%c0_941, %c2_942, %c1_943, %c0_944] : memref<2x6x6x64xf32, #tpu.memory_space<vmem>>, vector<1x1x4x64xf32>
    %727 = vector.shape_cast %726 : vector<1x1x4x64xf32> to vector<4x64xf32>
    %c0_945 = arith.constant 0 : index
    %c2_946 = arith.constant 2 : index
    %c2_947 = arith.constant 2 : index
    %c0_948 = arith.constant 0 : index
    %728 = vector.load %arg15[%c0_945, %c2_946, %c2_947, %c0_948] : memref<2x6x6x64xf32, #tpu.memory_space<vmem>>, vector<1x1x4x64xf32>
    %729 = vector.shape_cast %728 : vector<1x1x4x64xf32> to vector<4x64xf32>
    %c0_949 = arith.constant 0 : index
    %c3_950 = arith.constant 3 : index
    %c0_951 = arith.constant 0 : index
    %c0_952 = arith.constant 0 : index
    %730 = vector.load %arg15[%c0_949, %c3_950, %c0_951, %c0_952] : memref<2x6x6x64xf32, #tpu.memory_space<vmem>>, vector<1x1x4x64xf32>
    %731 = vector.shape_cast %730 : vector<1x1x4x64xf32> to vector<4x64xf32>
    %c0_953 = arith.constant 0 : index
    %c3_954 = arith.constant 3 : index
    %c1_955 = arith.constant 1 : index
    %c0_956 = arith.constant 0 : index
    %732 = vector.load %arg15[%c0_953, %c3_954, %c1_955, %c0_956] : memref<2x6x6x64xf32, #tpu.memory_space<vmem>>, vector<1x1x4x64xf32>
    %733 = vector.shape_cast %732 : vector<1x1x4x64xf32> to vector<4x64xf32>
    %c0_957 = arith.constant 0 : index
    %c3_958 = arith.constant 3 : index
    %c2_959 = arith.constant 2 : index
    %c0_960 = arith.constant 0 : index
    %734 = vector.load %arg15[%c0_957, %c3_958, %c2_959, %c0_960] : memref<2x6x6x64xf32, #tpu.memory_space<vmem>>, vector<1x1x4x64xf32>
    %735 = vector.shape_cast %734 : vector<1x1x4x64xf32> to vector<4x64xf32>
    %736 = tpu.concatenate %719, %721, %723, %725, %727, %729, %731, %733, %735 in 1 : vector<4x64xf32>, vector<4x64xf32>, vector<4x64xf32>, vector<4x64xf32>, vector<4x64xf32>, vector<4x64xf32>, vector<4x64xf32>, vector<4x64xf32>, vector<4x64xf32> -> vector<4x576xf32>
    %c4_961 = arith.constant 4 : index
    %c0_962 = arith.constant 0 : index
    %737 = vector.load %arg16[%c4_961, %c0_962] : memref<32x576xf32, #tpu.memory_space<vmem>>, vector<4x576xf32>
    tpu.vector_store %arg16[%c4_961, %c0_962], %736 {strides = array<i32>} : memref<32x576xf32, #tpu.memory_space<vmem>>, vector<4x576xf32>,
    %c0_963 = arith.constant 0 : index
    %c2_964 = arith.constant 2 : index
    %c0_965 = arith.constant 0 : index
    %c0_966 = arith.constant 0 : index
    %738 = vector.load %arg15[%c0_963, %c2_964, %c0_965, %c0_966] : memref<2x6x6x64xf32, #tpu.memory_space<vmem>>, vector<1x1x4x64xf32>
    %739 = vector.shape_cast %738 : vector<1x1x4x64xf32> to vector<4x64xf32>
    %c0_967 = arith.constant 0 : index
    %c2_968 = arith.constant 2 : index
    %c1_969 = arith.constant 1 : index
    %c0_970 = arith.constant 0 : index
    %740 = vector.load %arg15[%c0_967, %c2_968, %c1_969, %c0_970] : memref<2x6x6x64xf32, #tpu.memory_space<vmem>>, vector<1x1x4x64xf32>
    %741 = vector.shape_cast %740 : vector<1x1x4x64xf32> to vector<4x64xf32>
    %c0_971 = arith.constant 0 : index
    %c2_972 = arith.constant 2 : index
    %c2_973 = arith.constant 2 : index
    %c0_974 = arith.constant 0 : index
    %742 = vector.load %arg15[%c0_971, %c2_972, %c2_973, %c0_974] : memref<2x6x6x64xf32, #tpu.memory_space<vmem>>, vector<1x1x4x64xf32>
    %743 = vector.shape_cast %742 : vector<1x1x4x64xf32> to vector<4x64xf32>
    %c0_975 = arith.constant 0 : index
    %c3_976 = arith.constant 3 : index
    %c0_977 = arith.constant 0 : index
    %c0_978 = arith.constant 0 : index
    %744 = vector.load %arg15[%c0_975, %c3_976, %c0_977, %c0_978] : memref<2x6x6x64xf32, #tpu.memory_space<vmem>>, vector<1x1x4x64xf32>
    %745 = vector.shape_cast %744 : vector<1x1x4x64xf32> to vector<4x64xf32>
    %c0_979 = arith.constant 0 : index
    %c3_980 = arith.constant 3 : index
    %c1_981 = arith.constant 1 : index
    %c0_982 = arith.constant 0 : index
    %746 = vector.load %arg15[%c0_979, %c3_980, %c1_981, %c0_982] : memref<2x6x6x64xf32, #tpu.memory_space<vmem>>, vector<1x1x4x64xf32>
    %747 = vector.shape_cast %746 : vector<1x1x4x64xf32> to vector<4x64xf32>
    %c0_983 = arith.constant 0 : index
    %c3_984 = arith.constant 3 : index
    %c2_985 = arith.constant 2 : index
    %c0_986 = arith.constant 0 : index
    %748 = vector.load %arg15[%c0_983, %c3_984, %c2_985, %c0_986] : memref<2x6x6x64xf32, #tpu.memory_space<vmem>>, vector<1x1x4x64xf32>
    %749 = vector.shape_cast %748 : vector<1x1x4x64xf32> to vector<4x64xf32>
    %c0_987 = arith.constant 0 : index
    %c4_988 = arith.constant 4 : index
    %c0_989 = arith.constant 0 : index
    %c0_990 = arith.constant 0 : index
    %750 = vector.load %arg15[%c0_987, %c4_988, %c0_989, %c0_990] : memref<2x6x6x64xf32, #tpu.memory_space<vmem>>, vector<1x1x4x64xf32>
    %751 = vector.shape_cast %750 : vector<1x1x4x64xf32> to vector<4x64xf32>
    %c0_991 = arith.constant 0 : index
    %c4_992 = arith.constant 4 : index
    %c1_993 = arith.constant 1 : index
    %c0_994 = arith.constant 0 : index
    %752 = vector.load %arg15[%c0_991, %c4_992, %c1_993, %c0_994] : memref<2x6x6x64xf32, #tpu.memory_space<vmem>>, vector<1x1x4x64xf32>
    %753 = vector.shape_cast %752 : vector<1x1x4x64xf32> to vector<4x64xf32>
    %c0_995 = arith.constant 0 : index
    %c4_996 = arith.constant 4 : index
    %c2_997 = arith.constant 2 : index
    %c0_998 = arith.constant 0 : index
    %754 = vector.load %arg15[%c0_995, %c4_996, %c2_997, %c0_998] : memref<2x6x6x64xf32, #tpu.memory_space<vmem>>, vector<1x1x4x64xf32>
    %755 = vector.shape_cast %754 : vector<1x1x4x64xf32> to vector<4x64xf32>
    %756 = tpu.concatenate %739, %741, %743, %745, %747, %749, %751, %753, %755 in 1 : vector<4x64xf32>, vector<4x64xf32>, vector<4x64xf32>, vector<4x64xf32>, vector<4x64xf32>, vector<4x64xf32>, vector<4x64xf32>, vector<4x64xf32>, vector<4x64xf32> -> vector<4x576xf32>
    %c8_999 = arith.constant 8 : index
    %c0_1000 = arith.constant 0 : index
    %757 = vector.load %arg16[%c8_999, %c0_1000] : memref<32x576xf32, #tpu.memory_space<vmem>>, vector<4x576xf32>
    tpu.vector_store %arg16[%c8_999, %c0_1000], %756 {strides = array<i32>} : memref<32x576xf32, #tpu.memory_space<vmem>>, vector<4x576xf32>,
    %c0_1001 = arith.constant 0 : index
    %c3_1002 = arith.constant 3 : index
    %c0_1003 = arith.constant 0 : index
    %c0_1004 = arith.constant 0 : index
    %758 = vector.load %arg15[%c0_1001, %c3_1002, %c0_1003, %c0_1004] : memref<2x6x6x64xf32, #tpu.memory_space<vmem>>, vector<1x1x4x64xf32>
    %759 = vector.shape_cast %758 : vector<1x1x4x64xf32> to vector<4x64xf32>
    %c0_1005 = arith.constant 0 : index
    %c3_1006 = arith.constant 3 : index
    %c1_1007 = arith.constant 1 : index
    %c0_1008 = arith.constant 0 : index
    %760 = vector.load %arg15[%c0_1005, %c3_1006, %c1_1007, %c0_1008] : memref<2x6x6x64xf32, #tpu.memory_space<vmem>>, vector<1x1x4x64xf32>
    %761 = vector.shape_cast %760 : vector<1x1x4x64xf32> to vector<4x64xf32>
    %c0_1009 = arith.constant 0 : index
    %c3_1010 = arith.constant 3 : index
    %c2_1011 = arith.constant 2 : index
    %c0_1012 = arith.constant 0 : index
    %762 = vector.load %arg15[%c0_1009, %c3_1010, %c2_1011, %c0_1012] : memref<2x6x6x64xf32, #tpu.memory_space<vmem>>, vector<1x1x4x64xf32>
    %763 = vector.shape_cast %762 : vector<1x1x4x64xf32> to vector<4x64xf32>
    %c0_1013 = arith.constant 0 : index
    %c4_1014 = arith.constant 4 : index
    %c0_1015 = arith.constant 0 : index
    %c0_1016 = arith.constant 0 : index
    %764 = vector.load %arg15[%c0_1013, %c4_1014, %c0_1015, %c0_1016] : memref<2x6x6x64xf32, #tpu.memory_space<vmem>>, vector<1x1x4x64xf32>
    %765 = vector.shape_cast %764 : vector<1x1x4x64xf32> to vector<4x64xf32>
    %c0_1017 = arith.constant 0 : index
    %c4_1018 = arith.constant 4 : index
    %c1_1019 = arith.constant 1 : index
    %c0_1020 = arith.constant 0 : index
    %766 = vector.load %arg15[%c0_1017, %c4_1018, %c1_1019, %c0_1020] : memref<2x6x6x64xf32, #tpu.memory_space<vmem>>, vector<1x1x4x64xf32>
    %767 = vector.shape_cast %766 : vector<1x1x4x64xf32> to vector<4x64xf32>
    %c0_1021 = arith.constant 0 : index
    %c4_1022 = arith.constant 4 : index
    %c2_1023 = arith.constant 2 : index
    %c0_1024 = arith.constant 0 : index
    %768 = vector.load %arg15[%c0_1021, %c4_1022, %c2_1023, %c0_1024] : memref<2x6x6x64xf32, #tpu.memory_space<vmem>>, vector<1x1x4x64xf32>
    %769 = vector.shape_cast %768 : vector<1x1x4x64xf32> to vector<4x64xf32>
    %c0_1025 = arith.constant 0 : index
    %c5_1026 = arith.constant 5 : index
    %c0_1027 = arith.constant 0 : index
    %c0_1028 = arith.constant 0 : index
    %770 = vector.load %arg15[%c0_1025, %c5_1026, %c0_1027, %c0_1028] : memref<2x6x6x64xf32, #tpu.memory_space<vmem>>, vector<1x1x4x64xf32>
    %771 = vector.shape_cast %770 : vector<1x1x4x64xf32> to vector<4x64xf32>
    %c0_1029 = arith.constant 0 : index
    %c5_1030 = arith.constant 5 : index
    %c1_1031 = arith.constant 1 : index
    %c0_1032 = arith.constant 0 : index
    %772 = vector.load %arg15[%c0_1029, %c5_1030, %c1_1031, %c0_1032] : memref<2x6x6x64xf32, #tpu.memory_space<vmem>>, vector<1x1x4x64xf32>
    %773 = vector.shape_cast %772 : vector<1x1x4x64xf32> to vector<4x64xf32>
    %c0_1033 = arith.constant 0 : index
    %c5_1034 = arith.constant 5 : index
    %c2_1035 = arith.constant 2 : index
    %c0_1036 = arith.constant 0 : index
    %774 = vector.load %arg15[%c0_1033, %c5_1034, %c2_1035, %c0_1036] : memref<2x6x6x64xf32, #tpu.memory_space<vmem>>, vector<1x1x4x64xf32>
    %775 = vector.shape_cast %774 : vector<1x1x4x64xf32> to vector<4x64xf32>
    %776 = tpu.concatenate %759, %761, %763, %765, %767, %769, %771, %773, %775 in 1 : vector<4x64xf32>, vector<4x64xf32>, vector<4x64xf32>, vector<4x64xf32>, vector<4x64xf32>, vector<4x64xf32>, vector<4x64xf32>, vector<4x64xf32>, vector<4x64xf32> -> vector<4x576xf32>
    %c12 = arith.constant 12 : index
    %c0_1037 = arith.constant 0 : index
    %777 = vector.load %arg16[%c12, %c0_1037] : memref<32x576xf32, #tpu.memory_space<vmem>>, vector<4x576xf32>
    tpu.vector_store %arg16[%c12, %c0_1037], %776 {strides = array<i32>} : memref<32x576xf32, #tpu.memory_space<vmem>>, vector<4x576xf32>,
    %c1_1038 = arith.constant 1 : index
    %c0_1039 = arith.constant 0 : index
    %c0_1040 = arith.constant 0 : index
    %c0_1041 = arith.constant 0 : index
    %778 = vector.load %arg15[%c1_1038, %c0_1039, %c0_1040, %c0_1041] : memref<2x6x6x64xf32, #tpu.memory_space<vmem>>, vector<1x1x4x64xf32>
    %779 = vector.shape_cast %778 : vector<1x1x4x64xf32> to vector<4x64xf32>
    %c1_1042 = arith.constant 1 : index
    %c0_1043 = arith.constant 0 : index
    %c1_1044 = arith.constant 1 : index
    %c0_1045 = arith.constant 0 : index
    %780 = vector.load %arg15[%c1_1042, %c0_1043, %c1_1044, %c0_1045] : memref<2x6x6x64xf32, #tpu.memory_space<vmem>>, vector<1x1x4x64xf32>
    %781 = vector.shape_cast %780 : vector<1x1x4x64xf32> to vector<4x64xf32>
    %c1_1046 = arith.constant 1 : index
    %c0_1047 = arith.constant 0 : index
    %c2_1048 = arith.constant 2 : index
    %c0_1049 = arith.constant 0 : index
    %782 = vector.load %arg15[%c1_1046, %c0_1047, %c2_1048, %c0_1049] : memref<2x6x6x64xf32, #tpu.memory_space<vmem>>, vector<1x1x4x64xf32>
    %783 = vector.shape_cast %782 : vector<1x1x4x64xf32> to vector<4x64xf32>
    %c1_1050 = arith.constant 1 : index
    %c1_1051 = arith.constant 1 : index
    %c0_1052 = arith.constant 0 : index
    %c0_1053 = arith.constant 0 : index
    %784 = vector.load %arg15[%c1_1050, %c1_1051, %c0_1052, %c0_1053] : memref<2x6x6x64xf32, #tpu.memory_space<vmem>>, vector<1x1x4x64xf32>
    %785 = vector.shape_cast %784 : vector<1x1x4x64xf32> to vector<4x64xf32>
    %c1_1054 = arith.constant 1 : index
    %c1_1055 = arith.constant 1 : index
    %c1_1056 = arith.constant 1 : index
    %c0_1057 = arith.constant 0 : index
    %786 = vector.load %arg15[%c1_1054, %c1_1055, %c1_1056, %c0_1057] : memref<2x6x6x64xf32, #tpu.memory_space<vmem>>, vector<1x1x4x64xf32>
    %787 = vector.shape_cast %786 : vector<1x1x4x64xf32> to vector<4x64xf32>
    %c1_1058 = arith.constant 1 : index
    %c1_1059 = arith.constant 1 : index
    %c2_1060 = arith.constant 2 : index
    %c0_1061 = arith.constant 0 : index
    %788 = vector.load %arg15[%c1_1058, %c1_1059, %c2_1060, %c0_1061] : memref<2x6x6x64xf32, #tpu.memory_space<vmem>>, vector<1x1x4x64xf32>
    %789 = vector.shape_cast %788 : vector<1x1x4x64xf32> to vector<4x64xf32>
    %c1_1062 = arith.constant 1 : index
    %c2_1063 = arith.constant 2 : index
    %c0_1064 = arith.constant 0 : index
    %c0_1065 = arith.constant 0 : index
    %790 = vector.load %arg15[%c1_1062, %c2_1063, %c0_1064, %c0_1065] : memref<2x6x6x64xf32, #tpu.memory_space<vmem>>, vector<1x1x4x64xf32>
    %791 = vector.shape_cast %790 : vector<1x1x4x64xf32> to vector<4x64xf32>
    %c1_1066 = arith.constant 1 : index
    %c2_1067 = arith.constant 2 : index
    %c1_1068 = arith.constant 1 : index
    %c0_1069 = arith.constant 0 : index
    %792 = vector.load %arg15[%c1_1066, %c2_1067, %c1_1068, %c0_1069] : memref<2x6x6x64xf32, #tpu.memory_space<vmem>>, vector<1x1x4x64xf32>
    %793 = vector.shape_cast %792 : vector<1x1x4x64xf32> to vector<4x64xf32>
    %c1_1070 = arith.constant 1 : index
    %c2_1071 = arith.constant 2 : index
    %c2_1072 = arith.constant 2 : index
    %c0_1073 = arith.constant 0 : index
    %794 = vector.load %arg15[%c1_1070, %c2_1071, %c2_1072, %c0_1073] : memref<2x6x6x64xf32, #tpu.memory_space<vmem>>, vector<1x1x4x64xf32>
    %795 = vector.shape_cast %794 : vector<1x1x4x64xf32> to vector<4x64xf32>
    %796 = tpu.concatenate %779, %781, %783, %785, %787, %789, %791, %793, %795 in 1 : vector<4x64xf32>, vector<4x64xf32>, vector<4x64xf32>, vector<4x64xf32>, vector<4x64xf32>, vector<4x64xf32>, vector<4x64xf32>, vector<4x64xf32>, vector<4x64xf32> -> vector<4x576xf32>
    %c16_1074 = arith.constant 16 : index
    %c0_1075 = arith.constant 0 : index
    %797 = vector.load %arg16[%c16_1074, %c0_1075] : memref<32x576xf32, #tpu.memory_space<vmem>>, vector<4x576xf32>
    tpu.vector_store %arg16[%c16_1074, %c0_1075], %796 {strides = array<i32>} : memref<32x576xf32, #tpu.memory_space<vmem>>, vector<4x576xf32>,
    %c1_1076 = arith.constant 1 : index
    %c1_1077 = arith.constant 1 : index
    %c0_1078 = arith.constant 0 : index
    %c0_1079 = arith.constant 0 : index
    %798 = vector.load %arg15[%c1_1076, %c1_1077, %c0_1078, %c0_1079] : memref<2x6x6x64xf32, #tpu.memory_space<vmem>>, vector<1x1x4x64xf32>
    %799 = vector.shape_cast %798 : vector<1x1x4x64xf32> to vector<4x64xf32>
    %c1_1080 = arith.constant 1 : index
    %c1_1081 = arith.constant 1 : index
    %c1_1082 = arith.constant 1 : index
    %c0_1083 = arith.constant 0 : index
    %800 = vector.load %arg15[%c1_1080, %c1_1081, %c1_1082, %c0_1083] : memref<2x6x6x64xf32, #tpu.memory_space<vmem>>, vector<1x1x4x64xf32>
    %801 = vector.shape_cast %800 : vector<1x1x4x64xf32> to vector<4x64xf32>
    %c1_1084 = arith.constant 1 : index
    %c1_1085 = arith.constant 1 : index
    %c2_1086 = arith.constant 2 : index
    %c0_1087 = arith.constant 0 : index
    %802 = vector.load %arg15[%c1_1084, %c1_1085, %c2_1086, %c0_1087] : memref<2x6x6x64xf32, #tpu.memory_space<vmem>>, vector<1x1x4x64xf32>
    %803 = vector.shape_cast %802 : vector<1x1x4x64xf32> to vector<4x64xf32>
    %c1_1088 = arith.constant 1 : index
    %c2_1089 = arith.constant 2 : index
    %c0_1090 = arith.constant 0 : index
    %c0_1091 = arith.constant 0 : index
    %804 = vector.load %arg15[%c1_1088, %c2_1089, %c0_1090, %c0_1091] : memref<2x6x6x64xf32, #tpu.memory_space<vmem>>, vector<1x1x4x64xf32>
    %805 = vector.shape_cast %804 : vector<1x1x4x64xf32> to vector<4x64xf32>
    %c1_1092 = arith.constant 1 : index
    %c2_1093 = arith.constant 2 : index
    %c1_1094 = arith.constant 1 : index
    %c0_1095 = arith.constant 0 : index
    %806 = vector.load %arg15[%c1_1092, %c2_1093, %c1_1094, %c0_1095] : memref<2x6x6x64xf32, #tpu.memory_space<vmem>>, vector<1x1x4x64xf32>
    %807 = vector.shape_cast %806 : vector<1x1x4x64xf32> to vector<4x64xf32>
    %c1_1096 = arith.constant 1 : index
    %c2_1097 = arith.constant 2 : index
    %c2_1098 = arith.constant 2 : index
    %c0_1099 = arith.constant 0 : index
    %808 = vector.load %arg15[%c1_1096, %c2_1097, %c2_1098, %c0_1099] : memref<2x6x6x64xf32, #tpu.memory_space<vmem>>, vector<1x1x4x64xf32>
    %809 = vector.shape_cast %808 : vector<1x1x4x64xf32> to vector<4x64xf32>
    %c1_1100 = arith.constant 1 : index
    %c3_1101 = arith.constant 3 : index
    %c0_1102 = arith.constant 0 : index
    %c0_1103 = arith.constant 0 : index
    %810 = vector.load %arg15[%c1_1100, %c3_1101, %c0_1102, %c0_1103] : memref<2x6x6x64xf32, #tpu.memory_space<vmem>>, vector<1x1x4x64xf32>
    %811 = vector.shape_cast %810 : vector<1x1x4x64xf32> to vector<4x64xf32>
    %c1_1104 = arith.constant 1 : index
    %c3_1105 = arith.constant 3 : index
    %c1_1106 = arith.constant 1 : index
    %c0_1107 = arith.constant 0 : index
    %812 = vector.load %arg15[%c1_1104, %c3_1105, %c1_1106, %c0_1107] : memref<2x6x6x64xf32, #tpu.memory_space<vmem>>, vector<1x1x4x64xf32>
    %813 = vector.shape_cast %812 : vector<1x1x4x64xf32> to vector<4x64xf32>
    %c1_1108 = arith.constant 1 : index
    %c3_1109 = arith.constant 3 : index
    %c2_1110 = arith.constant 2 : index
    %c0_1111 = arith.constant 0 : index
    %814 = vector.load %arg15[%c1_1108, %c3_1109, %c2_1110, %c0_1111] : memref<2x6x6x64xf32, #tpu.memory_space<vmem>>, vector<1x1x4x64xf32>
    %815 = vector.shape_cast %814 : vector<1x1x4x64xf32> to vector<4x64xf32>
    %816 = tpu.concatenate %799, %801, %803, %805, %807, %809, %811, %813, %815 in 1 : vector<4x64xf32>, vector<4x64xf32>, vector<4x64xf32>, vector<4x64xf32>, vector<4x64xf32>, vector<4x64xf32>, vector<4x64xf32>, vector<4x64xf32>, vector<4x64xf32> -> vector<4x576xf32>
    %c20 = arith.constant 20 : index
    %c0_1112 = arith.constant 0 : index
    %817 = vector.load %arg16[%c20, %c0_1112] : memref<32x576xf32, #tpu.memory_space<vmem>>, vector<4x576xf32>
    tpu.vector_store %arg16[%c20, %c0_1112], %816 {strides = array<i32>} : memref<32x576xf32, #tpu.memory_space<vmem>>, vector<4x576xf32>,
    %c1_1113 = arith.constant 1 : index
    %c2_1114 = arith.constant 2 : index
    %c0_1115 = arith.constant 0 : index
    %c0_1116 = arith.constant 0 : index
    %818 = vector.load %arg15[%c1_1113, %c2_1114, %c0_1115, %c0_1116] : memref<2x6x6x64xf32, #tpu.memory_space<vmem>>, vector<1x1x4x64xf32>
    %819 = vector.shape_cast %818 : vector<1x1x4x64xf32> to vector<4x64xf32>
    %c1_1117 = arith.constant 1 : index
    %c2_1118 = arith.constant 2 : index
    %c1_1119 = arith.constant 1 : index
    %c0_1120 = arith.constant 0 : index
    %820 = vector.load %arg15[%c1_1117, %c2_1118, %c1_1119, %c0_1120] : memref<2x6x6x64xf32, #tpu.memory_space<vmem>>, vector<1x1x4x64xf32>
    %821 = vector.shape_cast %820 : vector<1x1x4x64xf32> to vector<4x64xf32>
    %c1_1121 = arith.constant 1 : index
    %c2_1122 = arith.constant 2 : index
    %c2_1123 = arith.constant 2 : index
    %c0_1124 = arith.constant 0 : index
    %822 = vector.load %arg15[%c1_1121, %c2_1122, %c2_1123, %c0_1124] : memref<2x6x6x64xf32, #tpu.memory_space<vmem>>, vector<1x1x4x64xf32>
    %823 = vector.shape_cast %822 : vector<1x1x4x64xf32> to vector<4x64xf32>
    %c1_1125 = arith.constant 1 : index
    %c3_1126 = arith.constant 3 : index
    %c0_1127 = arith.constant 0 : index
    %c0_1128 = arith.constant 0 : index
    %824 = vector.load %arg15[%c1_1125, %c3_1126, %c0_1127, %c0_1128] : memref<2x6x6x64xf32, #tpu.memory_space<vmem>>, vector<1x1x4x64xf32>
    %825 = vector.shape_cast %824 : vector<1x1x4x64xf32> to vector<4x64xf32>
    %c1_1129 = arith.constant 1 : index
    %c3_1130 = arith.constant 3 : index
    %c1_1131 = arith.constant 1 : index
    %c0_1132 = arith.constant 0 : index
    %826 = vector.load %arg15[%c1_1129, %c3_1130, %c1_1131, %c0_1132] : memref<2x6x6x64xf32, #tpu.memory_space<vmem>>, vector<1x1x4x64xf32>
    %827 = vector.shape_cast %826 : vector<1x1x4x64xf32> to vector<4x64xf32>
    %c1_1133 = arith.constant 1 : index
    %c3_1134 = arith.constant 3 : index
    %c2_1135 = arith.constant 2 : index
    %c0_1136 = arith.constant 0 : index
    %828 = vector.load %arg15[%c1_1133, %c3_1134, %c2_1135, %c0_1136] : memref<2x6x6x64xf32, #tpu.memory_space<vmem>>, vector<1x1x4x64xf32>
    %829 = vector.shape_cast %828 : vector<1x1x4x64xf32> to vector<4x64xf32>
    %c1_1137 = arith.constant 1 : index
    %c4_1138 = arith.constant 4 : index
    %c0_1139 = arith.constant 0 : index
    %c0_1140 = arith.constant 0 : index
    %830 = vector.load %arg15[%c1_1137, %c4_1138, %c0_1139, %c0_1140] : memref<2x6x6x64xf32, #tpu.memory_space<vmem>>, vector<1x1x4x64xf32>
    %831 = vector.shape_cast %830 : vector<1x1x4x64xf32> to vector<4x64xf32>
    %c1_1141 = arith.constant 1 : index
    %c4_1142 = arith.constant 4 : index
    %c1_1143 = arith.constant 1 : index
    %c0_1144 = arith.constant 0 : index
    %832 = vector.load %arg15[%c1_1141, %c4_1142, %c1_1143, %c0_1144] : memref<2x6x6x64xf32, #tpu.memory_space<vmem>>, vector<1x1x4x64xf32>
    %833 = vector.shape_cast %832 : vector<1x1x4x64xf32> to vector<4x64xf32>
    %c1_1145 = arith.constant 1 : index
    %c4_1146 = arith.constant 4 : index
    %c2_1147 = arith.constant 2 : index
    %c0_1148 = arith.constant 0 : index
    %834 = vector.load %arg15[%c1_1145, %c4_1146, %c2_1147, %c0_1148] : memref<2x6x6x64xf32, #tpu.memory_space<vmem>>, vector<1x1x4x64xf32>
    %835 = vector.shape_cast %834 : vector<1x1x4x64xf32> to vector<4x64xf32>
    %836 = tpu.concatenate %819, %821, %823, %825, %827, %829, %831, %833, %835 in 1 : vector<4x64xf32>, vector<4x64xf32>, vector<4x64xf32>, vector<4x64xf32>, vector<4x64xf32>, vector<4x64xf32>, vector<4x64xf32>, vector<4x64xf32>, vector<4x64xf32> -> vector<4x576xf32>
    %c24_1149 = arith.constant 24 : index
    %c0_1150 = arith.constant 0 : index
    %837 = vector.load %arg16[%c24_1149, %c0_1150] : memref<32x576xf32, #tpu.memory_space<vmem>>, vector<4x576xf32>
    tpu.vector_store %arg16[%c24_1149, %c0_1150], %836 {strides = array<i32>} : memref<32x576xf32, #tpu.memory_space<vmem>>, vector<4x576xf32>,
    %c1_1151 = arith.constant 1 : index
    %c3_1152 = arith.constant 3 : index
    %c0_1153 = arith.constant 0 : index
    %c0_1154 = arith.constant 0 : index
    %838 = vector.load %arg15[%c1_1151, %c3_1152, %c0_1153, %c0_1154] : memref<2x6x6x64xf32, #tpu.memory_space<vmem>>, vector<1x1x4x64xf32>
    %839 = vector.shape_cast %838 : vector<1x1x4x64xf32> to vector<4x64xf32>
    %c1_1155 = arith.constant 1 : index
    %c3_1156 = arith.constant 3 : index
    %c1_1157 = arith.constant 1 : index
    %c0_1158 = arith.constant 0 : index
    %840 = vector.load %arg15[%c1_1155, %c3_1156, %c1_1157, %c0_1158] : memref<2x6x6x64xf32, #tpu.memory_space<vmem>>, vector<1x1x4x64xf32>
    %841 = vector.shape_cast %840 : vector<1x1x4x64xf32> to vector<4x64xf32>
    %c1_1159 = arith.constant 1 : index
    %c3_1160 = arith.constant 3 : index
    %c2_1161 = arith.constant 2 : index
    %c0_1162 = arith.constant 0 : index
    %842 = vector.load %arg15[%c1_1159, %c3_1160, %c2_1161, %c0_1162] : memref<2x6x6x64xf32, #tpu.memory_space<vmem>>, vector<1x1x4x64xf32>
    %843 = vector.shape_cast %842 : vector<1x1x4x64xf32> to vector<4x64xf32>
    %c1_1163 = arith.constant 1 : index
    %c4_1164 = arith.constant 4 : index
    %c0_1165 = arith.constant 0 : index
    %c0_1166 = arith.constant 0 : index
    %844 = vector.load %arg15[%c1_1163, %c4_1164, %c0_1165, %c0_1166] : memref<2x6x6x64xf32, #tpu.memory_space<vmem>>, vector<1x1x4x64xf32>
    %845 = vector.shape_cast %844 : vector<1x1x4x64xf32> to vector<4x64xf32>
    %c1_1167 = arith.constant 1 : index
    %c4_1168 = arith.constant 4 : index
    %c1_1169 = arith.constant 1 : index
    %c0_1170 = arith.constant 0 : index
    %846 = vector.load %arg15[%c1_1167, %c4_1168, %c1_1169, %c0_1170] : memref<2x6x6x64xf32, #tpu.memory_space<vmem>>, vector<1x1x4x64xf32>
    %847 = vector.shape_cast %846 : vector<1x1x4x64xf32> to vector<4x64xf32>
    %c1_1171 = arith.constant 1 : index
    %c4_1172 = arith.constant 4 : index
    %c2_1173 = arith.constant 2 : index
    %c0_1174 = arith.constant 0 : index
    %848 = vector.load %arg15[%c1_1171, %c4_1172, %c2_1173, %c0_1174] : memref<2x6x6x64xf32, #tpu.memory_space<vmem>>, vector<1x1x4x64xf32>
    %849 = vector.shape_cast %848 : vector<1x1x4x64xf32> to vector<4x64xf32>
    %c1_1175 = arith.constant 1 : index
    %c5_1176 = arith.constant 5 : index
    %c0_1177 = arith.constant 0 : index
    %c0_1178 = arith.constant 0 : index
    %850 = vector.load %arg15[%c1_1175, %c5_1176, %c0_1177, %c0_1178] : memref<2x6x6x64xf32, #tpu.memory_space<vmem>>, vector<1x1x4x64xf32>
    %851 = vector.shape_cast %850 : vector<1x1x4x64xf32> to vector<4x64xf32>
    %c1_1179 = arith.constant 1 : index
    %c5_1180 = arith.constant 5 : index
    %c1_1181 = arith.constant 1 : index
    %c0_1182 = arith.constant 0 : index
    %852 = vector.load %arg15[%c1_1179, %c5_1180, %c1_1181, %c0_1182] : memref<2x6x6x64xf32, #tpu.memory_space<vmem>>, vector<1x1x4x64xf32>
    %853 = vector.shape_cast %852 : vector<1x1x4x64xf32> to vector<4x64xf32>
    %c1_1183 = arith.constant 1 : index
    %c5_1184 = arith.constant 5 : index
    %c2_1185 = arith.constant 2 : index
    %c0_1186 = arith.constant 0 : index
    %854 = vector.load %arg15[%c1_1183, %c5_1184, %c2_1185, %c0_1186] : memref<2x6x6x64xf32, #tpu.memory_space<vmem>>, vector<1x1x4x64xf32>
    %855 = vector.shape_cast %854 : vector<1x1x4x64xf32> to vector<4x64xf32>
    %856 = tpu.concatenate %839, %841, %843, %845, %847, %849, %851, %853, %855 in 1 : vector<4x64xf32>, vector<4x64xf32>, vector<4x64xf32>, vector<4x64xf32>, vector<4x64xf32>, vector<4x64xf32>, vector<4x64xf32>, vector<4x64xf32>, vector<4x64xf32> -> vector<4x576xf32>
    %c28 = arith.constant 28 : index
    %c0_1187 = arith.constant 0 : index
    %857 = vector.load %arg16[%c28, %c0_1187] : memref<32x576xf32, #tpu.memory_space<vmem>>, vector<4x576xf32>
    tpu.vector_store %arg16[%c28, %c0_1187], %856 {strides = array<i32>} : memref<32x576xf32, #tpu.memory_space<vmem>>, vector<4x576xf32>,
    %c0_1188 = arith.constant 0 : index
    %c0_1189 = arith.constant 0 : index
    %858 = vector.load %arg16[%c0_1188, %c0_1189] : memref<32x576xf32, #tpu.memory_space<vmem>>, vector<32x576xf32>
    %c0_1190 = arith.constant 0 : index
    %c0_1191 = arith.constant 0 : index
    %859 = vector.load %arg6[%c0_1190, %c0_1191] : memref<576x64xf32, #tpu.memory_space<vmem>>, vector<576x64xf32>
    %cst_1192 = arith.constant dense<0.000000e+00> : vector<32x64xf32>
    %860 = tpu.matmul %858, %859, %cst_1192 {dimension_numbers = #tpu.dot_dimension_numbers<[1], [0], [0], [1], [0, 0, 1, 1], [], []>} : vector<32x576xf32>, vector<576x64xf32>, vector<32x64xf32> -> vector<32x64xf32>
    %c0_1193 = arith.constant 0 : index
    %c0_1194 = arith.constant 0 : index
    %861 = vector.load %arg17[%c0_1193, %c0_1194] : memref<32x64xf32, #tpu.memory_space<vmem>>, vector<32x64xf32>
    tpu.vector_store %arg17[%c0_1193, %c0_1194], %860 {strides = array<i32>} : memref<32x64xf32, #tpu.memory_space<vmem>>, vector<32x64xf32>,
    %c0_1195 = arith.constant 0 : index
    %c0_1196 = arith.constant 0 : index
    %862 = vector.load %arg7[%c0_1195, %c0_1196] : memref<1x64xf32, #tpu.memory_space<vmem>>, vector<1x64xf32>
    %863 = vector.shape_cast %862 : vector<1x64xf32> to vector<1x64xf32>
    %864 = vector.broadcast %863 : vector<1x64xf32> to vector<2x64xf32>
    %cst_1197 = arith.constant 0.000000e+00 : f32
    %865 = vector.broadcast %cst_1197 : f32 to vector<1x64xf32>
    %cst_1198 = arith.constant 0.000000e+00 : f32
    %866 = vector.broadcast %cst_1198 : f32 to vector<4x64xf32>
    %c0_1199 = arith.constant 0 : index
    %c0_1200 = arith.constant 0 : index
    %c0_1201 = arith.constant 0 : index
    %c0_1202 = arith.constant 0 : index
    %867 = vector.load %arg18[%c0_1199, %c0_1200, %c0_1201, %c0_1202] : memref<2x4x4x64xf32, #tpu.memory_space<vmem>>, vector<1x1x4x64xf32>
    %868 = vector.shape_cast %867 : vector<1x1x4x64xf32> to vector<4x64xf32>
    %869 = vector.shape_cast %866 : vector<4x64xf32> to vector<1x1x4x64xf32>
    tpu.vector_store %arg18[%c0_1199, %c0_1200, %c0_1201, %c0_1202], %869 {strides = array<i32>} : memref<2x4x4x64xf32, #tpu.memory_space<vmem>>, vector<1x1x4x64xf32>,
    %c0_1203 = arith.constant 0 : index
    %c3_1204 = arith.constant 3 : index
    %c0_1205 = arith.constant 0 : index
    %c0_1206 = arith.constant 0 : index
    %870 = vector.load %arg18[%c0_1203, %c3_1204, %c0_1205, %c0_1206] : memref<2x4x4x64xf32, #tpu.memory_space<vmem>>, vector<1x1x4x64xf32>
    %871 = vector.shape_cast %870 : vector<1x1x4x64xf32> to vector<4x64xf32>
    %872 = vector.shape_cast %866 : vector<4x64xf32> to vector<1x1x4x64xf32>
    tpu.vector_store %arg18[%c0_1203, %c3_1204, %c0_1205, %c0_1206], %872 {strides = array<i32>} : memref<2x4x4x64xf32, #tpu.memory_space<vmem>>, vector<1x1x4x64xf32>,
    %c0_1207 = arith.constant 0 : index
    %c0_1208 = arith.constant 0 : index
    %873 = tpu.strided_load %arg17[%c0_1207, %c0_1208] {strides = array<i32: 2, 1>} : memref<32x64xf32, #tpu.memory_space<vmem>>, vector<2x64xf32>
    %c1_1209 = arith.constant 1 : index
    %c0_1210 = arith.constant 0 : index
    %874 = tpu.strided_load %arg17[%c1_1209, %c0_1210] {strides = array<i32: 2, 1>} : memref<32x64xf32, #tpu.memory_space<vmem>>, vector<2x64xf32>
    %c4_1211 = arith.constant 4 : index
    %c0_1212 = arith.constant 0 : index
    %875 = tpu.strided_load %arg17[%c4_1211, %c0_1212] {strides = array<i32: 2, 1>} : memref<32x64xf32, #tpu.memory_space<vmem>>, vector<2x64xf32>
    %c5_1213 = arith.constant 5 : index
    %c0_1214 = arith.constant 0 : index
    %876 = tpu.strided_load %arg17[%c5_1213, %c0_1214] {strides = array<i32: 2, 1>} : memref<32x64xf32, #tpu.memory_space<vmem>>, vector<2x64xf32>
    %877 = arith.maximumf %873, %874 : vector<2x64xf32>
    %878 = arith.maximumf %875, %876 : vector<2x64xf32>
    %879 = arith.maximumf %877, %878 : vector<2x64xf32>
    %880 = arith.addf %879, %864 : vector<2x64xf32>
    %cst_1215 = arith.constant 0.000000e+00 : f32
    %881 = vector.broadcast %cst_1215 : f32 to vector<2x64xf32>
    %882 = arith.maximumf %880, %881 : vector<2x64xf32>
    %883 = tpu.concatenate %865, %882, %865 in 0 : vector<1x64xf32>, vector<2x64xf32>, vector<1x64xf32> -> vector<4x64xf32>
    %c0_1216 = arith.constant 0 : index
    %c1_1217 = arith.constant 1 : index
    %c0_1218 = arith.constant 0 : index
    %c0_1219 = arith.constant 0 : index
    %884 = vector.load %arg18[%c0_1216, %c1_1217, %c0_1218, %c0_1219] : memref<2x4x4x64xf32, #tpu.memory_space<vmem>>, vector<1x1x4x64xf32>
    %885 = vector.shape_cast %884 : vector<1x1x4x64xf32> to vector<4x64xf32>
    %886 = vector.shape_cast %883 : vector<4x64xf32> to vector<1x1x4x64xf32>
    tpu.vector_store %arg18[%c0_1216, %c1_1217, %c0_1218, %c0_1219], %886 {strides = array<i32>} : memref<2x4x4x64xf32, #tpu.memory_space<vmem>>, vector<1x1x4x64xf32>,
    %c8_1220 = arith.constant 8 : index
    %c0_1221 = arith.constant 0 : index
    %887 = tpu.strided_load %arg17[%c8_1220, %c0_1221] {strides = array<i32: 2, 1>} : memref<32x64xf32, #tpu.memory_space<vmem>>, vector<2x64xf32>
    %c9_1222 = arith.constant 9 : index
    %c0_1223 = arith.constant 0 : index
    %888 = tpu.strided_load %arg17[%c9_1222, %c0_1223] {strides = array<i32: 2, 1>} : memref<32x64xf32, #tpu.memory_space<vmem>>, vector<2x64xf32>
    %c12_1224 = arith.constant 12 : index
    %c0_1225 = arith.constant 0 : index
    %889 = tpu.strided_load %arg17[%c12_1224, %c0_1225] {strides = array<i32: 2, 1>} : memref<32x64xf32, #tpu.memory_space<vmem>>, vector<2x64xf32>
    %c13 = arith.constant 13 : index
    %c0_1226 = arith.constant 0 : index
    %890 = tpu.strided_load %arg17[%c13, %c0_1226] {strides = array<i32: 2, 1>} : memref<32x64xf32, #tpu.memory_space<vmem>>, vector<2x64xf32>
    %891 = arith.maximumf %887, %888 : vector<2x64xf32>
    %892 = arith.maximumf %889, %890 : vector<2x64xf32>
    %893 = arith.maximumf %891, %892 : vector<2x64xf32>
    %894 = arith.addf %893, %864 : vector<2x64xf32>
    %cst_1227 = arith.constant 0.000000e+00 : f32
    %895 = vector.broadcast %cst_1227 : f32 to vector<2x64xf32>
    %896 = arith.maximumf %894, %895 : vector<2x64xf32>
    %897 = tpu.concatenate %865, %896, %865 in 0 : vector<1x64xf32>, vector<2x64xf32>, vector<1x64xf32> -> vector<4x64xf32>
    %c0_1228 = arith.constant 0 : index
    %c2_1229 = arith.constant 2 : index
    %c0_1230 = arith.constant 0 : index
    %c0_1231 = arith.constant 0 : index
    %898 = vector.load %arg18[%c0_1228, %c2_1229, %c0_1230, %c0_1231] : memref<2x4x4x64xf32, #tpu.memory_space<vmem>>, vector<1x1x4x64xf32>
    %899 = vector.shape_cast %898 : vector<1x1x4x64xf32> to vector<4x64xf32>
    %900 = vector.shape_cast %897 : vector<4x64xf32> to vector<1x1x4x64xf32>
    tpu.vector_store %arg18[%c0_1228, %c2_1229, %c0_1230, %c0_1231], %900 {strides = array<i32>} : memref<2x4x4x64xf32, #tpu.memory_space<vmem>>, vector<1x1x4x64xf32>,
    %c1_1232 = arith.constant 1 : index
    %c0_1233 = arith.constant 0 : index
    %c0_1234 = arith.constant 0 : index
    %c0_1235 = arith.constant 0 : index
    %901 = vector.load %arg18[%c1_1232, %c0_1233, %c0_1234, %c0_1235] : memref<2x4x4x64xf32, #tpu.memory_space<vmem>>, vector<1x1x4x64xf32>
    %902 = vector.shape_cast %901 : vector<1x1x4x64xf32> to vector<4x64xf32>
    %903 = vector.shape_cast %866 : vector<4x64xf32> to vector<1x1x4x64xf32>
    tpu.vector_store %arg18[%c1_1232, %c0_1233, %c0_1234, %c0_1235], %903 {strides = array<i32>} : memref<2x4x4x64xf32, #tpu.memory_space<vmem>>, vector<1x1x4x64xf32>,
    %c1_1236 = arith.constant 1 : index
    %c3_1237 = arith.constant 3 : index
    %c0_1238 = arith.constant 0 : index
    %c0_1239 = arith.constant 0 : index
    %904 = vector.load %arg18[%c1_1236, %c3_1237, %c0_1238, %c0_1239] : memref<2x4x4x64xf32, #tpu.memory_space<vmem>>, vector<1x1x4x64xf32>
    %905 = vector.shape_cast %904 : vector<1x1x4x64xf32> to vector<4x64xf32>
    %906 = vector.shape_cast %866 : vector<4x64xf32> to vector<1x1x4x64xf32>
    tpu.vector_store %arg18[%c1_1236, %c3_1237, %c0_1238, %c0_1239], %906 {strides = array<i32>} : memref<2x4x4x64xf32, #tpu.memory_space<vmem>>, vector<1x1x4x64xf32>,
    %c16_1240 = arith.constant 16 : index
    %c0_1241 = arith.constant 0 : index
    %907 = tpu.strided_load %arg17[%c16_1240, %c0_1241] {strides = array<i32: 2, 1>} : memref<32x64xf32, #tpu.memory_space<vmem>>, vector<2x64xf32>
    %c17_1242 = arith.constant 17 : index
    %c0_1243 = arith.constant 0 : index
    %908 = tpu.strided_load %arg17[%c17_1242, %c0_1243] {strides = array<i32: 2, 1>} : memref<32x64xf32, #tpu.memory_space<vmem>>, vector<2x64xf32>
    %c20_1244 = arith.constant 20 : index
    %c0_1245 = arith.constant 0 : index
    %909 = tpu.strided_load %arg17[%c20_1244, %c0_1245] {strides = array<i32: 2, 1>} : memref<32x64xf32, #tpu.memory_space<vmem>>, vector<2x64xf32>
    %c21 = arith.constant 21 : index
    %c0_1246 = arith.constant 0 : index
    %910 = tpu.strided_load %arg17[%c21, %c0_1246] {strides = array<i32: 2, 1>} : memref<32x64xf32, #tpu.memory_space<vmem>>, vector<2x64xf32>
    %911 = arith.maximumf %907, %908 : vector<2x64xf32>
    %912 = arith.maximumf %909, %910 : vector<2x64xf32>
    %913 = arith.maximumf %911, %912 : vector<2x64xf32>
    %914 = arith.addf %913, %864 : vector<2x64xf32>
    %cst_1247 = arith.constant 0.000000e+00 : f32
    %915 = vector.broadcast %cst_1247 : f32 to vector<2x64xf32>
    %916 = arith.maximumf %914, %915 : vector<2x64xf32>
    %917 = tpu.concatenate %865, %916, %865 in 0 : vector<1x64xf32>, vector<2x64xf32>, vector<1x64xf32> -> vector<4x64xf32>
    %c1_1248 = arith.constant 1 : index
    %c1_1249 = arith.constant 1 : index
    %c0_1250 = arith.constant 0 : index
    %c0_1251 = arith.constant 0 : index
    %918 = vector.load %arg18[%c1_1248, %c1_1249, %c0_1250, %c0_1251] : memref<2x4x4x64xf32, #tpu.memory_space<vmem>>, vector<1x1x4x64xf32>
    %919 = vector.shape_cast %918 : vector<1x1x4x64xf32> to vector<4x64xf32>
    %920 = vector.shape_cast %917 : vector<4x64xf32> to vector<1x1x4x64xf32>
    tpu.vector_store %arg18[%c1_1248, %c1_1249, %c0_1250, %c0_1251], %920 {strides = array<i32>} : memref<2x4x4x64xf32, #tpu.memory_space<vmem>>, vector<1x1x4x64xf32>,
    %c24_1252 = arith.constant 24 : index
    %c0_1253 = arith.constant 0 : index
    %921 = tpu.strided_load %arg17[%c24_1252, %c0_1253] {strides = array<i32: 2, 1>} : memref<32x64xf32, #tpu.memory_space<vmem>>, vector<2x64xf32>
    %c25_1254 = arith.constant 25 : index
    %c0_1255 = arith.constant 0 : index
    %922 = tpu.strided_load %arg17[%c25_1254, %c0_1255] {strides = array<i32: 2, 1>} : memref<32x64xf32, #tpu.memory_space<vmem>>, vector<2x64xf32>
    %c28_1256 = arith.constant 28 : index
    %c0_1257 = arith.constant 0 : index
    %923 = tpu.strided_load %arg17[%c28_1256, %c0_1257] {strides = array<i32: 2, 1>} : memref<32x64xf32, #tpu.memory_space<vmem>>, vector<2x64xf32>
    %c29 = arith.constant 29 : index
    %c0_1258 = arith.constant 0 : index
    %924 = tpu.strided_load %arg17[%c29, %c0_1258] {strides = array<i32: 2, 1>} : memref<32x64xf32, #tpu.memory_space<vmem>>, vector<2x64xf32>
    %925 = arith.maximumf %921, %922 : vector<2x64xf32>
    %926 = arith.maximumf %923, %924 : vector<2x64xf32>
    %927 = arith.maximumf %925, %926 : vector<2x64xf32>
    %928 = arith.addf %927, %864 : vector<2x64xf32>
    %cst_1259 = arith.constant 0.000000e+00 : f32
    %929 = vector.broadcast %cst_1259 : f32 to vector<2x64xf32>
    %930 = arith.maximumf %928, %929 : vector<2x64xf32>
    %931 = tpu.concatenate %865, %930, %865 in 0 : vector<1x64xf32>, vector<2x64xf32>, vector<1x64xf32> -> vector<4x64xf32>
    %c1_1260 = arith.constant 1 : index
    %c2_1261 = arith.constant 2 : index
    %c0_1262 = arith.constant 0 : index
    %c0_1263 = arith.constant 0 : index
    %932 = vector.load %arg18[%c1_1260, %c2_1261, %c0_1262, %c0_1263] : memref<2x4x4x64xf32, #tpu.memory_space<vmem>>, vector<1x1x4x64xf32>
    %933 = vector.shape_cast %932 : vector<1x1x4x64xf32> to vector<4x64xf32>
    %934 = vector.shape_cast %931 : vector<4x64xf32> to vector<1x1x4x64xf32>
    tpu.vector_store %arg18[%c1_1260, %c2_1261, %c0_1262, %c0_1263], %934 {strides = array<i32>} : memref<2x4x4x64xf32, #tpu.memory_space<vmem>>, vector<1x1x4x64xf32>,
    %c0_1264 = arith.constant 0 : index
    %c0_1265 = arith.constant 0 : index
    %c0_1266 = arith.constant 0 : index
    %c0_1267 = arith.constant 0 : index
    %935 = vector.load %arg18[%c0_1264, %c0_1265, %c0_1266, %c0_1267] : memref<2x4x4x64xf32, #tpu.memory_space<vmem>>, vector<1x1x2x64xf32>
    %936 = vector.shape_cast %935 : vector<1x1x2x64xf32> to vector<2x64xf32>
    %c0_1268 = arith.constant 0 : index
    %c0_1269 = arith.constant 0 : index
    %c1_1270 = arith.constant 1 : index
    %c0_1271 = arith.constant 0 : index
    %937 = vector.load %arg18[%c0_1268, %c0_1269, %c1_1270, %c0_1271] : memref<2x4x4x64xf32, #tpu.memory_space<vmem>>, vector<1x1x2x64xf32>
    %938 = vector.shape_cast %937 : vector<1x1x2x64xf32> to vector<2x64xf32>
    %c0_1272 = arith.constant 0 : index
    %c0_1273 = arith.constant 0 : index
    %c2_1274 = arith.constant 2 : index
    %c0_1275 = arith.constant 0 : index
    %939 = vector.load %arg18[%c0_1272, %c0_1273, %c2_1274, %c0_1275] : memref<2x4x4x64xf32, #tpu.memory_space<vmem>>, vector<1x1x2x64xf32>
    %940 = vector.shape_cast %939 : vector<1x1x2x64xf32> to vector<2x64xf32>
    %c0_1276 = arith.constant 0 : index
    %c1_1277 = arith.constant 1 : index
    %c0_1278 = arith.constant 0 : index
    %c0_1279 = arith.constant 0 : index
    %941 = vector.load %arg18[%c0_1276, %c1_1277, %c0_1278, %c0_1279] : memref<2x4x4x64xf32, #tpu.memory_space<vmem>>, vector<1x1x2x64xf32>
    %942 = vector.shape_cast %941 : vector<1x1x2x64xf32> to vector<2x64xf32>
    %c0_1280 = arith.constant 0 : index
    %c1_1281 = arith.constant 1 : index
    %c1_1282 = arith.constant 1 : index
    %c0_1283 = arith.constant 0 : index
    %943 = vector.load %arg18[%c0_1280, %c1_1281, %c1_1282, %c0_1283] : memref<2x4x4x64xf32, #tpu.memory_space<vmem>>, vector<1x1x2x64xf32>
    %944 = vector.shape_cast %943 : vector<1x1x2x64xf32> to vector<2x64xf32>
    %c0_1284 = arith.constant 0 : index
    %c1_1285 = arith.constant 1 : index
    %c2_1286 = arith.constant 2 : index
    %c0_1287 = arith.constant 0 : index
    %945 = vector.load %arg18[%c0_1284, %c1_1285, %c2_1286, %c0_1287] : memref<2x4x4x64xf32, #tpu.memory_space<vmem>>, vector<1x1x2x64xf32>
    %946 = vector.shape_cast %945 : vector<1x1x2x64xf32> to vector<2x64xf32>
    %c0_1288 = arith.constant 0 : index
    %c2_1289 = arith.constant 2 : index
    %c0_1290 = arith.constant 0 : index
    %c0_1291 = arith.constant 0 : index
    %947 = vector.load %arg18[%c0_1288, %c2_1289, %c0_1290, %c0_1291] : memref<2x4x4x64xf32, #tpu.memory_space<vmem>>, vector<1x1x2x64xf32>
    %948 = vector.shape_cast %947 : vector<1x1x2x64xf32> to vector<2x64xf32>
    %c0_1292 = arith.constant 0 : index
    %c2_1293 = arith.constant 2 : index
    %c1_1294 = arith.constant 1 : index
    %c0_1295 = arith.constant 0 : index
    %949 = vector.load %arg18[%c0_1292, %c2_1293, %c1_1294, %c0_1295] : memref<2x4x4x64xf32, #tpu.memory_space<vmem>>, vector<1x1x2x64xf32>
    %950 = vector.shape_cast %949 : vector<1x1x2x64xf32> to vector<2x64xf32>
    %c0_1296 = arith.constant 0 : index
    %c2_1297 = arith.constant 2 : index
    %c2_1298 = arith.constant 2 : index
    %c0_1299 = arith.constant 0 : index
    %951 = vector.load %arg18[%c0_1296, %c2_1297, %c2_1298, %c0_1299] : memref<2x4x4x64xf32, #tpu.memory_space<vmem>>, vector<1x1x2x64xf32>
    %952 = vector.shape_cast %951 : vector<1x1x2x64xf32> to vector<2x64xf32>
    %953 = tpu.concatenate %936, %938, %940, %942, %944, %946, %948, %950, %952 in 1 : vector<2x64xf32>, vector<2x64xf32>, vector<2x64xf32>, vector<2x64xf32>, vector<2x64xf32>, vector<2x64xf32>, vector<2x64xf32>, vector<2x64xf32>, vector<2x64xf32> -> vector<2x576xf32>
    %c0_1300 = arith.constant 0 : index
    %c0_1301 = arith.constant 0 : index
    %954 = vector.load %arg19[%c0_1300, %c0_1301] : memref<8x576xf32, #tpu.memory_space<vmem>>, vector<2x576xf32>
    tpu.vector_store %arg19[%c0_1300, %c0_1301], %953 {strides = array<i32>} : memref<8x576xf32, #tpu.memory_space<vmem>>, vector<2x576xf32>,
    %c0_1302 = arith.constant 0 : index
    %c1_1303 = arith.constant 1 : index
    %c0_1304 = arith.constant 0 : index
    %c0_1305 = arith.constant 0 : index
    %955 = vector.load %arg18[%c0_1302, %c1_1303, %c0_1304, %c0_1305] : memref<2x4x4x64xf32, #tpu.memory_space<vmem>>, vector<1x1x2x64xf32>
    %956 = vector.shape_cast %955 : vector<1x1x2x64xf32> to vector<2x64xf32>
    %c0_1306 = arith.constant 0 : index
    %c1_1307 = arith.constant 1 : index
    %c1_1308 = arith.constant 1 : index
    %c0_1309 = arith.constant 0 : index
    %957 = vector.load %arg18[%c0_1306, %c1_1307, %c1_1308, %c0_1309] : memref<2x4x4x64xf32, #tpu.memory_space<vmem>>, vector<1x1x2x64xf32>
    %958 = vector.shape_cast %957 : vector<1x1x2x64xf32> to vector<2x64xf32>
    %c0_1310 = arith.constant 0 : index
    %c1_1311 = arith.constant 1 : index
    %c2_1312 = arith.constant 2 : index
    %c0_1313 = arith.constant 0 : index
    %959 = vector.load %arg18[%c0_1310, %c1_1311, %c2_1312, %c0_1313] : memref<2x4x4x64xf32, #tpu.memory_space<vmem>>, vector<1x1x2x64xf32>
    %960 = vector.shape_cast %959 : vector<1x1x2x64xf32> to vector<2x64xf32>
    %c0_1314 = arith.constant 0 : index
    %c2_1315 = arith.constant 2 : index
    %c0_1316 = arith.constant 0 : index
    %c0_1317 = arith.constant 0 : index
    %961 = vector.load %arg18[%c0_1314, %c2_1315, %c0_1316, %c0_1317] : memref<2x4x4x64xf32, #tpu.memory_space<vmem>>, vector<1x1x2x64xf32>
    %962 = vector.shape_cast %961 : vector<1x1x2x64xf32> to vector<2x64xf32>
    %c0_1318 = arith.constant 0 : index
    %c2_1319 = arith.constant 2 : index
    %c1_1320 = arith.constant 1 : index
    %c0_1321 = arith.constant 0 : index
    %963 = vector.load %arg18[%c0_1318, %c2_1319, %c1_1320, %c0_1321] : memref<2x4x4x64xf32, #tpu.memory_space<vmem>>, vector<1x1x2x64xf32>
    %964 = vector.shape_cast %963 : vector<1x1x2x64xf32> to vector<2x64xf32>
    %c0_1322 = arith.constant 0 : index
    %c2_1323 = arith.constant 2 : index
    %c2_1324 = arith.constant 2 : index
    %c0_1325 = arith.constant 0 : index
    %965 = vector.load %arg18[%c0_1322, %c2_1323, %c2_1324, %c0_1325] : memref<2x4x4x64xf32, #tpu.memory_space<vmem>>, vector<1x1x2x64xf32>
    %966 = vector.shape_cast %965 : vector<1x1x2x64xf32> to vector<2x64xf32>
    %c0_1326 = arith.constant 0 : index
    %c3_1327 = arith.constant 3 : index
    %c0_1328 = arith.constant 0 : index
    %c0_1329 = arith.constant 0 : index
    %967 = vector.load %arg18[%c0_1326, %c3_1327, %c0_1328, %c0_1329] : memref<2x4x4x64xf32, #tpu.memory_space<vmem>>, vector<1x1x2x64xf32>
    %968 = vector.shape_cast %967 : vector<1x1x2x64xf32> to vector<2x64xf32>
    %c0_1330 = arith.constant 0 : index
    %c3_1331 = arith.constant 3 : index
    %c1_1332 = arith.constant 1 : index
    %c0_1333 = arith.constant 0 : index
    %969 = vector.load %arg18[%c0_1330, %c3_1331, %c1_1332, %c0_1333] : memref<2x4x4x64xf32, #tpu.memory_space<vmem>>, vector<1x1x2x64xf32>
    %970 = vector.shape_cast %969 : vector<1x1x2x64xf32> to vector<2x64xf32>
    %c0_1334 = arith.constant 0 : index
    %c3_1335 = arith.constant 3 : index
    %c2_1336 = arith.constant 2 : index
    %c0_1337 = arith.constant 0 : index
    %971 = vector.load %arg18[%c0_1334, %c3_1335, %c2_1336, %c0_1337] : memref<2x4x4x64xf32, #tpu.memory_space<vmem>>, vector<1x1x2x64xf32>
    %972 = vector.shape_cast %971 : vector<1x1x2x64xf32> to vector<2x64xf32>
    %973 = tpu.concatenate %956, %958, %960, %962, %964, %966, %968, %970, %972 in 1 : vector<2x64xf32>, vector<2x64xf32>, vector<2x64xf32>, vector<2x64xf32>, vector<2x64xf32>, vector<2x64xf32>, vector<2x64xf32>, vector<2x64xf32>, vector<2x64xf32> -> vector<2x576xf32>
    %c2_1338 = arith.constant 2 : index
    %c0_1339 = arith.constant 0 : index
    %974 = vector.load %arg19[%c2_1338, %c0_1339] : memref<8x576xf32, #tpu.memory_space<vmem>>, vector<2x576xf32>
    tpu.vector_store %arg19[%c2_1338, %c0_1339], %973 {strides = array<i32>} : memref<8x576xf32, #tpu.memory_space<vmem>>, vector<2x576xf32>,
    %c1_1340 = arith.constant 1 : index
    %c0_1341 = arith.constant 0 : index
    %c0_1342 = arith.constant 0 : index
    %c0_1343 = arith.constant 0 : index
    %975 = vector.load %arg18[%c1_1340, %c0_1341, %c0_1342, %c0_1343] : memref<2x4x4x64xf32, #tpu.memory_space<vmem>>, vector<1x1x2x64xf32>
    %976 = vector.shape_cast %975 : vector<1x1x2x64xf32> to vector<2x64xf32>
    %c1_1344 = arith.constant 1 : index
    %c0_1345 = arith.constant 0 : index
    %c1_1346 = arith.constant 1 : index
    %c0_1347 = arith.constant 0 : index
    %977 = vector.load %arg18[%c1_1344, %c0_1345, %c1_1346, %c0_1347] : memref<2x4x4x64xf32, #tpu.memory_space<vmem>>, vector<1x1x2x64xf32>
    %978 = vector.shape_cast %977 : vector<1x1x2x64xf32> to vector<2x64xf32>
    %c1_1348 = arith.constant 1 : index
    %c0_1349 = arith.constant 0 : index
    %c2_1350 = arith.constant 2 : index
    %c0_1351 = arith.constant 0 : index
    %979 = vector.load %arg18[%c1_1348, %c0_1349, %c2_1350, %c0_1351] : memref<2x4x4x64xf32, #tpu.memory_space<vmem>>, vector<1x1x2x64xf32>
    %980 = vector.shape_cast %979 : vector<1x1x2x64xf32> to vector<2x64xf32>
    %c1_1352 = arith.constant 1 : index
    %c1_1353 = arith.constant 1 : index
    %c0_1354 = arith.constant 0 : index
    %c0_1355 = arith.constant 0 : index
    %981 = vector.load %arg18[%c1_1352, %c1_1353, %c0_1354, %c0_1355] : memref<2x4x4x64xf32, #tpu.memory_space<vmem>>, vector<1x1x2x64xf32>
    %982 = vector.shape_cast %981 : vector<1x1x2x64xf32> to vector<2x64xf32>
    %c1_1356 = arith.constant 1 : index
    %c1_1357 = arith.constant 1 : index
    %c1_1358 = arith.constant 1 : index
    %c0_1359 = arith.constant 0 : index
    %983 = vector.load %arg18[%c1_1356, %c1_1357, %c1_1358, %c0_1359] : memref<2x4x4x64xf32, #tpu.memory_space<vmem>>, vector<1x1x2x64xf32>
    %984 = vector.shape_cast %983 : vector<1x1x2x64xf32> to vector<2x64xf32>
    %c1_1360 = arith.constant 1 : index
    %c1_1361 = arith.constant 1 : index
    %c2_1362 = arith.constant 2 : index
    %c0_1363 = arith.constant 0 : index
    %985 = vector.load %arg18[%c1_1360, %c1_1361, %c2_1362, %c0_1363] : memref<2x4x4x64xf32, #tpu.memory_space<vmem>>, vector<1x1x2x64xf32>
    %986 = vector.shape_cast %985 : vector<1x1x2x64xf32> to vector<2x64xf32>
    %c1_1364 = arith.constant 1 : index
    %c2_1365 = arith.constant 2 : index
    %c0_1366 = arith.constant 0 : index
    %c0_1367 = arith.constant 0 : index
    %987 = vector.load %arg18[%c1_1364, %c2_1365, %c0_1366, %c0_1367] : memref<2x4x4x64xf32, #tpu.memory_space<vmem>>, vector<1x1x2x64xf32>
    %988 = vector.shape_cast %987 : vector<1x1x2x64xf32> to vector<2x64xf32>
    %c1_1368 = arith.constant 1 : index
    %c2_1369 = arith.constant 2 : index
    %c1_1370 = arith.constant 1 : index
    %c0_1371 = arith.constant 0 : index
    %989 = vector.load %arg18[%c1_1368, %c2_1369, %c1_1370, %c0_1371] : memref<2x4x4x64xf32, #tpu.memory_space<vmem>>, vector<1x1x2x64xf32>
    %990 = vector.shape_cast %989 : vector<1x1x2x64xf32> to vector<2x64xf32>
    %c1_1372 = arith.constant 1 : index
    %c2_1373 = arith.constant 2 : index
    %c2_1374 = arith.constant 2 : index
    %c0_1375 = arith.constant 0 : index
    %991 = vector.load %arg18[%c1_1372, %c2_1373, %c2_1374, %c0_1375] : memref<2x4x4x64xf32, #tpu.memory_space<vmem>>, vector<1x1x2x64xf32>
    %992 = vector.shape_cast %991 : vector<1x1x2x64xf32> to vector<2x64xf32>
    %993 = tpu.concatenate %976, %978, %980, %982, %984, %986, %988, %990, %992 in 1 : vector<2x64xf32>, vector<2x64xf32>, vector<2x64xf32>, vector<2x64xf32>, vector<2x64xf32>, vector<2x64xf32>, vector<2x64xf32>, vector<2x64xf32>, vector<2x64xf32> -> vector<2x576xf32>
    %c4_1376 = arith.constant 4 : index
    %c0_1377 = arith.constant 0 : index
    %994 = vector.load %arg19[%c4_1376, %c0_1377] : memref<8x576xf32, #tpu.memory_space<vmem>>, vector<2x576xf32>
    tpu.vector_store %arg19[%c4_1376, %c0_1377], %993 {strides = array<i32>} : memref<8x576xf32, #tpu.memory_space<vmem>>, vector<2x576xf32>,
    %c1_1378 = arith.constant 1 : index
    %c1_1379 = arith.constant 1 : index
    %c0_1380 = arith.constant 0 : index
    %c0_1381 = arith.constant 0 : index
    %995 = vector.load %arg18[%c1_1378, %c1_1379, %c0_1380, %c0_1381] : memref<2x4x4x64xf32, #tpu.memory_space<vmem>>, vector<1x1x2x64xf32>
    %996 = vector.shape_cast %995 : vector<1x1x2x64xf32> to vector<2x64xf32>
    %c1_1382 = arith.constant 1 : index
    %c1_1383 = arith.constant 1 : index
    %c1_1384 = arith.constant 1 : index
    %c0_1385 = arith.constant 0 : index
    %997 = vector.load %arg18[%c1_1382, %c1_1383, %c1_1384, %c0_1385] : memref<2x4x4x64xf32, #tpu.memory_space<vmem>>, vector<1x1x2x64xf32>
    %998 = vector.shape_cast %997 : vector<1x1x2x64xf32> to vector<2x64xf32>
    %c1_1386 = arith.constant 1 : index
    %c1_1387 = arith.constant 1 : index
    %c2_1388 = arith.constant 2 : index
    %c0_1389 = arith.constant 0 : index
    %999 = vector.load %arg18[%c1_1386, %c1_1387, %c2_1388, %c0_1389] : memref<2x4x4x64xf32, #tpu.memory_space<vmem>>, vector<1x1x2x64xf32>
    %1000 = vector.shape_cast %999 : vector<1x1x2x64xf32> to vector<2x64xf32>
    %c1_1390 = arith.constant 1 : index
    %c2_1391 = arith.constant 2 : index
    %c0_1392 = arith.constant 0 : index
    %c0_1393 = arith.constant 0 : index
    %1001 = vector.load %arg18[%c1_1390, %c2_1391, %c0_1392, %c0_1393] : memref<2x4x4x64xf32, #tpu.memory_space<vmem>>, vector<1x1x2x64xf32>
    %1002 = vector.shape_cast %1001 : vector<1x1x2x64xf32> to vector<2x64xf32>
    %c1_1394 = arith.constant 1 : index
    %c2_1395 = arith.constant 2 : index
    %c1_1396 = arith.constant 1 : index
    %c0_1397 = arith.constant 0 : index
    %1003 = vector.load %arg18[%c1_1394, %c2_1395, %c1_1396, %c0_1397] : memref<2x4x4x64xf32, #tpu.memory_space<vmem>>, vector<1x1x2x64xf32>
    %1004 = vector.shape_cast %1003 : vector<1x1x2x64xf32> to vector<2x64xf32>
    %c1_1398 = arith.constant 1 : index
    %c2_1399 = arith.constant 2 : index
    %c2_1400 = arith.constant 2 : index
    %c0_1401 = arith.constant 0 : index
    %1005 = vector.load %arg18[%c1_1398, %c2_1399, %c2_1400, %c0_1401] : memref<2x4x4x64xf32, #tpu.memory_space<vmem>>, vector<1x1x2x64xf32>
    %1006 = vector.shape_cast %1005 : vector<1x1x2x64xf32> to vector<2x64xf32>
    %c1_1402 = arith.constant 1 : index
    %c3_1403 = arith.constant 3 : index
    %c0_1404 = arith.constant 0 : index
    %c0_1405 = arith.constant 0 : index
    %1007 = vector.load %arg18[%c1_1402, %c3_1403, %c0_1404, %c0_1405] : memref<2x4x4x64xf32, #tpu.memory_space<vmem>>, vector<1x1x2x64xf32>
    %1008 = vector.shape_cast %1007 : vector<1x1x2x64xf32> to vector<2x64xf32>
    %c1_1406 = arith.constant 1 : index
    %c3_1407 = arith.constant 3 : index
    %c1_1408 = arith.constant 1 : index
    %c0_1409 = arith.constant 0 : index
    %1009 = vector.load %arg18[%c1_1406, %c3_1407, %c1_1408, %c0_1409] : memref<2x4x4x64xf32, #tpu.memory_space<vmem>>, vector<1x1x2x64xf32>
    %1010 = vector.shape_cast %1009 : vector<1x1x2x64xf32> to vector<2x64xf32>
    %c1_1410 = arith.constant 1 : index
    %c3_1411 = arith.constant 3 : index
    %c2_1412 = arith.constant 2 : index
    %c0_1413 = arith.constant 0 : index
    %1011 = vector.load %arg18[%c1_1410, %c3_1411, %c2_1412, %c0_1413] : memref<2x4x4x64xf32, #tpu.memory_space<vmem>>, vector<1x1x2x64xf32>
    %1012 = vector.shape_cast %1011 : vector<1x1x2x64xf32> to vector<2x64xf32>
    %1013 = tpu.concatenate %996, %998, %1000, %1002, %1004, %1006, %1008, %1010, %1012 in 1 : vector<2x64xf32>, vector<2x64xf32>, vector<2x64xf32>, vector<2x64xf32>, vector<2x64xf32>, vector<2x64xf32>, vector<2x64xf32>, vector<2x64xf32>, vector<2x64xf32> -> vector<2x576xf32>
    %c6_1414 = arith.constant 6 : index
    %c0_1415 = arith.constant 0 : index
    %1014 = vector.load %arg19[%c6_1414, %c0_1415] : memref<8x576xf32, #tpu.memory_space<vmem>>, vector<2x576xf32>
    tpu.vector_store %arg19[%c6_1414, %c0_1415], %1013 {strides = array<i32>} : memref<8x576xf32, #tpu.memory_space<vmem>>, vector<2x576xf32>,
    %c0_1416 = arith.constant 0 : index
    %c0_1417 = arith.constant 0 : index
    %1015 = vector.load %arg19[%c0_1416, %c0_1417] : memref<8x576xf32, #tpu.memory_space<vmem>>, vector<8x576xf32>
    %c0_1418 = arith.constant 0 : index
    %c0_1419 = arith.constant 0 : index
    %1016 = vector.load %arg8[%c0_1418, %c0_1419] : memref<576x64xf32, #tpu.memory_space<vmem>>, vector<576x64xf32>
    %cst_1420 = arith.constant dense<0.000000e+00> : vector<8x64xf32>
    %1017 = tpu.matmul %1015, %1016, %cst_1420 {dimension_numbers = #tpu.dot_dimension_numbers<[1], [0], [0], [1], [0, 0, 1, 1], [], []>} : vector<8x576xf32>, vector<576x64xf32>, vector<8x64xf32> -> vector<8x64xf32>
    %c0_1421 = arith.constant 0 : index
    %c0_1422 = arith.constant 0 : index
    %1018 = vector.load %arg20[%c0_1421, %c0_1422] : memref<8x64xf32, #tpu.memory_space<vmem>>, vector<8x64xf32>
    tpu.vector_store %arg20[%c0_1421, %c0_1422], %1017 {strides = array<i32>} : memref<8x64xf32, #tpu.memory_space<vmem>>, vector<8x64xf32>,
    %c0_1423 = arith.constant 0 : index
    %c0_1424 = arith.constant 0 : index
    %1019 = vector.load %arg9[%c0_1423, %c0_1424] : memref<1x64xf32, #tpu.memory_space<vmem>>, vector<1x64xf32>
    %1020 = vector.shape_cast %1019 : vector<1x64xf32> to vector<1x64xf32>
    %1021 = vector.broadcast %1020 : vector<1x64xf32> to vector<4x64xf32>
    %c0_1425 = arith.constant 0 : index
    %c0_1426 = arith.constant 0 : index
    %1022 = vector.load %arg20[%c0_1425, %c0_1426] : memref<8x64xf32, #tpu.memory_space<vmem>>, vector<4x64xf32>
    %1023 = arith.addf %1022, %1021 : vector<4x64xf32>
    %cst_1427 = arith.constant 0.000000e+00 : f32
    %1024 = vector.broadcast %cst_1427 : f32 to vector<4x64xf32>
    %1025 = arith.maximumf %1023, %1024 : vector<4x64xf32>
    %cst_1428 = arith.constant dense<0.000000e+00> : vector<64xf32>
    %1026 = vector.multi_reduction <add>, %1025, %cst_1428 [0] : vector<4x64xf32> to vector<64xf32>
    %1027 = vector.shape_cast %1026 : vector<64xf32> to vector<1x64xf32>
    %cst_1429 = arith.constant 2.500000e-01 : f32
    %1028 = vector.broadcast %cst_1429 : f32 to vector<1x64xf32>
    %1029 = arith.mulf %1027, %1028 : vector<1x64xf32>
    %c0_1430 = arith.constant 0 : index
    %c0_1431 = arith.constant 0 : index
    %1030 = vector.load %arg10[%c0_1430, %c0_1431] : memref<2x64xf32, #tpu.memory_space<vmem>>, vector<1x64xf32>
    tpu.vector_store %arg10[%c0_1430, %c0_1431], %1029 {strides = array<i32>} : memref<2x64xf32, #tpu.memory_space<vmem>>, vector<1x64xf32>,
    %c4_1432 = arith.constant 4 : index
    %c0_1433 = arith.constant 0 : index
    %1031 = vector.load %arg20[%c4_1432, %c0_1433] : memref<8x64xf32, #tpu.memory_space<vmem>>, vector<4x64xf32>
    %1032 = arith.addf %1031, %1021 : vector<4x64xf32>
    %cst_1434 = arith.constant 0.000000e+00 : f32
    %1033 = vector.broadcast %cst_1434 : f32 to vector<4x64xf32>
    %1034 = arith.maximumf %1032, %1033 : vector<4x64xf32>
    %cst_1435 = arith.constant dense<0.000000e+00> : vector<64xf32>
    %1035 = vector.multi_reduction <add>, %1034, %cst_1435 [0] : vector<4x64xf32> to vector<64xf32>
    %1036 = vector.shape_cast %1035 : vector<64xf32> to vector<1x64xf32>
    %cst_1436 = arith.constant 2.500000e-01 : f32
    %1037 = vector.broadcast %cst_1436 : f32 to vector<1x64xf32>
    %1038 = arith.mulf %1036, %1037 : vector<1x64xf32>
    %c1_1437 = arith.constant 1 : index
    %c0_1438 = arith.constant 0 : index
    %1039 = vector.load %arg10[%c1_1437, %c0_1438] : memref<2x64xf32, #tpu.memory_space<vmem>>, vector<1x64xf32>
    tpu.vector_store %arg10[%c1_1437, %c0_1438], %1038 {strides = array<i32>} : memref<2x64xf32, #tpu.memory_space<vmem>>, vector<1x64xf32>,
    return
  }
  func.func @transform_0(%arg0: i32) -> (i32, i32) {
    %c0_i32 = arith.constant 0 : i32
    %c0_i32_0 = arith.constant 0 : i32
    return %arg0, %c0_i32 : i32, i32
  }
  func.func @transform_1(%arg0: i32) -> (i32, i32) {
    %c0_i32 = arith.constant 0 : i32
    %c0_i32_0 = arith.constant 0 : i32
    %c0_i32_1 = arith.constant 0 : i32
    return %c0_i32, %c0_i32_0 : i32, i32
  }
  func.func @transform_2(%arg0: i32) -> (i32, i32) {
    %c0_i32 = arith.constant 0 : i32
    %c0_i32_0 = arith.constant 0 : i32
    %c0_i32_1 = arith.constant 0 : i32
    return %c0_i32, %c0_i32_0 : i32, i32
  }
  func.func @transform_3(%arg0: i32) -> (i32, i32) {
    %c0_i32 = arith.constant 0 : i32
    %c0_i32_0 = arith.constant 0 : i32
    %c0_i32_1 = arith.constant 0 : i32
    return %c0_i32, %c0_i32_0 : i32, i32
  }
  func.func @transform_4(%arg0: i32) -> (i32, i32) {
    %c0_i32 = arith.constant 0 : i32
    %c0_i32_0 = arith.constant 0 : i32
    %c0_i32_1 = arith.constant 0 : i32
    return %c0_i32, %c0_i32_0 : i32, i32
  }
  func.func @transform_5(%arg0: i32) -> (i32, i32) {
    %c0_i32 = arith.constant 0 : i32
    %c0_i32_0 = arith.constant 0 : i32
    %c0_i32_1 = arith.constant 0 : i32
    return %c0_i32, %c0_i32_0 : i32, i32
  }
  func.func @transform_6(%arg0: i32) -> (i32, i32) {
    %c0_i32 = arith.constant 0 : i32
    %c0_i32_0 = arith.constant 0 : i32
    %c0_i32_1 = arith.constant 0 : i32
    return %c0_i32, %c0_i32_0 : i32, i32
  }
  func.func @transform_7(%arg0: i32) -> (i32, i32) {
    %c0_i32 = arith.constant 0 : i32
    %c0_i32_0 = arith.constant 0 : i32
    %c0_i32_1 = arith.constant 0 : i32
    return %c0_i32, %c0_i32_0 : i32, i32
  }
  func.func @transform_8(%arg0: i32) -> (i32, i32) {
    %c0_i32 = arith.constant 0 : i32
    %c0_i32_0 = arith.constant 0 : i32
    %c0_i32_1 = arith.constant 0 : i32
    return %c0_i32, %c0_i32_0 : i32, i32
  }
  func.func @transform_9(%arg0: i32) -> (i32, i32) {
    %c0_i32 = arith.constant 0 : i32
    %c0_i32_0 = arith.constant 0 : i32
    return %arg0, %c0_i32 : i32, i32
  }
}

</mosaic_0001>

<bundles_post_ra>
// kernel: tpu_custom_call.1
= control target key start
LH: loop header
LB: loop body
LE: loop exit
PB: predicated region body
PF: predicated region fallthrough
CT: control target
= control target key end

     0   :  { %vm99_vm0 = vcmask 130048   ;;  %s6250_s0 = inlined_call_operand.vmem [shape: f32[512,16], index: 0, kind: input, shape index: {}]   ;;  %s6251_s1 = inlined_call_operand.vmem [shape: f32[16,64], index: 1, kind: input, shape index: {}]   ;;  %s6252_s2 = inlined_call_operand.vmem [shape: f32[1,64], index: 2, kind: input, shape index: {}]   ;;  %s6253_s3 = inlined_call_operand.vmem [shape: f32[576,64], index: 3, kind: input, shape index: {}]   ;;  %s6254_s4 = inlined_call_operand.vmem [shape: f32[1,64], index: 4, kind: input, shape index: {}]   ;;  %s6255_s5 = inlined_call_operand.vmem [shape: f32[576,64], index: 5, kind: input, shape index: {}]   ;;  %s6256_s6 = inlined_call_operand.vmem [shape: f32[1,64], index: 6, kind: input, shape index: {}]   ;;  %s6257_s7 = inlined_call_operand.vmem [shape: f32[576,64], index: 7, kind: input, shape index: {}]   ;;  %s6258_s8 = inlined_call_operand.vmem [shape: f32[1,64], index: 8, kind: input, shape index: {}]   ;;  %s6259_s9 = inlined_call_operand.hbm [shape: f32[2,64], index: 9, kind: output, shape index: {}]  }
   0x1   :  { %v98_v0 = vld [vmem:[%s6251_s1 + $0x8] sm:$0xff]  ;;  %v97_v1 = vld [vmem:[%s6251_s1] sm:$0xff]  ;;  %v35_v4 = vld [vmem:[%s6250_s0 + $0x10] sm:$0xff] }
   0x2   :  { %v33_v2 = vld [vmem:[%s6250_s0] sm:$0xff]  ;;  %4297 = vmatprep.subr.mxu0 %v98_v0  ;;  %v34_v3 = vld [vmem:[%s6250_s0 + $0x8] sm:$0xff]  ;;  %v36_v5 = vld [vmem:[%s6250_s0 + $0x18] sm:$0xff] }
   0x3   :  { %4301 = vmatprep.mubr.msk.f32.mxu0 %vm99_vm0, %v33_v2  ;;  %4298 = vmatpush3.msra.mxu0 %v98_v0  ;;  %v37_v6 = vld [vmem:[%s6250_s0 + $0x20] sm:$0xff]  ;;  %v38_v7 = vld [vmem:[%s6250_s0 + $0x28] sm:$0xff]  ;;  %v39_v8 = vld [vmem:[%s6250_s0 + $0x30] sm:$0xff] }
   0x4   :  { %4299 = vmatprep.subr.mxu0 %v97_v1  ;;  %v40_v9 = vld [vmem:[%s6250_s0 + $0x38] sm:$0xff]  ;;  %v41_v10 = vld [vmem:[%s6250_s0 + $0x40] sm:$0xff]  ;;  %v42_v11 = vld [vmem:[%s6250_s0 + $0x48] sm:$0xff] }
   0x5   :  { %4300 = vmatpush3.msra.mxu0 %v97_v1  ;;  %v43_v12 = vld [vmem:[%s6250_s0 + $0x50] sm:$0xff]  ;;  %v44_v13 = vld [vmem:[%s6250_s0 + $0x58] sm:$0xff] }
   0x6   :  { %4302 = vmatmul.mubr.msk.f32.vlgmr.msra.gmra.mxu0 %vm99_vm0, %v34_v3 }
   0x7   :  { %4304 = vmatprep.mubr.msk.f32.mxu0 %vm99_vm0, %v35_v4 }
   0xa   :  { %4305 = vmatmul.mubr.msk.f32.gmra.mxu0 %vm99_vm0, %v36_v5 }
   0xb   :  { %4307 = vmatprep.mubr.msk.f32.mxu0 %vm99_vm0, %v37_v6 }
   0xe   :  { %4308 = vmatmul.mubr.msk.f32.gmra.mxu0 %vm99_vm0, %v38_v7 }
   0xf   :  { %4310 = vmatprep.mubr.msk.f32.mxu0 %vm99_vm0, %v39_v8 }
  0x12   :  { %4311 = vmatmul.mubr.msk.f32.gmra.mxu0 %vm99_vm0, %v40_v9 }
  0x13   :  { %4313 = vmatprep.mubr.msk.f32.mxu0 %vm99_vm0, %v41_v10 }
  0x16   :  { %4314 = vmatmul.mubr.msk.f32.gmra.mxu0 %vm99_vm0, %v42_v11 }
  0x17   :  { %4316 = vmatprep.mubr.msk.f32.mxu0 %vm99_vm0, %v43_v12 }
  0x18   :  { %14 = vsyncpa [#allocation13], 0  ;;  %v45_v14 = vld [vmem:[%s6250_s0 + $0x60] sm:$0xff]  ;;  %v46_v15 = vld [vmem:[%s6250_s0 + $0x68] sm:$0xff]  ;;  %vm677_vm1 = vcmask 523264   ;;  %vm750_vm2 = vcmask 517120  }
  0x19   :  { %v47_v16 = vld [vmem:[%s6250_s0 + $0x70] sm:$0xff]  ;;  %v48_v17 = vld [vmem:[%s6250_s0 + $0x78] sm:$0xff]  ;;  %v49_v18 = vld [vmem:[%s6250_s0 + $0x80] sm:$0xff]  ;;  %v4504_v54 = vmov 0.0   ;;  %vm770_vm3 = vcmask 1040384   ;;  %s4505_s20 = smov 64  }
  0x1a   :  { %4317 = vmatmul.mubr.msk.f32.gmra.mxu0 %vm99_vm0, %v44_v13  ;;  %v50_v19 = vld [vmem:[%s6250_s0 + $0x88] sm:$0xff]  ;;  %v51_v20 = vld [vmem:[%s6250_s0 + $0x90] sm:$0xff]  ;;  %v52_v21 = vld [vmem:[%s6250_s0 + $0x98] sm:$0xff]  ;;  %749 = vst.msk [vmem:[#allocation3] sm:$0xff] %vm677_vm1, %v4504_v54  ;;  %vm2299_vm4 = vcmask 521216   ;;  %vm2500_vm5 = vcmask 519168  }
  0x1b   :  { %4319 = vmatprep.mubr.msk.f32.mxu0 %vm99_vm0, %v45_v14  ;;  %v53_v22 = vld [vmem:[%s6250_s0 + $0xa0] sm:$0xff]  ;;  %v54_v23 = vld [vmem:[%s6250_s0 + $0xa8] sm:$0xff]  ;;  %v55_v24 = vld [vmem:[%s6250_s0 + $0xb0] sm:$0xff]  ;;  %751 = vst.msk [vmem:[#allocation3 + $0x8] sm:$0x3] %vm750_vm2, %v4504_v54  ;;  %vm2550_vm6 = vcmask 523268  }
  0x1c   :  { %v56_v25 = vld [vmem:[%s6250_s0 + $0xb8] sm:$0xff]  ;;  %v57_v26 = vld [vmem:[%s6250_s0 + $0xc0] sm:$0xff]  ;;  %v58_v27 = vld [vmem:[%s6250_s0 + $0xc8] sm:$0xff]  ;;  %753 = vst.msk [vmem:[#allocation3 + $0x90] sm:$0xff] %vm677_vm1, %v4504_v54  ;;  %vm2319_vm7 = vcmask 1044480   ;;  %vm3340_vm8 = vcmask 519170  }
  0x1d   :  { %v59_v28 = vld [vmem:[%s6250_s0 + $0xd0] sm:$0xff]  ;;  %v60_v29 = vld [vmem:[%s6250_s0 + $0xd8] sm:$0xff]  ;;  %v61_v30 = vld [vmem:[%s6250_s0 + $0xe0] sm:$0xff]  ;;  %754 = vst.msk [vmem:[#allocation3 + $0x98] sm:$0x3] %vm750_vm2, %v4504_v54  ;;  %vm3440_vm9 = vcmask 523270  }
  0x1e   :  { %4320 = vmatmul.mubr.msk.f32.gmra.mxu0 %vm99_vm0, %v46_v15  ;;  %v62_v31 = vld [vmem:[%s6250_s0 + $0xe8] sm:$0xff]  ;;  %v63_v32 = vld [vmem:[%s6250_s0 + $0xf0] sm:$0xff]  ;;  %v64_v33 = vld [vmem:[%s6250_s0 + $0xf8] sm:$0xff]  ;;  %924 = vst.msk [vmem:[#allocation3 + $0xa0] sm:$0xff] %vm677_vm1, %v4504_v54  ;;  %vm3190_vm10 = vcmask 1042432   ;;  %vm3390_vm11 = vcmask 521220  }
  0x1f   :  { %4322 = vmatprep.mubr.msk.f32.mxu0 %vm99_vm0, %v47_v16  ;;  %v65_v34 = vld [vmem:[%s6250_s0 + $0x100] sm:$0xff]  ;;  %v66_v35 = vld [vmem:[%s6250_s0 + $0x108] sm:$0xff]  ;;  %v67_v36 = vld [vmem:[%s6250_s0 + $0x110] sm:$0xff]  ;;  %925 = vst.msk [vmem:[#allocation3 + $0xa8] sm:$0x3] %vm750_vm2, %v4504_v54  ;;  %vm4506_vm12 = vmmov 0  }
  0x20   :  { %v68_v37 = vld [vmem:[%s6250_s0 + $0x118] sm:$0xff]  ;;  %v69_v38 = vld [vmem:[%s6250_s0 + $0x120] sm:$0xff]  ;;  %v70_v39 = vld [vmem:[%s6250_s0 + $0x128] sm:$0xff]  ;;  %927 = vst.msk [vmem:[#allocation3 + $0x130] sm:$0xff] %vm677_vm1, %v4504_v54  ;;  %vm3751_vm13 = vcmask 516096  }
  0x21   :  { %v71_v40 = vld [vmem:[%s6250_s0 + $0x130] sm:$0xff]  ;;  %v72_v41 = vld [vmem:[%s6250_s0 + $0x138] sm:$0xff]  ;;  %v73_v42 = vld [vmem:[%s6250_s0 + $0x140] sm:$0xff]  ;;  %928 = vst.msk [vmem:[#allocation3 + $0x138] sm:$0x3] %vm750_vm2, %v4504_v54 }
  0x22   :  { %4323 = vmatmul.mubr.msk.f32.gmra.mxu0 %vm99_vm0, %v48_v17  ;;  %v74_v43 = vld [vmem:[%s6250_s0 + $0x148] sm:$0xff]  ;;  %v75_v44 = vld [vmem:[%s6250_s0 + $0x150] sm:$0xff]  ;;  %v76_v45 = vld [vmem:[%s6250_s0 + $0x158] sm:$0xff]  ;;  %2300 = vst.msk [vmem:[#allocation6] sm:$0x3f] %vm2299_vm4, %v4504_v54 }
  0x23   :  { %4325 = vmatprep.mubr.msk.f32.mxu0 %vm99_vm0, %v49_v18  ;;  %v77_v46 = vld [vmem:[%s6250_s0 + $0x160] sm:$0xff]  ;;  %v78_v47 = vld [vmem:[%s6250_s0 + $0x168] sm:$0xff]  ;;  %v79_v48 = vld [vmem:[%s6250_s0 + $0x170] sm:$0xff]  ;;  %2302 = vst.msk [vmem:[#allocation6 + $0x28] sm:$0x3f] %vm2299_vm4, %v4504_v54 }
  0x24   :  { %v80_v49 = vld [vmem:[%s6250_s0 + $0x178] sm:$0xff]  ;;  %v81_v50 = vld [vmem:[%s6250_s0 + $0x180] sm:$0xff]  ;;  %v82_v51 = vld [vmem:[%s6250_s0 + $0x188] sm:$0xff]  ;;  %2384 = vst.msk [vmem:[#allocation6 + $0x30] sm:$0x3f] %vm2299_vm4, %v4504_v54 }
  0x25   :  { %v83_v52 = vld [vmem:[%s6250_s0 + $0x190] sm:$0xff]  ;;  %v84_v53 = vld [vmem:[%s6250_s0 + $0x198] sm:$0xff]  ;;  %v85_v55 = vld [vmem:[%s6250_s0 + $0x1a0] sm:$0xff]  ;;  %2386 = vst.msk [vmem:[#allocation6 + $0x58] sm:$0x3f] %vm2299_vm4, %v4504_v54 }
  0x26   :  { %4326 = vmatmul.mubr.msk.f32.gmra.mxu0 %vm99_vm0, %v50_v19  ;;  %v86_v56 = vld [vmem:[%s6250_s0 + $0x1a8] sm:$0xff]  ;;  %v87_v57 = vld [vmem:[%s6250_s0 + $0x1b0] sm:$0xff]  ;;  %v88_v58 = vld [vmem:[%s6250_s0 + $0x1b8] sm:$0xff]  ;;  %3171 = vst.msk [vmem:[#allocation9] sm:$0xf] %vm2500_vm5, %v4504_v54 }
  0x27   :  { %4328 = vmatprep.mubr.msk.f32.mxu0 %vm99_vm0, %v51_v20  ;;  %v1792_v59 = vld [vmem:[%s6253_s3 + $0x238] sm:$0xff]  ;;  %v89_v60 = vld [vmem:[%s6250_s0 + $0x1c0] sm:$0xff]  ;;  %v1791_v61 = vld [vmem:[%s6253_s3 + $0x230] sm:$0xff]  ;;  %3173 = vst.msk [vmem:[#allocation9 + $0xc] sm:$0xf] %vm2500_vm5, %v4504_v54 }
  0x28   :  { %4397 = vmatprep.subr.mxu0 %v1792_v59  ;;  %v90_v62 = vld [vmem:[%s6250_s0 + $0x1c8] sm:$0xff]  ;;  %v91_v0 = vld [vmem:[%s6250_s0 + $0x1d0] sm:$0xff]  ;;  %v1789_v1 = vld [vmem:[%s6253_s3 + $0x220] sm:$0xff]  ;;  %3215 = vst.msk [vmem:[#allocation9 + $0x10] sm:$0xf] %vm2500_vm5, %v4504_v54 }
  0x29   :  { %4398 = vmatpush3.msra.mxu0 %v1792_v59  ;;  %v1790_v63 = vld [vmem:[%s6253_s3 + $0x228] sm:$0xff]  ;;  %v92_v2 = vld [vmem:[%s6250_s0 + $0x1d8] sm:$0xff]  ;;  %v93_v4 = vld [vmem:[%s6250_s0 + $0x1e0] sm:$0xff]  ;;  %3217 = vst.msk [vmem:[#allocation9 + $0x1c] sm:$0xf] %vm2500_vm5, %v4504_v54 }
  0x2a   :  { %4329 = vmatmul.mubr.msk.f32.gmra.mxu0 %vm99_vm0, %v52_v21  ;;  %4399 = vmatprep.subr.mxu0 %v1791_v61  ;;  %v1788_v3 = vld [vmem:[%s6253_s3 + $0x218] sm:$0xff]  ;;  %v1787_v5 = vld [vmem:[%s6253_s3 + $0x210] sm:$0xff]  ;;  %v94_v6 = vld [vmem:[%s6250_s0 + $0x1e8] sm:$0xff] }
  0x2b   :  { %4331 = vmatprep.mubr.msk.f32.mxu0 %vm99_vm0, %v53_v22  ;;  %4400 = vmatpush3.msra.mxu0 %v1791_v61  ;;  %v95_v7 = vld [vmem:[%s6250_s0 + $0x1f0] sm:$0xff]  ;;  %v1786_v8 = vld [vmem:[%s6253_s3 + $0x208] sm:$0xff]  ;;  %v1785_v9 = vld [vmem:[%s6253_s3 + $0x200] sm:$0xff] }
  0x2c   :  { %4401 = vmatprep.subr.mxu0 %v1790_v63  ;;  %v96_v10 = vld [vmem:[%s6250_s0 + $0x1f8] sm:$0xff]  ;;  %v1751_v14 = vld [vmem:[%s6253_s3 + $0xf0] sm:$0xff]  ;;  %v1750_v17 = vld [vmem:[%s6253_s3 + $0xe8] sm:$0xff] }
  0x2d   :  { %4402 = vmatpush3.msra.mxu0 %v1790_v63  ;;  %v1343_v11 = vld [vmem:[#allocation3 + $0x92] sm:$0xff]  ;;  %v1734_v19 = vld [vmem:[%s6253_s3 + $0x68] sm:$0xff]  ;;  %v1749_v20 = vld [vmem:[%s6253_s3 + $0xe0] sm:$0xff] }
  0x2e   :  { %4332 = vmatmul.mubr.msk.f32.gmra.mxu0 %vm99_vm0, %v54_v23  ;;  %4403 = vmatprep.subr.mxu0 %v1789_v1  ;;  %1368 = vst.msk [vmem:[#allocation4 + $0x138] sm:$0xff] %vm677_vm1, %v1343_v11  ;;  %v1752_v12 = vld [vmem:[%s6253_s3 + $0xf8] sm:$0xff]  ;;  %v1735_v16 = vld [vmem:[%s6253_s3 + $0x70] sm:$0xff]  ;;  %v1733_v22 = vld [vmem:[%s6253_s3 + $0x60] sm:$0xff] }
  0x2f   :  { %4334 = vmatprep.mubr.msk.f32.mxu0 %vm99_vm0, %v55_v24  ;;  %4404 = vmatpush3.msra.mxu0 %v1789_v1  ;;  %v1736_v13 = vld [vmem:[%s6253_s3 + $0x78] sm:$0xff] }
  0x30   :  { %4405 = vmatprep.subr.mxu0 %v1788_v3  ;;  %3934 = vmatprep.subr.mxu1 %v1752_v12  ;;  %v1748_v23 = vld [vmem:[%s6253_s3 + $0xd8] sm:$0xff]  ;;  %v1722_v12 = vld [vmem:[%s6253_s3 + $0x8] sm:$0xff] }
  0x31   :  { %4406 = vmatpush3.msra.mxu0 %v1788_v3  ;;  %3935 = vmatpush3.msra.mxu1 %v1736_v13 }
  0x32   :  { %4335 = vmatmul.mubr.msk.f32.gmra.mxu0 %vm99_vm0, %v56_v25  ;;  %4407 = vmatprep.subr.mxu0 %v1787_v5  ;;  %v1732_v25 = vld [vmem:[%s6253_s3 + $0x58] sm:$0xff] }
  0x33   :  { %4337 = vmatprep.mubr.msk.f32.mxu0 %vm99_vm0, %v57_v26  ;;  %4408 = vmatpush3.msra.mxu0 %v1787_v5  ;;  %v1747_v26 = vld [vmem:[%s6253_s3 + $0xd0] sm:$0xff] }
  0x34   :  { %4409 = vmatprep.subr.mxu0 %v1786_v8  ;;  %3936 = vmatprep.subr.mxu1 %v1751_v14  ;;  %v1737_v14 = vld [vmem:[%s6253_s3 + $0x80] sm:$0xff] }
  0x35   :  { %4410 = vmatpush3.msra.mxu0 %v1786_v8  ;;  %3937 = vmatpush3.msra.mxu1 %v1735_v16 }
  0x36   :  { %4338 = vmatmul.mubr.msk.f32.gmra.mxu0 %vm99_vm0, %v58_v27  ;;  %4411 = vmatprep.subr.mxu0 %v1785_v9 }
  0x37   :  { %4340 = vmatprep.mubr.msk.f32.mxu0 %vm99_vm0, %v59_v28  ;;  %4412 = vmatpush3.msra.mxu0 %v1785_v9  ;;  %v1731_v28 = vld [vmem:[%s6253_s3 + $0x50] sm:$0xff] }
  0x38   :  { %3938 = vmatprep.subr.mxu1 %v1750_v17 }
  0x39   :  { %3939 = vmatpush3.msra.mxu1 %v1734_v19 }
  0x3a   :  { %4341 = vmatmul.mubr.msk.f32.gmra.mxu0 %vm99_vm0, %v60_v29  ;;  %3940 = vmatprep.subr.mxu1 %v1749_v20  ;;  %v1746_v29 = vld [vmem:[%s6253_s3 + $0xc8] sm:$0xff] }
  0x3b   :  { %4343 = vmatprep.mubr.msk.f32.mxu0 %vm99_vm0, %v61_v30  ;;  %3941 = vmatpush3.msra.mxu1 %v1733_v22 }
  0x3c   :  { %3942 = vmatprep.subr.mxu1 %v1748_v23 }
  0x3d   :  { %3943 = vmatpush3.msra.mxu1 %v1732_v25 }
  0x3e   :  { %4344 = vmatmul.mubr.msk.f32.gmra.mxu0 %vm99_vm0, %v62_v31  ;;  %3944 = vmatprep.subr.mxu1 %v1747_v26  ;;  %v1730_v31 = vld [vmem:[%s6253_s3 + $0x48] sm:$0xff] }
  0x3f   :  { %4346 = vmatprep.mubr.msk.f32.mxu0 %vm99_vm0, %v63_v32  ;;  %3945 = vmatpush3.msra.mxu1 %v1731_v28  ;;  %v1745_v32 = vld [vmem:[%s6253_s3 + $0xc0] sm:$0xff] }
  0x40   :  { %3946 = vmatprep.subr.mxu1 %v1746_v29 }
  0x41   :  { %3947 = vmatpush3.msra.mxu1 %v1730_v31 }
  0x42   :  { %4347 = vmatmul.mubr.msk.f32.gmra.mxu0 %vm99_vm0, %v64_v33  ;;  %3948 = vmatprep.subr.mxu1 %v1745_v32 }
  0x43   :  { %4349 = vmatprep.mubr.msk.f32.mxu0 %vm99_vm0, %v65_v34 }
  0x46   :  { %4350 = vmatmul.mubr.msk.f32.gmra.mxu0 %vm99_vm0, %v66_v35 }
  0x47   :  { %4352 = vmatprep.mubr.msk.f32.mxu0 %vm99_vm0, %v67_v36  ;;  %v1729_v36 = vld [vmem:[%s6253_s3 + $0x40] sm:$0xff] }
  0x48   :  { %3949 = vmatpush3.msra.mxu1 %v1729_v36 }
  0x4a   :  { %4353 = vmatmul.mubr.msk.f32.gmra.mxu0 %vm99_vm0, %v68_v37  ;;  %v1744_v37 = vld [vmem:[%s6253_s3 + $0xb8] sm:$0xff] }
  0x4b   :  { %4355 = vmatprep.mubr.msk.f32.mxu0 %vm99_vm0, %v69_v38  ;;  %3950 = vmatprep.subr.mxu1 %v1744_v37 }
  0x4e   :  { %4356 = vmatmul.mubr.msk.f32.gmra.mxu0 %vm99_vm0, %v70_v39 }
  0x4f   :  { %4358 = vmatprep.mubr.msk.f32.mxu0 %vm99_vm0, %v71_v40 }
  0x52   :  { %4359 = vmatmul.mubr.msk.f32.gmra.mxu0 %vm99_vm0, %v72_v41  ;;  %v1728_v41 = vld [vmem:[%s6253_s3 + $0x38] sm:$0xff] }
  0x53   :  { %4361 = vmatprep.mubr.msk.f32.mxu0 %vm99_vm0, %v73_v42  ;;  %3951 = vmatpush3.msra.mxu1 %v1728_v41 }
  0x56   :  { %4362 = vmatmul.mubr.msk.f32.gmra.mxu0 %vm99_vm0, %v74_v43 }
  0x57   :  { %4364 = vmatprep.mubr.msk.f32.mxu0 %vm99_vm0, %v75_v44  ;;  %v1743_v44 = vld [vmem:[%s6253_s3 + $0xb0] sm:$0xff] }
  0x58   :  { %3952 = vmatprep.subr.mxu1 %v1743_v44 }
  0x5a   :  { %4365 = vmatmul.mubr.msk.f32.gmra.mxu0 %vm99_vm0, %v76_v45 }
  0x5b   :  { %4367 = vmatprep.mubr.msk.f32.mxu0 %vm99_vm0, %v77_v46  ;;  %v4929_v46 = vld [vmem:[%s6252_s2] ss:$0 sm:$0xff] }
  0x5e   :  { %4368 = vmatmul.mubr.msk.f32.gmra.mxu0 %vm99_vm0, %v78_v47  ;;  %v1727_v47 = vld [vmem:[%s6253_s3 + $0x30] sm:$0xff] }
  0x5f   :  { %4370 = vmatprep.mubr.msk.f32.mxu0 %vm99_vm0, %v79_v48  ;;  %3953 = vmatpush3.msra.mxu1 %v1727_v47 }
  0x62   :  { %4371 = vmatmul.mubr.msk.f32.gmra.mxu0 %vm99_vm0, %v80_v49  ;;  %v1742_v49 = vld [vmem:[%s6253_s3 + $0xa8] sm:$0xff] }
  0x63   :  { %4373 = vmatprep.mubr.msk.f32.mxu0 %vm99_vm0, %v81_v50  ;;  %3954 = vmatprep.subr.mxu1 %v1742_v49 }
  0x66   :  { %4374 = vmatmul.mubr.msk.f32.gmra.mxu0 %vm99_vm0, %v82_v51  ;;  %v1726_v51 = vld [vmem:[%s6253_s3 + $0x28] sm:$0xff] }
  0x67   :  { %4376 = vmatprep.mubr.msk.f32.mxu0 %vm99_vm0, %v83_v52  ;;  %3955 = vmatpush3.msra.mxu1 %v1726_v51 }
  0x6a   :  { %4377 = vmatmul.mubr.msk.f32.gmra.mxu0 %vm99_vm0, %v84_v53  ;;  %v1741_v53 = vld [vmem:[%s6253_s3 + $0xa0] sm:$0xff] }
  0x6b   :  { %4379 = vmatprep.mubr.msk.f32.mxu0 %vm99_vm0, %v85_v55  ;;  %3956 = vmatprep.subr.mxu1 %v1741_v53 }
  0x6e   :  { %4380 = vmatmul.mubr.msk.f32.gmra.mxu0 %vm99_vm0, %v86_v56 }
  0x6f   :  { %4382 = vmatprep.mubr.msk.f32.mxu0 %vm99_vm0, %v87_v57 }
  0x72   :  { %4383 = vmatmul.mubr.msk.f32.gmra.mxu0 %vm99_vm0, %v88_v58  ;;  %v1725_v58 = vld [vmem:[%s6253_s3 + $0x20] sm:$0xff] }
  0x73   :  { %4385 = vmatprep.mubr.msk.f32.mxu0 %vm99_vm0, %v89_v60  ;;  %3957 = vmatpush3.msra.mxu1 %v1725_v58  ;;  %v1740_v60 = vld [vmem:[%s6253_s3 + $0x98] sm:$0xff] }
  0x74   :  { %3958 = vmatprep.subr.mxu1 %v1740_v60 }
  0x76   :  { %4386 = vmatmul.mubr.msk.f32.gmra.mxu0 %vm99_vm0, %v90_v62 }
  0x77   :  { %4388 = vmatprep.mubr.msk.f32.mxu0 %vm99_vm0, %v91_v0  ;;  %v1724_v0 = vld [vmem:[%s6253_s3 + $0x18] sm:$0xff] }
  0x78   :  { %3959 = vmatpush3.msra.mxu1 %v1724_v0 }
  0x7a   :  { %4389 = vmatmul.mubr.msk.f32.gmra.mxu0 %vm99_vm0, %v92_v2 }
  0x7b   :  { %4391 = vmatprep.mubr.msk.f32.mxu0 %vm99_vm0, %v93_v4  ;;  %v1739_v4 = vld [vmem:[%s6253_s3 + $0x90] sm:$0xff] }
  0x7c   :  { %3960 = vmatprep.subr.mxu1 %v1739_v4 }
  0x7e   :  { %4392 = vmatmul.mubr.msk.f32.gmra.mxu0 %vm99_vm0, %v94_v6  ;;  %v1723_v6 = vld [vmem:[%s6253_s3 + $0x10] sm:$0xff] }
  0x7f   :  { %4394 = vmatprep.mubr.msk.f32.mxu0 %vm99_vm0, %v95_v7  ;;  %3961 = vmatpush3.msra.mxu1 %v1723_v6 }
  0x82   :  { %4395 = vmatmul.mubr.msk.f32.gmra.mxu0 %vm99_vm0, %v96_v10  ;;  %v1738_v10 = vld [vmem:[%s6253_s3 + $0x88] sm:$0xff] }
  0x83   :  { %3962 = vmatprep.subr.mxu1 %v1738_v10 }
  0x84   :  { %3963 = vmatpush3.msra.mxu1 %v1722_v12 }
  0x85   :  { %3964 = vmatprep.subr.mxu1 %v1737_v14 }
  0xc6   :  { %v4303_v15 = vpop.f32.mrf.mxu0 }
  0xc7   :  { %679 = vst.msk [vmem:[#allocation2 + $0x8] sm:$0xff] %vm677_vm1, %v4303_v15 }
  0xc8   :  { %v358_v18 = vpop.f32.mrf.mxu0 }
  0xc9   :  { %678 = vst.msk [vmem:[#allocation2] sm:$0xff] %vm677_vm1, %v358_v18  ;;  %v1721_v18 = vld [vmem:[%s6253_s3] sm:$0xff] }
  0xca   :  { %v4306_v21 = vpop.f32.mrf.mxu0  ;;  %3965 = vmatpush3.msra.mxu1 %v1721_v18 }
  0xcb   :  { %681 = vst.msk [vmem:[#allocation2 + $0x18] sm:$0xff] %vm677_vm1, %v4306_v21 }
  0xcc   :  { %v368_v24 = vpop.f32.mrf.mxu0 }
  0xcd   :  { %680 = vst.msk [vmem:[#allocation2 + $0x10] sm:$0xff] %vm677_vm1, %v368_v24 }
  0xce   :  { %v4309_v27 = vpop.f32.mrf.mxu0 }
  0xcf   :  { %683 = vst.msk [vmem:[#allocation2 + $0x28] sm:$0xff] %vm677_vm1, %v4309_v27 }
  0xd0   :  { %v378_v30 = vpop.f32.mrf.mxu0  ;;  %v755_v33 = vld [vmem:[#allocation2] ss:$2 sm:$0xff]  ;;  %v757_v34 = vld [vmem:[#allocation2 + $0x1] ss:$2 sm:$0xff] }
  0xd1   :  { %682 = vst.msk [vmem:[#allocation2 + $0x20] sm:$0xff] %vm677_vm1, %v378_v30  ;;  %v762_v42 = vmax.f32 %v755_v33, %v757_v34  ;;  %v1098_v33 = vld [vmem:[#allocation3 + $0x1] sm:$0xff] }
  0xd2   :  { %v4312_v35 = vpop.f32.mrf.mxu0 }
  0xd3   :  { %685 = vst.msk [vmem:[#allocation2 + $0x38] sm:$0xff] %vm677_vm1, %v4312_v35 }
  0xd4   :  { %v759_v38 = vld [vmem:[#allocation2 + $0x10] ss:$2 sm:$0xff]  ;;  %v761_v39 = vld [vmem:[#allocation2 + $0x11] ss:$2 sm:$0xff]  ;;  %v388_v40 = vpop.f32.mrf.mxu0 }
  0xd5   :  { %v763_v43 = vmax.f32 %v759_v38, %v761_v39  ;;  %684 = vst.msk [vmem:[#allocation2 + $0x30] sm:$0xff] %vm677_vm1, %v388_v40 }
  0xd6   :  { %v4315_v45 = vpop.f32.mrf.mxu0 }
  0xd7   :  { %v764_v48 = vmax.f32 %v762_v42, %v763_v43  ;;  %687 = vst.msk [vmem:[#allocation2 + $0x48] sm:$0xff] %vm677_vm1, %v4315_v45 }
  0xd8   :  { %v398_v50 = vpop.f32.mrf.mxu0  ;;  %v777_v55 = vld [vmem:[#allocation2 + $0x20] ss:$2 sm:$0xff]  ;;  %v779_v56 = vld [vmem:[#allocation2 + $0x21] ss:$2 sm:$0xff] }
  0xd9   :  { %686 = vst.msk [vmem:[#allocation2 + $0x40] sm:$0xff] %vm677_vm1, %v398_v50  ;;  %v765_v52 = vadd.f32 %v4929_v46, %v764_v48  ;;  %v784_v1 = vmax.f32 %v777_v55, %v779_v56 }
  0xda   :  { %v4318_v57 = vpop.f32.mrf.mxu0 }
  0xdb   :  { %689 = vst.msk [vmem:[#allocation2 + $0x58] sm:$0xff] %vm677_vm1, %v4318_v57  ;;  %v766_v59 = vmax.f32 %v765_v52, 0.0 }
  0xdc   :  { %v781_v61 = vld [vmem:[#allocation2 + $0x30] ss:$2 sm:$0xff]  ;;  %v783_v62 = vld [vmem:[#allocation2 + $0x31] ss:$2 sm:$0xff]  ;;  %v408_v63 = vpop.f32.mrf.mxu0 }
  0xdd   :  { %v785_v2 = vmax.f32 %v781_v61, %v783_v62  ;;  %688 = vst.msk [vmem:[#allocation2 + $0x50] sm:$0xff] %vm677_vm1, %v408_v63  ;;  %v768_v3 = vrot.slane %v766_v59, 7 }
  0xde   :  { %v4321_v5 = vpop.f32.mrf.mxu0 }
  0xdf   :  { %v786_v7 = vmax.f32 %v784_v1, %v785_v2  ;;  %691 = vst.msk [vmem:[#allocation2 + $0x68] sm:$0xff] %vm677_vm1, %v4321_v5  ;;  %v771_v8 = vsel %vm770_vm3, 0.0, %v768_v3  ;;  %v772_v9 = vsel %vm770_vm3, %v768_v3, 0.0 }
  0xe0   :  { %v418_v11 = vpop.f32.mrf.mxu0  ;;  %774 = vst.msk [vmem:[#allocation3 + $0x10] sm:$0xff] %vm677_vm1, %v771_v8  ;;  %v798_v15 = vld [vmem:[#allocation2 + $0x40] ss:$2 sm:$0xff]  ;;  %v800_v16 = vld [vmem:[#allocation2 + $0x41] ss:$2 sm:$0xff] }
  0xe1   :  { %775 = vst.msk [vmem:[#allocation3 + $0x18] sm:$0x3] %vm750_vm2, %v772_v9  ;;  %v787_v13 = vadd.f32 %v4929_v46, %v786_v7  ;;  %v805_v23 = vmax.f32 %v798_v15, %v800_v16 }
  0xe2   :  { %690 = vst.msk [vmem:[#allocation2 + $0x60] sm:$0xff] %vm677_vm1, %v418_v11  ;;  %v4324_v17 = vpop.f32.mrf.mxu0 }
  0xe3   :  { %693 = vst.msk [vmem:[#allocation2 + $0x78] sm:$0xff] %vm677_vm1, %v4324_v17  ;;  %v788_v19 = vmax.f32 %v787_v13, 0.0 }
  0xe4   :  { %v802_v20 = vld [vmem:[#allocation2 + $0x50] ss:$2 sm:$0xff]  ;;  %v804_v21 = vld [vmem:[#allocation2 + $0x51] ss:$2 sm:$0xff]  ;;  %v428_v22 = vpop.f32.mrf.mxu0 }
  0xe5   :  { %v806_v24 = vmax.f32 %v802_v20, %v804_v21  ;;  %692 = vst.msk [vmem:[#allocation2 + $0x70] sm:$0xff] %vm677_vm1, %v428_v22  ;;  %v790_v25 = vrot.slane %v788_v19, 7 }
  0xe6   :  { %v4327_v26 = vpop.f32.mrf.mxu0 }
  0xe7   :  { %v807_v27 = vmax.f32 %v805_v23, %v806_v24  ;;  %695 = vst.msk [vmem:[#allocation2 + $0x88] sm:$0xff] %vm677_vm1, %v4327_v26  ;;  %v1100_v28 = vld [vmem:[#allocation3 + $0x10] sm:$0xff]  ;;  %v792_v29 = vsel %vm770_vm3, 0.0, %v790_v25  ;;  %v793_v30 = vsel %vm770_vm3, %v790_v25, 0.0 }
  0xe8   :  { %1111 = vrot.lane.b32.xlu0 %v1100_v28, %s4505_s20  ;;  %v438_v31 = vpop.f32.mrf.mxu0  ;;  %795 = vst.msk [vmem:[#allocation3 + $0x20] sm:$0xff] %vm677_vm1, %v792_v29  ;;  %v1132_v57 = vld [vmem:[#allocation3 + $0x11] sm:$0xff] }
  0xe9   :  { %796 = vst.msk [vmem:[#allocation3 + $0x28] sm:$0x3] %vm750_vm2, %v793_v30  ;;  %v808_v32 = vadd.f32 %v4929_v46, %v807_v27  ;;  %v819_v34 = vld [vmem:[#allocation2 + $0x60] ss:$2 sm:$0xff]  ;;  %v821_v35 = vld [vmem:[#allocation2 + $0x61] ss:$2 sm:$0xff] }
  0xea   :  { %694 = vst.msk [vmem:[#allocation2 + $0x80] sm:$0xff] %vm677_vm1, %v438_v31  ;;  %v4330_v36 = vpop.f32.mrf.mxu0  ;;  %v826_v41 = vmax.f32 %v819_v34, %v821_v35 }
  0xeb   :  { %697 = vst.msk [vmem:[#allocation2 + $0x98] sm:$0xff] %vm677_vm1, %v4330_v36  ;;  %v809_v37 = vmax.f32 %v808_v32, 0.0 }
  0xec   :  { %v823_v38 = vld [vmem:[#allocation2 + $0x70] ss:$2 sm:$0xff]  ;;  %v825_v39 = vld [vmem:[#allocation2 + $0x71] ss:$2 sm:$0xff]  ;;  %v448_v40 = vpop.f32.mrf.mxu0  ;;  %1107 = vrot.lane.b32.xlu0 %v1098_v33, %s4505_s20 }
  0xed   :  { %v827_v42 = vmax.f32 %v823_v38, %v825_v39  ;;  %696 = vst.msk [vmem:[#allocation2 + $0x90] sm:$0xff] %vm677_vm1, %v448_v40  ;;  %v811_v43 = vrot.slane %v809_v37, 7 }
  0xee   :  { %v4333_v44 = vpop.f32.mrf.mxu0 }
  0xef   :  { %v828_v45 = vmax.f32 %v826_v41, %v827_v42  ;;  %699 = vst.msk [vmem:[#allocation2 + $0xa8] sm:$0xff] %vm677_vm1, %v4333_v44  ;;  %v4996_v47 = vld [vmem:[#allocation3 + $0x20] sm:$0xff]  ;;  %v813_v49 = vsel %vm770_vm3, 0.0, %v811_v43  ;;  %v814_v50 = vsel %vm770_vm3, %v811_v43, 0.0 }
  0xf0   :  { %v4998_v48 = vld [vmem:[#allocation3 + $0x22] sm:$0xff]  ;;  %1145 = vrot.lane.b32.xlu1 %v4996_v47, %s4505_s20  ;;  %v458_v51 = vpop.f32.mrf.mxu0  ;;  %816 = vst.msk [vmem:[#allocation3 + $0x30] sm:$0xff] %vm677_vm1, %v813_v49 }
  0xf1   :  { %1130 = vst.msk [vmem:[#allocation4 + $0x20] sm:$0xff] %vm677_vm1, %v4998_v48  ;;  %v829_v52 = vadd.f32 %v4929_v46, %v828_v45  ;;  %698 = vst.msk [vmem:[#allocation2 + $0xa0] sm:$0xff] %vm677_vm1, %v458_v51  ;;  %v840_v53 = vld [vmem:[#allocation2 + $0x80] ss:$2 sm:$0xff]  ;;  %v842_v55 = vld [vmem:[#allocation2 + $0x81] ss:$2 sm:$0xff] }
  0xf2   :  { %817 = vst.msk [vmem:[#allocation3 + $0x38] sm:$0x3] %vm750_vm2, %v814_v50  ;;  %v4336_v56 = vpop.f32.mrf.mxu0  ;;  %v847_v62 = vmax.f32 %v840_v53, %v842_v55  ;;  %v5014_v3 = vld [vmem:[#allocation3 + $0x21] sm:$0xff] }
  0xf3   :  { %701 = vst.msk [vmem:[#allocation2 + $0xb8] sm:$0xff] %vm677_vm1, %v4336_v56  ;;  %v830_v58 = vmax.f32 %v829_v52, 0.0 }
  0xf4   :  { %v844_v59 = vld [vmem:[#allocation2 + $0x90] ss:$2 sm:$0xff]  ;;  %v846_v60 = vld [vmem:[#allocation2 + $0x91] ss:$2 sm:$0xff]  ;;  %1141 = vrot.lane.b32.xlu1 %v1132_v57, %s4505_s20  ;;  %v468_v61 = vpop.f32.mrf.mxu0 }
  0xf5   :  { %v848_v63 = vmax.f32 %v844_v59, %v846_v60  ;;  %700 = vst.msk [vmem:[#allocation2 + $0xb0] sm:$0xff] %vm677_vm1, %v468_v61  ;;  %v832_v0 = vrot.slane %v830_v58, 7 }
  0xf6   :  { %v4339_v1 = vpop.f32.mrf.mxu0 }
  0xf7   :  { %v849_v2 = vmax.f32 %v847_v62, %v848_v63  ;;  %703 = vst.msk [vmem:[#allocation2 + $0xc8] sm:$0xff] %vm677_vm1, %v4339_v1  ;;  %v5016_v5 = vld [vmem:[#allocation3 + $0x30] sm:$0xff]  ;;  %v834_v6 = vsel %vm770_vm3, 0.0, %v832_v0  ;;  %v835_v7 = vsel %vm770_vm3, %v832_v0, 0.0 }
  0xf8   :  { %v1645_v4 = vld [vmem:[#allocation4 + $0x20] sm:$0xff]  ;;  %1175 = vrot.lane.b32.xlu1 %v5014_v3, %s4505_s20  ;;  %v478_v8 = vpop.f32.mrf.mxu0  ;;  %837 = vst.msk [vmem:[#allocation3 + $0x40] sm:$0xff] %vm677_vm1, %v834_v6  ;;  %1179 = vrot.lane.b32.xlu0 %v5016_v5, %s4505_s20 }
  0xf9   :  { %4413 = vmatprep.mubr.msk.f32.mxu0 %vm677_vm1, %v1645_v4  ;;  %v5023_v9 = vld [vmem:[#allocation3 + $0x32] sm:$0xff]  ;;  %838 = vst.msk [vmem:[#allocation3 + $0x48] sm:$0x3] %vm750_vm2, %v835_v7  ;;  %v850_v10 = vadd.f32 %v4929_v46, %v849_v2  ;;  %v861_v11 = vld [vmem:[#allocation2 + $0xa0] ss:$2 sm:$0xff] }
  0xfa   :  { %702 = vst.msk [vmem:[#allocation2 + $0xc0] sm:$0xff] %vm677_vm1, %v478_v8  ;;  %1164 = vst.msk [vmem:[#allocation4 + $0x48] sm:$0xff] %vm677_vm1, %v5023_v9  ;;  %v863_v12 = vld [vmem:[#allocation2 + $0xa1] ss:$2 sm:$0xff]  ;;  %v4342_v13 = vpop.f32.mrf.mxu0  ;;  %v5034_v14 = vld [vmem:[#allocation3 + $0x31] sm:$0xff] }
  0xfb   :  { %705 = vst.msk [vmem:[#allocation2 + $0xd8] sm:$0xff] %vm677_vm1, %v4342_v13  ;;  %v851_v15 = vmax.f32 %v850_v10, 0.0  ;;  %v868_v19 = vmax.f32 %v861_v11, %v863_v12 }
  0xfc   :  { %v865_v16 = vld [vmem:[#allocation2 + $0xb0] ss:$2 sm:$0xff]  ;;  %v867_v17 = vld [vmem:[#allocation2 + $0xb1] ss:$2 sm:$0xff]  ;;  %1209 = vrot.lane.b32.xlu1 %v5034_v14, %s4505_s20  ;;  %v488_v18 = vpop.f32.mrf.mxu0 }
  0xfd   :  { %v869_v20 = vmax.f32 %v865_v16, %v867_v17  ;;  %704 = vst.msk [vmem:[#allocation2 + $0xd0] sm:$0xff] %vm677_vm1, %v488_v18  ;;  %v853_v21 = vrot.slane %v851_v15, 7 }
  0xfe   :  { %v4345_v22 = vpop.f32.mrf.mxu0 }
  0xff   :  { %v870_v23 = vmax.f32 %v868_v19, %v869_v20  ;;  %707 = vst.msk [vmem:[#allocation2 + $0xe8] sm:$0xff] %vm677_vm1, %v4345_v22  ;;  %v5042_v25 = vld [vmem:[#allocation3 + $0x40] sm:$0xff]  ;;  %v855_v27 = vsel %vm770_vm3, 0.0, %v853_v21  ;;  %v856_v28 = vsel %vm770_vm3, %v853_v21, 0.0 }
 0x100   :  { %v5040_v24 = vld [vmem:[#allocation3 + $0x41] sm:$0xff]  ;;  %1213 = vrot.lane.b32.xlu0 %v5042_v25, %s4505_s20  ;;  %v498_v30 = vpop.f32.mrf.mxu0  ;;  %858 = vst.msk [vmem:[#allocation3 + $0x50] sm:$0xff] %vm677_vm1, %v855_v27 }
 0x101   :  { %v5044_v26 = vld [vmem:[#allocation3 + $0x42] sm:$0xff]  ;;  %1243 = vrot.lane.b32.xlu1 %v5040_v24, %s4505_s20  ;;  %859 = vst.msk [vmem:[#allocation3 + $0x58] sm:$0x3] %vm750_vm2, %v856_v28  ;;  %v871_v31 = vadd.f32 %v4929_v46, %v870_v23 }
 0x102   :  { %v1650_v29 = vld [vmem:[#allocation4 + $0x48] sm:$0xff]  ;;  %1198 = vst.msk [vmem:[#allocation4 + $0x70] sm:$0xff] %vm677_vm1, %v5044_v26  ;;  %706 = vst.msk [vmem:[#allocation2 + $0xe0] sm:$0xff] %vm677_vm1, %v498_v30  ;;  %v4348_v34 = vpop.f32.mrf.mxu0 }
 0x103   :  { %4414 = vmatmul.mubr.msk.f32.vlgmr.msra.gmra.mxu0 %vm677_vm1, %v1650_v29  ;;  %v882_v32 = vld [vmem:[#allocation2 + $0xc0] ss:$2 sm:$0xff]  ;;  %v884_v33 = vld [vmem:[#allocation2 + $0xc1] ss:$2 sm:$0xff]  ;;  %709 = vst.msk [vmem:[#allocation2 + $0xf8] sm:$0xff] %vm677_vm1, %v4348_v34  ;;  %v872_v35 = vmax.f32 %v871_v31, 0.0 }
 0x104   :  { %v886_v36 = vld [vmem:[#allocation2 + $0xd0] ss:$2 sm:$0xff]  ;;  %v888_v37 = vld [vmem:[#allocation2 + $0xd1] ss:$2 sm:$0xff]  ;;  %v508_v38 = vpop.f32.mrf.mxu0  ;;  %v889_v39 = vmax.f32 %v882_v32, %v884_v33 }
 0x105   :  { %v890_v40 = vmax.f32 %v886_v36, %v888_v37  ;;  %708 = vst.msk [vmem:[#allocation2 + $0xf0] sm:$0xff] %vm677_vm1, %v508_v38  ;;  %v874_v41 = vrot.slane %v872_v35, 7 }
 0x106   :  { %v4351_v42 = vpop.f32.mrf.mxu0 }
 0x107   :  { %v891_v43 = vmax.f32 %v889_v39, %v890_v40  ;;  %711 = vst.msk [vmem:[#allocation2 + $0x108] sm:$0xff] %vm677_vm1, %v4351_v42  ;;  %v5064_v49 = vld [vmem:[#allocation3 + $0x50] sm:$0xff]  ;;  %v876_v50 = vsel %vm770_vm3, 0.0, %v874_v41  ;;  %v877_v51 = vsel %vm770_vm3, %v874_v41, 0.0  ;;  %v1370_v39 = vld [vmem:[#allocation3 + $0xa1] sm:$0xff] }
 0x108   :  { %v5062_v45 = vld [vmem:[#allocation3 + $0x51] sm:$0xff]  ;;  %v518_v52 = vpop.f32.mrf.mxu0  ;;  %879 = vst.msk [vmem:[#allocation3 + $0x60] sm:$0xff] %vm677_vm1, %v876_v50  ;;  %1247 = vrot.lane.b32.xlu0 %v5064_v49, %s4505_s20 }
 0x109   :  { %v1655_v44 = vld [vmem:[#allocation4 + $0x70] sm:$0xff]  ;;  %1277 = vrot.lane.b32.xlu1 %v5062_v45, %s4505_s20  ;;  %880 = vst.msk [vmem:[#allocation3 + $0x68] sm:$0x3] %vm750_vm2, %v877_v51  ;;  %v892_v55 = vadd.f32 %v4929_v46, %v891_v43  ;;  %v903_v56 = vld [vmem:[#allocation2 + $0xe0] ss:$2 sm:$0xff] }
 0x10a   :  { %4416 = vmatprep.mubr.msk.f32.mxu0 %vm677_vm1, %v1655_v44  ;;  %v5071_v53 = vld [vmem:[#allocation3 + $0x52] sm:$0xff]  ;;  %710 = vst.msk [vmem:[#allocation2 + $0x100] sm:$0xff] %vm677_vm1, %v518_v52  ;;  %v905_v57 = vld [vmem:[#allocation2 + $0xe1] ss:$2 sm:$0xff]  ;;  %v4354_v58 = vpop.f32.mrf.mxu0 }
 0x10b   :  { %1232 = vst.msk [vmem:[#allocation4 + $0x98] sm:$0xff] %vm677_vm1, %v5071_v53  ;;  %713 = vst.msk [vmem:[#allocation2 + $0x118] sm:$0xff] %vm677_vm1, %v4354_v58  ;;  %v893_v59 = vmax.f32 %v892_v55, 0.0  ;;  %v910_v63 = vmax.f32 %v903_v56, %v905_v57  ;;  %v1784_v57 = vld [vmem:[%s6253_s3 + $0x1f8] sm:$0xff] }
 0x10c   :  { %v907_v60 = vld [vmem:[#allocation2 + $0xf0] ss:$2 sm:$0xff]  ;;  %v909_v61 = vld [vmem:[#allocation2 + $0xf1] ss:$2 sm:$0xff]  ;;  %v528_v62 = vpop.f32.mrf.mxu0  ;;  %4014 = vmatprep.subr.mxu1 %v1784_v57 }
 0x10d   :  { %v911_v0 = vmax.f32 %v907_v60, %v909_v61  ;;  %712 = vst.msk [vmem:[#allocation2 + $0x110] sm:$0xff] %vm677_vm1, %v528_v62  ;;  %v895_v1 = vrot.slane %v893_v59, 7 }
 0x10e   :  { %v4357_v2 = vpop.f32.mrf.mxu0 }
 0x10f   :  { %v912_v4 = vmax.f32 %v910_v63, %v911_v0  ;;  %715 = vst.msk [vmem:[#allocation2 + $0x128] sm:$0xff] %vm677_vm1, %v4357_v2  ;;  %v5086_v7 = vld [vmem:[#allocation3 + $0x60] sm:$0xff]  ;;  %v897_v10 = vsel %vm770_vm3, 0.0, %v895_v1  ;;  %v898_v11 = vsel %vm770_vm3, %v895_v1, 0.0 }
 0x110   :  { %v5084_v6 = vld [vmem:[#allocation3 + $0x61] sm:$0xff]  ;;  %1281 = vrot.lane.b32.xlu0 %v5086_v7, %s4505_s20  ;;  %v538_v13 = vpop.f32.mrf.mxu0  ;;  %900 = vst.msk [vmem:[#allocation3 + $0x70] sm:$0xff] %vm677_vm1, %v897_v10 }
 0x111   :  { %v5088_v8 = vld [vmem:[#allocation3 + $0x62] sm:$0xff]  ;;  %1311 = vrot.lane.b32.xlu1 %v5084_v6, %s4505_s20  ;;  %901 = vst.msk [vmem:[#allocation3 + $0x78] sm:$0x3] %vm750_vm2, %v898_v11  ;;  %v913_v15 = vadd.f32 %v4929_v46, %v912_v4 }
 0x112   :  { %v1660_v12 = vld [vmem:[#allocation4 + $0x98] sm:$0xff]  ;;  %1266 = vst.msk [vmem:[#allocation4 + $0xc0] sm:$0xff] %vm677_vm1, %v5088_v8  ;;  %714 = vst.msk [vmem:[#allocation2 + $0x120] sm:$0xff] %vm677_vm1, %v538_v13  ;;  %v930_v16 = vld [vmem:[#allocation2 + $0x100] ss:$2 sm:$0xff]  ;;  %v4360_v18 = vpop.f32.mrf.mxu0 }
 0x113   :  { %4417 = vmatmul.mubr.msk.f32.gmra.mxu0 %vm677_vm1, %v1660_v12  ;;  %v932_v17 = vld [vmem:[#allocation2 + $0x101] ss:$2 sm:$0xff]  ;;  %717 = vst.msk [vmem:[#allocation2 + $0x138] sm:$0xff] %vm677_vm1, %v4360_v18  ;;  %v914_v19 = vmax.f32 %v913_v15, 0.0 }
 0x114   :  { %v934_v20 = vld [vmem:[#allocation2 + $0x110] ss:$2 sm:$0xff]  ;;  %v936_v21 = vld [vmem:[#allocation2 + $0x111] ss:$2 sm:$0xff]  ;;  %v548_v22 = vpop.f32.mrf.mxu0  ;;  %v937_v23 = vmax.f32 %v930_v16, %v932_v17 }
 0x115   :  { %v938_v27 = vmax.f32 %v934_v20, %v936_v21  ;;  %716 = vst.msk [vmem:[#allocation2 + $0x130] sm:$0xff] %vm677_vm1, %v548_v22  ;;  %v916_v28 = vrot.slane %v914_v19, 7  ;;  %v1680_v21 = vld [vmem:[#allocation4 + $0x138] sm:$0xff] }
 0x116   :  { %v4363_v29 = vpop.f32.mrf.mxu0 }
 0x117   :  { %v939_v30 = vmax.f32 %v937_v23, %v938_v27  ;;  %719 = vst.msk [vmem:[#allocation2 + $0x148] sm:$0xff] %vm677_vm1, %v4363_v29  ;;  %v5108_v33 = vld [vmem:[#allocation3 + $0x70] sm:$0xff]  ;;  %v918_v34 = vsel %vm770_vm3, 0.0, %v916_v28  ;;  %v919_v35 = vsel %vm770_vm3, %v916_v28, 0.0 }
 0x118   :  { %v5106_v32 = vld [vmem:[#allocation3 + $0x71] sm:$0xff]  ;;  %v558_v36 = vpop.f32.mrf.mxu0  ;;  %921 = vst.msk [vmem:[#allocation3 + $0x80] sm:$0xff] %vm677_vm1, %v918_v34  ;;  %1315 = vrot.lane.b32.xlu0 %v5108_v33, %s4505_s20 }
 0x119   :  { %v1665_v31 = vld [vmem:[#allocation4 + $0xc0] sm:$0xff]  ;;  %1345 = vrot.lane.b32.xlu1 %v5106_v32, %s4505_s20  ;;  %v5115_v37 = vld [vmem:[#allocation3 + $0x72] sm:$0xff]  ;;  %922 = vst.msk [vmem:[#allocation3 + $0x88] sm:$0x3] %vm750_vm2, %v919_v35  ;;  %v940_v38 = vadd.f32 %v4929_v46, %v939_v30 }
 0x11a   :  { %4419 = vmatprep.mubr.msk.f32.mxu0 %vm677_vm1, %v1665_v31  ;;  %718 = vst.msk [vmem:[#allocation2 + $0x140] sm:$0xff] %vm677_vm1, %v558_v36  ;;  %1300 = vst.msk [vmem:[#allocation4 + $0xe8] sm:$0xff] %vm677_vm1, %v5115_v37  ;;  %v951_v40 = vld [vmem:[#allocation2 + $0x120] ss:$2 sm:$0xff]  ;;  %v953_v41 = vld [vmem:[#allocation2 + $0x121] ss:$2 sm:$0xff]  ;;  %v4366_v42 = vpop.f32.mrf.mxu0 }
 0x11b   :  { %721 = vst.msk [vmem:[#allocation2 + $0x158] sm:$0xff] %vm677_vm1, %v4366_v42  ;;  %v941_v43 = vmax.f32 %v940_v38, 0.0  ;;  %v958_v52 = vmax.f32 %v951_v40, %v953_v41 }
 0x11c   :  { %v955_v44 = vld [vmem:[#allocation2 + $0x130] ss:$2 sm:$0xff]  ;;  %v957_v50 = vld [vmem:[#allocation2 + $0x131] ss:$2 sm:$0xff]  ;;  %v568_v51 = vpop.f32.mrf.mxu0 }
 0x11d   :  { %1379 = vrot.lane.b32.xlu1 %v1370_v39, %s4505_s20  ;;  %v959_v55 = vmax.f32 %v955_v44, %v957_v50  ;;  %720 = vst.msk [vmem:[#allocation2 + $0x150] sm:$0xff] %vm677_vm1, %v568_v51  ;;  %v943_v56 = vrot.slane %v941_v43, 7 }
 0x11e   :  { %v4369_v58 = vpop.f32.mrf.mxu0 }
 0x11f   :  { %v960_v59 = vmax.f32 %v958_v52, %v959_v55  ;;  %723 = vst.msk [vmem:[#allocation2 + $0x168] sm:$0xff] %vm677_vm1, %v4369_v58  ;;  %v1338_v60 = vld [vmem:[#allocation3 + $0x80] sm:$0xff]  ;;  %v945_v62 = vsel %vm770_vm3, 0.0, %v943_v56  ;;  %v946_v63 = vsel %vm770_vm3, %v943_v56, 0.0 }
 0x120   :  { %v5132_v61 = vld [vmem:[#allocation3 + $0x82] sm:$0xff]  ;;  %1349 = vrot.lane.b32.xlu0 %v1338_v60, %s4505_s20  ;;  %v578_v1 = vpop.f32.mrf.mxu0  ;;  %948 = vst.msk [vmem:[#allocation3 + $0xb0] sm:$0xff] %vm677_vm1, %v945_v62 }
 0x121   :  { %v1670_v0 = vld [vmem:[#allocation4 + $0xe8] sm:$0xff]  ;;  %1334 = vst.msk [vmem:[#allocation4 + $0x110] sm:$0xff] %vm677_vm1, %v5132_v61  ;;  %v961_v2 = vadd.f32 %v4929_v46, %v960_v59  ;;  %722 = vst.msk [vmem:[#allocation2 + $0x160] sm:$0xff] %vm677_vm1, %v578_v1 }
 0x122   :  { %949 = vst.msk [vmem:[#allocation3 + $0xb8] sm:$0x3] %vm750_vm2, %v946_v63  ;;  %4420 = vmatmul.mubr.msk.f32.gmra.mxu0 %vm677_vm1, %v1670_v0  ;;  %v972_v4 = vld [vmem:[#allocation2 + $0x140] ss:$2 sm:$0xff]  ;;  %v974_v10 = vld [vmem:[#allocation2 + $0x141] ss:$2 sm:$0xff]  ;;  %v4372_v11 = vpop.f32.mrf.mxu0 }
 0x123   :  { %725 = vst.msk [vmem:[#allocation2 + $0x178] sm:$0xff] %vm677_vm1, %v4372_v11  ;;  %v962_v12 = vmax.f32 %v961_v2, 0.0  ;;  %v979_v17 = vmax.f32 %v972_v4, %v974_v10 }
 0x124   :  { %v976_v13 = vld [vmem:[#allocation2 + $0x150] ss:$2 sm:$0xff]  ;;  %v978_v15 = vld [vmem:[#allocation2 + $0x151] ss:$2 sm:$0xff]  ;;  %v588_v16 = vpop.f32.mrf.mxu0 }
 0x125   :  { %v980_v18 = vmax.f32 %v976_v13, %v978_v15  ;;  %724 = vst.msk [vmem:[#allocation2 + $0x170] sm:$0xff] %vm677_vm1, %v588_v16  ;;  %v964_v19 = vrot.slane %v962_v12, 7 }
 0x126   :  { %v4375_v20 = vpop.f32.mrf.mxu0 }
 0x127   :  { %v981_v22 = vmax.f32 %v979_v17, %v980_v18  ;;  %727 = vst.msk [vmem:[#allocation2 + $0x188] sm:$0xff] %vm677_vm1, %v4375_v20  ;;  %v5147_v28 = vld [vmem:[#allocation3 + $0xb0] sm:$0xff]  ;;  %v966_v29 = vsel %vm770_vm3, 0.0, %v964_v19  ;;  %v967_v30 = vsel %vm770_vm3, %v964_v19, 0.0 }
 0x128   :  { %v1675_v23 = vld [vmem:[#allocation4 + $0x110] sm:$0xff]  ;;  %v598_v31 = vpop.f32.mrf.mxu0  ;;  %969 = vst.msk [vmem:[#allocation3 + $0xc0] sm:$0xff] %vm677_vm1, %v966_v29  ;;  %1383 = vrot.lane.b32.xlu0 %v5147_v28, %s4505_s20  ;;  %v993_v35 = vld [vmem:[#allocation2 + $0x160] ss:$2 sm:$0xff]  ;;  %v995_v36 = vld [vmem:[#allocation2 + $0x161] ss:$2 sm:$0xff] }
 0x129   :  { %v1404_v27 = vld [vmem:[#allocation3 + $0xb1] sm:$0xff]  ;;  %4422 = vmatprep.mubr.msk.f32.mxu0 %vm677_vm1, %v1675_v23  ;;  %970 = vst.msk [vmem:[#allocation3 + $0xc8] sm:$0x3] %vm750_vm2, %v967_v30  ;;  %v982_v34 = vadd.f32 %v4929_v46, %v981_v22  ;;  %v1000_v43 = vmax.f32 %v993_v35, %v995_v36 }
 0x12a   :  { %1413 = vrot.lane.b32.xlu1 %v1404_v27, %s4505_s20  ;;  %726 = vst.msk [vmem:[#allocation2 + $0x180] sm:$0xff] %vm677_vm1, %v598_v31  ;;  %4423 = vmatmul.mubr.msk.f32.gmra.mxu0 %vm677_vm1, %v1680_v21  ;;  %v4378_v38 = vpop.f32.mrf.mxu0 }
 0x12b   :  { %729 = vst.msk [vmem:[#allocation2 + $0x198] sm:$0xff] %vm677_vm1, %v4378_v38  ;;  %v983_v39 = vmax.f32 %v982_v34, 0.0 }
 0x12c   :  { %v997_v40 = vld [vmem:[#allocation2 + $0x170] ss:$2 sm:$0xff]  ;;  %v999_v41 = vld [vmem:[#allocation2 + $0x171] ss:$2 sm:$0xff]  ;;  %v608_v42 = vpop.f32.mrf.mxu0 }
 0x12d   :  { %v1001_v44 = vmax.f32 %v997_v40, %v999_v41  ;;  %728 = vst.msk [vmem:[#allocation2 + $0x190] sm:$0xff] %vm677_vm1, %v608_v42  ;;  %v985_v50 = vrot.slane %v983_v39, 7 }
 0x12e   :  { %v4381_v51 = vpop.f32.mrf.mxu0 }
 0x12f   :  { %v1002_v52 = vmax.f32 %v1000_v43, %v1001_v44  ;;  %731 = vst.msk [vmem:[#allocation2 + $0x1a8] sm:$0xff] %vm677_vm1, %v4381_v51  ;;  %v5165_v56 = vld [vmem:[#allocation3 + $0xc0] sm:$0xff]  ;;  %v987_v58 = vsel %vm770_vm3, 0.0, %v985_v50  ;;  %v988_v59 = vsel %vm770_vm3, %v985_v50, 0.0 }
 0x130   :  { %v5163_v55 = vld [vmem:[#allocation3 + $0xc1] sm:$0xff]  ;;  %1417 = vrot.lane.b32.xlu0 %v5165_v56, %s4505_s20  ;;  %v618_v60 = vpop.f32.mrf.mxu0  ;;  %990 = vst.msk [vmem:[#allocation3 + $0xd0] sm:$0xff] %vm677_vm1, %v987_v58 }
 0x131   :  { %v5167_v57 = vld [vmem:[#allocation3 + $0xc2] sm:$0xff]  ;;  %1447 = vrot.lane.b32.xlu1 %v5163_v55, %s4505_s20  ;;  %991 = vst.msk [vmem:[#allocation3 + $0xd8] sm:$0x3] %vm750_vm2, %v988_v59  ;;  %v1003_v62 = vadd.f32 %v4929_v46, %v1002_v52 }
 0x132   :  { %1402 = vst.msk [vmem:[#allocation4 + $0x160] sm:$0xff] %vm677_vm1, %v5167_v57  ;;  %730 = vst.msk [vmem:[#allocation2 + $0x1a0] sm:$0xff] %vm677_vm1, %v618_v60  ;;  %v1014_v63 = vld [vmem:[#allocation2 + $0x180] ss:$2 sm:$0xff]  ;;  %v1016_v0 = vld [vmem:[#allocation2 + $0x181] ss:$2 sm:$0xff]  ;;  %v4384_v1 = vpop.f32.mrf.mxu0 }
 0x133   :  { %733 = vst.msk [vmem:[#allocation2 + $0x1b8] sm:$0xff] %vm677_vm1, %v4384_v1  ;;  %v1004_v2 = vmax.f32 %v1003_v62, 0.0  ;;  %v1021_v12 = vmax.f32 %v1014_v63, %v1016_v0 }
 0x134   :  { %v1018_v4 = vld [vmem:[#allocation2 + $0x190] ss:$2 sm:$0xff]  ;;  %v1020_v10 = vld [vmem:[#allocation2 + $0x191] ss:$2 sm:$0xff]  ;;  %v628_v11 = vpop.f32.mrf.mxu0 }
 0x135   :  { %v1022_v13 = vmax.f32 %v1018_v4, %v1020_v10  ;;  %732 = vst.msk [vmem:[#allocation2 + $0x1b0] sm:$0xff] %vm677_vm1, %v628_v11  ;;  %v1006_v15 = vrot.slane %v1004_v2, 7 }
 0x136   :  { %v4387_v16 = vpop.f32.mrf.mxu0 }
 0x137   :  { %v1023_v17 = vmax.f32 %v1021_v12, %v1022_v13  ;;  %735 = vst.msk [vmem:[#allocation2 + $0x1c8] sm:$0xff] %vm677_vm1, %v4387_v16  ;;  %v5186_v20 = vld [vmem:[#allocation3 + $0xd0] sm:$0xff]  ;;  %v1008_v21 = vsel %vm770_vm3, 0.0, %v1006_v15  ;;  %v1009_v22 = vsel %vm770_vm3, %v1006_v15, 0.0 }
 0x138   :  { %v5184_v19 = vld [vmem:[#allocation3 + $0xd1] sm:$0xff]  ;;  %v638_v23 = vpop.f32.mrf.mxu0  ;;  %1011 = vst.msk [vmem:[#allocation3 + $0xe0] sm:$0xff] %vm677_vm1, %v1008_v21  ;;  %1451 = vrot.lane.b32.xlu0 %v5186_v20, %s4505_s20 }
 0x139   :  { %v1685_v18 = vld [vmem:[#allocation4 + $0x160] sm:$0xff]  ;;  %1481 = vrot.lane.b32.xlu1 %v5184_v19, %s4505_s20  ;;  %v5193_v27 = vld [vmem:[#allocation3 + $0xd2] sm:$0xff]  ;;  %1012 = vst.msk [vmem:[#allocation3 + $0xe8] sm:$0x3] %vm750_vm2, %v1009_v22  ;;  %v1024_v29 = vadd.f32 %v4929_v46, %v1023_v17 }
 0x13a   :  { %4425 = vmatprep.mubr.msk.f32.mxu0 %vm677_vm1, %v1685_v18  ;;  %734 = vst.msk [vmem:[#allocation2 + $0x1c0] sm:$0xff] %vm677_vm1, %v638_v23  ;;  %1436 = vst.msk [vmem:[#allocation4 + $0x188] sm:$0xff] %vm677_vm1, %v5193_v27  ;;  %v1035_v30 = vld [vmem:[#allocation2 + $0x1a0] ss:$2 sm:$0xff]  ;;  %v1037_v31 = vld [vmem:[#allocation2 + $0x1a1] ss:$2 sm:$0xff]  ;;  %v4390_v34 = vpop.f32.mrf.mxu0 }
 0x13b   :  { %737 = vst.msk [vmem:[#allocation2 + $0x1d8] sm:$0xff] %vm677_vm1, %v4390_v34  ;;  %v1025_v35 = vmax.f32 %v1024_v29, 0.0  ;;  %v1042_v40 = vmax.f32 %v1035_v30, %v1037_v31 }
 0x13c   :  { %v1039_v36 = vld [vmem:[#allocation2 + $0x1b0] ss:$2 sm:$0xff]  ;;  %v1041_v38 = vld [vmem:[#allocation2 + $0x1b1] ss:$2 sm:$0xff]  ;;  %v648_v39 = vpop.f32.mrf.mxu0 }
 0x13d   :  { %v1043_v41 = vmax.f32 %v1039_v36, %v1041_v38  ;;  %736 = vst.msk [vmem:[#allocation2 + $0x1d0] sm:$0xff] %vm677_vm1, %v648_v39  ;;  %v1027_v42 = vrot.slane %v1025_v35, 7 }
 0x13e   :  { %v4393_v43 = vpop.f32.mrf.mxu0 }
 0x13f   :  { %v1044_v44 = vmax.f32 %v1042_v40, %v1043_v41  ;;  %739 = vst.msk [vmem:[#allocation2 + $0x1e8] sm:$0xff] %vm677_vm1, %v4393_v43  ;;  %v5208_v51 = vld [vmem:[#allocation3 + $0xe0] sm:$0xff]  ;;  %v1029_v58 = vsel %vm770_vm3, 0.0, %v1027_v42  ;;  %v1030_v59 = vsel %vm770_vm3, %v1027_v42, 0.0 }
 0x140   :  { %v5206_v50 = vld [vmem:[#allocation3 + $0xe1] sm:$0xff]  ;;  %1485 = vrot.lane.b32.xlu0 %v5208_v51, %s4505_s20  ;;  %v658_v62 = vpop.f32.mrf.mxu0  ;;  %1032 = vst.msk [vmem:[#allocation3 + $0xf0] sm:$0xff] %vm677_vm1, %v1029_v58 }
 0x141   :  { %v5210_v52 = vld [vmem:[#allocation3 + $0xe2] sm:$0xff]  ;;  %1515 = vrot.lane.b32.xlu1 %v5206_v50, %s4505_s20  ;;  %1033 = vst.msk [vmem:[#allocation3 + $0xf8] sm:$0x3] %vm750_vm2, %v1030_v59  ;;  %v1045_v63 = vadd.f32 %v4929_v46, %v1044_v44 }
 0x142   :  { %v1690_v60 = vld [vmem:[#allocation4 + $0x188] sm:$0xff]  ;;  %1470 = vst.msk [vmem:[#allocation4 + $0x1b0] sm:$0xff] %vm677_vm1, %v5210_v52  ;;  %738 = vst.msk [vmem:[#allocation2 + $0x1e0] sm:$0xff] %vm677_vm1, %v658_v62  ;;  %v4396_v2 = vpop.f32.mrf.mxu0 }
 0x143   :  { %4426 = vmatmul.mubr.msk.f32.gmra.mxu0 %vm677_vm1, %v1690_v60  ;;  %v1056_v0 = vld [vmem:[#allocation2 + $0x1c0] ss:$2 sm:$0xff]  ;;  %v1058_v1 = vld [vmem:[#allocation2 + $0x1c1] ss:$2 sm:$0xff]  ;;  %741 = vst.msk [vmem:[#allocation2 + $0x1f8] sm:$0xff] %vm677_vm1, %v4396_v2  ;;  %v1046_v4 = vmax.f32 %v1045_v63, 0.0 }
 0x144   :  { %v1060_v10 = vld [vmem:[#allocation2 + $0x1d0] ss:$2 sm:$0xff]  ;;  %v1062_v11 = vld [vmem:[#allocation2 + $0x1d1] ss:$2 sm:$0xff]  ;;  %v668_v12 = vpop.f32.mrf.mxu0  ;;  %v1063_v13 = vmax.f32 %v1056_v0, %v1058_v1 }
 0x145   :  { %v1064_v15 = vmax.f32 %v1060_v10, %v1062_v11  ;;  %740 = vst.msk [vmem:[#allocation2 + $0x1f0] sm:$0xff] %vm677_vm1, %v668_v12  ;;  %v1048_v16 = vrot.slane %v1046_v4, 7 }
 0x147   :  { %v1065_v17 = vmax.f32 %v1063_v13, %v1064_v15  ;;  %v5229_v22 = vld [vmem:[#allocation3 + $0xf0] sm:$0xff]  ;;  %v1050_v23 = vsel %vm770_vm3, 0.0, %v1048_v16  ;;  %v1051_v29 = vsel %vm770_vm3, %v1048_v16, 0.0  ;;  %v1099_v15 = vld [vmem:[#allocation3 + $0x2] sm:$0xff] }
 0x148   :  { %v5227_v21 = vld [vmem:[#allocation3 + $0xf1] sm:$0xff]  ;;  %1053 = vst.msk [vmem:[#allocation3 + $0x100] sm:$0xff] %vm677_vm1, %v1050_v23  ;;  %1519 = vrot.lane.b32.xlu0 %v5229_v22, %s4505_s20  ;;  %v1097_v23 = vld [vmem:[#allocation3] sm:$0xff] }
 0x149   :  { %v1695_v18 = vld [vmem:[#allocation4 + $0x1b0] sm:$0xff]  ;;  %1549 = vrot.lane.b32.xlu1 %v5227_v21, %s4505_s20  ;;  %1054 = vst.msk [vmem:[#allocation3 + $0x108] sm:$0x3] %vm750_vm2, %v1051_v29  ;;  %v1066_v31 = vadd.f32 %v4929_v46, %v1065_v17  ;;  %v1077_v34 = vld [vmem:[#allocation2 + $0x1e0] ss:$2 sm:$0xff] }
 0x14a   :  { %4428 = vmatprep.mubr.msk.f32.mxu0 %vm677_vm1, %v1695_v18  ;;  %v5236_v30 = vld [vmem:[#allocation3 + $0xf2] sm:$0xff]  ;;  %v1079_v35 = vld [vmem:[#allocation2 + $0x1e1] ss:$2 sm:$0xff] }
 0x14b   :  { %1504 = vst.msk [vmem:[#allocation4 + $0x1d8] sm:$0xff] %vm677_vm1, %v5236_v30  ;;  %v1067_v36 = vmax.f32 %v1066_v31, 0.0  ;;  %v1084_v40 = vmax.f32 %v1077_v34, %v1079_v35  ;;  %v1102_v18 = vld [vmem:[#allocation3 + $0x12] sm:$0xff] }
 0x14c   :  { %v1081_v38 = vld [vmem:[#allocation2 + $0x1f0] ss:$2 sm:$0xff]  ;;  %v1083_v39 = vld [vmem:[#allocation2 + $0x1f1] ss:$2 sm:$0xff] }
 0x14d   :  { %v1085_v41 = vmax.f32 %v1081_v38, %v1083_v39  ;;  %v1069_v42 = vrot.slane %v1067_v36, 7  ;;  %v1768_v36 = vld [vmem:[%s6253_s3 + $0x178] sm:$0xff]  ;;  %v1783_v39 = vld [vmem:[%s6253_s3 + $0x1f0] sm:$0xff] }
 0x14f   :  { %v1086_v43 = vmax.f32 %v1084_v40, %v1085_v41  ;;  %v5247_v58 = vld [vmem:[#allocation3 + $0x100] sm:$0xff]  ;;  %v1071_v60 = vsel %vm770_vm3, 0.0, %v1069_v42  ;;  %v1072_v62 = vsel %vm770_vm3, %v1069_v42, 0.0  ;;  %v1767_v41 = vld [vmem:[%s6253_s3 + $0x170] sm:$0xff] }
 0x150   :  { %v5245_v44 = vld [vmem:[#allocation3 + $0x101] sm:$0xff]  ;;  %1553 = vrot.lane.b32.xlu0 %v5247_v58, %s4505_s20  ;;  %1074 = vst.msk [vmem:[#allocation3 + $0x110] sm:$0xff] %vm677_vm1, %v1071_v60 }
 0x151   :  { %v5249_v59 = vld [vmem:[#allocation3 + $0x102] sm:$0xff]  ;;  %1583 = vrot.lane.b32.xlu1 %v5245_v44, %s4505_s20  ;;  %1075 = vst.msk [vmem:[#allocation3 + $0x118] sm:$0x3] %vm750_vm2, %v1072_v62  ;;  %v1087_v0 = vadd.f32 %v4929_v46, %v1086_v43  ;;  %v1131_v62 = vld [vmem:[#allocation3 + $0x10] sm:$0xff] }
 0x152   :  { %v1700_v63 = vld [vmem:[#allocation4 + $0x1d8] sm:$0xff]  ;;  %1538 = vst.msk [vmem:[#allocation4 + $0x200] sm:$0xff] %vm677_vm1, %v5249_v59  ;;  %v1782_v43 = vld [vmem:[%s6253_s3 + $0x1e8] sm:$0xff] }
 0x153   :  { %4429 = vmatmul.mubr.msk.f32.gmra.mxu0 %vm677_vm1, %v1700_v63  ;;  %v1088_v1 = vmax.f32 %v1087_v0, 0.0  ;;  %v1766_v60 = vld [vmem:[%s6253_s3 + $0x168] sm:$0xff] }
 0x155   :  { %v1090_v2 = vrot.slane %v1088_v1, 7 }
 0x157   :  { %v5265_v11 = vld [vmem:[#allocation3 + $0x110] sm:$0xff]  ;;  %v1092_v12 = vsel %vm770_vm3, 0.0, %v1090_v2  ;;  %v1093_v13 = vsel %vm770_vm3, %v1090_v2, 0.0  ;;  %v1781_v2 = vld [vmem:[%s6253_s3 + $0x1e0] sm:$0xff] }
 0x158   :  { %v5263_v10 = vld [vmem:[#allocation3 + $0x111] sm:$0xff]  ;;  %1095 = vst.msk [vmem:[#allocation3 + $0x120] sm:$0xff] %vm677_vm1, %v1092_v12  ;;  %1587 = vrot.lane.b32.xlu0 %v5265_v11, %s4505_s20 }
 0x159   :  { %v1705_v4 = vld [vmem:[#allocation4 + $0x200] sm:$0xff]  ;;  %1617 = vrot.lane.b32.xlu1 %v5263_v10, %s4505_s20  ;;  %v5272_v46 = vld [vmem:[#allocation3 + $0x112] sm:$0xff]  ;;  %1096 = vst.msk [vmem:[#allocation3 + $0x128] sm:$0x3] %vm750_vm2, %v1093_v13 }
 0x15a   :  { %4431 = vmatprep.mubr.msk.f32.mxu0 %vm677_vm1, %v1705_v4  ;;  %1572 = vst.msk [vmem:[#allocation4 + $0x228] sm:$0xff] %vm677_vm1, %v5272_v46  ;;  %v1112_v16 = vpop.permute.xlu0 %1111  ;;  %v1780_v12 = vld [vmem:[%s6253_s3 + $0x1d8] sm:$0xff] }
 0x15b   :  { %v1123_v17 = vsel %vm677_vm1, %v1099_v15, %v1112_v16  ;;  %v1764_v16 = vld [vmem:[%s6253_s3 + $0x158] sm:$0xff] }
 0x15c   :  { %1905 = vmatprep.mubr.f32.mxu1 %v1123_v17 }
 0x15d   :  { %1115 = vrot.lane.b32.xlu1 %v1102_v18, %s4505_s20 }
 0x15e   :  { %v1108_v29 = vpop.permute.xlu0 %1107 }
 0x15f   :  { %v1610_v31 = vld [vmem:[#allocation3 + $0x120] sm:$0xff]  ;;  %v1122_v34 = vsel %vm677_vm1, %v1097_v23, %v1108_v29 }
 0x160   :  { %v5283_v35 = vld [vmem:[#allocation3 + $0x122] sm:$0xff]  ;;  %1621 = vrot.lane.b32.xlu0 %v1610_v31, %s4505_s20  ;;  %1906 = vmatmul.mubr.f32.vlgmr.msra.gmra.mxu1 %v1122_v34 }
 0x161   :  { %1149 = vrot.lane.b32.xlu1 %v4998_v48, %s4505_s20  ;;  %v1710_v38 = vld [vmem:[#allocation4 + $0x228] sm:$0xff]  ;;  %1606 = vst.msk [vmem:[#allocation4 + $0x250] sm:$0xff] %vm677_vm1, %v5283_v35  ;;  %4015 = vmatpush3.msra.mxu1 %v1768_v36  ;;  %v1761_v36 = vld [vmem:[%s6253_s3 + $0x140] sm:$0xff] }
 0x162   :  { %4432 = vmatmul.mubr.msk.f32.gmra.mxu0 %vm677_vm1, %v1710_v38  ;;  %v1146_v40 = vpop.permute.xlu1 %1145  ;;  %4016 = vmatprep.subr.mxu1 %v1783_v39  ;;  %v1759_v39 = vld [vmem:[%s6253_s3 + $0x130] sm:$0xff] }
 0x163   :  { %v1157_v42 = vsel %vm677_vm1, %v1102_v18, %v1146_v40  ;;  %4017 = vmatpush3.msra.mxu1 %v1767_v41  ;;  %v1778_v18 = vld [vmem:[%s6253_s3 + $0x1c8] sm:$0xff] }
 0x164   :  { %1119 = vrot.lane.b32.xlu0 %v5014_v3, %s4505_s20  ;;  %1910 = vmatprep.mubr.f32.mxu1 %v1157_v42  ;;  %v1765_v3 = vld [vmem:[%s6253_s3 + $0x160] sm:$0xff]  ;;  %v5387_v42 = vld [vmem:[#allocation3 + $0xb2] sm:$0xff] }
 0x165   :  { %1183 = vrot.lane.b32.xlu1 %v5023_v9, %s4505_s20  ;;  %4018 = vmatprep.subr.mxu1 %v1782_v43 }
 0x166   :  { %v1142_v63 = vpop.permute.xlu1 %1141  ;;  %4019 = vmatpush3.msra.mxu1 %v1766_v60  ;;  %v1342_v60 = vld [vmem:[#allocation3 + $0x91] sm:$0xff] }
 0x167   :  { %v1156_v0 = vsel %vm677_vm1, %v1131_v62, %v1142_v63  ;;  %4020 = vmatprep.subr.mxu1 %v1781_v2  ;;  %v1773_v62 = vld [vmem:[%s6253_s3 + $0x1a0] sm:$0xff]  ;;  %v1772_v63 = vld [vmem:[%s6253_s3 + $0x198] sm:$0xff] }
 0x168   :  { %v1715_v1 = vld [vmem:[#allocation4 + $0x250] sm:$0xff]  ;;  %1153 = vrot.lane.b32.xlu0 %v5034_v14, %s4505_s20  ;;  %1911 = vmatmul.mubr.f32.gmra.mxu1 %v1156_v0  ;;  %v1756_v2 = vld [vmem:[%s6253_s3 + $0x118] sm:$0xff] }
 0x169   :  { %1217 = vrot.lane.b32.xlu1 %v5044_v26, %s4505_s20  ;;  %4434 = vmatprep.mubr.msk.f32.mxu0 %vm677_vm1, %v1715_v1 }
 0x16a   :  { %v1176_v4 = vpop.permute.xlu1 %1175  ;;  %v1180_v15 = vpop.permute.xlu0 %1179  ;;  %4021 = vmatpush3.msra.mxu1 %v1765_v3 }
 0x16b   :  { %v1190_v13 = vsel %vm677_vm1, %v4996_v47, %v1176_v4  ;;  %v1191_v14 = vsel %vm677_vm1, %v4998_v48, %v1180_v15  ;;  %4022 = vmatprep.subr.mxu1 %v1780_v12  ;;  %v1779_v47 = vld [vmem:[%s6253_s3 + $0x1d0] sm:$0xff] }
 0x16c   :  { %1187 = vrot.lane.b32.xlu0 %v5040_v24, %s4505_s20  ;;  %1915 = vmatprep.mubr.f32.mxu1 %v1191_v14  ;;  %v1763_v24 = vld [vmem:[%s6253_s3 + $0x150] sm:$0xff]  ;;  %v1753_v14 = vld [vmem:[%s6253_s3 + $0x100] sm:$0xff] }
 0x16d   :  { %1251 = vrot.lane.b32.xlu1 %v5071_v53, %s4505_s20  ;;  %1916 = vmatmul.mubr.f32.gmra.mxu1 %v1190_v13  ;;  %v1771_v12 = vld [vmem:[%s6253_s3 + $0x190] sm:$0xff] }
 0x16e   :  { %v1210_v17 = vpop.permute.xlu1 %1209  ;;  %4023 = vmatpush3.msra.mxu1 %v1764_v16  ;;  %v1755_v13 = vld [vmem:[%s6253_s3 + $0x110] sm:$0xff] }
 0x16f   :  { %v1224_v48 = vsel %vm677_vm1, %v5016_v5, %v1210_v17  ;;  %4024 = vmatprep.subr.mxu1 %v1779_v47  ;;  %v1762_v5 = vld [vmem:[%s6253_s3 + $0x148] sm:$0xff] }
 0x170   :  { %1221 = vrot.lane.b32.xlu0 %v5062_v45, %s4505_s20  ;;  %4025 = vmatpush3.msra.mxu1 %v1763_v24  ;;  %v1777_v45 = vld [vmem:[%s6253_s3 + $0x1c0] sm:$0xff]  ;;  %v1615_v24 = vld [vmem:[#allocation3 + $0x132] sm:$0xff] }
 0x171   :  { %1285 = vrot.lane.b32.xlu1 %v5088_v8, %s4505_s20  ;;  %4026 = vmatprep.subr.mxu1 %v1778_v18  ;;  %1640 = vst.msk [vmem:[#allocation4 + $0x278] sm:$0xff] %vm677_vm1, %v1615_v24  ;;  %v1271_v24 = vld [vmem:[#allocation3 + $0x61] sm:$0xff] }
 0x172   :  { %v1214_v29 = vpop.permute.xlu0 %1213  ;;  %4027 = vmatpush3.msra.mxu1 %v1762_v5  ;;  %v5475_v5 = vld [vmem:[#allocation3 + $0x121] sm:$0xff] }
 0x173   :  { %v1244_v23 = vpop.permute.xlu1 %1243  ;;  %v1225_v34 = vsel %vm677_vm1, %v5023_v9, %v1214_v29  ;;  %4028 = vmatprep.subr.mxu1 %v1777_v45  ;;  %v1776_v9 = vld [vmem:[%s6253_s3 + $0x1b8] sm:$0xff] }
 0x174   :  { %v1258_v31 = vsel %vm677_vm1, %v5042_v25, %v1244_v23  ;;  %1255 = vrot.lane.b32.xlu0 %v5084_v6, %s4505_s20  ;;  %1920 = vmatprep.mubr.f32.mxu1 %v1225_v34  ;;  %v1760_v25 = vld [vmem:[%s6253_s3 + $0x138] sm:$0xff]  ;;  %v1775_v6 = vld [vmem:[%s6253_s3 + $0x1b0] sm:$0xff] }
 0x175   :  { %1319 = vrot.lane.b32.xlu1 %v5115_v37, %s4505_s20  ;;  %1921 = vmatmul.mubr.f32.gmra.mxu1 %v1224_v48 }
 0x176   :  { %4029 = vmatpush3.msra.mxu1 %v1761_v36 }
 0x177   :  { %4030 = vmatprep.subr.mxu1 %v1776_v9 }
 0x178   :  { %1289 = vrot.lane.b32.xlu0 %v5106_v32, %s4505_s20  ;;  %4031 = vmatpush3.msra.mxu1 %v1760_v25  ;;  %v1774_v32 = vld [vmem:[%s6253_s3 + $0x1a8] sm:$0xff] }
 0x179   :  { %1353 = vrot.lane.b32.xlu1 %v5132_v61, %s4505_s20  ;;  %v5389_v61 = vld [vmem:[#allocation3 + $0x81] sm:$0xff]  ;;  %4032 = vmatprep.subr.mxu1 %v1775_v6 }
 0x17a   :  { %v1248_v41 = vpop.permute.xlu0 %1247  ;;  %4033 = vmatpush3.msra.mxu1 %v1759_v39 }
 0x17b   :  { %v1278_v38 = vpop.permute.xlu1 %1277  ;;  %v1259_v43 = vsel %vm677_vm1, %v5044_v26, %v1248_v41  ;;  %4034 = vmatprep.subr.mxu1 %v1774_v32  ;;  %v1757_v26 = vld [vmem:[%s6253_s3 + $0x120] sm:$0xff] }
 0x17c   :  { %v1292_v40 = vsel %vm677_vm1, %v5064_v49, %v1278_v38  ;;  %1323 = vrot.lane.b32.xlu0 %v5389_v61, %s4505_s20  ;;  %v1758_v49 = vld [vmem:[%s6253_s3 + $0x128] sm:$0xff]  ;;  %1925 = vmatprep.mubr.f32.mxu1 %v1259_v43 }
 0x17d   :  { %1387 = vrot.lane.b32.xlu1 %v5387_v42, %s4505_s20  ;;  %1926 = vmatmul.mubr.f32.gmra.mxu1 %v1258_v31  ;;  %v1614_v31 = vld [vmem:[#allocation3 + $0x131] sm:$0xff] }
 0x17e   :  { %4035 = vmatpush3.msra.mxu1 %v1758_v49 }
 0x17f   :  { %4036 = vmatprep.subr.mxu1 %v1773_v62 }
 0x180   :  { %1357 = vrot.lane.b32.xlu0 %v1342_v60, %s4505_s20  ;;  %4037 = vmatpush3.msra.mxu1 %v1757_v26  ;;  %v1101_v60 = vld [vmem:[#allocation3 + $0x11] sm:$0xff] }
 0x181   :  { %1421 = vrot.lane.b32.xlu1 %v5167_v57, %s4505_s20  ;;  %4038 = vmatprep.subr.mxu1 %v1772_v63 }
 0x182   :  { %v1282_v1 = vpop.permute.xlu0 %1281  ;;  %4039 = vmatpush3.msra.mxu1 %v1756_v2 }
 0x183   :  { %v1312_v0 = vpop.permute.xlu1 %1311  ;;  %v1293_v4 = vsel %vm677_vm1, %v5071_v53, %v1282_v1  ;;  %4040 = vmatprep.subr.mxu1 %v1771_v12  ;;  %v1770_v53 = vld [vmem:[%s6253_s3 + $0x188] sm:$0xff] }
 0x184   :  { %v1326_v3 = vsel %vm677_vm1, %v5086_v7, %v1312_v0  ;;  %1391 = vrot.lane.b32.xlu0 %v5163_v55, %s4505_s20  ;;  %1930 = vmatprep.mubr.f32.mxu1 %v1293_v4  ;;  %v1754_v7 = vld [vmem:[%s6253_s3 + $0x108] sm:$0xff]  ;;  %v1769_v55 = vld [vmem:[%s6253_s3 + $0x180] sm:$0xff] }
 0x185   :  { %1455 = vrot.lane.b32.xlu1 %v5193_v27, %s4505_s20  ;;  %1931 = vmatmul.mubr.f32.gmra.mxu1 %v1292_v40 }
 0x186   :  { %4041 = vmatpush3.msra.mxu1 %v1755_v13  ;;  %v1203_v13 = vld [vmem:[#allocation3 + $0x41] sm:$0xff] }
 0x187   :  { %4042 = vmatprep.subr.mxu1 %v1770_v53 }
 0x188   :  { %1425 = vrot.lane.b32.xlu0 %v5184_v19, %s4505_s20  ;;  %4043 = vmatpush3.msra.mxu1 %v1754_v7  ;;  %v1369_v19 = vld [vmem:[#allocation3 + $0xa0] sm:$0xff]  ;;  %v1137_v7 = vld [vmem:[#allocation3 + $0x30] sm:$0xff] }
 0x189   :  { %1489 = vrot.lane.b32.xlu1 %v5210_v52, %s4505_s20  ;;  %4044 = vmatprep.subr.mxu1 %v1769_v55 }
 0x18a   :  { %v1316_v17 = vpop.permute.xlu0 %1315  ;;  %4045 = vmatpush3.msra.mxu1 %v1753_v14  ;;  %v1237_v14 = vld [vmem:[#allocation3 + $0x51] sm:$0xff] }
 0x18b   :  { %v1346_v15 = vpop.permute.xlu1 %1345  ;;  %v1327_v47 = vsel %vm677_vm1, %v5088_v8, %v1316_v17  ;;  %v1171_v17 = vld [vmem:[#allocation3 + $0x40] sm:$0xff] }
 0x18c   :  { %v1360_v16 = vsel %vm677_vm1, %v5108_v33, %v1346_v15  ;;  %1459 = vrot.lane.b32.xlu0 %v5206_v50, %s4505_s20  ;;  %1935 = vmatprep.mubr.f32.mxu1 %v1327_v47  ;;  %v1720_v50 = vld [vmem:[#allocation4 + $0x278] sm:$0xff] }
 0x18d   :  { %1523 = vrot.lane.b32.xlu1 %v5236_v30, %s4505_s20  ;;  %1936 = vmatmul.mubr.f32.gmra.mxu1 %v1326_v3  ;;  %v1103_v3 = vld [vmem:[#allocation3 + $0x20] sm:$0xff] }
 0x18e   :  { %4435 = vmatmul.mubr.msk.f32.gmra.mxu0 %vm677_vm1, %v1720_v50 }
 0x18f   :  { %v1380_v48 = vpop.permute.xlu1 %1379 }
 0x190   :  { %v1394_v18 = vsel %vm677_vm1, %v1369_v19, %v1380_v48  ;;  %1493 = vrot.lane.b32.xlu0 %v5227_v21, %s4505_s20  ;;  %v1371_v21 = vld [vmem:[#allocation3 + $0xa2] sm:$0xff] }
 0x191   :  { %1557 = vrot.lane.b32.xlu1 %v5249_v59, %s4505_s20 }
 0x192   :  { %v1350_v8 = vpop.permute.xlu0 %1349 }
 0x193   :  { %v1361_v33 = vsel %vm677_vm1, %v5115_v37, %v1350_v8  ;;  %v1205_v8 = vld [vmem:[#allocation3 + $0x50] sm:$0xff] }
 0x194   :  { %1527 = vrot.lane.b32.xlu0 %v5245_v44, %s4505_s20  ;;  %1940 = vmatprep.mubr.f32.mxu1 %v1361_v33 }
 0x195   :  { %1591 = vrot.lane.b32.xlu1 %v5272_v46, %s4505_s20  ;;  %1941 = vmatmul.mubr.f32.gmra.mxu1 %v1360_v16 }
 0x198   :  { %1561 = vrot.lane.b32.xlu0 %v5263_v10, %s4505_s20 }
 0x199   :  { %1625 = vrot.lane.b32.xlu1 %v5283_v35, %s4505_s20 }
 0x19a   :  { %v1384_v29 = vpop.permute.xlu0 %1383 }
 0x19b   :  { %v1395_v44 = vsel %vm677_vm1, %v1371_v21, %v1384_v29  ;;  %v1239_v29 = vld [vmem:[#allocation3 + $0x60] sm:$0xff] }
 0x19c   :  { %v1414_v23 = vpop.permute.xlu1 %1413  ;;  %1595 = vrot.lane.b32.xlu0 %v5475_v5, %s4505_s20  ;;  %1945 = vmatprep.mubr.f32.mxu1 %v1395_v44 }
 0x19d   :  { %v1428_v37 = vsel %vm677_vm1, %v5147_v28, %v1414_v23  ;;  %1946 = vmatmul.mubr.f32.gmra.mxu1 %v1394_v18  ;;  %v1305_v23 = vld [vmem:[#allocation3 + $0x71] sm:$0xff] }
 0x1a0   :  { %1629 = vrot.lane.b32.xlu0 %v1614_v31, %s4505_s20 }
 0x1a2   :  { %v1418_v10 = vpop.permute.xlu0 %1417 }
 0x1a3   :  { %v1448_v35 = vpop.permute.xlu1 %1447  ;;  %v1429_v28 = vsel %vm677_vm1, %v5387_v42, %v1418_v10 }
 0x1a4   :  { %v1462_v34 = vsel %vm677_vm1, %v5165_v56, %v1448_v35  ;;  %1950 = vmatprep.mubr.f32.mxu1 %v1429_v28 }
 0x1a5   :  { %1951 = vmatmul.mubr.f32.gmra.mxu1 %v1428_v37 }
 0x1aa   :  { %v1452_v9 = vpop.permute.xlu0 %1451 }
 0x1ab   :  { %v1482_v45 = vpop.permute.xlu1 %1481  ;;  %v1463_v25 = vsel %vm677_vm1, %v5167_v57, %v1452_v9  ;;  %v1373_v9 = vld [vmem:[#allocation3 + $0xb1] sm:$0xff] }
 0x1ac   :  { %v1496_v36 = vsel %vm677_vm1, %v5186_v20, %v1482_v45  ;;  %1955 = vmatprep.mubr.f32.mxu1 %v1463_v25 }
 0x1ad   :  { %1956 = vmatmul.mubr.f32.gmra.mxu1 %v1462_v34  ;;  %v1273_v34 = vld [vmem:[#allocation3 + $0x70] sm:$0xff] }
 0x1b2   :  { %v1486_v38 = vpop.permute.xlu0 %1485 }
 0x1b3   :  { %v1516_v6 = vpop.permute.xlu1 %1515  ;;  %v1497_v39 = vsel %vm677_vm1, %v5193_v27, %v1486_v38 }
 0x1b4   :  { %v1530_v56 = vsel %vm677_vm1, %v5208_v51, %v1516_v6  ;;  %1960 = vmatprep.mubr.f32.mxu1 %v1497_v39  ;;  %v1307_v6 = vld [vmem:[#allocation3 + $0x80] sm:$0xff] }
 0x1b5   :  { %1961 = vmatmul.mubr.f32.gmra.mxu1 %v1496_v36 }
 0x1ba   :  { %v1520_v41 = vpop.permute.xlu0 %1519 }
 0x1bb   :  { %v1550_v40 = vpop.permute.xlu1 %1549  ;;  %v1531_v57 = vsel %vm677_vm1, %v5210_v52, %v1520_v41 }
 0x1bc   :  { %v1564_v20 = vsel %vm677_vm1, %v5229_v22, %v1550_v40  ;;  %1965 = vmatprep.mubr.f32.mxu1 %v1531_v57  ;;  %v1341_v40 = vld [vmem:[#allocation3 + $0x90] sm:$0xff] }
 0x1bd   :  { %1966 = vmatmul.mubr.f32.gmra.mxu1 %v1530_v56 }
 0x1c2   :  { %v1554_v32 = vpop.permute.xlu0 %1553 }
 0x1c3   :  { %v1584_v42 = vpop.permute.xlu1 %1583  ;;  %v1565_v27 = vsel %vm677_vm1, %v5236_v30, %v1554_v32  ;;  %v1441_v32 = vld [vmem:[#allocation3 + $0xd1] sm:$0xff] }
 0x1c4   :  { %v1598_v51 = vsel %vm677_vm1, %v5247_v58, %v1584_v42  ;;  %1970 = vmatprep.mubr.f32.mxu1 %v1565_v27  ;;  %v1135_v58 = vld [vmem:[#allocation3 + $0x21] sm:$0xff] }
 0x1c5   :  { %1971 = vmatmul.mubr.f32.gmra.mxu1 %v1564_v20  ;;  %v1407_v20 = vld [vmem:[#allocation3 + $0xc1] sm:$0xff] }
 0x1c6   :  { %v1375_v27 = vld [vmem:[#allocation3 + $0xc0] sm:$0xff] }
 0x1ca   :  { %v1588_v49 = vpop.permute.xlu0 %1587 }
 0x1cb   :  { %v1618_v43 = vpop.permute.xlu1 %1617  ;;  %v1599_v52 = vsel %vm677_vm1, %v5249_v59, %v1588_v49 }
 0x1cc   :  { %v1632_v22 = vsel %vm677_vm1, %v5265_v11, %v1618_v43  ;;  %1975 = vmatprep.mubr.f32.mxu1 %v1599_v52  ;;  %v1169_v11 = vld [vmem:[#allocation3 + $0x31] sm:$0xff]  ;;  %v1475_v52 = vld [vmem:[#allocation3 + $0xe1] sm:$0xff] }
 0x1cd   :  { %1976 = vmatmul.mubr.f32.gmra.mxu1 %v1598_v51 }
 0x1cf   :  { %v1116_v62 = vpop.permute.xlu1 %1115 }
 0x1d0   :  { %v1124_v26 = vsel %vm677_vm1, %v1101_v60, %v1116_v62  ;;  %v1409_v62 = vld [vmem:[#allocation3 + $0xd0] sm:$0xff] }
 0x1d2   :  { %v1622_v0 = vpop.permute.xlu0 %1621 }
 0x1d3   :  { %v1150_v63 = vpop.permute.xlu1 %1149  ;;  %v1633_v1 = vsel %vm677_vm1, %v5272_v46, %v1622_v0  ;;  %v1509_v0 = vld [vmem:[#allocation3 + $0xf1] sm:$0xff] }
 0x1d4   :  { %v1158_v30 = vsel %vm677_vm1, %v1135_v58, %v1150_v63  ;;  %1980 = vmatprep.mubr.f32.mxu1 %v1633_v1  ;;  %v1443_v1 = vld [vmem:[#allocation3 + $0xe0] sm:$0xff] }
 0x1d5   :  { %1981 = vmatmul.mubr.f32.gmra.mxu1 %v1632_v22 }
 0x1d6   :  { %v1120_v59 = vpop.permute.xlu0 %1119 }
 0x1d7   :  { %v1184_v2 = vpop.permute.xlu1 %1183  ;;  %v1125_v12 = vsel %vm677_vm1, %v1103_v3, %v1120_v59  ;;  %v1543_v59 = vld [vmem:[#allocation3 + $0x101] sm:$0xff] }
 0x1d8   :  { %v1192_v4 = vsel %vm677_vm1, %v1169_v11, %v1184_v2  ;;  %2050 = vmatprep.mubr.f32.mxu1 %v1125_v12  ;;  %v1477_v12 = vld [vmem:[#allocation3 + $0xf0] sm:$0xff] }
 0x1d9   :  { %2051 = vmatmul.mubr.f32.vlgmr.msra.gmra.mxu1 %v1124_v26 }
 0x1da   :  { %v1154_v55 = vpop.permute.xlu0 %1153 }
 0x1db   :  { %v1218_v53 = vpop.permute.xlu1 %1217  ;;  %v1159_v46 = vsel %vm677_vm1, %v1137_v7, %v1154_v55 }
 0x1dc   :  { %v1226_v15 = vsel %vm677_vm1, %v1203_v13, %v1218_v53  ;;  %2055 = vmatprep.mubr.f32.mxu1 %v1159_v46  ;;  %v1511_v46 = vld [vmem:[#allocation3 + $0x100] sm:$0xff] }
 0x1dd   :  { %2056 = vmatmul.mubr.f32.gmra.mxu1 %v1158_v30 }
 0x1de   :  { %v1188_v47 = vpop.permute.xlu0 %1187 }
 0x1df   :  { %v1252_v16 = vpop.permute.xlu1 %1251  ;;  %v1193_v48 = vsel %vm677_vm1, %v1171_v17, %v1188_v47 }
 0x1e0   :  { %v1260_v19 = vsel %vm677_vm1, %v1237_v14, %v1252_v16  ;;  %2060 = vmatprep.mubr.f32.mxu1 %v1193_v48 }
 0x1e1   :  { %2061 = vmatmul.mubr.f32.gmra.mxu1 %v1192_v4 }
 0x1e2   :  { %v1222_v33 = vpop.permute.xlu0 %1221 }
 0x1e3   :  { %v1286_v18 = vpop.permute.xlu1 %1285  ;;  %v1227_v21 = vsel %vm677_vm1, %v1205_v8, %v1222_v33  ;;  %v1579_v33 = vld [vmem:[#allocation3 + $0x120] sm:$0xff] }
 0x1e4   :  { %v1294_v50 = vsel %vm677_vm1, %v1271_v24, %v1286_v18  ;;  %2065 = vmatprep.mubr.f32.mxu1 %v1227_v21  ;;  %v1613_v21 = vld [vmem:[#allocation3 + $0x130] sm:$0xff] }
 0x1e5   :  { %2066 = vmatmul.mubr.f32.gmra.mxu1 %v1226_v15  ;;  %v1577_v15 = vld [vmem:[#allocation3 + $0x111] sm:$0xff] }
 0x1e6   :  { %v1256_v44 = vpop.permute.xlu0 %1255 }
 0x1e7   :  { %v1320_v37 = vpop.permute.xlu1 %1319  ;;  %v1261_v35 = vsel %vm677_vm1, %v1239_v29, %v1256_v44 }
 0x1e8   :  { %v1328_v31 = vsel %vm677_vm1, %v1305_v23, %v1320_v37  ;;  %2070 = vmatprep.mubr.f32.mxu1 %v1261_v35 }
 0x1e9   :  { %2071 = vmatmul.mubr.f32.gmra.mxu1 %v1260_v19  ;;  %v1545_v19 = vld [vmem:[#allocation3 + $0x110] sm:$0xff] }
 0x1ea   :  { %v1290_v28 = vpop.permute.xlu0 %1289 }
 0x1eb   :  { %v1354_v10 = vpop.permute.xlu1 %1353  ;;  %v1295_v36 = vsel %vm677_vm1, %v1273_v34, %v1290_v28 }
 0x1ec   :  { %v1362_v45 = vsel %vm677_vm1, %v5389_v61, %v1354_v10  ;;  %2075 = vmatprep.mubr.f32.mxu1 %v1295_v36 }
 0x1ed   :  { %2076 = vmatmul.mubr.f32.gmra.mxu1 %v1294_v50 }
 0x1ee   :  { %v1324_v38 = vpop.permute.xlu0 %1323 }
 0x1ef   :  { %v1388_v25 = vpop.permute.xlu1 %1387  ;;  %v1329_v39 = vsel %vm677_vm1, %v1307_v6, %v1324_v38  ;;  %v2468_v6 = vld [vmem:[#allocation6 + $0x1] sm:$0xf] }
 0x1f0   :  { %v1396_v56 = vsel %vm677_vm1, %v1373_v9, %v1388_v25  ;;  %2080 = vmatprep.mubr.f32.mxu1 %v1329_v39  ;;  %2477 = vrot.lane.b32.xlu1 %v2468_v6, %s4505_s20  ;;  %v2593_v39 = vld [vmem:[#allocation6 + $0x29] sm:$0xf] }
 0x1f1   :  { %2081 = vmatmul.mubr.f32.gmra.mxu1 %v1328_v31  ;;  %2608 = vrot.lane.b32.xlu0 %v2593_v39, %s4505_s20 }
 0x1f2   :  { %v1358_v57 = vpop.permute.xlu0 %1357 }
 0x1f3   :  { %v1422_v41 = vpop.permute.xlu1 %1421  ;;  %v1363_v42 = vsel %vm677_vm1, %v1341_v40, %v1358_v57 }
 0x1f4   :  { %v1430_v61 = vsel %vm677_vm1, %v1407_v20, %v1422_v41  ;;  %2085 = vmatprep.mubr.f32.mxu1 %v1363_v42 }
 0x1f5   :  { %2086 = vmatmul.mubr.f32.gmra.mxu1 %v1362_v45 }
 0x1f6   :  { %v1392_v43 = vpop.permute.xlu0 %1391 }
 0x1f7   :  { %v1456_v51 = vpop.permute.xlu1 %1455  ;;  %v1397_v49 = vsel %vm677_vm1, %v1375_v27, %v1392_v43 }
 0x1f8   :  { %v1464_v22 = vsel %vm677_vm1, %v1441_v32, %v1456_v51  ;;  %2090 = vmatprep.mubr.f32.mxu1 %v1397_v49 }
 0x1f9   :  { %2091 = vmatmul.mubr.f32.gmra.mxu1 %v1396_v56  ;;  %v2636_v56 = vld [vmem:[#allocation6 + $0x31] sm:$0xf] }
 0x1fa   :  { %v1426_v26 = vpop.permute.xlu0 %1425  ;;  %2645 = vrot.lane.b32.xlu1 %v2636_v56, %s4505_s20 }
 0x1fb   :  { %v1490_v60 = vpop.permute.xlu1 %1489  ;;  %v1431_v63 = vsel %vm677_vm1, %v1409_v62, %v1426_v26 }
 0x1fc   :  { %v1498_v58 = vsel %vm677_vm1, %v1475_v52, %v1490_v60  ;;  %2095 = vmatprep.mubr.f32.mxu1 %v1431_v63  ;;  %v2594_v63 = vld [vmem:[#allocation6 + $0x2a] sm:$0xf] }
 0x1fd   :  { %2096 = vmatmul.mubr.f32.gmra.mxu1 %v1430_v61 }
 0x1fe   :  { %v1460_v11 = vpop.permute.xlu0 %1459 }
 0x1ff   :  { %v1524_v30 = vpop.permute.xlu1 %1523  ;;  %v1465_v3 = vsel %vm677_vm1, %v1443_v1, %v1460_v11 }
 0x200   :  { %v1532_v2 = vsel %vm677_vm1, %v1509_v0, %v1524_v30  ;;  %2100 = vmatprep.mubr.f32.mxu1 %v1465_v3  ;;  %v2624_v0 = vrot.slane %v2594_v63, 4 }
 0x201   :  { %2101 = vmatmul.mubr.f32.gmra.mxu1 %v1464_v22 }
 0x202   :  { %v1494_v13 = vpop.permute.xlu0 %1493  ;;  %2634 = vst.msk [vmem:[#allocation7 + $0x48] sm:$0xf0] %vm2550_vm6, %v2624_v0 }
 0x203   :  { %v1558_v4 = vpop.permute.xlu1 %1557  ;;  %v1499_v7 = vsel %vm677_vm1, %v1477_v12, %v1494_v13 }
 0x204   :  { %v1566_v53 = vsel %vm677_vm1, %v1543_v59, %v1558_v4  ;;  %2105 = vmatprep.mubr.f32.mxu1 %v1499_v7  ;;  %v2836_v7 = vld [vmem:[%s6255_s5 + $0x78] sm:$0xff] }
 0x205   :  { %2106 = vmatmul.mubr.f32.gmra.mxu1 %v1498_v58 }
 0x206   :  { %v1528_v14 = vpop.permute.xlu0 %1527 }
 0x207   :  { %v1592_v55 = vpop.permute.xlu1 %1591  ;;  %v1533_v17 = vsel %vm677_vm1, %v1511_v46, %v1528_v14  ;;  %v2835_v46 = vld [vmem:[%s6255_s5 + $0x70] sm:$0xff]  ;;  %v2850_v14 = vld [vmem:[%s6255_s5 + $0xe8] sm:$0xff] }
 0x208   :  { %v1600_v16 = vsel %vm677_vm1, %v1577_v15, %v1592_v55  ;;  %2110 = vmatprep.mubr.f32.mxu1 %v1533_v17  ;;  %v2851_v55 = vld [vmem:[%s6255_s5 + $0xf0] sm:$0xff]  ;;  %v2834_v17 = vld [vmem:[%s6255_s5 + $0x68] sm:$0xff] }
 0x209   :  { %2111 = vmatmul.mubr.f32.gmra.mxu1 %v1532_v2 }
 0x20a   :  { %v1562_v48 = vpop.permute.xlu0 %1561 }
 0x20b   :  { %v1626_v47 = vpop.permute.xlu1 %1625  ;;  %v1567_v18 = vsel %vm677_vm1, %v1545_v19, %v1562_v48  ;;  %v2849_v19 = vld [vmem:[%s6255_s5 + $0xe0] sm:$0xff] }
 0x20c   :  { %v1634_v24 = vsel %vm677_vm1, %v5475_v5, %v1626_v47  ;;  %2115 = vmatprep.mubr.f32.mxu1 %v1567_v18  ;;  %v2833_v48 = vld [vmem:[%s6255_s5 + $0x60] sm:$0xff]  ;;  %v2848_v18 = vld [vmem:[%s6255_s5 + $0xd8] sm:$0xff] }
 0x20d   :  { %2116 = vmatmul.mubr.f32.gmra.mxu1 %v1566_v53  ;;  %v2852_v53 = vld [vmem:[%s6255_s5 + $0xf8] sm:$0xff] }
 0x20e   :  { %v1596_v8 = vpop.permute.xlu0 %1595  ;;  %4118 = vmatprep.subr.mxu1 %v2852_v53 }
 0x20f   :  { %v1601_v50 = vsel %vm677_vm1, %v1579_v33, %v1596_v8  ;;  %4119 = vmatpush3.msra.mxu1 %v2836_v7  ;;  %v2832_v33 = vld [vmem:[%s6255_s5 + $0x58] sm:$0xff]  ;;  %v2467_v7 = vld [vmem:[#allocation6] sm:$0xf] }
 0x210   :  { %2120 = vmatprep.mubr.f32.mxu1 %v1601_v50  ;;  %4120 = vmatprep.subr.mxu1 %v2851_v55  ;;  %v2847_v50 = vld [vmem:[%s6255_s5 + $0xd0] sm:$0xff] }
 0x211   :  { %2121 = vmatmul.mubr.f32.gmra.mxu1 %v1600_v16 }
 0x212   :  { %v1630_v23 = vpop.permute.xlu0 %1629  ;;  %4121 = vmatpush3.msra.mxu1 %v2835_v46 }
 0x213   :  { %v1635_v37 = vsel %vm677_vm1, %v1613_v21, %v1630_v23  ;;  %4122 = vmatprep.subr.mxu1 %v2850_v14  ;;  %v2831_v21 = vld [vmem:[%s6255_s5 + $0x50] sm:$0xff] }
 0x214   :  { %2125 = vmatprep.mubr.f32.mxu1 %v1635_v37  ;;  %4123 = vmatpush3.msra.mxu1 %v2834_v17 }
 0x215   :  { %2126 = vmatmul.mubr.f32.gmra.mxu1 %v1634_v24  ;;  %v2760_v24 = vld [vmem:[#allocation6 + $0x5a] sm:$0xf]  ;;  %4124 = vmatprep.subr.mxu1 %v2849_v19 }
 0x216   :  { %v2790_v8 = vrot.slane %v2760_v24, 4  ;;  %4125 = vmatpush3.msra.mxu1 %v2833_v48 }
 0x217   :  { %4126 = vmatprep.subr.mxu1 %v2848_v18 }
 0x218   :  { %2800 = vst.msk [vmem:[#allocation7 + $0x98] sm:$0xf0] %vm2550_vm6, %v2790_v8  ;;  %4127 = vmatpush3.msra.mxu1 %v2832_v33 }
 0x219   :  { %4128 = vmatprep.subr.mxu1 %v2847_v50  ;;  %v2635_v50 = vld [vmem:[#allocation6 + $0x30] sm:$0xf] }
 0x21a   :  { %4129 = vmatpush3.msra.mxu1 %v2831_v21  ;;  %v2592_v21 = vld [vmem:[#allocation6 + $0x28] sm:$0xf] }
 0x220   :  { %v3966_v29 = vpop.f32.mrf.mxu1 }
 0x222   :  { %v3967_v44 = vpop.f32.mrf.mxu1 }
 0x223   :  { %v5541_v31 = vadd.f32 %v3967_v44, %v3966_v29 }
 0x228   :  { %v3969_v5 = vpop.f32.mrf.mxu1 }
 0x22a   :  { %v3970_v35 = vpop.f32.mrf.mxu1 }
 0x22b   :  { %v5543_v10 = vadd.f32 %v3970_v35, %v3969_v5 }
 0x22d   :  { %v3972_v34 = vpop.f32.mrf.mxu1 }
 0x22f   :  { %v3973_v28 = vpop.f32.mrf.mxu1 }
 0x230   :  { %v5545_v45 = vadd.f32 %v3973_v28, %v3972_v34  ;;  %v4415_v28 = vpop.f32.mrf.mxu0 }
 0x232   :  { %v2197_v56 = vpop.f32.mrf.mxu0 }
 0x235   :  { %v3975_v36 = vpop.f32.mrf.mxu1 }
 0x237   :  { %v3976_v9 = vpop.f32.mrf.mxu1 }
 0x238   :  { %v5555_v25 = vadd.f32 %v3976_v9, %v3975_v36 }
 0x23d   :  { %v3978_v38 = vpop.f32.mrf.mxu1 }
 0x23f   :  { %v3979_v40 = vpop.f32.mrf.mxu1 }
 0x240   :  { %v5560_v20 = vadd.f32 %v3979_v40, %v3978_v38 }
 0x245   :  { %v3981_v41 = vpop.f32.mrf.mxu1 }
 0x247   :  { %v3982_v57 = vpop.f32.mrf.mxu1 }
 0x248   :  { %v5562_v61 = vadd.f32 %v3982_v57, %v3981_v41 }
 0x24d   :  { %v3984_v42 = vpop.f32.mrf.mxu1 }
 0x24f   :  { %v3985_v32 = vpop.f32.mrf.mxu1 }
 0x250   :  { %v5564_v51 = vadd.f32 %v3985_v32, %v3984_v42  ;;  %v4418_v32 = vpop.f32.mrf.mxu0 }
 0x255   :  { %v3987_v27 = vpop.f32.mrf.mxu1 }
 0x257   :  { %v3988_v43 = vpop.f32.mrf.mxu1 }
 0x258   :  { %v5566_v22 = vadd.f32 %v3988_v43, %v3987_v27 }
 0x25d   :  { %v3990_v49 = vpop.f32.mrf.mxu1 }
 0x25f   :  { %v3991_v52 = vpop.f32.mrf.mxu1 }
 0x260   :  { %v5576_v60 = vadd.f32 %v3991_v52, %v3990_v49 }
 0x262   :  { %v2478_v17 = vpop.permute.xlu1 %2477 }
 0x263   :  { %v2492_v24 = vsel %vm677_vm1, %v2467_v7, %v2478_v17  ;;  %v2882_v17 = vld [vmem:[%s6255_s5 + $0x1e8] sm:$0xff] }
 0x264   :  { %2496 = vst [vmem:[#allocation7] sm:$0xf] %v2492_v24 }
 0x265   :  { %v3993_v62 = vpop.f32.mrf.mxu1 }
 0x267   :  { %v3994_v26 = vpop.f32.mrf.mxu1 }
 0x268   :  { %v5578_v58 = vadd.f32 %v3994_v26, %v3993_v62  ;;  %v2207_v26 = vpop.f32.mrf.mxu0 }
 0x26d   :  { %v3996_v30 = vpop.f32.mrf.mxu1 }
 0x26f   :  { %v3997_v1 = vpop.f32.mrf.mxu1 }
 0x270   :  { %v5581_v11 = vadd.f32 %v3997_v1, %v3996_v30 }
 0x275   :  { %v3999_v2 = vpop.f32.mrf.mxu1 }
 0x277   :  { %v4000_v3 = vpop.f32.mrf.mxu1 }
 0x278   :  { %v5583_v59 = vadd.f32 %v4000_v3, %v3999_v2  ;;  %v4421_v2 = vpop.f32.mrf.mxu0 }
 0x27a   :  { %v2217_v19 = vpop.f32.mrf.mxu0 }
 0x27d   :  { %v4002_v4 = vpop.f32.mrf.mxu1 }
 0x27f   :  { %v4003_v12 = vpop.f32.mrf.mxu1 }
 0x280   :  { %v5585_v13 = vadd.f32 %v4003_v12, %v4002_v4 }
 0x285   :  { %v4005_v15 = vpop.f32.mrf.mxu1 }
 0x287   :  { %v4006_v16 = vpop.f32.mrf.mxu1 }
 0x288   :  { %v5605_v47 = vadd.f32 %v4006_v16, %v4005_v15 }
 0x28d   :  { %v4008_v23 = vpop.f32.mrf.mxu1 }
 0x28f   :  { %v4009_v37 = vpop.f32.mrf.mxu1 }
 0x290   :  { %v5626_v29 = vadd.f32 %v4009_v37, %v4008_v23 }
 0x295   :  { %v4011_v44 = vpop.f32.mrf.mxu1 }
 0x297   :  { %v4012_v5 = vpop.f32.mrf.mxu1 }
 0x298   :  { %v5628_v35 = vadd.f32 %v4012_v5, %v4011_v44  ;;  %v2646_v44 = vpop.permute.xlu1 %2645  ;;  %v2609_v5 = vpop.permute.xlu0 %2608 }
 0x299   :  { %v4046_v34 = vpop.f32.mrf.mxu1 }
 0x29b   :  { %v4047_v36 = vpop.f32.mrf.mxu1 }
 0x29c   :  { %v4048_v9 = vadd.f32 %v4047_v36, %v4046_v34  ;;  %v4424_v34 = vpop.f32.mrf.mxu0 }
 0x29d   :  { %v4049_v6 = vpop.f32.mrf.mxu1 }
 0x29e   :  { %v2053_v38 = vadd.f32 %v4048_v9, %v5541_v31 }
 0x29f   :  { %v4050_v39 = vpop.f32.mrf.mxu1 }
 0x2a0   :  { %v2198_v40 = vadd.f32 %v2197_v56, %v2053_v38  ;;  %v4051_v41 = vadd.f32 %v4050_v39, %v4049_v6  ;;  %v2660_v6 = vsel %vm677_vm1, %v2635_v50, %v2646_v44  ;;  %v2614_v38 = vsel %vm677_vm1, %v2592_v21, %v2609_v5 }
 0x2a1   :  { %v4052_v57 = vpop.f32.mrf.mxu1  ;;  %2664 = vst [vmem:[#allocation7 + $0x50] sm:$0xf] %v2660_v6 }
 0x2a2   :  { %2276 = vst.msk [vmem:[#allocation5] sm:$0xff] %vm677_vm1, %v2198_v40  ;;  %v2058_v42 = vadd.f32 %v4051_v41, %v5543_v10  ;;  %v2623_v41 = vrot.slane %v2614_v38, 4  ;;  %v2880_v38 = vld [vmem:[%s6255_s5 + $0x1d8] sm:$0xff] }
 0x2a3   :  { %v4053_v27 = vpop.f32.mrf.mxu1 }
 0x2a4   :  { %v2203_v43 = vadd.f32 %v4415_v28, %v2058_v42  ;;  %v4054_v49 = vadd.f32 %v4053_v27, %v4052_v57  ;;  %2633 = vst [vmem:[#allocation7 + $0x40] sm:$0xf0] %v2623_v41 }
 0x2a5   :  { %v4055_v52 = vpop.f32.mrf.mxu1 }
 0x2a6   :  { %2277 = vst.msk [vmem:[#allocation5 + $0x8] sm:$0xff] %vm677_vm1, %v2203_v43  ;;  %v2063_v62 = vadd.f32 %v4054_v49, %v5545_v45 }
 0x2a7   :  { %v4056_v31 = vpop.f32.mrf.mxu1 }
 0x2a8   :  { %v2208_v63 = vadd.f32 %v2207_v26, %v2063_v62  ;;  %v4057_v0 = vadd.f32 %v4056_v31, %v4055_v52  ;;  %v2227_v52 = vpop.f32.mrf.mxu0  ;;  %v2846_v26 = vld [vmem:[%s6255_s5 + $0xc8] sm:$0xff]  ;;  %v2884_v31 = vld [vmem:[%s6255_s5 + $0x1f8] sm:$0xff] }
 0x2a9   :  { %v4058_v30 = vpop.f32.mrf.mxu1  ;;  %v2303_v10 = vld [vmem:[#allocation5] ss:$2 sm:$0xf]  ;;  %v2305_v3 = vld [vmem:[#allocation5 + $0x1] ss:$2 sm:$0xf]  ;;  %4130 = vmatprep.subr.mxu1 %v2846_v26  ;;  %4162 = vmatprep.subr.mxu0 %v2884_v31 }
 0x2aa   :  { %2278 = vst.msk [vmem:[#allocation5 + $0x10] sm:$0xff] %vm677_vm1, %v2208_v63  ;;  %v2068_v1 = vadd.f32 %v4057_v0, %v5555_v25  ;;  %v2310_v45 = vmax.f32 %v2303_v10, %v2305_v3  ;;  %v5642_v25 = vld [vmem:[%s6254_s4] ss:$0 sm:$0xff] }
 0x2ab   :  { %v4059_v4 = vpop.f32.mrf.mxu1 }
 0x2ac   :  { %v2213_v12 = vadd.f32 %v4418_v32, %v2068_v1  ;;  %v4060_v53 = vadd.f32 %v4059_v4, %v4058_v30 }
 0x2ad   :  { %v2307_v55 = vld [vmem:[#allocation5 + $0x8] ss:$2 sm:$0xf]  ;;  %v2309_v15 = vld [vmem:[#allocation5 + $0x9] ss:$2 sm:$0xf]  ;;  %v4061_v46 = vpop.f32.mrf.mxu1 }
 0x2ae   :  { %v2311_v14 = vmax.f32 %v2307_v55, %v2309_v15  ;;  %2279 = vst.msk [vmem:[#allocation5 + $0x18] sm:$0xff] %vm677_vm1, %v2213_v12  ;;  %v2073_v16 = vadd.f32 %v4060_v53, %v5560_v20  ;;  %v2845_v55 = vld [vmem:[%s6255_s5 + $0xc0] sm:$0xff]  ;;  %v2883_v15 = vld [vmem:[%s6255_s5 + $0x1f0] sm:$0xff] }
 0x2af   :  { %v4062_v48 = vpop.f32.mrf.mxu1 }
 0x2b0   :  { %v2218_v18 = vadd.f32 %v2217_v19, %v2073_v16  ;;  %v4063_v8 = vadd.f32 %v4062_v48, %v4061_v46  ;;  %v2312_v33 = vmax.f32 %v2310_v45, %v2311_v14  ;;  %v2829_v46 = vld [vmem:[%s6255_s5 + $0x40] sm:$0xff]  ;;  %v5678_v45 = vpop.f32.mrf.mxu0  ;;  %v2844_v16 = vld [vmem:[%s6255_s5 + $0xb8] sm:$0xff] }
 0x2b1   :  { %v4064_v23 = vpop.f32.mrf.mxu1  ;;  %v2324_v28 = vld [vmem:[#allocation5 + $0x10] ss:$2 sm:$0xf]  ;;  %v2326_v36 = vld [vmem:[#allocation5 + $0x11] ss:$2 sm:$0xf] }
 0x2b2   :  { %2280 = vst.msk [vmem:[#allocation5 + $0x20] sm:$0xff] %vm677_vm1, %v2218_v18  ;;  %v2078_v20 = vadd.f32 %v4063_v8, %v5562_v61  ;;  %v2313_v37 = vadd.f32 %v5642_v25, %v2312_v33  ;;  %v2331_v32 = vmax.f32 %v2324_v28, %v2326_v36  ;;  %v2828_v18 = vld [vmem:[%s6255_s5 + $0x38] sm:$0xff]  ;;  %v2866_v8 = vld [vmem:[%s6255_s5 + $0x168] sm:$0xff]  ;;  %v2843_v33 = vld [vmem:[%s6255_s5 + $0xb0] sm:$0xff] }
 0x2b3   :  { %v4065_v9 = vpop.f32.mrf.mxu1  ;;  %v2827_v28 = vld [vmem:[%s6255_s5 + $0x30] sm:$0xff]  ;;  %v2865_v36 = vld [vmem:[%s6255_s5 + $0x160] sm:$0xff] }
 0x2b4   :  { %v2223_v56 = vadd.f32 %v4421_v2, %v2078_v20  ;;  %v4066_v39 = vadd.f32 %v4065_v9, %v4064_v23  ;;  %v2314_v40 = vmax.f32 %v2313_v37, 0.0  ;;  %v2868_v2 = vld [vmem:[%s6255_s5 + $0x178] sm:$0xff]  ;;  %v2237_v9 = vpop.f32.mrf.mxu0 }
 0x2b5   :  { %v2328_v57 = vld [vmem:[#allocation5 + $0x18] ss:$2 sm:$0xf]  ;;  %v2330_v42 = vld [vmem:[#allocation5 + $0x19] ss:$2 sm:$0xf]  ;;  %v4067_v61 = vpop.f32.mrf.mxu1  ;;  %4163 = vmatpush3.msra.mxu0 %v2868_v2 }
 0x2b6   :  { %v2332_v27 = vmax.f32 %v2328_v57, %v2330_v42  ;;  %2281 = vst.msk [vmem:[#allocation5 + $0x28] sm:$0xff] %vm677_vm1, %v2223_v56  ;;  %v2083_v43 = vadd.f32 %v4066_v39, %v5564_v51  ;;  %v2316_v49 = vrot.slane %v2314_v40, 7  ;;  %v2830_v51 = vld [vmem:[%s6255_s5 + $0x48] sm:$0xff]  ;;  %4164 = vmatprep.subr.mxu0 %v2883_v15  ;;  %v2864_v42 = vld [vmem:[%s6255_s5 + $0x158] sm:$0xff]  ;;  %v2879_v2 = vld [vmem:[%s6255_s5 + $0x1d0] sm:$0xff] }
 0x2b7   :  { %v4068_v62 = vpop.f32.mrf.mxu1  ;;  %4131 = vmatpush3.msra.mxu1 %v2830_v51  ;;  %v2826_v57 = vld [vmem:[%s6255_s5 + $0x28] sm:$0xff] }
 0x2b8   :  { %v2228_v63 = vadd.f32 %v2227_v52, %v2083_v43  ;;  %v4069_v0 = vadd.f32 %v4068_v62, %v4067_v61  ;;  %v2318_v30 = vsel %vm770_vm3, 0.0, %v2316_v49  ;;  %v2333_v1 = vmax.f32 %v2331_v32, %v2332_v27  ;;  %4132 = vmatprep.subr.mxu1 %v2845_v55  ;;  %v5726_v62 = vpop.f32.mrf.mxu0 }
 0x2b9   :  { %v2344_v10 = vld [vmem:[#allocation5 + $0x20] ss:$2 sm:$0xf]  ;;  %v2346_v3 = vld [vmem:[#allocation5 + $0x21] ss:$2 sm:$0xf]  ;;  %v4070_v4 = vpop.f32.mrf.mxu1  ;;  %4133 = vmatpush3.msra.mxu1 %v2829_v46 }
 0x2ba   :  { %2282 = vst.msk [vmem:[#allocation5 + $0x30] sm:$0xff] %vm677_vm1, %v2228_v63  ;;  %v2088_v12 = vadd.f32 %v4069_v0, %v5566_v22  ;;  %v2320_v53 = vsel %vm2319_vm7, %v2318_v30, 0.0  ;;  %v2334_v7 = vadd.f32 %v5642_v25, %v2333_v1  ;;  %v2867_v22 = vld [vmem:[%s6255_s5 + $0x170] sm:$0xff]  ;;  %4134 = vmatprep.subr.mxu1 %v2844_v16  ;;  %v2351_v20 = vmax.f32 %v2344_v10, %v2346_v3  ;;  %v2825_v10 = vld [vmem:[%s6255_s5 + $0x20] sm:$0xff] }
 0x2bb   :  { %v4071_v14 = vpop.f32.mrf.mxu1  ;;  %2322 = vst.msk [vmem:[#allocation6 + $0x8] sm:$0x3f] %vm2299_vm4, %v2320_v53  ;;  %4165 = vmatpush3.msra.mxu0 %v2867_v22  ;;  %4135 = vmatpush3.msra.mxu1 %v2828_v18  ;;  %v2863_v46 = vld [vmem:[%s6255_s5 + $0x150] sm:$0xff]  ;;  %v2247_v22 = vpop.f32.mrf.mxu0 }
 0x2bc   :  { %v2233_v19 = vadd.f32 %v4424_v34, %v2088_v12  ;;  %v4072_v48 = vadd.f32 %v4071_v14, %v4070_v4  ;;  %v2335_v24 = vmax.f32 %v2334_v7, 0.0  ;;  %4166 = vmatprep.subr.mxu0 %v2882_v17  ;;  %v2881_v34 = vld [vmem:[%s6255_s5 + $0x1e0] sm:$0xff]  ;;  %4136 = vmatprep.subr.mxu1 %v2843_v33  ;;  %v2878_v14 = vld [vmem:[%s6255_s5 + $0x1c8] sm:$0xff] }
 0x2bd   :  { %v2348_v50 = vld [vmem:[#allocation5 + $0x28] ss:$2 sm:$0xf]  ;;  %v2350_v21 = vld [vmem:[#allocation5 + $0x29] ss:$2 sm:$0xf]  ;;  %v4073_v23 = vpop.f32.mrf.mxu1  ;;  %4167 = vmatpush3.msra.mxu0 %v2866_v8  ;;  %4137 = vmatpush3.msra.mxu1 %v2827_v28 }
 0x2be   :  { %v2352_v37 = vmax.f32 %v2348_v50, %v2350_v21  ;;  %2283 = vst.msk [vmem:[#allocation5 + $0x38] sm:$0xff] %vm677_vm1, %v2233_v19  ;;  %v2093_v44 = vadd.f32 %v4072_v48, %v5576_v60  ;;  %v2337_v5 = vrot.slane %v2335_v24, 7  ;;  %4168 = vmatprep.subr.mxu0 %v2881_v34  ;;  %v2842_v60 = vld [vmem:[%s6255_s5 + $0xa8] sm:$0xff]  ;;  %v2839_v19 = vld [vmem:[%s6255_s5 + $0x90] sm:$0xff]  ;;  %v2877_v33 = vld [vmem:[%s6255_s5 + $0x1c0] sm:$0xff] }
 0x2bf   :  { %v4074_v6 = vpop.f32.mrf.mxu1  ;;  %4169 = vmatpush3.msra.mxu0 %v2865_v36  ;;  %4138 = vmatprep.subr.mxu1 %v2842_v60  ;;  %v2862_v17 = vld [vmem:[%s6255_s5 + $0x148] sm:$0xff]  ;;  %v2823_v50 = vld [vmem:[%s6255_s5 + $0x10] sm:$0xff]  ;;  %v2861_v21 = vld [vmem:[%s6255_s5 + $0x140] sm:$0xff] }
 0x2c0   :  { %v2238_v56 = vadd.f32 %v2237_v9, %v2093_v44  ;;  %v4075_v39 = vadd.f32 %v4074_v6, %v4073_v23  ;;  %v2339_v40 = vsel %vm770_vm3, 0.0, %v2337_v5  ;;  %v2353_v41 = vmax.f32 %v2351_v20, %v2352_v37  ;;  %4170 = vmatprep.subr.mxu0 %v2880_v38  ;;  %4139 = vmatpush3.msra.mxu1 %v2826_v57  ;;  %v2838_v28 = vld [vmem:[%s6255_s5 + $0x88] sm:$0xff]  ;;  %v2876_v36 = vld [vmem:[%s6255_s5 + $0x1b8] sm:$0xff]  ;;  %v4433_v9 = vpop.f32.mrf.mxu0 }
 0x2c1   :  { %v2364_v61 = vld [vmem:[#allocation5 + $0x30] ss:$2 sm:$0xf]  ;;  %v4076_v32 = vpop.f32.mrf.mxu1  ;;  %4171 = vmatpush3.msra.mxu0 %v2864_v42  ;;  %v2366_v26 = vld [vmem:[#allocation5 + $0x31] ss:$2 sm:$0xf] }
 0x2c2   :  { %2284 = vst.msk [vmem:[#allocation5 + $0x40] sm:$0xff] %vm677_vm1, %v2238_v56  ;;  %v2098_v27 = vadd.f32 %v4075_v39, %v5578_v58  ;;  %v2503_v43 = vld [vmem:[#allocation6 + $0x9] sm:$0xf]  ;;  %v2354_v52 = vadd.f32 %v5642_v25, %v2353_v41  ;;  %v2340_v63 = vsel %vm2319_vm7, %v2339_v40, 0.0  ;;  %v2841_v58 = vld [vmem:[%s6255_s5 + $0xa0] sm:$0xff]  ;;  %4172 = vmatprep.subr.mxu0 %v2879_v2  ;;  %v2371_v53 = vmax.f32 %v2364_v61, %v2366_v26  ;;  %v2860_v41 = vld [vmem:[%s6255_s5 + $0x138] sm:$0xff]  ;;  %v2257_v26 = vpop.f32.mrf.mxu0 }
 0x2c3   :  { %v2470_v49 = vld [vmem:[#allocation6 + $0x8] sm:$0xf]  ;;  %2512 = vrot.lane.b32.xlu1 %v2503_v43, %s4505_s20  ;;  %v4077_v31 = vpop.f32.mrf.mxu1  ;;  %2342 = vst.msk [vmem:[#allocation6 + $0x10] sm:$0x3f] %vm2299_vm4, %v2340_v63  ;;  %4140 = vmatprep.subr.mxu1 %v2841_v58  ;;  %v2875_v63 = vld [vmem:[%s6255_s5 + $0x1b0] sm:$0xff]  ;;  %v2821_v58 = vld [vmem:[%s6255_s5] sm:$0xff] }
 0x2c4   :  { %2481 = vrot.lane.b32.xlu0 %v2470_v49, %s4505_s20  ;;  %v2243_v0 = vadd.f32 %v5678_v45, %v2098_v27  ;;  %v4078_v30 = vadd.f32 %v4077_v31, %v4076_v32  ;;  %v2472_v1 = vld [vmem:[#allocation6 + $0xa] sm:$0xf]  ;;  %v2355_v51 = vmax.f32 %v2354_v52, 0.0  ;;  %4141 = vmatpush3.msra.mxu1 %v2825_v10  ;;  %v2840_v45 = vld [vmem:[%s6255_s5 + $0x98] sm:$0xff] }
 0x2c5   :  { %v2368_v3 = vld [vmem:[#allocation5 + $0x38] ss:$2 sm:$0xf]  ;;  %v2370_v4 = vld [vmem:[#allocation5 + $0x39] ss:$2 sm:$0xf]  ;;  %v4079_v12 = vpop.f32.mrf.mxu1  ;;  %4173 = vmatpush3.msra.mxu0 %v2863_v46  ;;  %4142 = vmatprep.subr.mxu1 %v2840_v45 }
 0x2c6   :  { %v2372_v7 = vmax.f32 %v2368_v3, %v2370_v4  ;;  %2285 = vst.msk [vmem:[#allocation5 + $0x48] sm:$0xff] %vm677_vm1, %v2243_v0  ;;  %v2103_v55 = vadd.f32 %v4078_v30, %v5581_v11  ;;  %v2357_v15 = vrot.slane %v2355_v51, 7  ;;  %v2824_v11 = vld [vmem:[%s6255_s5 + $0x18] sm:$0xff]  ;;  %4174 = vmatprep.subr.mxu0 %v2878_v14  ;;  %v2874_v2 = vld [vmem:[%s6255_s5 + $0x1a8] sm:$0xff] }
 0x2c7   :  { %v4080_v16 = vpop.f32.mrf.mxu1  ;;  %4143 = vmatpush3.msra.mxu1 %v2824_v11  ;;  %4175 = vmatpush3.msra.mxu0 %v2862_v17  ;;  %v2858_v10 = vld [vmem:[%s6255_s5 + $0x128] sm:$0xff]  ;;  %v2857_v17 = vld [vmem:[%s6255_s5 + $0x120] sm:$0xff] }
 0x2c8   :  { %2485 = vrot.lane.b32.xlu0 %v2472_v1, %s4505_s20  ;;  %v2248_v48 = vadd.f32 %v2247_v22, %v2103_v55  ;;  %v4081_v24 = vadd.f32 %v4080_v16, %v4079_v12  ;;  %v2359_v18 = vsel %vm770_vm3, 0.0, %v2357_v15  ;;  %v2373_v8 = vmax.f32 %v2371_v53, %v2372_v7  ;;  %4144 = vmatprep.subr.mxu1 %v2839_v19  ;;  %v5815_v12 = vpop.f32.mrf.mxu0  ;;  %v2873_v22 = vld [vmem:[%s6255_s5 + $0x1a0] sm:$0xff] }
 0x2c9   :  { %v2388_v23 = vld [vmem:[#allocation5 + $0x40] ss:$2 sm:$0xf]  ;;  %v4082_v20 = vpop.f32.mrf.mxu1  ;;  %v2390_v37 = vld [vmem:[#allocation5 + $0x41] ss:$2 sm:$0xf]  ;;  %4176 = vmatprep.subr.mxu0 %v2877_v33  ;;  %4145 = vmatpush3.msra.mxu1 %v2823_v50 }
 0x2ca   :  { %2286 = vst.msk [vmem:[#allocation5 + $0x50] sm:$0xff] %vm677_vm1, %v2248_v48  ;;  %v2108_v44 = vadd.f32 %v4081_v24, %v5583_v59  ;;  %v2360_v5 = vsel %vm2319_vm7, %v2359_v18, 0.0  ;;  %v2374_v34 = vadd.f32 %v5642_v25, %v2373_v8  ;;  %v2553_v6 = vld [vmem:[#allocation6 + $0x11] sm:$0xf]  ;;  %4177 = vmatpush3.msra.mxu0 %v2861_v21  ;;  %v2822_v59 = vld [vmem:[%s6255_s5 + $0x8] sm:$0xff]  ;;  %4146 = vmatprep.subr.mxu1 %v2838_v28  ;;  %v2267_v18 = vpop.f32.mrf.mxu0 }
 0x2cb   :  { %v2505_v60 = vld [vmem:[#allocation6 + $0x10] sm:$0xf]  ;;  %v4083_v38 = vpop.f32.mrf.mxu1  ;;  %2362 = vst.msk [vmem:[#allocation6 + $0x18] sm:$0x3f] %vm2299_vm4, %v2360_v5  ;;  %2562 = vrot.lane.b32.xlu1 %v2553_v6, %s4505_s20  ;;  %4178 = vmatprep.subr.mxu0 %v2876_v36  ;;  %v2395_v32 = vmax.f32 %v2388_v23, %v2390_v37  ;;  %v2856_v37 = vld [vmem:[%s6255_s5 + $0x118] sm:$0xff] }
 0x2cc   :  { %v2253_v56 = vadd.f32 %v5726_v62, %v2108_v44  ;;  %2516 = vrot.lane.b32.xlu0 %v2505_v60, %s4505_s20  ;;  %v4084_v39 = vadd.f32 %v4083_v38, %v4082_v20  ;;  %v2375_v40 = vmax.f32 %v2374_v34, 0.0  ;;  %v2507_v49 = vld [vmem:[#allocation6 + $0x12] sm:$0xf]  ;;  %4147 = vmatpush3.msra.mxu1 %v2822_v59  ;;  %v2837_v62 = vld [vmem:[%s6255_s5 + $0x80] sm:$0xff]  ;;  %v2872_v20 = vld [vmem:[%s6255_s5 + $0x198] sm:$0xff] }
 0x2cd   :  { %v2392_v57 = vld [vmem:[#allocation5 + $0x48] ss:$2 sm:$0xf]  ;;  %v2394_v42 = vld [vmem:[#allocation5 + $0x49] ss:$2 sm:$0xf]  ;;  %v4085_v61 = vpop.f32.mrf.mxu1  ;;  %4179 = vmatpush3.msra.mxu0 %v2860_v41  ;;  %4148 = vmatprep.subr.mxu1 %v2837_v62 }
 0x2ce   :  { %v2396_v27 = vmax.f32 %v2392_v57, %v2394_v42  ;;  %2287 = vst.msk [vmem:[#allocation5 + $0x58] sm:$0xff] %vm677_vm1, %v2253_v56  ;;  %v2113_v43 = vadd.f32 %v4084_v39, %v5585_v13  ;;  %v2377_v52 = vrot.slane %v2375_v40, 7  ;;  %v2859_v13 = vld [vmem:[%s6255_s5 + $0x130] sm:$0xff]  ;;  %4180 = vmatprep.subr.mxu0 %v2875_v63  ;;  %4149 = vmatpush3.msra.mxu1 %v2821_v58  ;;  %v2870_v60 = vld [vmem:[%s6255_s5 + $0x188] sm:$0xff] }
 0x2cf   :  { %v4086_v31 = vpop.f32.mrf.mxu1  ;;  %v2474_v4 = vld [vmem:[#allocation6 + $0x11] sm:$0xf]  ;;  %4181 = vmatpush3.msra.mxu0 %v2859_v13  ;;  %v2854_v59 = vld [vmem:[%s6255_s5 + $0x108] sm:$0xff] }
 0x2d0   :  { %v2258_v0 = vadd.f32 %v2257_v26, %v2113_v43  ;;  %2520 = vrot.lane.b32.xlu0 %v2507_v49, %s4505_s20  ;;  %v4087_v30 = vadd.f32 %v4086_v31, %v4085_v61  ;;  %v2379_v1 = vsel %vm770_vm3, 0.0, %v2377_v52  ;;  %v2397_v51 = vmax.f32 %v2395_v32, %v2396_v27  ;;  %4182 = vmatprep.subr.mxu0 %v2874_v2  ;;  %v2871_v34 = vld [vmem:[%s6255_s5 + $0x190] sm:$0xff]  ;;  %v2869_v32 = vld [vmem:[%s6255_s5 + $0x180] sm:$0xff] }
 0x2d1   :  { %v4088_v3 = vpop.f32.mrf.mxu1  ;;  %v2408_v53 = vld [vmem:[#allocation5 + $0x50] ss:$2 sm:$0xf]  ;;  %v2410_v46 = vld [vmem:[#allocation5 + $0x51] ss:$2 sm:$0xf]  ;;  %4183 = vmatpush3.msra.mxu0 %v2858_v10 }
 0x2d2   :  { %2288 = vst.msk [vmem:[#allocation5 + $0x60] sm:$0xff] %vm677_vm1, %v2258_v0  ;;  %v2118_v7 = vadd.f32 %v4087_v30, %v5605_v47  ;;  %v2587_v55 = vld [vmem:[#allocation6 + $0x19] sm:$0xf]  ;;  %v2398_v15 = vadd.f32 %v5642_v25, %v2397_v51  ;;  %v2380_v14 = vsel %vm2319_vm7, %v2379_v1, 0.0  ;;  %4184 = vmatprep.subr.mxu0 %v2873_v22  ;;  %v2415_v8 = vmax.f32 %v2408_v53, %v2410_v46  ;;  %v2475_v57 = vld [vmem:[#allocation6 + $0x12] sm:$0xf] }
 0x2d3   :  { %2596 = vrot.lane.b32.xlu1 %v2587_v55, %s4505_s20  ;;  %v4089_v45 = vpop.f32.mrf.mxu1  ;;  %2382 = vst.msk [vmem:[#allocation6 + $0x20] sm:$0x3f] %vm2299_vm4, %v2380_v14  ;;  %4185 = vmatpush3.msra.mxu0 %v2857_v17  ;;  %v2555_v50 = vld [vmem:[#allocation6 + $0x18] sm:$0xf]  ;;  %v2853_v43 = vld [vmem:[%s6255_s5 + $0x100] sm:$0xff] }
 0x2d4   :  { %v2263_v16 = vadd.f32 %v4433_v9, %v2118_v7  ;;  %2489 = vrot.lane.b32.xlu0 %v2474_v4, %s4505_s20  ;;  %v4090_v11 = vadd.f32 %v4089_v45, %v4088_v3  ;;  %v2399_v47 = vmax.f32 %v2398_v15, 0.0  ;;  %v2509_v44 = vld [vmem:[#allocation6 + $0x19] sm:$0xf]  ;;  %4186 = vmatprep.subr.mxu0 %v2872_v20  ;;  %2501 = vst.msk [vmem:[#allocation7 + $0x20] sm:$0xf] %vm2500_vm5, %v2475_v57 }
 0x2d5   :  { %v2412_v19 = vld [vmem:[#allocation5 + $0x58] ss:$2 sm:$0xf]  ;;  %v2414_v48 = vld [vmem:[#allocation5 + $0x59] ss:$2 sm:$0xf]  ;;  %v4091_v24 = vpop.f32.mrf.mxu1  ;;  %4187 = vmatpush3.msra.mxu0 %v2856_v37 }
 0x2d6   :  { %v2416_v33 = vmax.f32 %v2412_v19, %v2414_v48  ;;  %2289 = vst.msk [vmem:[#allocation5 + $0x68] sm:$0xff] %vm677_vm1, %v2263_v16  ;;  %v2123_v21 = vadd.f32 %v4090_v11, %v5626_v29  ;;  %v2401_v23 = vrot.slane %v2399_v47, 7  ;;  %v2855_v29 = vld [vmem:[%s6255_s5 + $0x110] sm:$0xff]  ;;  %v2557_v38 = vld [vmem:[#allocation6 + $0x1a] sm:$0xf]  ;;  %4188 = vmatprep.subr.mxu0 %v2871_v34 }
 0x2d7   :  { %2566 = vrot.lane.b32.xlu1 %v2555_v50, %s4505_s20  ;;  %v4092_v5 = vpop.f32.mrf.mxu1  ;;  %4189 = vmatpush3.msra.mxu0 %v2855_v29  ;;  %v2510_v63 = vld [vmem:[#allocation6 + $0x1a] sm:$0xf] }
 0x2d8   :  { %2524 = vrot.lane.b32.xlu0 %v2509_v44, %s4505_s20  ;;  %v4093_v28 = vadd.f32 %v4092_v5, %v4091_v24  ;;  %v2268_v36 = vadd.f32 %v2267_v18, %v2123_v21  ;;  %v2403_v9 = vsel %vm770_vm3, 0.0, %v2401_v23  ;;  %v2417_v6 = vmax.f32 %v2415_v8, %v2416_v33  ;;  %4190 = vmatprep.subr.mxu0 %v2870_v60  ;;  %v5894_v37 = vld [vmem:[%s6255_s5 + $0x238] sm:$0xff] }
 0x2d9   :  { %v2428_v56 = vld [vmem:[#allocation5 + $0x60] ss:$2 sm:$0xf]  ;;  %v2404_v40 = vsel %vm2319_vm7, %v2403_v9, 0.0  ;;  %4191 = vmatpush3.msra.mxu0 %v2854_v59  ;;  %v2540_v0 = vrot.slane %v2510_v63, 4  ;;  %4437 = vmatprep.subr.mxu1 %v5894_v37 }
 0x2da   :  { %v2128_v39 = vadd.f32 %v4093_v28, %v5628_v35  ;;  %2290 = vst.msk [vmem:[#allocation5 + $0x70] sm:$0xff] %vm677_vm1, %v2268_v36  ;;  %v2418_v41 = vadd.f32 %v5642_v25, %v2417_v6  ;;  %v2430_v42 = vld [vmem:[#allocation5 + $0x61] ss:$2 sm:$0xf]  ;;  %4192 = vmatprep.subr.mxu0 %v2869_v32  ;;  %v2759_v5 = vld [vmem:[#allocation6 + $0x59] sm:$0xf] }
 0x2db   :  { %v2589_v61 = vld [vmem:[#allocation6 + $0x20] sm:$0xf]  ;;  %2406 = vst.msk [vmem:[#allocation6 + $0x38] sm:$0x3f] %vm2299_vm4, %v2404_v40  ;;  %v2435_v62 = vmax.f32 %v2428_v56, %v2430_v42  ;;  %4193 = vmatpush3.msra.mxu0 %v2853_v43  ;;  %v2502_v56 = vld [vmem:[#allocation6 + $0x8] sm:$0xf] }
 0x2dc   :  { %v2273_v35 = vadd.f32 %v5815_v12, %v2128_v39  ;;  %2600 = vrot.lane.b32.xlu1 %v2589_v61, %s4505_s20  ;;  %2570 = vrot.lane.b32.xlu0 %v2557_v38, %s4505_s20  ;;  %v2419_v27 = vmax.f32 %v2418_v41, 0.0  ;;  %v2560_v58 = vld [vmem:[#allocation6 + $0x22] sm:$0xf]  ;;  %2551 = vst.msk [vmem:[#allocation7 + $0x20] sm:$0xf0] %vm2550_vm6, %v2540_v0 }
 0x2dd   :  { %v2432_v49 = vld [vmem:[#allocation5 + $0x68] ss:$2 sm:$0xf]  ;;  %v2434_v52 = vld [vmem:[#allocation5 + $0x69] ss:$2 sm:$0xf] }
 0x2de   :  { %v2436_v26 = vmax.f32 %v2432_v49, %v2434_v52  ;;  %2291 = vst.msk [vmem:[#allocation5 + $0x78] sm:$0xff] %vm677_vm1, %v2273_v35  ;;  %v2421_v31 = vrot.slane %v2419_v27, 7  ;;  %v2591_v13 = vld [vmem:[#allocation6 + $0x22] sm:$0xf]  ;;  %v2471_v42 = vld [vmem:[#allocation6 + $0x9] sm:$0xf] }
 0x2df   :  { %2585 = vst.msk [vmem:[#allocation7 + $0x48] sm:$0xf] %vm2500_vm5, %v2560_v58  ;;  %v2559_v4 = vld [vmem:[#allocation6 + $0x21] sm:$0xf]  ;;  %v2552_v27 = vld [vmem:[#allocation6 + $0x10] sm:$0xf] }
 0x2e0   :  { %2604 = vrot.lane.b32.xlu0 %v2591_v13, %s4505_s20  ;;  %v2423_v30 = vsel %vm770_vm3, 0.0, %v2421_v31  ;;  %v2437_v1 = vmax.f32 %v2435_v62, %v2436_v26  ;;  %v2469_v38 = vld [vmem:[#allocation6 + $0x2] sm:$0xf]  ;;  %v2504_v43 = vld [vmem:[#allocation6 + $0xa] sm:$0xf] }
 0x2e1   :  { %v2448_v51 = vld [vmem:[#allocation5 + $0x70] ss:$2 sm:$0xf]  ;;  %v2450_v3 = vld [vmem:[#allocation5 + $0x71] ss:$2 sm:$0xf] }
 0x2e2   :  { %v2670_v2 = vld [vmem:[#allocation6 + $0x39] sm:$0xf]  ;;  %v2438_v10 = vadd.f32 %v5642_v25, %v2437_v1  ;;  %v2424_v12 = vsel %vm2319_vm7, %v2423_v30, 0.0  ;;  %v2455_v15 = vmax.f32 %v2448_v51, %v2450_v3  ;;  %v2506_v31 = vld [vmem:[#allocation6 + $0x11] sm:$0xf] }
 0x2e3   :  { %2679 = vrot.lane.b32.xlu1 %v2670_v2, %s4505_s20  ;;  %2426 = vst.msk [vmem:[#allocation6 + $0x40] sm:$0x3f] %vm2299_vm4, %v2424_v12  ;;  %v2638_v45 = vld [vmem:[#allocation6 + $0x38] sm:$0xf]  ;;  %v2473_v51 = vld [vmem:[#allocation6 + $0x10] sm:$0xf] }
 0x2e4   :  { %2574 = vrot.lane.b32.xlu0 %v2559_v4, %s4505_s20  ;;  %v2439_v53 = vmax.f32 %v2438_v10, 0.0  ;;  %v2640_v22 = vld [vmem:[#allocation6 + $0x3a] sm:$0xf]  ;;  %v2554_v4 = vld [vmem:[#allocation6 + $0x12] sm:$0xf] }
 0x2e5   :  { %v2452_v7 = vld [vmem:[#allocation5 + $0x78] ss:$2 sm:$0xf]  ;;  %v2454_v55 = vld [vmem:[#allocation5 + $0x79] ss:$2 sm:$0xf] }
 0x2e6   :  { %v2456_v46 = vmax.f32 %v2452_v7, %v2454_v55  ;;  %v2441_v14 = vrot.slane %v2439_v53, 7  ;;  %v2586_v30 = vld [vmem:[#allocation6 + $0x18] sm:$0xf] }
 0x2e7   :  { %2649 = vrot.lane.b32.xlu1 %v2638_v45, %s4505_s20  ;;  %v2508_v55 = vld [vmem:[#allocation6 + $0x18] sm:$0xf]  ;;  %v2891_v45 = vld [vmem:[%s6255_s5 + $0x230] sm:$0xff] }
 0x2e8   :  { %v2457_v16 = vmax.f32 %v2455_v15, %v2456_v46  ;;  %2653 = vrot.lane.b32.xlu0 %v2640_v22, %s4505_s20  ;;  %v2443_v11 = vsel %vm770_vm3, 0.0, %v2441_v14 }
 0x2e9   :  { %v2444_v47 = vsel %vm2319_vm7, %v2443_v11, 0.0  ;;  %v2588_v11 = vld [vmem:[#allocation6 + $0x1a] sm:$0xf] }
 0x2ea   :  { %2446 = vst.msk [vmem:[#allocation6 + $0x48] sm:$0x3f] %vm2299_vm4, %v2444_v47  ;;  %v2458_v17 = vadd.f32 %v5642_v25, %v2457_v16  ;;  %v2672_v19 = vld [vmem:[#allocation6 + $0x40] sm:$0xf]  ;;  %v2890_v16 = vld [vmem:[%s6255_s5 + $0x228] sm:$0xff] }
 0x2eb   :  { %v2674_v48 = vld [vmem:[#allocation6 + $0x42] sm:$0xf]  ;;  %2683 = vrot.lane.b32.xlu1 %v2672_v19, %s4505_s20 }
 0x2ec   :  { %2687 = vrot.lane.b32.xlu0 %v2674_v48, %s4505_s20  ;;  %v2459_v24 = vmax.f32 %v2458_v17, 0.0  ;;  %v2643_v8 = vld [vmem:[#allocation6 + $0x42] sm:$0xf]  ;;  %v2556_v17 = vld [vmem:[#allocation6 + $0x19] sm:$0xf] }
 0x2ed   :  { %v2719_v33 = vld [vmem:[#allocation6 + $0x41] sm:$0xf]  ;;  %2668 = vst.msk [vmem:[#allocation7 + $0x70] sm:$0xf] %vm2500_vm5, %v2643_v8 }
 0x2ee   :  { %v2461_v18 = vrot.slane %v2459_v24, 7  ;;  %v2642_v50 = vld [vmem:[#allocation6 + $0x41] sm:$0xf] }
 0x2ef   :  { %2728 = vrot.lane.b32.xlu1 %v2719_v33, %s4505_s20  ;;  %v2889_v48 = vld [vmem:[%s6255_s5 + $0x220] sm:$0xff]  ;;  %v2888_v33 = vld [vmem:[%s6255_s5 + $0x218] sm:$0xff] }
 0x2f0   :  { %2657 = vrot.lane.b32.xlu0 %v2642_v50, %s4505_s20  ;;  %v2463_v21 = vsel %vm770_vm3, 0.0, %v2461_v18  ;;  %v2590_v50 = vld [vmem:[#allocation6 + $0x21] sm:$0xf] }
 0x2f1   :  { %v2753_v25 = vld [vmem:[#allocation6 + $0x49] sm:$0xf]  ;;  %v2464_v20 = vsel %vm2319_vm7, %v2463_v21, 0.0 }
 0x2f2   :  { %v2676_v23 = vld [vmem:[#allocation6 + $0x49] sm:$0xf]  ;;  %2466 = vst.msk [vmem:[#allocation6 + $0x50] sm:$0x3f] %vm2299_vm4, %v2464_v20 }
 0x2f3   :  { %2762 = vrot.lane.b32.xlu1 %v2753_v25, %s4505_s20  ;;  %v2677_v44 = vld [vmem:[#allocation6 + $0x4a] sm:$0xf]  ;;  %v2887_v25 = vld [vmem:[%s6255_s5 + $0x210] sm:$0xff] }
 0x2f4   :  { %2691 = vrot.lane.b32.xlu0 %v2676_v23, %s4505_s20  ;;  %v2707_v34 = vrot.slane %v2677_v44, 4  ;;  %v2721_v29 = vld [vmem:[#allocation6 + $0x48] sm:$0xf] }
 0x2f5   :  { %v2723_v60 = vld [vmem:[#allocation6 + $0x4a] sm:$0xf] }
 0x2f6   :  { %2717 = vst.msk [vmem:[#allocation7 + $0x70] sm:$0xf0] %vm2550_vm6, %v2707_v34 }
 0x2f7   :  { %2732 = vrot.lane.b32.xlu1 %v2721_v29, %s4505_s20 }
 0x2f8   :  { %2774 = vrot.lane.b32.xlu0 %v2759_v5, %s4505_s20  ;;  %v2669_v5 = vld [vmem:[#allocation6 + $0x38] sm:$0xf] }
 0x2f9   :  { %v2755_v28 = vld [vmem:[#allocation6 + $0x50] sm:$0xf] }
 0x2fa   :  { %v2725_v36 = vld [vmem:[#allocation6 + $0x51] sm:$0xf] }
 0x2fb   :  { %2766 = vrot.lane.b32.xlu1 %v2755_v28, %s4505_s20  ;;  %v2726_v9 = vld [vmem:[#allocation6 + $0x52] sm:$0xf]  ;;  %v2558_v28 = vld [vmem:[#allocation6 + $0x20] sm:$0xf] }
 0x2fc   :  { %2740 = vrot.lane.b32.xlu0 %v2725_v36, %s4505_s20  ;;  %2751 = vst.msk [vmem:[#allocation7 + $0x98] sm:$0xf] %vm2500_vm5, %v2726_v9  ;;  %v2757_v6 = vld [vmem:[#allocation6 + $0x52] sm:$0xf] }
 0x2ff   :  { %2770 = vrot.lane.b32.xlu1 %v2757_v6, %s4505_s20  ;;  %v2885_v6 = vld [vmem:[%s6255_s5 + $0x200] sm:$0xff] }
 0x303   :  { %2736 = vrot.lane.b32.xlu1 %v2723_v60, %s4505_s20 }
 0x335   :  { %v2513_v59 = vpop.permute.xlu1 %2512 }
 0x336   :  { %v2482_v39 = vpop.permute.xlu0 %2481  ;;  %v2527_v40 = vsel %vm677_vm1, %v2502_v56, %v2513_v59  ;;  %v2637_v59 = vld [vmem:[#allocation6 + $0x32] sm:$0xf] }
 0x337   :  { %v2493_v41 = vsel %vm677_vm1, %v2469_v38, %v2482_v39  ;;  %v2536_v57 = vrot.slane %v2527_v40, 4 }
 0x338   :  { %2497 = vst [vmem:[#allocation7 + $0x8] sm:$0xf] %v2493_v41  ;;  %v2639_v41 = vld [vmem:[#allocation6 + $0x39] sm:$0xf] }
 0x339   :  { %2546 = vst [vmem:[#allocation7] sm:$0xf0] %v2536_v57 }
 0x33a   :  { %v2486_v61 = vpop.permute.xlu0 %2485 }
 0x33b   :  { %v2494_v32 = vsel %vm677_vm1, %v2471_v42, %v2486_v61 }
 0x33c   :  { %2498 = vst [vmem:[#allocation7 + $0x10] sm:$0xf] %v2494_v32  ;;  %v2671_v32 = vld [vmem:[#allocation6 + $0x3a] sm:$0xf] }
 0x33d   :  { %v2563_v35 = vpop.permute.xlu1 %2562 }
 0x33e   :  { %v2517_v49 = vpop.permute.xlu0 %2516  ;;  %v2577_v52 = vsel %vm677_vm1, %v2552_v27, %v2563_v35  ;;  %v2673_v27 = vld [vmem:[#allocation6 + $0x41] sm:$0xf] }
 0x33f   :  { %v2528_v62 = vsel %vm677_vm1, %v2504_v43, %v2517_v49  ;;  %2581 = vst [vmem:[#allocation7 + $0x28] sm:$0xf] %v2577_v52 }
 0x340   :  { %v2537_v26 = vrot.slane %v2528_v62, 4  ;;  %v2801_v46 = vld [vmem:[#allocation7] sm:$0xff] }
 0x342   :  { %2547 = vst [vmem:[#allocation7 + $0x8] sm:$0xf0] %v2537_v26  ;;  %v2521_v63 = vpop.permute.xlu0 %2520 }
 0x343   :  { %v2529_v58 = vsel %vm677_vm1, %v2506_v31, %v2521_v63 }
 0x344   :  { %v2538_v13 = vrot.slane %v2529_v58, 4  ;;  %v2718_v58 = vld [vmem:[#allocation6 + $0x40] sm:$0xf] }
 0x345   :  { %v2597_v0 = vpop.permute.xlu1 %2596 }
 0x346   :  { %2548 = vst [vmem:[#allocation7 + $0x10] sm:$0xf0] %v2538_v13  ;;  %v2611_v1 = vsel %vm677_vm1, %v2586_v30, %v2597_v0  ;;  %v2490_v2 = vpop.permute.xlu0 %2489  ;;  %v2641_v0 = vld [vmem:[#allocation6 + $0x40] sm:$0xf] }
 0x347   :  { %v2620_v10 = vrot.slane %v2611_v1, 4  ;;  %v2495_v3 = vsel %vm677_vm1, %v2473_v51, %v2490_v2 }
 0x348   :  { %2499 = vst [vmem:[#allocation7 + $0x18] sm:$0xf] %v2495_v3  ;;  %v2675_v3 = vld [vmem:[#allocation6 + $0x48] sm:$0xf] }
 0x349   :  { %2630 = vst [vmem:[#allocation7 + $0x28] sm:$0xf0] %v2620_v10  ;;  %v2567_v12 = vpop.permute.xlu1 %2566  ;;  %v2802_v53 = vld [vmem:[#allocation7 + $0x8] sm:$0xff] }
 0x34a   :  { %v2578_v7 = vsel %vm677_vm1, %v2554_v4, %v2567_v12  ;;  %v2525_v15 = vpop.permute.xlu0 %2524  ;;  %2969 = vmatprep.mubr.f32.mxu1 %v2802_v53  ;;  %v2752_v10 = vld [vmem:[#allocation6 + $0x48] sm:$0xf] }
 0x34b   :  { %2582 = vst [vmem:[#allocation7 + $0x30] sm:$0xf] %v2578_v7  ;;  %v2530_v14 = vsel %vm677_vm1, %v2508_v55, %v2525_v15  ;;  %2970 = vmatmul.mubr.f32.vlgmr.msra.gmra.mxu1 %v2801_v46  ;;  %v2758_v15 = vld [vmem:[#allocation6 + $0x58] sm:$0xf] }
 0x34c   :  { %v2539_v22 = vrot.slane %v2530_v14, 4  ;;  %4438 = vmatpush3.msra.mxu1 %v5894_v37  ;;  %v2886_v37 = vld [vmem:[%s6255_s5 + $0x208] sm:$0xff] }
 0x34d   :  { %4439 = vmatprep.subr.mxu1 %v2891_v45  ;;  %v2803_v9 = vld [vmem:[#allocation7 + $0x10] sm:$0xff] }
 0x34e   :  { %2549 = vst [vmem:[#allocation7 + $0x18] sm:$0xf0] %v2539_v22  ;;  %v2601_v47 = vpop.permute.xlu1 %2600  ;;  %v2571_v19 = vpop.permute.xlu0 %2570  ;;  %4440 = vmatpush3.msra.mxu1 %v2891_v45  ;;  %v2720_v45 = vld [vmem:[#allocation6 + $0x42] sm:$0xf] }
 0x34f   :  { %v2612_v24 = vsel %vm677_vm1, %v2588_v11, %v2601_v47  ;;  %v2579_v18 = vsel %vm677_vm1, %v2556_v17, %v2571_v19  ;;  %4441 = vmatprep.subr.mxu1 %v2890_v16  ;;  %v2754_v19 = vld [vmem:[#allocation6 + $0x4a] sm:$0xf] }
 0x350   :  { %v2621_v8 = vrot.slane %v2612_v24, 4  ;;  %2583 = vst [vmem:[#allocation7 + $0x38] sm:$0xf] %v2579_v18  ;;  %4442 = vmatpush3.msra.mxu1 %v2890_v16  ;;  %v2806_v42 = vld [vmem:[#allocation7 + $0x28] sm:$0xff]  ;;  %v2724_v18 = vld [vmem:[#allocation6 + $0x50] sm:$0xf] }
 0x351   :  { %4443 = vmatprep.subr.mxu1 %v2889_v48 }
 0x352   :  { %2631 = vst [vmem:[#allocation7 + $0x30] sm:$0xf0] %v2621_v8  ;;  %v2605_v21 = vpop.permute.xlu0 %2604  ;;  %4444 = vmatpush3.msra.mxu1 %v2889_v48 }
 0x353   :  { %v2613_v23 = vsel %vm677_vm1, %v2590_v50, %v2605_v21  ;;  %4445 = vmatprep.subr.mxu1 %v2888_v33 }
 0x354   :  { %v2622_v20 = vrot.slane %v2613_v23, 4  ;;  %4446 = vmatpush3.msra.mxu1 %v2888_v33 }
 0x355   :  { %v2680_v44 = vpop.permute.xlu1 %2679  ;;  %v2804_v34 = vld [vmem:[#allocation7 + $0x18] sm:$0xff]  ;;  %4447 = vmatprep.subr.mxu1 %v2887_v25 }
 0x356   :  { %2632 = vst [vmem:[#allocation7 + $0x38] sm:$0xf0] %v2622_v20  ;;  %v2694_v29 = vsel %vm677_vm1, %v2669_v5, %v2680_v44  ;;  %3054 = vmatprep.mubr.f32.mxu0 %v2804_v34  ;;  %v2575_v36 = vpop.permute.xlu0 %2574  ;;  %4448 = vmatpush3.msra.mxu1 %v2887_v25  ;;  %v2756_v25 = vld [vmem:[#allocation6 + $0x51] sm:$0xf]  ;;  %v2722_v5 = vld [vmem:[#allocation6 + $0x49] sm:$0xf] }
 0x357   :  { %v2703_v60 = vrot.slane %v2694_v29, 4  ;;  %v2580_v38 = vsel %vm677_vm1, %v2558_v28, %v2575_v36  ;;  %3055 = vmatmul.mubr.f32.vlgmr.msra.gmra.mxu0 %v2803_v9  ;;  %4449 = vmatprep.subr.mxu1 %v2886_v37 }
 0x358   :  { %2584 = vst [vmem:[#allocation7 + $0x40] sm:$0xf] %v2580_v38  ;;  %4450 = vmatpush3.msra.mxu1 %v2886_v37 }
 0x359   :  { %2713 = vst [vmem:[#allocation7 + $0x50] sm:$0xf0] %v2703_v60  ;;  %v2650_v56 = vpop.permute.xlu1 %2649  ;;  %v2807_v39 = vld [vmem:[#allocation7 + $0x30] sm:$0xff]  ;;  %4451 = vmatprep.subr.mxu1 %v2885_v6  ;;  %v2810_v60 = vld [vmem:[#allocation7 + $0x48] sm:$0xff] }
 0x35a   :  { %v2661_v40 = vsel %vm677_vm1, %v2637_v59, %v2650_v56  ;;  %v2654_v57 = vpop.permute.xlu0 %2653  ;;  %2974 = vmatprep.mubr.f32.mxu1 %v2807_v39  ;;  %4452 = vmatpush3.msra.mxu1 %v2885_v6  ;;  %v2805_v6 = vld [vmem:[#allocation7 + $0x20] sm:$0xff]  ;;  %v2815_v59 = vld [vmem:[#allocation7 + $0x70] sm:$0xff]  ;;  %v2820_v56 = vld [vmem:[#allocation7 + $0x98] sm:$0xff] }
 0x35b   :  { %2665 = vst [vmem:[#allocation7 + $0x58] sm:$0xf] %v2661_v40  ;;  %v2662_v61 = vsel %vm677_vm1, %v2639_v41, %v2654_v57  ;;  %2975 = vmatmul.mubr.f32.gmra.mxu1 %v2806_v42  ;;  %v3343_v39 = vld [vmem:[#allocation9 + $0x11] sm:$0x3]  ;;  %v3259_v40 = vld [vmem:[#allocation9 + $0x1] sm:$0x3] }
 0x35c   :  { %2666 = vst [vmem:[#allocation7 + $0x60] sm:$0xf] %v2662_v61  ;;  %3352 = vrot.lane.b32.xlu0 %v3343_v39, %s4505_s20  ;;  %3268 = vrot.lane.b32.xlu1 %v3259_v40, %s4505_s20  ;;  %v3299_v41 = vld [vmem:[#allocation9 + $0xd] sm:$0x3]  ;;  %v3478_v57 = vld [vmem:[%s6257_s7 + $0xf8] sm:$0xff]  ;;  %v3477_v61 = vld [vmem:[%s6257_s7 + $0xf0] sm:$0xff] }
 0x35d   :  { %v2684_v35 = vpop.permute.xlu1 %2683  ;;  %v2808_v63 = vld [vmem:[#allocation7 + $0x38] sm:$0xff]  ;;  %4218 = vmatprep.subr.mxu0 %v3478_v57 }
 0x35e   :  { %v2688_v43 = vpop.permute.xlu0 %2687  ;;  %v2695_v49 = vsel %vm677_vm1, %v2671_v32, %v2684_v35  ;;  %v3462_v42 = vld [vmem:[%s6257_s7 + $0x78] sm:$0xff]  ;;  %v3461_v32 = vld [vmem:[%s6257_s7 + $0x70] sm:$0xff]  ;;  %v3476_v35 = vld [vmem:[%s6257_s7 + $0xe8] sm:$0xff] }
 0x35f   :  { %v2696_v52 = vsel %vm677_vm1, %v2673_v27, %v2688_v43  ;;  %v2809_v62 = vld [vmem:[#allocation7 + $0x40] sm:$0xff]  ;;  %v2704_v26 = vrot.slane %v2695_v49, 4  ;;  %4219 = vmatpush3.msra.mxu0 %v3462_v42  ;;  %v3460_v27 = vld [vmem:[%s6257_s7 + $0x68] sm:$0xff] }
 0x360   :  { %v2705_v31 = vrot.slane %v2696_v52, 4  ;;  %3059 = vmatprep.mubr.f32.mxu0 %v2809_v62  ;;  %v2811_v16 = vld [vmem:[#allocation7 + $0x50] sm:$0xff]  ;;  %3314 = vrot.lane.b32.xlu0 %v3299_v41, %s4505_s20  ;;  %v3475_v43 = vld [vmem:[%s6257_s7 + $0xe0] sm:$0xff]  ;;  %v3300_v49 = vld [vmem:[#allocation9 + $0xe] sm:$0x3] }
 0x361   :  { %3060 = vmatmul.mubr.f32.gmra.mxu0 %v2808_v63  ;;  %2714 = vst [vmem:[#allocation7 + $0x58] sm:$0xf0] %v2704_v26  ;;  %v2729_v13 = vpop.permute.xlu1 %2728  ;;  %4220 = vmatprep.subr.mxu0 %v3477_v61  ;;  %v3400_v52 = vld [vmem:[#allocation9 + $0x1e] sm:$0x3]  ;;  %v3330_v62 = vrot.slane %v3300_v49, 6 }
 0x362   :  { %2715 = vst [vmem:[#allocation7 + $0x60] sm:$0xf0] %v2705_v31  ;;  %v2658_v30 = vpop.permute.xlu0 %2657  ;;  %v2743_v1 = vsel %vm677_vm1, %v2718_v58, %v2729_v13  ;;  %4221 = vmatpush3.msra.mxu0 %v3461_v32  ;;  %v3430_v26 = vrot.slane %v3400_v52, 2 }
 0x363   :  { %v2663_v51 = vsel %vm677_vm1, %v2641_v0, %v2658_v30  ;;  %2747 = vst [vmem:[#allocation7 + $0x78] sm:$0xf] %v2743_v1  ;;  %4222 = vmatprep.subr.mxu0 %v3476_v35  ;;  %3341 = vst.msk [vmem:[#allocation10 + $0x20] sm:$0xc] %vm3340_vm8, %v3330_v62 }
 0x364   :  { %2667 = vst [vmem:[#allocation7 + $0x68] sm:$0xf] %v2663_v51  ;;  %4223 = vmatpush3.msra.mxu0 %v3460_v27  ;;  %3441 = vst.msk [vmem:[#allocation10 + $0x20] sm:$0xc0] %vm3440_vm9, %v3430_v26  ;;  %v3298_v27 = vld [vmem:[#allocation9 + $0xc] sm:$0x3] }
 0x365   :  { %v2763_v2 = vpop.permute.xlu1 %2762  ;;  %4224 = vmatprep.subr.mxu0 %v3475_v43 }
 0x366   :  { %v2692_v4 = vpop.permute.xlu0 %2691  ;;  %v2777_v12 = vsel %vm677_vm1, %v2752_v10, %v2763_v2 }
 0x367   :  { %v2697_v53 = vsel %vm677_vm1, %v2675_v3, %v2692_v4  ;;  %v2786_v7 = vrot.slane %v2777_v12, 4 }
 0x368   :  { %v2706_v55 = vrot.slane %v2697_v53, 4  ;;  %v2812_v46 = vld [vmem:[#allocation7 + $0x58] sm:$0xff] }
 0x369   :  { %2796 = vst [vmem:[#allocation7 + $0x78] sm:$0xf0] %v2786_v7  ;;  %v2733_v14 = vpop.permute.xlu1 %2732  ;;  %2979 = vmatprep.mubr.f32.mxu1 %v2812_v46  ;;  %v2813_v20 = vld [vmem:[#allocation7 + $0x60] sm:$0xff] }
 0x36a   :  { %2716 = vst [vmem:[#allocation7 + $0x68] sm:$0xf0] %v2706_v55  ;;  %v2775_v22 = vpop.permute.xlu0 %2774  ;;  %v2744_v11 = vsel %vm677_vm1, %v2720_v45, %v2733_v14  ;;  %2980 = vmatmul.mubr.f32.gmra.mxu1 %v2811_v16 }
 0x36b   :  { %v2780_v47 = vsel %vm677_vm1, %v2758_v15, %v2775_v22  ;;  %2748 = vst [vmem:[#allocation7 + $0x80] sm:$0xf] %v2744_v11 }
 0x36c   :  { %v2789_v17 = vrot.slane %v2780_v47, 4 }
 0x36d   :  { %v2767_v48 = vpop.permute.xlu1 %2766 }
 0x36e   :  { %2799 = vst [vmem:[#allocation7 + $0x90] sm:$0xf0] %v2789_v17  ;;  %v2741_v24 = vpop.permute.xlu0 %2740  ;;  %v2778_v8 = vsel %vm677_vm1, %v2754_v19, %v2767_v48 }
 0x36f   :  { %v2746_v33 = vsel %vm677_vm1, %v2724_v18, %v2741_v24  ;;  %v2787_v50 = vrot.slane %v2778_v8, 4 }
 0x370   :  { %2750 = vst [vmem:[#allocation7 + $0x90] sm:$0xf] %v2746_v33  ;;  %v2816_v9 = vld [vmem:[#allocation7 + $0x78] sm:$0xff] }
 0x371   :  { %v2814_v21 = vld [vmem:[#allocation7 + $0x68] sm:$0xff]  ;;  %2797 = vst [vmem:[#allocation7 + $0x80] sm:$0xf0] %v2787_v50  ;;  %v2771_v23 = vpop.permute.xlu1 %2770 }
 0x372   :  { %3064 = vmatprep.mubr.f32.mxu0 %v2814_v21  ;;  %v2779_v37 = vsel %vm677_vm1, %v2756_v25, %v2771_v23 }
 0x373   :  { %3065 = vmatmul.mubr.f32.gmra.mxu0 %v2813_v20  ;;  %v2788_v44 = vrot.slane %v2779_v37, 4  ;;  %v3342_v37 = vld [vmem:[#allocation9 + $0x10] sm:$0x3] }
 0x375   :  { %2798 = vst [vmem:[#allocation7 + $0x88] sm:$0xf0] %v2788_v44  ;;  %v2737_v34 = vpop.permute.xlu1 %2736  ;;  %v3258_v44 = vld [vmem:[#allocation9] sm:$0x3] }
 0x376   :  { %v2745_v29 = vsel %vm677_vm1, %v2722_v5, %v2737_v34 }
 0x377   :  { %v2819_v28 = vld [vmem:[#allocation7 + $0x90] sm:$0xff]  ;;  %2749 = vst [vmem:[#allocation7 + $0x88] sm:$0xf] %v2745_v29  ;;  %v3865_v29 = vld [vmem:[%s6256_s6] ss:$0 sm:$0xff] }
 0x378   :  { %3069 = vmatprep.mubr.f32.mxu0 %v2819_v28  ;;  %v2817_v36 = vld [vmem:[#allocation7 + $0x80] sm:$0xff] }
 0x379   :  { %2984 = vmatprep.mubr.f32.mxu1 %v2817_v36 }
 0x37a   :  { %2985 = vmatmul.mubr.f32.gmra.mxu1 %v2816_v9 }
 0x37b   :  { %4453 = vmatprep.mubr.msk.f32.mxu1 %vm677_vm1, %v2805_v6 }
 0x37e   :  { %4454 = vmatmul.mubr.msk.f32.vlgmr.msra.gmra.mxu1 %vm677_vm1, %v2810_v60  ;;  %v2818_v38 = vld [vmem:[#allocation7 + $0x88] sm:$0xff] }
 0x37f   :  { %3070 = vmatmul.mubr.f32.gmra.mxu0 %v2818_v38  ;;  %4456 = vmatprep.mubr.msk.f32.mxu1 %vm677_vm1, %v2815_v59 }
 0x382   :  { %4457 = vmatmul.mubr.msk.f32.gmra.mxu1 %vm677_vm1, %v2820_v56 }
 0x3ce   :  { %v3353_v6 = vpop.permute.xlu0 %3352  ;;  %v3269_v60 = vpop.permute.xlu1 %3268 }
 0x3cf   :  { %v3367_v39 = vsel %vm677_vm1, %v3342_v37, %v3353_v6  ;;  %v3283_v40 = vsel %vm677_vm1, %v3258_v44, %v3269_v60  ;;  %v3509_v37 = vld [vmem:[%s6257_s7 + $0x1f0] sm:$0xff]  ;;  %v3455_v60 = vld [vmem:[%s6257_s7 + $0x40] sm:$0xff] }
 0x3d0   :  { %3287 = vst [vmem:[#allocation10] sm:$0x3] %v3283_v40  ;;  %v3376_v35 = vrot.slane %v3367_v39, 4  ;;  %v3492_v40 = vld [vmem:[%s6257_s7 + $0x168] sm:$0xff] }
 0x3d2   :  { %3386 = vst [vmem:[#allocation10] sm:$0x30] %v3376_v35  ;;  %v3315_v26 = vpop.permute.xlu0 %3314 }
 0x40b   :  { %v4150_v31 = vpop.f32.mrf.mxu1 }
 0x40d   :  { %v4151_v63 = vpop.f32.mrf.mxu1 }
 0x40e   :  { %v4152_v46 = vadd.f32 %v4151_v63, %v4150_v31 }
 0x417   :  { %v4194_v58 = vpop.f32.mrf.mxu0 }
 0x419   :  { %v4195_v0 = vpop.f32.mrf.mxu0 }
 0x41a   :  { %v4196_v53 = vadd.f32 %v4195_v0, %v4194_v58  ;;  %v3320_v58 = vsel %vm677_vm1, %v3298_v27, %v3315_v26 }
 0x41b   :  { %v4153_v13 = vpop.f32.mrf.mxu1 }
 0x41c   :  { %v3057_v47 = vadd.f32 %v4196_v53, %v4152_v46 }
 0x41d   :  { %v4154_v30 = vpop.f32.mrf.mxu1 }
 0x41e   :  { %v4155_v7 = vadd.f32 %v4154_v30, %v4153_v13 }
 0x421   :  { %v4197_v1 = vpop.f32.mrf.mxu0 }
 0x423   :  { %v4198_v2 = vpop.f32.mrf.mxu0 }
 0x424   :  { %v4199_v4 = vadd.f32 %v4198_v2, %v4197_v1 }
 0x426   :  { %v3062_v45 = vadd.f32 %v4199_v4, %v4155_v7  ;;  %v3329_v7 = vrot.slane %v3320_v58, 6  ;;  %v3399_v58 = vld [vmem:[#allocation9 + $0x1d] sm:$0x3] }
 0x428   :  { %3339 = vst [vmem:[#allocation10 + $0x18] sm:$0xc] %v3329_v7  ;;  %v3487_v7 = vld [vmem:[%s6257_s7 + $0x140] sm:$0xff] }
 0x42a   :  { %v4156_v51 = vpop.f32.mrf.mxu1 }
 0x42c   :  { %v4157_v10 = vpop.f32.mrf.mxu1 }
 0x42d   :  { %v4158_v19 = vadd.f32 %v4157_v10, %v4156_v51 }
 0x433   :  { %v4200_v3 = vpop.f32.mrf.mxu0 }
 0x435   :  { %v4201_v55 = vpop.f32.mrf.mxu0 }
 0x436   :  { %v4202_v22 = vadd.f32 %v4201_v55, %v4200_v3 }
 0x438   :  { %v3067_v50 = vadd.f32 %v4202_v22, %v4158_v19  ;;  %v3458_v19 = vld [vmem:[%s6257_s7 + $0x58] sm:$0xff] }
 0x43a   :  { %v4159_v12 = vpop.f32.mrf.mxu1 }
 0x43c   :  { %v4160_v15 = vpop.f32.mrf.mxu1 }
 0x43d   :  { %v4161_v18 = vadd.f32 %v4160_v15, %v4159_v12 }
 0x43e   :  { %v4455_v14 = vpop.f32.mrf.mxu1 }
 0x43f   :  { %v3147_v16 = vadd.f32 %v4455_v14, %v3062_v45  ;;  %v4203_v11 = vpop.f32.mrf.mxu0 }
 0x440   :  { %v3141_v17 = vpop.f32.mrf.mxu1 }
 0x441   :  { %3161 = vst.msk [vmem:[#allocation8 + $0x8] sm:$0xff] %vm677_vm1, %v3147_v16  ;;  %v3142_v48 = vadd.f32 %v3141_v17, %v3057_v47  ;;  %v4204_v24 = vpop.f32.mrf.mxu0  ;;  %v3459_v47 = vld [vmem:[%s6257_s7 + $0x60] sm:$0xff]  ;;  %v3474_v17 = vld [vmem:[%s6257_s7 + $0xd8] sm:$0xff] }
 0x442   :  { %v4205_v8 = vadd.f32 %v4204_v24, %v4203_v11  ;;  %v4458_v33 = vpop.f32.mrf.mxu1  ;;  %4225 = vmatpush3.msra.mxu0 %v3459_v47  ;;  %v3463_v47 = vld [vmem:[%s6257_s7 + $0x80] sm:$0xff] }
 0x443   :  { %3160 = vst.msk [vmem:[#allocation8] sm:$0xff] %vm677_vm1, %v3142_v48  ;;  %4226 = vmatprep.subr.mxu0 %v3474_v17 }
 0x444   :  { %v3072_v21 = vadd.f32 %v4205_v8, %v4161_v18  ;;  %v3151_v25 = vpop.f32.mrf.mxu1  ;;  %v3473_v8 = vld [vmem:[%s6257_s7 + $0xd0] sm:$0xff]  ;;  %4227 = vmatpush3.msra.mxu0 %v3458_v19 }
 0x445   :  { %v3152_v23 = vadd.f32 %v3151_v25, %v3067_v50  ;;  %v3457_v50 = vld [vmem:[%s6257_s7 + $0x50] sm:$0xff]  ;;  %4228 = vmatprep.subr.mxu0 %v3473_v8  ;;  %v3499_v8 = vld [vmem:[%s6257_s7 + $0x1a0] sm:$0xff] }
 0x446   :  { %v3157_v20 = vadd.f32 %v4458_v33, %v3072_v21  ;;  %v3510_v21 = vld [vmem:[%s6257_s7 + $0x1f8] sm:$0xff]  ;;  %4229 = vmatpush3.msra.mxu0 %v3457_v50  ;;  %v3485_v19 = vld [vmem:[%s6257_s7 + $0x130] sm:$0xff] }
 0x447   :  { %3162 = vst.msk [vmem:[#allocation8 + $0x10] sm:$0xff] %vm677_vm1, %v3152_v23  ;;  %4253 = vmatprep.subr.mxu1 %v3510_v21  ;;  %v3472_v23 = vld [vmem:[%s6257_s7 + $0xc8] sm:$0xff] }
 0x448   :  { %v3195_v5 = vld [vmem:[#allocation8 + $0x8] ss:$2 sm:$0x3]  ;;  %v3197_v34 = vld [vmem:[#allocation8 + $0x9] ss:$2 sm:$0x3]  ;;  %4230 = vmatprep.subr.mxu0 %v3472_v23 }
 0x449   :  { %3163 = vst.msk [vmem:[#allocation8 + $0x18] sm:$0xff] %vm677_vm1, %v3157_v20  ;;  %v3199_v28 = vld [vmem:[#allocation8 + $0xc] ss:$2 sm:$0x3]  ;;  %v3202_v9 = vmax.f32 %v3195_v5, %v3197_v34  ;;  %v3494_v20 = vld [vmem:[%s6257_s7 + $0x178] sm:$0xff] }
 0x44a   :  { %v3201_v36 = vld [vmem:[#allocation8 + $0xd] ss:$2 sm:$0x3]  ;;  %v3174_v59 = vld [vmem:[#allocation8] ss:$2 sm:$0x3]  ;;  %4254 = vmatpush3.msra.mxu1 %v3494_v20 }
 0x44b   :  { %v3203_v38 = vmax.f32 %v3199_v28, %v3201_v36  ;;  %v3176_v56 = vld [vmem:[#allocation8 + $0x1] ss:$2 sm:$0x3]  ;;  %v3178_v41 = vld [vmem:[#allocation8 + $0x4] ss:$2 sm:$0x3]  ;;  %4255 = vmatprep.subr.mxu1 %v3509_v37 }
 0x44c   :  { %v3180_v57 = vld [vmem:[#allocation8 + $0x5] ss:$2 sm:$0x3]  ;;  %v3181_v42 = vmax.f32 %v3174_v59, %v3176_v56  ;;  %v3456_v5 = vld [vmem:[%s6257_s7 + $0x48] sm:$0xff]  ;;  %v3493_v28 = vld [vmem:[%s6257_s7 + $0x170] sm:$0xff] }
 0x44d   :  { %v3204_v61 = vmax.f32 %v3202_v9, %v3203_v38  ;;  %v3182_v32 = vmax.f32 %v3178_v41, %v3180_v57  ;;  %4256 = vmatpush3.msra.mxu1 %v3493_v28  ;;  %4231 = vmatpush3.msra.mxu0 %v3456_v5  ;;  %v3508_v38 = vld [vmem:[%s6257_s7 + $0x1e8] sm:$0xff]  ;;  %v3470_v59 = vld [vmem:[%s6257_s7 + $0xb8] sm:$0xff]  ;;  %v3507_v57 = vld [vmem:[%s6257_s7 + $0x1e0] sm:$0xff] }
 0x44e   :  { %v3219_v52 = vld [vmem:[#allocation8 + $0x10] ss:$2 sm:$0x3]  ;;  %v3221_v62 = vld [vmem:[#allocation8 + $0x11] ss:$2 sm:$0x3]  ;;  %4257 = vmatprep.subr.mxu1 %v3508_v38 }
 0x44f   :  { %v3205_v43 = vadd.f32 %v3865_v29, %v3204_v61  ;;  %v3183_v49 = vmax.f32 %v3181_v42, %v3182_v32  ;;  %v3226_v51 = vmax.f32 %v3219_v52, %v3221_v62  ;;  %v3223_v10 = vld [vmem:[#allocation8 + $0x14] ss:$2 sm:$0x3]  ;;  %v3225_v3 = vld [vmem:[#allocation8 + $0x15] ss:$2 sm:$0x3]  ;;  %4258 = vmatpush3.msra.mxu1 %v3492_v40 }
 0x450   :  { %v3239_v31 = vld [vmem:[#allocation8 + $0x18] ss:$2 sm:$0x3]  ;;  %v3241_v63 = vld [vmem:[#allocation8 + $0x19] ss:$2 sm:$0x3]  ;;  %v3227_v4 = vmax.f32 %v3223_v10, %v3225_v3  ;;  %4259 = vmatprep.subr.mxu1 %v3507_v57 }
 0x451   :  { %v3184_v13 = vadd.f32 %v3865_v29, %v3183_v49  ;;  %v3243_v0 = vld [vmem:[#allocation8 + $0x1c] ss:$2 sm:$0x3]  ;;  %v3245_v30 = vld [vmem:[#allocation8 + $0x1d] ss:$2 sm:$0x3]  ;;  %v3246_v1 = vmax.f32 %v3239_v31, %v3241_v63 }
 0x452   :  { %v3247_v2 = vmax.f32 %v3243_v0, %v3245_v30  ;;  %v3206_v12 = vmax.f32 %v3205_v43, 0.0  ;;  %v3228_v15 = vmax.f32 %v3226_v51, %v3227_v4  ;;  %v3454_v41 = vld [vmem:[%s6257_s7 + $0x38] sm:$0xff]  ;;  %v3469_v61 = vld [vmem:[%s6257_s7 + $0xb0] sm:$0xff]  ;;  %v3491_v32 = vld [vmem:[%s6257_s7 + $0x160] sm:$0xff] }
 0x453   :  { %v3185_v53 = vmax.f32 %v3184_v13, 0.0  ;;  %4260 = vmatpush3.msra.mxu1 %v3491_v32  ;;  %v3453_v43 = vld [vmem:[%s6257_s7 + $0x30] sm:$0xff]  ;;  %v3506_v49 = vld [vmem:[%s6257_s7 + $0x1d8] sm:$0xff]  ;;  %v3468_v52 = vld [vmem:[%s6257_s7 + $0xa8] sm:$0xff] }
 0x454   :  { %v3248_v55 = vmax.f32 %v3246_v1, %v3247_v2  ;;  %v3208_v46 = vrot.slane %v3206_v12, 7  ;;  %v3229_v22 = vadd.f32 %v3865_v29, %v3228_v15  ;;  %v3490_v62 = vld [vmem:[%s6257_s7 + $0x158] sm:$0xff]  ;;  %4261 = vmatprep.subr.mxu1 %v3506_v49  ;;  %v3452_v31 = vld [vmem:[%s6257_s7 + $0x28] sm:$0xff]  ;;  %v3505_v63 = vld [vmem:[%s6257_s7 + $0x1d0] sm:$0xff] }
 0x455   :  { %v3187_v45 = vrot.slane %v3185_v53, 7  ;;  %v3467_v13 = vld [vmem:[%s6257_s7 + $0xa0] sm:$0xff]  ;;  %v3489_v0 = vld [vmem:[%s6257_s7 + $0x150] sm:$0xff]  ;;  %4262 = vmatpush3.msra.mxu1 %v3490_v62  ;;  %v3504_v1 = vld [vmem:[%s6257_s7 + $0x1c8] sm:$0xff] }
 0x456   :  { %v3249_v14 = vadd.f32 %v3865_v29, %v3248_v55  ;;  %v3210_v16 = vsel %vm770_vm3, 0.0, %v3208_v46  ;;  %v3230_v33 = vmax.f32 %v3229_v22, 0.0  ;;  %v3471_v29 = vld [vmem:[%s6257_s7 + $0xc0] sm:$0xff]  ;;  %4263 = vmatprep.subr.mxu1 %v3505_v63  ;;  %v3466_v51 = vld [vmem:[%s6257_s7 + $0x98] sm:$0xff]  ;;  %v3488_v10 = vld [vmem:[%s6257_s7 + $0x148] sm:$0xff] }
 0x457   :  { %v3189_v11 = vsel %vm770_vm3, 0.0, %v3187_v45  ;;  %v3211_v48 = vsel %vm3190_vm10, %v3210_v16, 0.0  ;;  %4232 = vmatprep.subr.mxu0 %v3471_v29  ;;  %v3451_v30 = vld [vmem:[%s6257_s7 + $0x20] sm:$0xff]  ;;  %4264 = vmatpush3.msra.mxu1 %v3489_v0  ;;  %v3450_v3 = vld [vmem:[%s6257_s7 + $0x18] sm:$0xff]  ;;  %v3465_v12 = vld [vmem:[%s6257_s7 + $0x90] sm:$0xff] }
 0x458   :  { %v3191_v24 = vsel %vm3190_vm10, %v3189_v11, 0.0  ;;  %v3250_v18 = vmax.f32 %v3249_v14, 0.0  ;;  %3213 = vst.msk [vmem:[#allocation9 + $0x8] sm:$0xf] %vm2500_vm5, %v3211_v48  ;;  %v3232_v44 = vrot.slane %v3230_v33, 7  ;;  %4233 = vmatpush3.msra.mxu0 %v3455_v60  ;;  %v3503_v4 = vld [vmem:[%s6257_s7 + $0x1c0] sm:$0xff]  ;;  %4265 = vmatprep.subr.mxu1 %v3504_v1 }
 0x459   :  { %3193 = vst.msk [vmem:[#allocation9 + $0x4] sm:$0xf] %vm2500_vm5, %v3191_v24  ;;  %4234 = vmatprep.subr.mxu0 %v3470_v59  ;;  %4266 = vmatpush3.msra.mxu1 %v3488_v10  ;;  %v3449_v55 = vld [vmem:[%s6257_s7 + $0x10] sm:$0xff]  ;;  %v3502_v46 = vld [vmem:[%s6257_s7 + $0x1b8] sm:$0xff]  ;;  %v3464_v45 = vld [vmem:[%s6257_s7 + $0x88] sm:$0xff] }
 0x45a   :  { %v3252_v25 = vrot.slane %v3250_v18, 7  ;;  %v3234_v9 = vsel %vm770_vm3, 0.0, %v3232_v44  ;;  %4235 = vmatpush3.msra.mxu0 %v3454_v41  ;;  %4267 = vmatprep.subr.mxu1 %v3503_v4  ;;  %v3486_v14 = vld [vmem:[%s6257_s7 + $0x138] sm:$0xff]  ;;  %v3448_v22 = vld [vmem:[%s6257_s7 + $0x8] sm:$0xff]  ;;  %v3501_v11 = vld [vmem:[%s6257_s7 + $0x1b0] sm:$0xff] }
 0x45b   :  { %v3235_v6 = vsel %vm3190_vm10, %v3234_v9, 0.0  ;;  %4236 = vmatprep.subr.mxu0 %v3469_v61  ;;  %4268 = vmatpush3.msra.mxu1 %v3487_v7  ;;  %v3447_v48 = vld [vmem:[%s6257_s7] sm:$0xff]  ;;  %v3500_v24 = vld [vmem:[%s6257_s7 + $0x1a8] sm:$0xff]  ;;  %v3498_v20 = vld [vmem:[%s6257_s7 + $0x198] sm:$0xff] }
 0x45c   :  { %v3254_v34 = vsel %vm770_vm3, 0.0, %v3252_v25  ;;  %3237 = vst.msk [vmem:[#allocation9 + $0x14] sm:$0xf] %vm2500_vm5, %v3235_v6  ;;  %4237 = vmatpush3.msra.mxu0 %v3453_v43  ;;  %4269 = vmatprep.subr.mxu1 %v3502_v46  ;;  %v3484_v18 = vld [vmem:[%s6257_s7 + $0x128] sm:$0xff]  ;;  %v3483_v25 = vld [vmem:[%s6257_s7 + $0x120] sm:$0xff]  ;;  %v3482_v37 = vld [vmem:[%s6257_s7 + $0x118] sm:$0xff] }
 0x45d   :  { %v3255_v36 = vsel %vm3190_vm10, %v3254_v34, 0.0  ;;  %4238 = vmatprep.subr.mxu0 %v3468_v52  ;;  %4270 = vmatpush3.msra.mxu1 %v3486_v14  ;;  %v3497_v44 = vld [vmem:[%s6257_s7 + $0x190] sm:$0xff]  ;;  %v3496_v34 = vld [vmem:[%s6257_s7 + $0x188] sm:$0xff]  ;;  %v3495_v28 = vld [vmem:[%s6257_s7 + $0x180] sm:$0xff] }
 0x45e   :  { %3257 = vst.msk [vmem:[#allocation9 + $0x18] sm:$0xf] %vm2500_vm5, %v3255_v36  ;;  %4239 = vmatpush3.msra.mxu0 %v3452_v31  ;;  %4271 = vmatprep.subr.mxu1 %v3501_v11  ;;  %v3481_v5 = vld [vmem:[%s6257_s7 + $0x110] sm:$0xff]  ;;  %v3480_v29 = vld [vmem:[%s6257_s7 + $0x108] sm:$0xff]  ;;  %v3479_v36 = vld [vmem:[%s6257_s7 + $0x100] sm:$0xff] }
 0x45f   :  { %v3295_v56 = vld [vmem:[#allocation9 + $0x8] sm:$0x3]  ;;  %4240 = vmatprep.subr.mxu0 %v3467_v13  ;;  %v3297_v15 = vld [vmem:[#allocation9 + $0xa] sm:$0x3]  ;;  %4272 = vmatpush3.msra.mxu1 %v3485_v19  ;;  %v3260_v41 = vld [vmem:[#allocation9 + $0x2] sm:$0x3] }
 0x460   :  { %v3293_v39 = vld [vmem:[#allocation9 + $0x5] sm:$0x3]  ;;  %3306 = vrot.lane.b32.xlu0 %v3295_v56, %s4505_s20  ;;  %4241 = vmatpush3.msra.mxu0 %v3451_v30  ;;  %v3265_v16 = vld [vmem:[#allocation9 + $0x9] sm:$0x3]  ;;  %v3344_v43 = vld [vmem:[#allocation9 + $0x12] sm:$0x3] }
 0x461   :  { %3302 = vrot.lane.b32.xlu1 %v3293_v39, %s4505_s20  ;;  %v3261_v42 = vld [vmem:[#allocation9 + $0x4] sm:$0x3]  ;;  %4242 = vmatprep.subr.mxu0 %v3466_v51  ;;  %v3266_v33 = vld [vmem:[#allocation9 + $0xa] sm:$0x3]  ;;  %v3263_v21 = vld [vmem:[#allocation9 + $0x6] sm:$0x3] }
 0x462   :  { %4243 = vmatpush3.msra.mxu0 %v3450_v3  ;;  %4273 = vmatprep.subr.mxu1 %v3500_v24  ;;  %3291 = vst.msk [vmem:[#allocation10 + $0x20] sm:$0x3] %vm750_vm2, %v3266_v33  ;;  %v3294_v9 = vld [vmem:[#allocation9 + $0x6] sm:$0x3]  ;;  %v3292_v60 = vld [vmem:[#allocation9 + $0x4] sm:$0x3] }
 0x463   :  { %v3345_v26 = vld [vmem:[#allocation9 + $0x14] sm:$0x3]  ;;  %v3347_v53 = vld [vmem:[#allocation9 + $0x16] sm:$0x3]  ;;  %4244 = vmatprep.subr.mxu0 %v3465_v12  ;;  %4274 = vmatpush3.msra.mxu1 %v3484_v18  ;;  %v3296_v7 = vld [vmem:[#allocation9 + $0x9] sm:$0x3] }
 0x464   :  { %3272 = vrot.lane.b32.xlu0 %v3261_v42, %s4505_s20  ;;  %v3393_v2 = vld [vmem:[#allocation9 + $0x15] sm:$0x3]  ;;  %4245 = vmatpush3.msra.mxu0 %v3449_v55  ;;  %v3264_v14 = vld [vmem:[#allocation9 + $0x8] sm:$0x3]  ;;  %v3518_v24 = vld [vmem:[%s6257_s7 + $0x238] sm:$0xff] }
 0x465   :  { %v3349_v35 = vld [vmem:[#allocation9 + $0x19] sm:$0x3]  ;;  %4246 = vmatprep.subr.mxu0 %v3464_v45  ;;  %4275 = vmatprep.subr.mxu1 %v3499_v8  ;;  %v3394_v49 = vld [vmem:[#allocation9 + $0x16] sm:$0x3]  ;;  %v3392_v1 = vld [vmem:[#allocation9 + $0x14] sm:$0x3] }
 0x466   :  { %3364 = vrot.lane.b32.xlu1 %v3349_v35, %s4505_s20  ;;  %v3395_v27 = vld [vmem:[#allocation9 + $0x18] sm:$0x3]  ;;  %v3397_v17 = vld [vmem:[#allocation9 + $0x1a] sm:$0x3]  ;;  %4247 = vmatpush3.msra.mxu0 %v3448_v22  ;;  %v3346_v4 = vld [vmem:[#allocation9 + $0x15] sm:$0x3] }
 0x467   :  { %4248 = vmatprep.subr.mxu0 %v3463_v47  ;;  %v3350_v50 = vld [vmem:[#allocation9 + $0x1a] sm:$0x3]  ;;  %4276 = vmatpush3.msra.mxu1 %v3483_v25  ;;  %v3348_v32 = vld [vmem:[#allocation9 + $0x18] sm:$0x3]  ;;  %v3262_v8 = vld [vmem:[#allocation9 + $0x5] sm:$0x3] }
 0x468   :  { %3406 = vrot.lane.b32.xlu0 %v3395_v27, %s4505_s20  ;;  %4249 = vmatpush3.msra.mxu0 %v3447_v48  ;;  %v3380_v23 = vrot.slane %v3350_v50, 4  ;;  %v3396_v47 = vld [vmem:[#allocation9 + $0x19] sm:$0x3]  ;;  %v3517_v50 = vld [vmem:[%s6257_s7 + $0x230] sm:$0xff]  ;;  %v3516_v25 = vld [vmem:[%s6257_s7 + $0x228] sm:$0xff] }
 0x469   :  { %4459 = vmatprep.subr.mxu0 %v4504_v54  ;;  %4277 = vmatprep.subr.mxu1 %v3498_v20  ;;  %v3515_v20 = vld [vmem:[%s6257_s7 + $0x220] sm:$0xff] }
 0x46a   :  { %3356 = vrot.lane.b32.xlu1 %v3345_v26, %s4505_s20  ;;  %3391 = vst.msk [vmem:[#allocation10 + $0x20] sm:$0x30] %vm3390_vm11, %v3380_v23  ;;  %4278 = vmatpush3.msra.mxu1 %v3482_v37  ;;  %v3514_v37 = vld [vmem:[%s6257_s7 + $0x218] sm:$0xff] }
 0x46b   :  { %4279 = vmatprep.subr.mxu1 %v3497_v44  ;;  %v3513_v44 = vld [vmem:[%s6257_s7 + $0x210] sm:$0xff] }
 0x46c   :  { %3414 = vrot.lane.b32.xlu0 %v3399_v58, %s4505_s20  ;;  %4280 = vmatpush3.msra.mxu1 %v3481_v5  ;;  %v3398_v58 = vld [vmem:[#allocation9 + $0x1c] sm:$0x3] }
 0x46d   :  { %4281 = vmatprep.subr.mxu1 %v3496_v34  ;;  %v3512_v34 = vld [vmem:[%s6257_s7 + $0x208] sm:$0xff] }
 0x46e   :  { %3402 = vrot.lane.b32.xlu1 %v3393_v2, %s4505_s20  ;;  %4282 = vmatpush3.msra.mxu1 %v3480_v29  ;;  %v3511_v29 = vld [vmem:[%s6257_s7 + $0x200] sm:$0xff] }
 0x46f   :  { %4283 = vmatprep.subr.mxu1 %v3495_v28 }
 0x470   :  { %3360 = vrot.lane.b32.xlu0 %v3347_v53, %s4505_s20  ;;  %4284 = vmatpush3.msra.mxu1 %v3479_v36 }
 0x471   :  { %v3446_v28 = vld [vmem:[#allocation10 + $0x20] sm:$0xff] }
 0x472   :  { %3310 = vrot.lane.b32.xlu1 %v3297_v15, %s4505_s20 }
 0x474   :  { %3280 = vrot.lane.b32.xlu0 %v3265_v16, %s4505_s20 }
 0x476   :  { %3410 = vrot.lane.b32.xlu1 %v3397_v17, %s4505_s20 }
 0x47a   :  { %3276 = vrot.lane.b32.xlu1 %v3263_v21, %s4505_s20 }
 0x4d2   :  { %v3307_v6 = vpop.permute.xlu0 %3306 }
 0x4d3   :  { %v3303_v38 = vpop.permute.xlu1 %3302  ;;  %v3318_v59 = vsel %vm677_vm1, %v3294_v9, %v3307_v6 }
 0x4d4   :  { %v3317_v56 = vsel %vm677_vm1, %v3292_v60, %v3303_v38  ;;  %v3327_v39 = vrot.slane %v3318_v59, 6 }
 0x4d5   :  { %v3326_v40 = vrot.slane %v3317_v56, 6 }
 0x4d6   :  { %3337 = vst [vmem:[#allocation10 + $0x8] sm:$0xc] %v3327_v39  ;;  %v3273_v57 = vpop.permute.xlu0 %3272 }
 0x4d7   :  { %3336 = vst [vmem:[#allocation10] sm:$0xc] %v3326_v40  ;;  %v3284_v42 = vsel %vm677_vm1, %v3260_v41, %v3273_v57 }
 0x4d8   :  { %v3365_v61 = vpop.permute.xlu1 %3364  ;;  %3288 = vst [vmem:[#allocation10 + $0x8] sm:$0x3] %v3284_v42 }
 0x4d9   :  { %v3370_v35 = vsel %vm677_vm1, %v3348_v32, %v3365_v61 }
 0x4da   :  { %v3379_v27 = vrot.slane %v3370_v35, 4  ;;  %v3407_v52 = vpop.permute.xlu0 %3406 }
 0x4db   :  { %v3418_v62 = vsel %vm677_vm1, %v3394_v49, %v3407_v52 }
 0x4dc   :  { %3389 = vst [vmem:[#allocation10 + $0x18] sm:$0x30] %v3379_v27  ;;  %v3357_v26 = vpop.permute.xlu1 %3356  ;;  %v3427_v31 = vrot.slane %v3418_v62, 2 }
 0x4dd   :  { %v3368_v63 = vsel %vm677_vm1, %v3344_v43, %v3357_v26 }
 0x4de   :  { %v3377_v13 = vrot.slane %v3368_v63, 4  ;;  %3437 = vst [vmem:[#allocation10 + $0x8] sm:$0xc0] %v3427_v31  ;;  %v3415_v0 = vpop.permute.xlu0 %3414 }
 0x4df   :  { %v3420_v30 = vsel %vm677_vm1, %v3398_v58, %v3415_v0 }
 0x4e0   :  { %3387 = vst [vmem:[#allocation10 + $0x8] sm:$0x30] %v3377_v13  ;;  %v3403_v51 = vpop.permute.xlu1 %3402  ;;  %v3429_v2 = vrot.slane %v3420_v30, 2 }
 0x4e1   :  { %v3417_v10 = vsel %vm677_vm1, %v3392_v1, %v3403_v51 }
 0x4e2   :  { %v3426_v3 = vrot.slane %v3417_v10, 2  ;;  %3439 = vst [vmem:[#allocation10 + $0x18] sm:$0xc0] %v3429_v2  ;;  %v3361_v12 = vpop.permute.xlu0 %3360 }
 0x4e3   :  { %v3369_v53 = vsel %vm677_vm1, %v3346_v4, %v3361_v12 }
 0x4e4   :  { %3436 = vst [vmem:[#allocation10] sm:$0xc0] %v3426_v3  ;;  %v3311_v55 = vpop.permute.xlu1 %3310  ;;  %v3378_v15 = vrot.slane %v3369_v53, 4 }
 0x4e5   :  { %v3319_v46 = vsel %vm677_vm1, %v3296_v7, %v3311_v55 }
 0x4e6   :  { %v3328_v45 = vrot.slane %v3319_v46, 6  ;;  %3388 = vst [vmem:[#allocation10 + $0x10] sm:$0x30] %v3378_v15  ;;  %v3281_v22 = vpop.permute.xlu0 %3280 }
 0x4e7   :  { %v3443_v16 = vld [vmem:[#allocation10 + $0x8] sm:$0xff]  ;;  %v3286_v11 = vsel %vm677_vm1, %v3264_v14, %v3281_v22 }
 0x4e8   :  { %3338 = vst [vmem:[#allocation10 + $0x10] sm:$0xc] %v3328_v45  ;;  %3586 = vmatprep.mubr.f32.mxu0 %v3443_v16  ;;  %v3411_v17 = vpop.permute.xlu1 %3410  ;;  %3290 = vst [vmem:[#allocation10 + $0x18] sm:$0x3] %v3286_v11 }
 0x4e9   :  { %v3419_v19 = vsel %vm677_vm1, %v3396_v47, %v3411_v17 }
 0x4ea   :  { %v3428_v48 = vrot.slane %v3419_v19, 2 }
 0x4eb   :  { %v3442_v18 = vld [vmem:[#allocation10] sm:$0xff] }
 0x4ec   :  { %3438 = vst [vmem:[#allocation10 + $0x10] sm:$0xc0] %v3428_v48  ;;  %3587 = vmatmul.mubr.f32.vlgmr.msra.gmra.mxu0 %v3442_v18  ;;  %v3277_v33 = vpop.permute.xlu1 %3276 }
 0x4ed   :  { %4460 = vmatpush3.msra.mxu0 %v3518_v24  ;;  %v3285_v21 = vsel %vm677_vm1, %v3262_v8, %v3277_v33  ;;  %4475 = vmatprep.mubr.msk.f32.mxu0 %vm4506_vm12, %v4504_v54 }
 0x4ee   :  { %3289 = vst [vmem:[#allocation10 + $0x10] sm:$0x3] %v3285_v21  ;;  %4461 = vmatprep.subr.mxu0 %v4504_v54 }
 0x4ef   :  { %4462 = vmatpush3.msra.mxu0 %v3517_v50  ;;  %v3445_v23 = vld [vmem:[#allocation10 + $0x18] sm:$0xff] }
 0x4f0   :  { %4463 = vmatprep.subr.mxu0 %v4504_v54  ;;  %3656 = vmatprep.mubr.f32.mxu1 %v3445_v23 }
 0x4f1   :  { %4464 = vmatpush3.msra.mxu0 %v3516_v25 }
 0x4f2   :  { %4465 = vmatprep.subr.mxu0 %v4504_v54 }
 0x4f3   :  { %4466 = vmatpush3.msra.mxu0 %v3515_v20 }
 0x4f4   :  { %4467 = vmatprep.subr.mxu0 %v4504_v54 }
 0x4f5   :  { %4468 = vmatpush3.msra.mxu0 %v3514_v37  ;;  %v3444_v5 = vld [vmem:[#allocation10 + $0x10] sm:$0xff] }
 0x4f6   :  { %4469 = vmatprep.subr.mxu0 %v4504_v54  ;;  %3657 = vmatmul.mubr.f32.vlgmr.msra.gmra.mxu1 %v3444_v5 }
 0x4f7   :  { %4470 = vmatpush3.msra.mxu0 %v3513_v44 }
 0x4f8   :  { %4471 = vmatprep.subr.mxu0 %v4504_v54 }
 0x4f9   :  { %4472 = vmatpush3.msra.mxu0 %v3512_v34 }
 0x4fa   :  { %4473 = vmatprep.subr.mxu0 %v4504_v54  ;;  %v3867_v54 = vld [vmem:[%s6258_s8] ss:$0 sm:$0xff]  ;;  %s4507_s8 = smov [#allocation12]  }
 0x4fb   :  { %4474 = vmatpush3.msra.mxu0 %v3511_v29  ;;  %s3771_s21 = sshll.u32 %s4507_s8, 4  ;;  %s3772_s21 = int_to_ptr.vmem [resolvable:$true] %s3771_s21 }
 0x4fc   :  { %4476 = vmatmul.mubr.msk.f32.vlgmr.msra.gmra.mxu0 %vm677_vm1, %v3446_v28  ;;  %s4482_s22 = scalar_lea.vmem %s3772_s21, 32  ;;  %p4487_p1 = scmp.lt.s32.totalorder %s3772_s21, %s3772_s21 }
 0x4fd   :  { %p4483_p0 = scmp.ne.s32.totalorder %s3772_s21, %s4482_s22  ;;  %p4488_p2 = scmp.lt.s32.totalorder %s4482_s22, %s4482_s22 }
 0x4ff   :  { %p4489_p3 = por %p4488_p2, %p4487_p1 }
 0x501   :  { %p4490_p4 = pnand %p4489_p3, %p4483_p0 }
 0x5ac   :  { %v4250_v36 = vpop.f32.mrf.mxu0 }
 0x5ae   :  { %v4251_v9 = vpop.f32.mrf.mxu0 }
 0x5af   :  { %v4252_v38 = vadd.f32 %v4251_v9, %v4250_v36 }
 0x5b6   :  { %v4285_v6 = vpop.f32.mrf.mxu1 }
 0x5b8   :  { %v4286_v60 = vpop.f32.mrf.mxu1 }
 0x5b9   :  { %v4287_v59 = vadd.f32 %v4286_v60, %v4285_v6 }
 0x5bb   :  { %v3659_v56 = vadd.f32 %v4287_v59, %v4252_v38 }
 0x5bc   :  { %v3728_v39 = vpop.f32.mrf.mxu0 }
 0x5bd   :  { %v3729_v40 = vadd.f32 %v3728_v39, %v3659_v56 }
 0x5be   :  { %v4477_v41 = vpop.f32.mrf.mxu0 }
 0x5bf   :  { %3732 = vst.msk [vmem:[#allocation11] sm:$0xff] %vm677_vm1, %v3729_v40 }
 0x5c6   :  { %v3740_v57 = vld [vmem:[#allocation11] sm:$0xf]  ;;  %v3753_v42 = vld [vmem:[#allocation11 + $0x4] sm:$0xf] }
 0x5c7   :  { %v3741_v61 = vadd.f32 %v3867_v54, %v3740_v57  ;;  %v3754_v32 = vadd.f32 %v3867_v54, %v3753_v42 }
 0x5c9   :  { %v3742_v35 = vmax.f32 %v3741_v61, 0.0  ;;  %v3755_v27 = vmax.f32 %v3754_v32, 0.0 }
 0x5cb   :  { %v3743_v43 = vsel %vm2500_vm5, %v3742_v35, 0.0  ;;  %v3756_v49 = vsel %vm2500_vm5, %v3755_v27, 0.0 }
 0x5cc   :  { %v3744_v52 = vrot.slane %v3743_v43, 4  ;;  %v3757_v62 = vrot.slane %v3756_v49, 4 }
 0x5ce   :  { %v3745_v26 = vadd.f32 %v3744_v52, %v3743_v43  ;;  %v3758_v31 = vadd.f32 %v3757_v62, %v3756_v49 }
 0x5d0   :  { %v3746_v63 = vrot.slane %v3745_v26, 2  ;;  %v3759_v58 = vrot.slane %v3758_v31, 2 }
 0x5d2   :  { %v3747_v13 = vadd.f32 %v3746_v63, %v3745_v26  ;;  %v3760_v0 = vadd.f32 %v3759_v58, %v3758_v31 }
 0x5d4   :  { %v3748_v30 = vrot.slane %v3747_v13, 1  ;;  %v3761_v1 = vrot.slane %v3760_v0, 1 }
 0x5d6   :  { %v3749_v51 = vadd.f32 %v3748_v30, %v3747_v13  ;;  %v3762_v2 = vadd.f32 %v3761_v1, %v3760_v0 }
 0x5d8   :  { %v3750_v10 = vmul.f32 0.25, %v3749_v51  ;;  %v3763_v3 = vmul.f32 0.25, %v3762_v2 }
 0x5da   :  { %3752 = vst.msk [vmem:[#allocation12] sm:$0x1] %vm3751_vm13, %v3750_v10  ;;  %3764 = vst.msk [vmem:[#allocation12 + $0x1] sm:$0x1] %vm3751_vm13, %v3763_v3 }
 0x5db   :  { %4493 = shalt.err (!%p4490_p4)
}
 0x5dc   :  { %3774 = dma.vmem_to_hbm [thread:$0]  %s3772_s21, 32, %s6259_s9, [#allocation13]  }
 0x5dd   :  { %4502 = dma.done.wait [#allocation13], 32  }
 0x5de   :  { %4503 = vsyncadd [#allocation13], 4294967264 }
 0x5df   :  { %3778 = vsyncpa [#allocation13], 1 }

</bundles_post_ra>
